<compile_context>
chip_gen: v5e
topology: v5e:2x2
jax: 0.10.0
libtpu: 0.0.40
codegen_flags: <defaults>
</compile_context>

<pallas_src>
import functools

import jax
import jax.numpy as jnp
from jax.experimental import pallas as pl
from jax.experimental.pallas import tpu as pltpu

FEATURE_DIM = 512
INPUT_CHANNEL = 12


def _round_up(x, m):
    return (x + m - 1) // m * m


def _cp(c):
    """Channel count padded to the 128-lane width (carried between layers)."""
    return _round_up(c, 128)


# ----------------------------- Pallas kernels ------------------------------


def _stem_pool_kernel(pe_ref, po_ref, w_ref, b_ref, o_ref, ho_scr, *, lp, no):
    """Fused stem: conv7/s2 (as an 84-wide patch matmul) + folded BN + ReLU + MaxPool(3, s2, p1).

    pe_ref / po_ref hold the patches of the even / odd conv-output positions, so the three
    maxpool taps h[2i-1], h[2i], h[2i+1] become contiguous reads of `he` and a one-row-shifted
    VMEM scratch of `ho` (no strided VMEM access).  Post-ReLU values are >= 0, so zero padding
    of the scratch is equivalent to PyTorch's -inf maxpool padding.
    """
    w = w_ref[...]
    b = b_ref[...]
    he = jnp.maximum(jnp.dot(pe_ref[0], w, preferred_element_type=jnp.float32) + b, 0.0)
    ho = jnp.maximum(jnp.dot(po_ref[0], w, preferred_element_type=jnp.float32) + b, 0.0)
    ho_scr[...] = jnp.zeros(ho_scr.shape, ho_scr.dtype)
    ho_scr[1:no + 1, :] = ho                       # scratch[j] = h[2j-1]
    y = jnp.maximum(jnp.maximum(ho_scr[0:lp, :], he), ho_scr[1:lp + 1, :])
    o_ref[0] = y.astype(o_ref.dtype)


def _block_kernel_s1(x_ref, w1_ref, b1_ref, w2_ref, b2_ref, o_ref, h_scr, *, lout, pool):
    """Fused BasicBlock, stride 1, identity shortcut.

    conv3x3+BN+ReLU -> conv3x3+BN -> +x -> ReLU, all in one grid step.  Each conv is three
    per-tap bf16 MXU dots over contiguous shifted windows; the conv1 intermediate lives only in
    the zero-padded `h_scr` VMEM scratch.
    """
    cmid = w1_ref.shape[2]
    cout = w2_ref.shape[2]
    xv = x_ref[0].astype(jnp.float32)                       # (lout+2, cin_p), padded by 1/1

    acc = jnp.zeros((lout, cmid), jnp.float32)
    for t in range(3):
        acc += jnp.dot(xv[t:t + lout].astype(jnp.bfloat16), w1_ref[t],
                       preferred_element_type=jnp.float32)
    h = jnp.maximum(acc + b1_ref[...], 0.0)

    h_scr[...] = jnp.zeros(h_scr.shape, h_scr.dtype)        # conv2 zero padding rows
    h_scr[1:lout + 1, :] = h

    acc2 = jnp.zeros((lout, cout), jnp.float32)
    for t in range(3):
        acc2 += jnp.dot(h_scr[t:t + lout, :].astype(jnp.bfloat16), w2_ref[t],
                        preferred_element_type=jnp.float32)

    y = jnp.maximum(acc2 + b2_ref[...] + xv[1:lout + 1], 0.0)   # identity residual + ReLU
    if pool:
        o_ref[0] = jnp.mean(y, axis=0, keepdims=True)           # fused global average pool
    else:
        o_ref[0] = y.astype(o_ref.dtype)


def _block_kernel_s2(xe_ref, xo_ref, w1_ref, b1_ref, w2_ref, b2_ref, wd_ref, bd_ref,
                     o_ref, h_scr, *, lout, pool):
    """Fused BasicBlock, stride 2, 1x1/s2 downsample shortcut; optional fused global-avg-pool.

    xe/xo are the even/odd time phases of the (pad-1) input, so all conv1 taps and the
    downsample read are contiguous slices.
    """
    cmid = w1_ref.shape[2]
    cout = w2_ref.shape[2]
    xe = xe_ref[0].astype(jnp.float32)                      # (lout+1, cin_p)
    xo = xo_ref[0].astype(jnp.float32)                      # (lout,   cin_p)

    taps = (xe[0:lout], xo, xe[1:lout + 1])                 # x_pad[2i], x_pad[2i+1], x_pad[2i+2]
    acc = jnp.zeros((lout, cmid), jnp.float32)
    for t in range(3):
        acc += jnp.dot(taps[t].astype(jnp.bfloat16), w1_ref[t],
                       preferred_element_type=jnp.float32)
    h = jnp.maximum(acc + b1_ref[...], 0.0)

    h_scr[...] = jnp.zeros(h_scr.shape, h_scr.dtype)
    h_scr[1:lout + 1, :] = h

    acc2 = jnp.zeros((lout, cout), jnp.float32)
    for t in range(3):
        acc2 += jnp.dot(h_scr[t:t + lout, :].astype(jnp.bfloat16), w2_ref[t],
                        preferred_element_type=jnp.float32)

    sc = jnp.dot(xo.astype(jnp.bfloat16), wd_ref[0],
                 preferred_element_type=jnp.float32) + bd_ref[...]   # 1x1/s2 downsample shortcut
    y = jnp.maximum(acc2 + b2_ref[...] + sc, 0.0)
    if pool:
        o_ref[0] = jnp.mean(y, axis=0, keepdims=True)
    else:
        o_ref[0] = y.astype(o_ref.dtype)


# ------------------------------ Pallas wrappers -----------------------------


def stem_maxpool(x_nlc, p):
    """(B, L, 12) f32 -> (B, L//4, 128) bf16.  One pallas_call: conv7/s2 + BN + ReLU + maxpool."""
    B, L, _ = x_nlc.shape
    lh = (L + 2 * 3 - 7) // 2 + 1                # conv output length
    lp = (lh - 1) // 2 + 1                       # maxpool output length
    no = min(lp, lh // 2)                        # number of valid odd conv positions needed
    xp = jnp.pad(x_nlc, ((0, 0), (3, 3), (0, 0)))

    def patches(start, n):
        # With only 12 input channels the (n, 7*12) patches are smaller than lane-padded x,
        # so building them in XLA is cheaper than in-kernel tap accumulation here.
        cols = [xp[:, start + t: start + t + 4 * (n - 1) + 1: 4, :] for t in range(7)]
        return jnp.concatenate(cols, axis=-1)    # (B, n, 84)

    kp, cout_p = p["w"].shape
    pe = jnp.pad(patches(0, lp), ((0, 0), (0, 0), (0, kp - 7 * INPUT_CHANNEL))).astype(jnp.bfloat16)
    po = jnp.pad(patches(2, no), ((0, 0), (0, 0), (0, kp - 7 * INPUT_CHANNEL))).astype(jnp.bfloat16)

    return pl.pallas_call(
        functools.partial(_stem_pool_kernel, lp=lp, no=no),
        grid=(B,),
        in_specs=[
            pl.BlockSpec((1, lp, kp), lambda b: (b, 0, 0)),
            pl.BlockSpec((1, no, kp), lambda b: (b, 0, 0)),
            pl.BlockSpec((kp, cout_p), lambda b: (0, 0)),
            pl.BlockSpec((1, cout_p), lambda b: (0, 0)),
        ],
        out_specs=pl.BlockSpec((1, lp, cout_p), lambda b: (b, 0, 0)),
        out_shape=jax.ShapeDtypeStruct((B, lp, cout_p), jnp.bfloat16),
        scratch_shapes=[pltpu.VMEM((lp + 1, cout_p), jnp.float32)],
        compiler_params=pltpu.CompilerParams(dimension_semantics=("parallel",)),
    )(pe, po, p["w"], p["b"])


def basic_block(x, p, *, pool=False):
    """One fused-BasicBlock pallas_call.  x: (B, Lin, Cin_p) bf16, channels lane-padded."""
    B, lin, cin_p = x.shape
    stride = p["stride"]
    cout_p = p["w1"].shape[2]
    lout = lin if stride == 1 else (lin - 1) // 2 + 1

    if pool:
        out_shape = jax.ShapeDtypeStruct((B, 1, cout_p), jnp.float32)
        out_spec = pl.BlockSpec((1, 1, cout_p), lambda b: (b, 0, 0))
    else:
        out_shape = jax.ShapeDtypeStruct((B, lout, cout_p), jnp.bfloat16)
        out_spec = pl.BlockSpec((1, lout, cout_p), lambda b: (b, 0, 0))

    w_specs = [
        pl.BlockSpec(p["w1"].shape, lambda b: (0, 0, 0)),
        pl.BlockSpec((1, cout_p), lambda b: (0, 0)),
        pl.BlockSpec(p["w2"].shape, lambda b: (0, 0, 0)),
        pl.BlockSpec((1, cout_p), lambda b: (0, 0)),
    ]
    scratch = [pltpu.VMEM((lout + 2, cout_p), jnp.float32)]
    cparams = pltpu.CompilerParams(dimension_semantics=("parallel",))

    if stride == 1:
        xp = jnp.pad(x, ((0, 0), (1, 1), (0, 0)))
        return pl.pallas_call(
            functools.partial(_block_kernel_s1, lout=lout, pool=pool),
            grid=(B,),
            in_specs=[pl.BlockSpec((1, lout + 2, cin_p), lambda b: (b, 0, 0))] + w_specs,
            out_specs=out_spec,
            out_shape=out_shape,
            scratch_shapes=scratch,
            compiler_params=cparams,
        )(xp, p["w1"], p["b1"], p["w2"], p["b2"])

    # Stride 2: even/odd phase split in XLA (a single 1x rearrangement, not a k-fold im2col),
    # so every in-kernel read is a contiguous sublane slice.
    rpad = max(0, 2 * lout - lin)
    xp = jnp.pad(x, ((0, 0), (1, rpad), (0, 0)))
    xe = xp[:, 0:2 * lout + 1:2, :]              # x_pad[2m],   m = 0..lout
    xo = xp[:, 1:2 * lout:2, :]                  # x_pad[2m+1], m = 0..lout-1
    return pl.pallas_call(
        functools.partial(_block_kernel_s2, lout=lout, pool=pool),
        grid=(B,),
        in_specs=[
            pl.BlockSpec((1, lout + 1, cin_p), lambda b: (b, 0, 0)),
            pl.BlockSpec((1, lout, cin_p), lambda b: (b, 0, 0)),
        ] + w_specs + [
            pl.BlockSpec(p["wd"].shape, lambda b: (0, 0, 0)),
            pl.BlockSpec((1, cout_p), lambda b: (0, 0)),
        ],
        out_specs=out_spec,
        out_shape=out_shape,
        scratch_shapes=scratch,
        compiler_params=cparams,
    )(xe, xo, p["w1"], p["b1"], p["w2"], p["b2"], p["wd"], p["bd"])


# ------------------------------ model definition ----------------------------


def _init_conv_bn(key, cin, cout, k, cin_p, cout_p, *, stem=False):
    """Random conv + eval-mode BN, with the BN scale pre-folded into the (bf16) weights.

    Returns (w, b): w is (k, cin_p, cout_p) bf16 (or a (Kp, cout_p) patch-matmul matrix for the
    stem); b is (1, cout_p) f32.  Padded channels get zero weight/bias so they stay exactly 0.
    """
    kw, kg, kb = jax.random.split(key, 3)
    fan_in = cin * k
    w = jax.random.normal(kw, (cout, cin, k), jnp.float32) * (2.0 / fan_in) ** 0.5
    gamma = 1.0 + 0.1 * jax.random.normal(kg, (cout,), jnp.float32)
    beta = 0.1 * jax.random.normal(kb, (cout,), jnp.float32)
    mean = jnp.zeros((cout,), jnp.float32)
    var = jnp.ones((cout,), jnp.float32)
    eps = 1e-5
    scale = gamma / jnp.sqrt(var + eps)           # folded (eval-mode) BatchNorm
    bias = beta - mean * scale

    wf = w * scale[:, None, None]                 # fold BN scale into the weights
    wkio = jnp.transpose(wf, (2, 1, 0))           # (k, cin, cout)
    if stem:
        w2 = wkio.reshape(k * cin, cout)          # tap-major patch layout
        w_pad = jnp.zeros((_round_up(k * cin, 128), cout_p), jnp.float32)
        w_pad = w_pad.at[:k * cin, :cout].set(w2)
    else:
        w_pad = jnp.zeros((k, cin_p, cout_p), jnp.float32)
        w_pad = w_pad.at[:, :cin, :cout].set(wkio)
    b_pad = jnp.zeros((1, cout_p), jnp.float32).at[0, :cout].set(bias)
    return w_pad.astype(jnp.bfloat16), b_pad


def _init_block(keys, cin, cout, stride):
    cin_p, cout_p = _cp(cin), _cp(cout)
    w1, b1 = _init_conv_bn(keys[0], cin, cout, 3, cin_p, cout_p)
    w2, b2 = _init_conv_bn(keys[1], cout, cout, 3, cout_p, cout_p)
    p = {"w1": w1, "b1": b1, "w2": w2, "b2": b2, "stride": stride}
    if stride != 1 or cin != cout:
        wd, bd = _init_conv_bn(keys[2], cin, cout, 1, cin_p, cout_p)
        p["wd"], p["bd"] = wd, bd
    return p


def init_encoder_params(key):
    keys = jax.random.split(key, 13)
    w_st, b_st = _init_conv_bn(keys[0], INPUT_CHANNEL, 64, 7, INPUT_CHANNEL, _cp(64), stem=True)
    p = {"stem": {"w": w_st, "b": b_st}}
    p["layer1"] = _init_block(keys[1:4], 64, 64, 1)
    p["layer2"] = _init_block(keys[4:7], 64, 128, 2)
    p["layer3"] = _init_block(keys[7:10], 128, 256, 2)
    p["layer4"] = _init_block(keys[10:13], 256, FEATURE_DIM, 2)
    return p


def encoder_forward(params, x_ncl):
    # PyTorch NCL (B, 12, L) input.  5 pallas_calls total: fused stem+maxpool, then one fused
    # kernel per BasicBlock; global average pooling is fused into the layer4 epilogue.
    x = jnp.transpose(x_ncl, (0, 2, 1)).astype(jnp.float32)   # channels-last
    x = stem_maxpool(x, params["stem"])                       # (B, L/4, 128) bf16 (64 real ch)
    x = basic_block(x, params["layer1"])                      # (B, L/4, 128)
    x = basic_block(x, params["layer2"])                      # (B, L/8, 128)
    x = basic_block(x, params["layer3"])                      # (B, L/16, 256)
    feats = basic_block(x, params["layer4"], pool=True)       # (B, 1, 512) f32, GAP fused
    return feats[:, 0, :]                                     # (B, 512)


if __name__ == "__main__":
    key = jax.random.PRNGKey(0)
    kp, kx = jax.random.split(key)
    params = init_encoder_params(kp)
    x = jax.random.normal(kx, (2, INPUT_CHANNEL, 64), jnp.float32)   # (B, 12 leads, L)

    fwd = jax.jit(functools.partial(encoder_forward, params))
    feats = fwd(x)
    jax.block_until_ready(feats)

    assert feats.shape == (2, FEATURE_DIM), feats.shape
    assert bool(jnp.all(jnp.isfinite(feats)))
    print("KERNEL_OK")
</pallas_src>

<mosaic_0001>
module attributes {stable_mosaic.version = 11 : i64} {
  func.func @_stem_pool_kernel(%arg0: i32, %arg1: memref<1x16x128xbf16, #tpu.memory_space<vmem>>, %arg2: memref<1x16x128xbf16, #tpu.memory_space<vmem>>, %arg3: memref<128x128xbf16, #tpu.memory_space<vmem>>, %arg4: memref<1x128xf32, #tpu.memory_space<vmem>>, %arg5: memref<1x16x128xbf16, #tpu.memory_space<vmem>>, %arg6: memref<17x128xf32, #tpu.memory_space<vmem>>) attributes {dimension_semantics = [#tpu.dimension_semantics<parallel>], iteration_bounds = array<i64: 2>, scalar_prefetch = 0 : i64, scratch_operands = 1 : i64, tpu.core_type = #tpu.core_type<tc>, window_params = [{transform_indices = @transform_0, window_bounds = array<i64: 1, 16, 128>}, {transform_indices = @transform_1, window_bounds = array<i64: 1, 16, 128>}, {pipeline_mode = #tpu.pipeline_mode<synchronous>, transform_indices = @transform_2, window_bounds = array<i64: 128, 128>}, {pipeline_mode = #tpu.pipeline_mode<synchronous>, transform_indices = @transform_3, window_bounds = array<i64: 1, 128>}, {transform_indices = @transform_4, window_bounds = array<i64: 1, 16, 128>}]} {
    %c0 = arith.constant 0 : index
    %c0_0 = arith.constant 0 : index
    %0 = vector.load %arg3[%c0, %c0_0] : memref<128x128xbf16, #tpu.memory_space<vmem>>, vector<128x128xbf16>
    %c0_1 = arith.constant 0 : index
    %c0_2 = arith.constant 0 : index
    %1 = vector.load %arg4[%c0_1, %c0_2] : memref<1x128xf32, #tpu.memory_space<vmem>>, vector<1x128xf32>
    %c0_3 = arith.constant 0 : index
    %c0_4 = arith.constant 0 : index
    %c0_5 = arith.constant 0 : index
    %2 = vector.load %arg1[%c0_3, %c0_4, %c0_5] : memref<1x16x128xbf16, #tpu.memory_space<vmem>>, vector<1x16x128xbf16>
    %3 = vector.shape_cast %2 : vector<1x16x128xbf16> to vector<16x128xbf16>
    %cst = arith.constant dense<0.000000e+00> : vector<16x128xf32>
    %4 = tpu.matmul %3, %0, %cst {dimension_numbers = #tpu.dot_dimension_numbers<[1], [0], [0], [1], [0, 0, 1, 1], [], []>} : vector<16x128xbf16>, vector<128x128xbf16>, vector<16x128xf32> -> vector<16x128xf32>
    %5 = vector.broadcast %1 : vector<1x128xf32> to vector<16x128xf32>
    %6 = arith.addf %4, %5 : vector<16x128xf32>
    %cst_6 = arith.constant 0.000000e+00 : f32
    %7 = vector.broadcast %cst_6 : f32 to vector<16x128xf32>
    %8 = arith.maximumf %6, %7 : vector<16x128xf32>
    %c0_7 = arith.constant 0 : index
    %c0_8 = arith.constant 0 : index
    %c0_9 = arith.constant 0 : index
    %9 = vector.load %arg2[%c0_7, %c0_8, %c0_9] : memref<1x16x128xbf16, #tpu.memory_space<vmem>>, vector<1x16x128xbf16>
    %10 = vector.shape_cast %9 : vector<1x16x128xbf16> to vector<16x128xbf16>
    %cst_10 = arith.constant dense<0.000000e+00> : vector<16x128xf32>
    %11 = tpu.matmul %10, %0, %cst_10 {dimension_numbers = #tpu.dot_dimension_numbers<[1], [0], [0], [1], [0, 0, 1, 1], [], []>} : vector<16x128xbf16>, vector<128x128xbf16>, vector<16x128xf32> -> vector<16x128xf32>
    %12 = vector.broadcast %1 : vector<1x128xf32> to vector<16x128xf32>
    %13 = arith.addf %11, %12 : vector<16x128xf32>
    %cst_11 = arith.constant 0.000000e+00 : f32
    %14 = vector.broadcast %cst_11 : f32 to vector<16x128xf32>
    %15 = arith.maximumf %13, %14 : vector<16x128xf32>
    %cst_12 = arith.constant 0.000000e+00 : f32
    %16 = vector.broadcast %cst_12 : f32 to vector<17x128xf32>
    %c0_13 = arith.constant 0 : index
    %c0_14 = arith.constant 0 : index
    %17 = vector.load %arg6[%c0_13, %c0_14] : memref<17x128xf32, #tpu.memory_space<vmem>>, vector<17x128xf32>
    tpu.vector_store %arg6[%c0_13, %c0_14], %16 {strides = array<i32>} : memref<17x128xf32, #tpu.memory_space<vmem>>, vector<17x128xf32>,
    %c1 = arith.constant 1 : index
    %c0_15 = arith.constant 0 : index
    %18 = vector.load %arg6[%c1, %c0_15] : memref<17x128xf32, #tpu.memory_space<vmem>>, vector<16x128xf32>
    tpu.vector_store %arg6[%c1, %c0_15], %15 {strides = array<i32>} : memref<17x128xf32, #tpu.memory_space<vmem>>, vector<16x128xf32>,
    %c0_16 = arith.constant 0 : index
    %c0_17 = arith.constant 0 : index
    %19 = vector.load %arg6[%c0_16, %c0_17] : memref<17x128xf32, #tpu.memory_space<vmem>>, vector<16x128xf32>
    %20 = arith.maximumf %19, %8 : vector<16x128xf32>
    %c1_18 = arith.constant 1 : index
    %c0_19 = arith.constant 0 : index
    %21 = vector.load %arg6[%c1_18, %c0_19] : memref<17x128xf32, #tpu.memory_space<vmem>>, vector<16x128xf32>
    %22 = arith.maximumf %20, %21 : vector<16x128xf32>
    %23 = arith.truncf %22 : vector<16x128xf32> to vector<16x128xbf16>
    %c0_20 = arith.constant 0 : index
    %c0_21 = arith.constant 0 : index
    %c0_22 = arith.constant 0 : index
    %24 = vector.load %arg5[%c0_20, %c0_21, %c0_22] : memref<1x16x128xbf16, #tpu.memory_space<vmem>>, vector<1x16x128xbf16>
    %25 = vector.shape_cast %24 : vector<1x16x128xbf16> to vector<16x128xbf16>
    %26 = vector.shape_cast %23 : vector<16x128xbf16> to vector<1x16x128xbf16>
    tpu.vector_store %arg5[%c0_20, %c0_21, %c0_22], %26 {strides = array<i32>} : memref<1x16x128xbf16, #tpu.memory_space<vmem>>, vector<1x16x128xbf16>,
    return
  }
  func.func @transform_0(%arg0: i32) -> (i32, i32, i32) {
    %c0_i32 = arith.constant 0 : i32
    %c0_i32_0 = arith.constant 0 : i32
    %c0_i32_1 = arith.constant 0 : i32
    return %arg0, %c0_i32, %c0_i32_0 : i32, i32, i32
  }
  func.func @transform_1(%arg0: i32) -> (i32, i32, i32) {
    %c0_i32 = arith.constant 0 : i32
    %c0_i32_0 = arith.constant 0 : i32
    %c0_i32_1 = arith.constant 0 : i32
    return %arg0, %c0_i32, %c0_i32_0 : i32, i32, i32
  }
  func.func @transform_2(%arg0: i32) -> (i32, i32) {
    %c0_i32 = arith.constant 0 : i32
    %c0_i32_0 = arith.constant 0 : i32
    %c0_i32_1 = arith.constant 0 : i32
    return %c0_i32, %c0_i32_0 : i32, i32
  }
  func.func @transform_3(%arg0: i32) -> (i32, i32) {
    %c0_i32 = arith.constant 0 : i32
    %c0_i32_0 = arith.constant 0 : i32
    %c0_i32_1 = arith.constant 0 : i32
    return %c0_i32, %c0_i32_0 : i32, i32
  }
  func.func @transform_4(%arg0: i32) -> (i32, i32, i32) {
    %c0_i32 = arith.constant 0 : i32
    %c0_i32_0 = arith.constant 0 : i32
    %c0_i32_1 = arith.constant 0 : i32
    return %arg0, %c0_i32, %c0_i32_0 : i32, i32, i32
  }
}

module attributes {stable_mosaic.version = 11 : i64} {
  func.func @_block_kernel_s1(%arg0: i32, %arg1: memref<1x18x128xbf16, #tpu.memory_space<vmem>>, %arg2: memref<3x128x128xbf16, #tpu.memory_space<vmem>>, %arg3: memref<1x128xf32, #tpu.memory_space<vmem>>, %arg4: memref<3x128x128xbf16, #tpu.memory_space<vmem>>, %arg5: memref<1x128xf32, #tpu.memory_space<vmem>>, %arg6: memref<1x16x128xbf16, #tpu.memory_space<vmem>>, %arg7: memref<18x128xf32, #tpu.memory_space<vmem>>) attributes {dimension_semantics = [#tpu.dimension_semantics<parallel>], iteration_bounds = array<i64: 2>, scalar_prefetch = 0 : i64, scratch_operands = 1 : i64, tpu.core_type = #tpu.core_type<tc>, window_params = [{transform_indices = @transform_0, window_bounds = array<i64: 1, 18, 128>}, {pipeline_mode = #tpu.pipeline_mode<synchronous>, transform_indices = @transform_1, window_bounds = array<i64: 3, 128, 128>}, {pipeline_mode = #tpu.pipeline_mode<synchronous>, transform_indices = @transform_2, window_bounds = array<i64: 1, 128>}, {pipeline_mode = #tpu.pipeline_mode<synchronous>, transform_indices = @transform_3, window_bounds = array<i64: 3, 128, 128>}, {pipeline_mode = #tpu.pipeline_mode<synchronous>, transform_indices = @transform_4, window_bounds = array<i64: 1, 128>}, {transform_indices = @transform_5, window_bounds = array<i64: 1, 16, 128>}]} {
    %c0 = arith.constant 0 : index
    %c0_0 = arith.constant 0 : index
    %c0_1 = arith.constant 0 : index
    %0 = vector.load %arg1[%c0, %c0_0, %c0_1] : memref<1x18x128xbf16, #tpu.memory_space<vmem>>, vector<1x18x128xbf16>
    %1 = vector.shape_cast %0 : vector<1x18x128xbf16> to vector<18x128xbf16>
    %2 = arith.extf %1 : vector<18x128xbf16> to vector<18x128xf32>
    %cst = arith.constant 0.000000e+00 : f32
    %3 = vector.broadcast %cst : f32 to vector<16x128xf32>
    %4 = vector.extract_strided_slice %2 {offsets = [0, 0], sizes = [16, 128], strides = [1, 1]} : vector<18x128xf32> to vector<16x128xf32>
    %5 = arith.truncf %4 : vector<16x128xf32> to vector<16x128xbf16>
    %c0_2 = arith.constant 0 : index
    %c0_3 = arith.constant 0 : index
    %c0_4 = arith.constant 0 : index
    %6 = vector.load %arg2[%c0_2, %c0_3, %c0_4] : memref<3x128x128xbf16, #tpu.memory_space<vmem>>, vector<1x128x128xbf16>
    %7 = vector.shape_cast %6 : vector<1x128x128xbf16> to vector<128x128xbf16>
    %cst_5 = arith.constant dense<0.000000e+00> : vector<16x128xf32>
    %8 = tpu.matmul %5, %7, %cst_5 {dimension_numbers = #tpu.dot_dimension_numbers<[1], [0], [0], [1], [0, 0, 1, 1], [], []>} : vector<16x128xbf16>, vector<128x128xbf16>, vector<16x128xf32> -> vector<16x128xf32>
    %9 = arith.addf %3, %8 : vector<16x128xf32>
    %10 = vector.extract_strided_slice %2 {offsets = [1, 0], sizes = [16, 128], strides = [1, 1]} : vector<18x128xf32> to vector<16x128xf32>
    %11 = arith.truncf %10 : vector<16x128xf32> to vector<16x128xbf16>
    %c1 = arith.constant 1 : index
    %c0_6 = arith.constant 0 : index
    %c0_7 = arith.constant 0 : index
    %12 = vector.load %arg2[%c1, %c0_6, %c0_7] : memref<3x128x128xbf16, #tpu.memory_space<vmem>>, vector<1x128x128xbf16>
    %13 = vector.shape_cast %12 : vector<1x128x128xbf16> to vector<128x128xbf16>
    %cst_8 = arith.constant dense<0.000000e+00> : vector<16x128xf32>
    %14 = tpu.matmul %11, %13, %cst_8 {dimension_numbers = #tpu.dot_dimension_numbers<[1], [0], [0], [1], [0, 0, 1, 1], [], []>} : vector<16x128xbf16>, vector<128x128xbf16>, vector<16x128xf32> -> vector<16x128xf32>
    %15 = arith.addf %9, %14 : vector<16x128xf32>
    %16 = vector.extract_strided_slice %2 {offsets = [2, 0], sizes = [16, 128], strides = [1, 1]} : vector<18x128xf32> to vector<16x128xf32>
    %17 = arith.truncf %16 : vector<16x128xf32> to vector<16x128xbf16>
    %c2 = arith.constant 2 : index
    %c0_9 = arith.constant 0 : index
    %c0_10 = arith.constant 0 : index
    %18 = vector.load %arg2[%c2, %c0_9, %c0_10] : memref<3x128x128xbf16, #tpu.memory_space<vmem>>, vector<1x128x128xbf16>
    %19 = vector.shape_cast %18 : vector<1x128x128xbf16> to vector<128x128xbf16>
    %cst_11 = arith.constant dense<0.000000e+00> : vector<16x128xf32>
    %20 = tpu.matmul %17, %19, %cst_11 {dimension_numbers = #tpu.dot_dimension_numbers<[1], [0], [0], [1], [0, 0, 1, 1], [], []>} : vector<16x128xbf16>, vector<128x128xbf16>, vector<16x128xf32> -> vector<16x128xf32>
    %21 = arith.addf %15, %20 : vector<16x128xf32>
    %c0_12 = arith.constant 0 : index
    %c0_13 = arith.constant 0 : index
    %22 = vector.load %arg3[%c0_12, %c0_13] : memref<1x128xf32, #tpu.memory_space<vmem>>, vector<1x128xf32>
    %23 = vector.broadcast %22 : vector<1x128xf32> to vector<16x128xf32>
    %24 = arith.addf %21, %23 : vector<16x128xf32>
    %cst_14 = arith.constant 0.000000e+00 : f32
    %25 = vector.broadcast %cst_14 : f32 to vector<16x128xf32>
    %26 = arith.maximumf %24, %25 : vector<16x128xf32>
    %cst_15 = arith.constant 0.000000e+00 : f32
    %27 = vector.broadcast %cst_15 : f32 to vector<18x128xf32>
    %c0_16 = arith.constant 0 : index
    %c0_17 = arith.constant 0 : index
    %28 = vector.load %arg7[%c0_16, %c0_17] : memref<18x128xf32, #tpu.memory_space<vmem>>, vector<18x128xf32>
    tpu.vector_store %arg7[%c0_16, %c0_17], %27 {strides = array<i32>} : memref<18x128xf32, #tpu.memory_space<vmem>>, vector<18x128xf32>,
    %c1_18 = arith.constant 1 : index
    %c0_19 = arith.constant 0 : index
    %29 = vector.load %arg7[%c1_18, %c0_19] : memref<18x128xf32, #tpu.memory_space<vmem>>, vector<16x128xf32>
    tpu.vector_store %arg7[%c1_18, %c0_19], %26 {strides = array<i32>} : memref<18x128xf32, #tpu.memory_space<vmem>>, vector<16x128xf32>,
    %cst_20 = arith.constant 0.000000e+00 : f32
    %30 = vector.broadcast %cst_20 : f32 to vector<16x128xf32>
    %c0_21 = arith.constant 0 : index
    %c0_22 = arith.constant 0 : index
    %31 = vector.load %arg7[%c0_21, %c0_22] : memref<18x128xf32, #tpu.memory_space<vmem>>, vector<16x128xf32>
    %32 = arith.truncf %31 : vector<16x128xf32> to vector<16x128xbf16>
    %c0_23 = arith.constant 0 : index
    %c0_24 = arith.constant 0 : index
    %c0_25 = arith.constant 0 : index
    %33 = vector.load %arg4[%c0_23, %c0_24, %c0_25] : memref<3x128x128xbf16, #tpu.memory_space<vmem>>, vector<1x128x128xbf16>
    %34 = vector.shape_cast %33 : vector<1x128x128xbf16> to vector<128x128xbf16>
    %cst_26 = arith.constant dense<0.000000e+00> : vector<16x128xf32>
    %35 = tpu.matmul %32, %34, %cst_26 {dimension_numbers = #tpu.dot_dimension_numbers<[1], [0], [0], [1], [0, 0, 1, 1], [], []>} : vector<16x128xbf16>, vector<128x128xbf16>, vector<16x128xf32> -> vector<16x128xf32>
    %36 = arith.addf %30, %35 : vector<16x128xf32>
    %c1_27 = arith.constant 1 : index
    %c0_28 = arith.constant 0 : index
    %37 = vector.load %arg7[%c1_27, %c0_28] : memref<18x128xf32, #tpu.memory_space<vmem>>, vector<16x128xf32>
    %38 = arith.truncf %37 : vector<16x128xf32> to vector<16x128xbf16>
    %c1_29 = arith.constant 1 : index
    %c0_30 = arith.constant 0 : index
    %c0_31 = arith.constant 0 : index
    %39 = vector.load %arg4[%c1_29, %c0_30, %c0_31] : memref<3x128x128xbf16, #tpu.memory_space<vmem>>, vector<1x128x128xbf16>
    %40 = vector.shape_cast %39 : vector<1x128x128xbf16> to vector<128x128xbf16>
    %cst_32 = arith.constant dense<0.000000e+00> : vector<16x128xf32>
    %41 = tpu.matmul %38, %40, %cst_32 {dimension_numbers = #tpu.dot_dimension_numbers<[1], [0], [0], [1], [0, 0, 1, 1], [], []>} : vector<16x128xbf16>, vector<128x128xbf16>, vector<16x128xf32> -> vector<16x128xf32>
    %42 = arith.addf %36, %41 : vector<16x128xf32>
    %c2_33 = arith.constant 2 : index
    %c0_34 = arith.constant 0 : index
    %43 = vector.load %arg7[%c2_33, %c0_34] : memref<18x128xf32, #tpu.memory_space<vmem>>, vector<16x128xf32>
    %44 = arith.truncf %43 : vector<16x128xf32> to vector<16x128xbf16>
    %c2_35 = arith.constant 2 : index
    %c0_36 = arith.constant 0 : index
    %c0_37 = arith.constant 0 : index
    %45 = vector.load %arg4[%c2_35, %c0_36, %c0_37] : memref<3x128x128xbf16, #tpu.memory_space<vmem>>, vector<1x128x128xbf16>
    %46 = vector.shape_cast %45 : vector<1x128x128xbf16> to vector<128x128xbf16>
    %cst_38 = arith.constant dense<0.000000e+00> : vector<16x128xf32>
    %47 = tpu.matmul %44, %46, %cst_38 {dimension_numbers = #tpu.dot_dimension_numbers<[1], [0], [0], [1], [0, 0, 1, 1], [], []>} : vector<16x128xbf16>, vector<128x128xbf16>, vector<16x128xf32> -> vector<16x128xf32>
    %48 = arith.addf %42, %47 : vector<16x128xf32>
    %c0_39 = arith.constant 0 : index
    %c0_40 = arith.constant 0 : index
    %49 = vector.load %arg5[%c0_39, %c0_40] : memref<1x128xf32, #tpu.memory_space<vmem>>, vector<1x128xf32>
    %50 = vector.broadcast %49 : vector<1x128xf32> to vector<16x128xf32>
    %51 = arith.addf %48, %50 : vector<16x128xf32>
    %52 = vector.extract_strided_slice %2 {offsets = [1, 0], sizes = [16, 128], strides = [1, 1]} : vector<18x128xf32> to vector<16x128xf32>
    %53 = arith.addf %51, %52 : vector<16x128xf32>
    %cst_41 = arith.constant 0.000000e+00 : f32
    %54 = vector.broadcast %cst_41 : f32 to vector<16x128xf32>
    %55 = arith.maximumf %53, %54 : vector<16x128xf32>
    %56 = arith.truncf %55 : vector<16x128xf32> to vector<16x128xbf16>
    %c0_42 = arith.constant 0 : index
    %c0_43 = arith.constant 0 : index
    %c0_44 = arith.constant 0 : index
    %57 = vector.load %arg6[%c0_42, %c0_43, %c0_44] : memref<1x16x128xbf16, #tpu.memory_space<vmem>>, vector<1x16x128xbf16>
    %58 = vector.shape_cast %57 : vector<1x16x128xbf16> to vector<16x128xbf16>
    %59 = vector.shape_cast %56 : vector<16x128xbf16> to vector<1x16x128xbf16>
    tpu.vector_store %arg6[%c0_42, %c0_43, %c0_44], %59 {strides = array<i32>} : memref<1x16x128xbf16, #tpu.memory_space<vmem>>, vector<1x16x128xbf16>,
    return
  }
  func.func @transform_0(%arg0: i32) -> (i32, i32, i32) {
    %c0_i32 = arith.constant 0 : i32
    %c0_i32_0 = arith.constant 0 : i32
    %c0_i32_1 = arith.constant 0 : i32
    return %arg0, %c0_i32, %c0_i32_0 : i32, i32, i32
  }
  func.func @transform_1(%arg0: i32) -> (i32, i32, i32) {
    %c0_i32 = arith.constant 0 : i32
    %c0_i32_0 = arith.constant 0 : i32
    %c0_i32_1 = arith.constant 0 : i32
    %c0_i32_2 = arith.constant 0 : i32
    return %c0_i32, %c0_i32_0, %c0_i32_1 : i32, i32, i32
  }
  func.func @transform_2(%arg0: i32) -> (i32, i32) {
    %c0_i32 = arith.constant 0 : i32
    %c0_i32_0 = arith.constant 0 : i32
    %c0_i32_1 = arith.constant 0 : i32
    return %c0_i32, %c0_i32_0 : i32, i32
  }
  func.func @transform_3(%arg0: i32) -> (i32, i32, i32) {
    %c0_i32 = arith.constant 0 : i32
    %c0_i32_0 = arith.constant 0 : i32
    %c0_i32_1 = arith.constant 0 : i32
    %c0_i32_2 = arith.constant 0 : i32
    return %c0_i32, %c0_i32_0, %c0_i32_1 : i32, i32, i32
  }
  func.func @transform_4(%arg0: i32) -> (i32, i32) {
    %c0_i32 = arith.constant 0 : i32
    %c0_i32_0 = arith.constant 0 : i32
    %c0_i32_1 = arith.constant 0 : i32
    return %c0_i32, %c0_i32_0 : i32, i32
  }
  func.func @transform_5(%arg0: i32) -> (i32, i32, i32) {
    %c0_i32 = arith.constant 0 : i32
    %c0_i32_0 = arith.constant 0 : i32
    %c0_i32_1 = arith.constant 0 : i32
    return %arg0, %c0_i32, %c0_i32_0 : i32, i32, i32
  }
}

module attributes {stable_mosaic.version = 11 : i64} {
  func.func @_block_kernel_s2(%arg0: i32, %arg1: memref<1x9x128xbf16, #tpu.memory_space<vmem>>, %arg2: memref<1x8x128xbf16, #tpu.memory_space<vmem>>, %arg3: memref<3x128x128xbf16, #tpu.memory_space<vmem>>, %arg4: memref<1x128xf32, #tpu.memory_space<vmem>>, %arg5: memref<3x128x128xbf16, #tpu.memory_space<vmem>>, %arg6: memref<1x128xf32, #tpu.memory_space<vmem>>, %arg7: memref<1x128x128xbf16, #tpu.memory_space<vmem>>, %arg8: memref<1x128xf32, #tpu.memory_space<vmem>>, %arg9: memref<1x8x128xbf16, #tpu.memory_space<vmem>>, %arg10: memref<10x128xf32, #tpu.memory_space<vmem>>) attributes {dimension_semantics = [#tpu.dimension_semantics<parallel>], iteration_bounds = array<i64: 2>, scalar_prefetch = 0 : i64, scratch_operands = 1 : i64, tpu.core_type = #tpu.core_type<tc>, window_params = [{transform_indices = @transform_0, window_bounds = array<i64: 1, 9, 128>}, {transform_indices = @transform_1, window_bounds = array<i64: 1, 8, 128>}, {pipeline_mode = #tpu.pipeline_mode<synchronous>, transform_indices = @transform_2, window_bounds = array<i64: 3, 128, 128>}, {pipeline_mode = #tpu.pipeline_mode<synchronous>, transform_indices = @transform_3, window_bounds = array<i64: 1, 128>}, {pipeline_mode = #tpu.pipeline_mode<synchronous>, transform_indices = @transform_4, window_bounds = array<i64: 3, 128, 128>}, {pipeline_mode = #tpu.pipeline_mode<synchronous>, transform_indices = @transform_5, window_bounds = array<i64: 1, 128>}, {pipeline_mode = #tpu.pipeline_mode<synchronous>, transform_indices = @transform_6, window_bounds = array<i64: 1, 128, 128>}, {pipeline_mode = #tpu.pipeline_mode<synchronous>, transform_indices = @transform_7, window_bounds = array<i64: 1, 128>}, {transform_indices = @transform_8, window_bounds = array<i64: 1, 8, 128>}]} {
    %c0 = arith.constant 0 : index
    %c0_0 = arith.constant 0 : index
    %c0_1 = arith.constant 0 : index
    %0 = vector.load %arg1[%c0, %c0_0, %c0_1] : memref<1x9x128xbf16, #tpu.memory_space<vmem>>, vector<1x9x128xbf16>
    %1 = vector.shape_cast %0 : vector<1x9x128xbf16> to vector<9x128xbf16>
    %2 = arith.extf %1 : vector<9x128xbf16> to vector<9x128xf32>
    %c0_2 = arith.constant 0 : index
    %c0_3 = arith.constant 0 : index
    %c0_4 = arith.constant 0 : index
    %3 = vector.load %arg2[%c0_2, %c0_3, %c0_4] : memref<1x8x128xbf16, #tpu.memory_space<vmem>>, vector<1x8x128xbf16>
    %4 = vector.shape_cast %3 : vector<1x8x128xbf16> to vector<8x128xbf16>
    %5 = arith.extf %4 : vector<8x128xbf16> to vector<8x128xf32>
    %6 = vector.extract_strided_slice %2 {offsets = [0, 0], sizes = [8, 128], strides = [1, 1]} : vector<9x128xf32> to vector<8x128xf32>
    %7 = vector.extract_strided_slice %2 {offsets = [1, 0], sizes = [8, 128], strides = [1, 1]} : vector<9x128xf32> to vector<8x128xf32>
    %cst = arith.constant 0.000000e+00 : f32
    %8 = vector.broadcast %cst : f32 to vector<8x128xf32>
    %9 = arith.truncf %6 : vector<8x128xf32> to vector<8x128xbf16>
    %c0_5 = arith.constant 0 : index
    %c0_6 = arith.constant 0 : index
    %c0_7 = arith.constant 0 : index
    %10 = vector.load %arg3[%c0_5, %c0_6, %c0_7] : memref<3x128x128xbf16, #tpu.memory_space<vmem>>, vector<1x128x128xbf16>
    %11 = vector.shape_cast %10 : vector<1x128x128xbf16> to vector<128x128xbf16>
    %cst_8 = arith.constant dense<0.000000e+00> : vector<8x128xf32>
    %12 = tpu.matmul %9, %11, %cst_8 {dimension_numbers = #tpu.dot_dimension_numbers<[1], [0], [0], [1], [0, 0, 1, 1], [], []>} : vector<8x128xbf16>, vector<128x128xbf16>, vector<8x128xf32> -> vector<8x128xf32>
    %13 = arith.addf %8, %12 : vector<8x128xf32>
    %14 = arith.truncf %5 : vector<8x128xf32> to vector<8x128xbf16>
    %c1 = arith.constant 1 : index
    %c0_9 = arith.constant 0 : index
    %c0_10 = arith.constant 0 : index
    %15 = vector.load %arg3[%c1, %c0_9, %c0_10] : memref<3x128x128xbf16, #tpu.memory_space<vmem>>, vector<1x128x128xbf16>
    %16 = vector.shape_cast %15 : vector<1x128x128xbf16> to vector<128x128xbf16>
    %cst_11 = arith.constant dense<0.000000e+00> : vector<8x128xf32>
    %17 = tpu.matmul %14, %16, %cst_11 {dimension_numbers = #tpu.dot_dimension_numbers<[1], [0], [0], [1], [0, 0, 1, 1], [], []>} : vector<8x128xbf16>, vector<128x128xbf16>, vector<8x128xf32> -> vector<8x128xf32>
    %18 = arith.addf %13, %17 : vector<8x128xf32>
    %19 = arith.truncf %7 : vector<8x128xf32> to vector<8x128xbf16>
    %c2 = arith.constant 2 : index
    %c0_12 = arith.constant 0 : index
    %c0_13 = arith.constant 0 : index
    %20 = vector.load %arg3[%c2, %c0_12, %c0_13] : memref<3x128x128xbf16, #tpu.memory_space<vmem>>, vector<1x128x128xbf16>
    %21 = vector.shape_cast %20 : vector<1x128x128xbf16> to vector<128x128xbf16>
    %cst_14 = arith.constant dense<0.000000e+00> : vector<8x128xf32>
    %22 = tpu.matmul %19, %21, %cst_14 {dimension_numbers = #tpu.dot_dimension_numbers<[1], [0], [0], [1], [0, 0, 1, 1], [], []>} : vector<8x128xbf16>, vector<128x128xbf16>, vector<8x128xf32> -> vector<8x128xf32>
    %23 = arith.addf %18, %22 : vector<8x128xf32>
    %c0_15 = arith.constant 0 : index
    %c0_16 = arith.constant 0 : index
    %24 = vector.load %arg4[%c0_15, %c0_16] : memref<1x128xf32, #tpu.memory_space<vmem>>, vector<1x128xf32>
    %25 = vector.broadcast %24 : vector<1x128xf32> to vector<8x128xf32>
    %26 = arith.addf %23, %25 : vector<8x128xf32>
    %cst_17 = arith.constant 0.000000e+00 : f32
    %27 = vector.broadcast %cst_17 : f32 to vector<8x128xf32>
    %28 = arith.maximumf %26, %27 : vector<8x128xf32>
    %cst_18 = arith.constant 0.000000e+00 : f32
    %29 = vector.broadcast %cst_18 : f32 to vector<10x128xf32>
    %c0_19 = arith.constant 0 : index
    %c0_20 = arith.constant 0 : index
    %30 = vector.load %arg10[%c0_19, %c0_20] : memref<10x128xf32, #tpu.memory_space<vmem>>, vector<10x128xf32>
    tpu.vector_store %arg10[%c0_19, %c0_20], %29 {strides = array<i32>} : memref<10x128xf32, #tpu.memory_space<vmem>>, vector<10x128xf32>,
    %c1_21 = arith.constant 1 : index
    %c0_22 = arith.constant 0 : index
    %31 = vector.load %arg10[%c1_21, %c0_22] : memref<10x128xf32, #tpu.memory_space<vmem>>, vector<8x128xf32>
    tpu.vector_store %arg10[%c1_21, %c0_22], %28 {strides = array<i32>} : memref<10x128xf32, #tpu.memory_space<vmem>>, vector<8x128xf32>,
    %cst_23 = arith.constant 0.000000e+00 : f32
    %32 = vector.broadcast %cst_23 : f32 to vector<8x128xf32>
    %c0_24 = arith.constant 0 : index
    %c0_25 = arith.constant 0 : index
    %33 = vector.load %arg10[%c0_24, %c0_25] : memref<10x128xf32, #tpu.memory_space<vmem>>, vector<8x128xf32>
    %34 = arith.truncf %33 : vector<8x128xf32> to vector<8x128xbf16>
    %c0_26 = arith.constant 0 : index
    %c0_27 = arith.constant 0 : index
    %c0_28 = arith.constant 0 : index
    %35 = vector.load %arg5[%c0_26, %c0_27, %c0_28] : memref<3x128x128xbf16, #tpu.memory_space<vmem>>, vector<1x128x128xbf16>
    %36 = vector.shape_cast %35 : vector<1x128x128xbf16> to vector<128x128xbf16>
    %cst_29 = arith.constant dense<0.000000e+00> : vector<8x128xf32>
    %37 = tpu.matmul %34, %36, %cst_29 {dimension_numbers = #tpu.dot_dimension_numbers<[1], [0], [0], [1], [0, 0, 1, 1], [], []>} : vector<8x128xbf16>, vector<128x128xbf16>, vector<8x128xf32> -> vector<8x128xf32>
    %38 = arith.addf %32, %37 : vector<8x128xf32>
    %c1_30 = arith.constant 1 : index
    %c0_31 = arith.constant 0 : index
    %39 = vector.load %arg10[%c1_30, %c0_31] : memref<10x128xf32, #tpu.memory_space<vmem>>, vector<8x128xf32>
    %40 = arith.truncf %39 : vector<8x128xf32> to vector<8x128xbf16>
    %c1_32 = arith.constant 1 : index
    %c0_33 = arith.constant 0 : index
    %c0_34 = arith.constant 0 : index
    %41 = vector.load %arg5[%c1_32, %c0_33, %c0_34] : memref<3x128x128xbf16, #tpu.memory_space<vmem>>, vector<1x128x128xbf16>
    %42 = vector.shape_cast %41 : vector<1x128x128xbf16> to vector<128x128xbf16>
    %cst_35 = arith.constant dense<0.000000e+00> : vector<8x128xf32>
    %43 = tpu.matmul %40, %42, %cst_35 {dimension_numbers = #tpu.dot_dimension_numbers<[1], [0], [0], [1], [0, 0, 1, 1], [], []>} : vector<8x128xbf16>, vector<128x128xbf16>, vector<8x128xf32> -> vector<8x128xf32>
    %44 = arith.addf %38, %43 : vector<8x128xf32>
    %c2_36 = arith.constant 2 : index
    %c0_37 = arith.constant 0 : index
    %45 = vector.load %arg10[%c2_36, %c0_37] : memref<10x128xf32, #tpu.memory_space<vmem>>, vector<8x128xf32>
    %46 = arith.truncf %45 : vector<8x128xf32> to vector<8x128xbf16>
    %c2_38 = arith.constant 2 : index
    %c0_39 = arith.constant 0 : index
    %c0_40 = arith.constant 0 : index
    %47 = vector.load %arg5[%c2_38, %c0_39, %c0_40] : memref<3x128x128xbf16, #tpu.memory_space<vmem>>, vector<1x128x128xbf16>
    %48 = vector.shape_cast %47 : vector<1x128x128xbf16> to vector<128x128xbf16>
    %cst_41 = arith.constant dense<0.000000e+00> : vector<8x128xf32>
    %49 = tpu.matmul %46, %48, %cst_41 {dimension_numbers = #tpu.dot_dimension_numbers<[1], [0], [0], [1], [0, 0, 1, 1], [], []>} : vector<8x128xbf16>, vector<128x128xbf16>, vector<8x128xf32> -> vector<8x128xf32>
    %50 = arith.addf %44, %49 : vector<8x128xf32>
    %51 = arith.truncf %5 : vector<8x128xf32> to vector<8x128xbf16>
    %c0_42 = arith.constant 0 : index
    %c0_43 = arith.constant 0 : index
    %c0_44 = arith.constant 0 : index
    %52 = vector.load %arg7[%c0_42, %c0_43, %c0_44] : memref<1x128x128xbf16, #tpu.memory_space<vmem>>, vector<1x128x128xbf16>
    %53 = vector.shape_cast %52 : vector<1x128x128xbf16> to vector<128x128xbf16>
    %cst_45 = arith.constant dense<0.000000e+00> : vector<8x128xf32>
    %54 = tpu.matmul %51, %53, %cst_45 {dimension_numbers = #tpu.dot_dimension_numbers<[1], [0], [0], [1], [0, 0, 1, 1], [], []>} : vector<8x128xbf16>, vector<128x128xbf16>, vector<8x128xf32> -> vector<8x128xf32>
    %c0_46 = arith.constant 0 : index
    %c0_47 = arith.constant 0 : index
    %55 = vector.load %arg8[%c0_46, %c0_47] : memref<1x128xf32, #tpu.memory_space<vmem>>, vector<1x128xf32>
    %56 = vector.broadcast %55 : vector<1x128xf32> to vector<8x128xf32>
    %57 = arith.addf %54, %56 : vector<8x128xf32>
    %c0_48 = arith.constant 0 : index
    %c0_49 = arith.constant 0 : index
    %58 = vector.load %arg6[%c0_48, %c0_49] : memref<1x128xf32, #tpu.memory_space<vmem>>, vector<1x128xf32>
    %59 = vector.broadcast %58 : vector<1x128xf32> to vector<8x128xf32>
    %60 = arith.addf %50, %59 : vector<8x128xf32>
    %61 = arith.addf %60, %57 : vector<8x128xf32>
    %cst_50 = arith.constant 0.000000e+00 : f32
    %62 = vector.broadcast %cst_50 : f32 to vector<8x128xf32>
    %63 = arith.maximumf %61, %62 : vector<8x128xf32>
    %64 = arith.truncf %63 : vector<8x128xf32> to vector<8x128xbf16>
    %c0_51 = arith.constant 0 : index
    %c0_52 = arith.constant 0 : index
    %c0_53 = arith.constant 0 : index
    %65 = vector.load %arg9[%c0_51, %c0_52, %c0_53] : memref<1x8x128xbf16, #tpu.memory_space<vmem>>, vector<1x8x128xbf16>
    %66 = vector.shape_cast %65 : vector<1x8x128xbf16> to vector<8x128xbf16>
    %67 = vector.shape_cast %64 : vector<8x128xbf16> to vector<1x8x128xbf16>
    tpu.vector_store %arg9[%c0_51, %c0_52, %c0_53], %67 {strides = array<i32>} : memref<1x8x128xbf16, #tpu.memory_space<vmem>>, vector<1x8x128xbf16>,
    return
  }
  func.func @transform_0(%arg0: i32) -> (i32, i32, i32) {
    %c0_i32 = arith.constant 0 : i32
    %c0_i32_0 = arith.constant 0 : i32
    %c0_i32_1 = arith.constant 0 : i32
    return %arg0, %c0_i32, %c0_i32_0 : i32, i32, i32
  }
  func.func @transform_1(%arg0: i32) -> (i32, i32, i32) {
    %c0_i32 = arith.constant 0 : i32
    %c0_i32_0 = arith.constant 0 : i32
    %c0_i32_1 = arith.constant 0 : i32
    return %arg0, %c0_i32, %c0_i32_0 : i32, i32, i32
  }
  func.func @transform_2(%arg0: i32) -> (i32, i32, i32) {
    %c0_i32 = arith.constant 0 : i32
    %c0_i32_0 = arith.constant 0 : i32
    %c0_i32_1 = arith.constant 0 : i32
    %c0_i32_2 = arith.constant 0 : i32
    return %c0_i32, %c0_i32_0, %c0_i32_1 : i32, i32, i32
  }
  func.func @transform_3(%arg0: i32) -> (i32, i32) {
    %c0_i32 = arith.constant 0 : i32
    %c0_i32_0 = arith.constant 0 : i32
    %c0_i32_1 = arith.constant 0 : i32
    return %c0_i32, %c0_i32_0 : i32, i32
  }
  func.func @transform_4(%arg0: i32) -> (i32, i32, i32) {
    %c0_i32 = arith.constant 0 : i32
    %c0_i32_0 = arith.constant 0 : i32
    %c0_i32_1 = arith.constant 0 : i32
    %c0_i32_2 = arith.constant 0 : i32
    return %c0_i32, %c0_i32_0, %c0_i32_1 : i32, i32, i32
  }
  func.func @transform_5(%arg0: i32) -> (i32, i32) {
    %c0_i32 = arith.constant 0 : i32
    %c0_i32_0 = arith.constant 0 : i32
    %c0_i32_1 = arith.constant 0 : i32
    return %c0_i32, %c0_i32_0 : i32, i32
  }
  func.func @transform_6(%arg0: i32) -> (i32, i32, i32) {
    %c0_i32 = arith.constant 0 : i32
    %c0_i32_0 = arith.constant 0 : i32
    %c0_i32_1 = arith.constant 0 : i32
    %c0_i32_2 = arith.constant 0 : i32
    return %c0_i32, %c0_i32_0, %c0_i32_1 : i32, i32, i32
  }
  func.func @transform_7(%arg0: i32) -> (i32, i32) {
    %c0_i32 = arith.constant 0 : i32
    %c0_i32_0 = arith.constant 0 : i32
    %c0_i32_1 = arith.constant 0 : i32
    return %c0_i32, %c0_i32_0 : i32, i32
  }
  func.func @transform_8(%arg0: i32) -> (i32, i32, i32) {
    %c0_i32 = arith.constant 0 : i32
    %c0_i32_0 = arith.constant 0 : i32
    %c0_i32_1 = arith.constant 0 : i32
    return %arg0, %c0_i32, %c0_i32_0 : i32, i32, i32
  }
}

module attributes {stable_mosaic.version = 11 : i64} {
  func.func @_block_kernel_s2(%arg0: i32, %arg1: memref<1x5x128xbf16, #tpu.memory_space<vmem>>, %arg2: memref<1x4x128xbf16, #tpu.memory_space<vmem>>, %arg3: memref<3x128x256xbf16, #tpu.memory_space<vmem>>, %arg4: memref<1x256xf32, #tpu.memory_space<vmem>>, %arg5: memref<3x256x256xbf16, #tpu.memory_space<vmem>>, %arg6: memref<1x256xf32, #tpu.memory_space<vmem>>, %arg7: memref<1x128x256xbf16, #tpu.memory_space<vmem>>, %arg8: memref<1x256xf32, #tpu.memory_space<vmem>>, %arg9: memref<1x4x256xbf16, #tpu.memory_space<vmem>>, %arg10: memref<6x256xf32, #tpu.memory_space<vmem>>) attributes {dimension_semantics = [#tpu.dimension_semantics<parallel>], iteration_bounds = array<i64: 2>, scalar_prefetch = 0 : i64, scratch_operands = 1 : i64, tpu.core_type = #tpu.core_type<tc>, window_params = [{transform_indices = @transform_0, window_bounds = array<i64: 1, 5, 128>}, {transform_indices = @transform_1, window_bounds = array<i64: 1, 4, 128>}, {pipeline_mode = #tpu.pipeline_mode<synchronous>, transform_indices = @transform_2, window_bounds = array<i64: 3, 128, 256>}, {pipeline_mode = #tpu.pipeline_mode<synchronous>, transform_indices = @transform_3, window_bounds = array<i64: 1, 256>}, {pipeline_mode = #tpu.pipeline_mode<synchronous>, transform_indices = @transform_4, window_bounds = array<i64: 3, 256, 256>}, {pipeline_mode = #tpu.pipeline_mode<synchronous>, transform_indices = @transform_5, window_bounds = array<i64: 1, 256>}, {pipeline_mode = #tpu.pipeline_mode<synchronous>, transform_indices = @transform_6, window_bounds = array<i64: 1, 128, 256>}, {pipeline_mode = #tpu.pipeline_mode<synchronous>, transform_indices = @transform_7, window_bounds = array<i64: 1, 256>}, {transform_indices = @transform_8, window_bounds = array<i64: 1, 4, 256>}]} {
    %c0 = arith.constant 0 : index
    %c0_0 = arith.constant 0 : index
    %c0_1 = arith.constant 0 : index
    %0 = vector.load %arg1[%c0, %c0_0, %c0_1] : memref<1x5x128xbf16, #tpu.memory_space<vmem>>, vector<1x5x128xbf16>
    %1 = vector.shape_cast %0 : vector<1x5x128xbf16> to vector<5x128xbf16>
    %2 = arith.extf %1 : vector<5x128xbf16> to vector<5x128xf32>
    %c0_2 = arith.constant 0 : index
    %c0_3 = arith.constant 0 : index
    %c0_4 = arith.constant 0 : index
    %3 = vector.load %arg2[%c0_2, %c0_3, %c0_4] : memref<1x4x128xbf16, #tpu.memory_space<vmem>>, vector<1x4x128xbf16>
    %4 = vector.shape_cast %3 : vector<1x4x128xbf16> to vector<4x128xbf16>
    %5 = arith.extf %4 : vector<4x128xbf16> to vector<4x128xf32>
    %6 = vector.extract_strided_slice %2 {offsets = [0, 0], sizes = [4, 128], strides = [1, 1]} : vector<5x128xf32> to vector<4x128xf32>
    %7 = vector.extract_strided_slice %2 {offsets = [1, 0], sizes = [4, 128], strides = [1, 1]} : vector<5x128xf32> to vector<4x128xf32>
    %cst = arith.constant 0.000000e+00 : f32
    %8 = vector.broadcast %cst : f32 to vector<4x256xf32>
    %9 = arith.truncf %6 : vector<4x128xf32> to vector<4x128xbf16>
    %c0_5 = arith.constant 0 : index
    %c0_6 = arith.constant 0 : index
    %c0_7 = arith.constant 0 : index
    %10 = vector.load %arg3[%c0_5, %c0_6, %c0_7] : memref<3x128x256xbf16, #tpu.memory_space<vmem>>, vector<1x128x256xbf16>
    %11 = vector.shape_cast %10 : vector<1x128x256xbf16> to vector<128x256xbf16>
    %cst_8 = arith.constant dense<0.000000e+00> : vector<4x256xf32>
    %12 = tpu.matmul %9, %11, %cst_8 {dimension_numbers = #tpu.dot_dimension_numbers<[1], [0], [0], [1], [0, 0, 1, 1], [], []>} : vector<4x128xbf16>, vector<128x256xbf16>, vector<4x256xf32> -> vector<4x256xf32>
    %13 = arith.addf %8, %12 : vector<4x256xf32>
    %14 = arith.truncf %5 : vector<4x128xf32> to vector<4x128xbf16>
    %c1 = arith.constant 1 : index
    %c0_9 = arith.constant 0 : index
    %c0_10 = arith.constant 0 : index
    %15 = vector.load %arg3[%c1, %c0_9, %c0_10] : memref<3x128x256xbf16, #tpu.memory_space<vmem>>, vector<1x128x256xbf16>
    %16 = vector.shape_cast %15 : vector<1x128x256xbf16> to vector<128x256xbf16>
    %cst_11 = arith.constant dense<0.000000e+00> : vector<4x256xf32>
    %17 = tpu.matmul %14, %16, %cst_11 {dimension_numbers = #tpu.dot_dimension_numbers<[1], [0], [0], [1], [0, 0, 1, 1], [], []>} : vector<4x128xbf16>, vector<128x256xbf16>, vector<4x256xf32> -> vector<4x256xf32>
    %18 = arith.addf %13, %17 : vector<4x256xf32>
    %19 = arith.truncf %7 : vector<4x128xf32> to vector<4x128xbf16>
    %c2 = arith.constant 2 : index
    %c0_12 = arith.constant 0 : index
    %c0_13 = arith.constant 0 : index
    %20 = vector.load %arg3[%c2, %c0_12, %c0_13] : memref<3x128x256xbf16, #tpu.memory_space<vmem>>, vector<1x128x256xbf16>
    %21 = vector.shape_cast %20 : vector<1x128x256xbf16> to vector<128x256xbf16>
    %cst_14 = arith.constant dense<0.000000e+00> : vector<4x256xf32>
    %22 = tpu.matmul %19, %21, %cst_14 {dimension_numbers = #tpu.dot_dimension_numbers<[1], [0], [0], [1], [0, 0, 1, 1], [], []>} : vector<4x128xbf16>, vector<128x256xbf16>, vector<4x256xf32> -> vector<4x256xf32>
    %23 = arith.addf %18, %22 : vector<4x256xf32>
    %c0_15 = arith.constant 0 : index
    %c0_16 = arith.constant 0 : index
    %24 = vector.load %arg4[%c0_15, %c0_16] : memref<1x256xf32, #tpu.memory_space<vmem>>, vector<1x256xf32>
    %25 = vector.broadcast %24 : vector<1x256xf32> to vector<4x256xf32>
    %26 = arith.addf %23, %25 : vector<4x256xf32>
    %cst_17 = arith.constant 0.000000e+00 : f32
    %27 = vector.broadcast %cst_17 : f32 to vector<4x256xf32>
    %28 = arith.maximumf %26, %27 : vector<4x256xf32>
    %cst_18 = arith.constant 0.000000e+00 : f32
    %29 = vector.broadcast %cst_18 : f32 to vector<6x256xf32>
    %c0_19 = arith.constant 0 : index
    %c0_20 = arith.constant 0 : index
    %30 = vector.load %arg10[%c0_19, %c0_20] : memref<6x256xf32, #tpu.memory_space<vmem>>, vector<6x256xf32>
    tpu.vector_store %arg10[%c0_19, %c0_20], %29 {strides = array<i32>} : memref<6x256xf32, #tpu.memory_space<vmem>>, vector<6x256xf32>,
    %c1_21 = arith.constant 1 : index
    %c0_22 = arith.constant 0 : index
    %31 = vector.load %arg10[%c1_21, %c0_22] : memref<6x256xf32, #tpu.memory_space<vmem>>, vector<4x256xf32>
    tpu.vector_store %arg10[%c1_21, %c0_22], %28 {strides = array<i32>} : memref<6x256xf32, #tpu.memory_space<vmem>>, vector<4x256xf32>,
    %cst_23 = arith.constant 0.000000e+00 : f32
    %32 = vector.broadcast %cst_23 : f32 to vector<4x256xf32>
    %c0_24 = arith.constant 0 : index
    %c0_25 = arith.constant 0 : index
    %33 = vector.load %arg10[%c0_24, %c0_25] : memref<6x256xf32, #tpu.memory_space<vmem>>, vector<4x256xf32>
    %34 = arith.truncf %33 : vector<4x256xf32> to vector<4x256xbf16>
    %c0_26 = arith.constant 0 : index
    %c0_27 = arith.constant 0 : index
    %c0_28 = arith.constant 0 : index
    %35 = vector.load %arg5[%c0_26, %c0_27, %c0_28] : memref<3x256x256xbf16, #tpu.memory_space<vmem>>, vector<1x256x256xbf16>
    %36 = vector.shape_cast %35 : vector<1x256x256xbf16> to vector<256x256xbf16>
    %cst_29 = arith.constant dense<0.000000e+00> : vector<4x256xf32>
    %37 = tpu.matmul %34, %36, %cst_29 {dimension_numbers = #tpu.dot_dimension_numbers<[1], [0], [0], [1], [0, 0, 1, 1], [], []>} : vector<4x256xbf16>, vector<256x256xbf16>, vector<4x256xf32> -> vector<4x256xf32>
    %38 = arith.addf %32, %37 : vector<4x256xf32>
    %c1_30 = arith.constant 1 : index
    %c0_31 = arith.constant 0 : index
    %39 = vector.load %arg10[%c1_30, %c0_31] : memref<6x256xf32, #tpu.memory_space<vmem>>, vector<4x256xf32>
    %40 = arith.truncf %39 : vector<4x256xf32> to vector<4x256xbf16>
    %c1_32 = arith.constant 1 : index
    %c0_33 = arith.constant 0 : index
    %c0_34 = arith.constant 0 : index
    %41 = vector.load %arg5[%c1_32, %c0_33, %c0_34] : memref<3x256x256xbf16, #tpu.memory_space<vmem>>, vector<1x256x256xbf16>
    %42 = vector.shape_cast %41 : vector<1x256x256xbf16> to vector<256x256xbf16>
    %cst_35 = arith.constant dense<0.000000e+00> : vector<4x256xf32>
    %43 = tpu.matmul %40, %42, %cst_35 {dimension_numbers = #tpu.dot_dimension_numbers<[1], [0], [0], [1], [0, 0, 1, 1], [], []>} : vector<4x256xbf16>, vector<256x256xbf16>, vector<4x256xf32> -> vector<4x256xf32>
    %44 = arith.addf %38, %43 : vector<4x256xf32>
    %c2_36 = arith.constant 2 : index
    %c0_37 = arith.constant 0 : index
    %45 = vector.load %arg10[%c2_36, %c0_37] : memref<6x256xf32, #tpu.memory_space<vmem>>, vector<4x256xf32>
    %46 = arith.truncf %45 : vector<4x256xf32> to vector<4x256xbf16>
    %c2_38 = arith.constant 2 : index
    %c0_39 = arith.constant 0 : index
    %c0_40 = arith.constant 0 : index
    %47 = vector.load %arg5[%c2_38, %c0_39, %c0_40] : memref<3x256x256xbf16, #tpu.memory_space<vmem>>, vector<1x256x256xbf16>
    %48 = vector.shape_cast %47 : vector<1x256x256xbf16> to vector<256x256xbf16>
    %cst_41 = arith.constant dense<0.000000e+00> : vector<4x256xf32>
    %49 = tpu.matmul %46, %48, %cst_41 {dimension_numbers = #tpu.dot_dimension_numbers<[1], [0], [0], [1], [0, 0, 1, 1], [], []>} : vector<4x256xbf16>, vector<256x256xbf16>, vector<4x256xf32> -> vector<4x256xf32>
    %50 = arith.addf %44, %49 : vector<4x256xf32>
    %51 = arith.truncf %5 : vector<4x128xf32> to vector<4x128xbf16>
    %c0_42 = arith.constant 0 : index
    %c0_43 = arith.constant 0 : index
    %c0_44 = arith.constant 0 : index
    %52 = vector.load %arg7[%c0_42, %c0_43, %c0_44] : memref<1x128x256xbf16, #tpu.memory_space<vmem>>, vector<1x128x256xbf16>
    %53 = vector.shape_cast %52 : vector<1x128x256xbf16> to vector<128x256xbf16>
    %cst_45 = arith.constant dense<0.000000e+00> : vector<4x256xf32>
    %54 = tpu.matmul %51, %53, %cst_45 {dimension_numbers = #tpu.dot_dimension_numbers<[1], [0], [0], [1], [0, 0, 1, 1], [], []>} : vector<4x128xbf16>, vector<128x256xbf16>, vector<4x256xf32> -> vector<4x256xf32>
    %c0_46 = arith.constant 0 : index
    %c0_47 = arith.constant 0 : index
    %55 = vector.load %arg8[%c0_46, %c0_47] : memref<1x256xf32, #tpu.memory_space<vmem>>, vector<1x256xf32>
    %56 = vector.broadcast %55 : vector<1x256xf32> to vector<4x256xf32>
    %57 = arith.addf %54, %56 : vector<4x256xf32>
    %c0_48 = arith.constant 0 : index
    %c0_49 = arith.constant 0 : index
    %58 = vector.load %arg6[%c0_48, %c0_49] : memref<1x256xf32, #tpu.memory_space<vmem>>, vector<1x256xf32>
    %59 = vector.broadcast %58 : vector<1x256xf32> to vector<4x256xf32>
    %60 = arith.addf %50, %59 : vector<4x256xf32>
    %61 = arith.addf %60, %57 : vector<4x256xf32>
    %cst_50 = arith.constant 0.000000e+00 : f32
    %62 = vector.broadcast %cst_50 : f32 to vector<4x256xf32>
    %63 = arith.maximumf %61, %62 : vector<4x256xf32>
    %64 = arith.truncf %63 : vector<4x256xf32> to vector<4x256xbf16>
    %c0_51 = arith.constant 0 : index
    %c0_52 = arith.constant 0 : index
    %c0_53 = arith.constant 0 : index
    %65 = vector.load %arg9[%c0_51, %c0_52, %c0_53] : memref<1x4x256xbf16, #tpu.memory_space<vmem>>, vector<1x4x256xbf16>
    %66 = vector.shape_cast %65 : vector<1x4x256xbf16> to vector<4x256xbf16>
    %67 = vector.shape_cast %64 : vector<4x256xbf16> to vector<1x4x256xbf16>
    tpu.vector_store %arg9[%c0_51, %c0_52, %c0_53], %67 {strides = array<i32>} : memref<1x4x256xbf16, #tpu.memory_space<vmem>>, vector<1x4x256xbf16>,
    return
  }
  func.func @transform_0(%arg0: i32) -> (i32, i32, i32) {
    %c0_i32 = arith.constant 0 : i32
    %c0_i32_0 = arith.constant 0 : i32
    %c0_i32_1 = arith.constant 0 : i32
    return %arg0, %c0_i32, %c0_i32_0 : i32, i32, i32
  }
  func.func @transform_1(%arg0: i32) -> (i32, i32, i32) {
    %c0_i32 = arith.constant 0 : i32
    %c0_i32_0 = arith.constant 0 : i32
    %c0_i32_1 = arith.constant 0 : i32
    return %arg0, %c0_i32, %c0_i32_0 : i32, i32, i32
  }
  func.func @transform_2(%arg0: i32) -> (i32, i32, i32) {
    %c0_i32 = arith.constant 0 : i32
    %c0_i32_0 = arith.constant 0 : i32
    %c0_i32_1 = arith.constant 0 : i32
    %c0_i32_2 = arith.constant 0 : i32
    return %c0_i32, %c0_i32_0, %c0_i32_1 : i32, i32, i32
  }
  func.func @transform_3(%arg0: i32) -> (i32, i32) {
    %c0_i32 = arith.constant 0 : i32
    %c0_i32_0 = arith.constant 0 : i32
    %c0_i32_1 = arith.constant 0 : i32
    return %c0_i32, %c0_i32_0 : i32, i32
  }
  func.func @transform_4(%arg0: i32) -> (i32, i32, i32) {
    %c0_i32 = arith.constant 0 : i32
    %c0_i32_0 = arith.constant 0 : i32
    %c0_i32_1 = arith.constant 0 : i32
    %c0_i32_2 = arith.constant 0 : i32
    return %c0_i32, %c0_i32_0, %c0_i32_1 : i32, i32, i32
  }
  func.func @transform_5(%arg0: i32) -> (i32, i32) {
    %c0_i32 = arith.constant 0 : i32
    %c0_i32_0 = arith.constant 0 : i32
    %c0_i32_1 = arith.constant 0 : i32
    return %c0_i32, %c0_i32_0 : i32, i32
  }
  func.func @transform_6(%arg0: i32) -> (i32, i32, i32) {
    %c0_i32 = arith.constant 0 : i32
    %c0_i32_0 = arith.constant 0 : i32
    %c0_i32_1 = arith.constant 0 : i32
    %c0_i32_2 = arith.constant 0 : i32
    return %c0_i32, %c0_i32_0, %c0_i32_1 : i32, i32, i32
  }
  func.func @transform_7(%arg0: i32) -> (i32, i32) {
    %c0_i32 = arith.constant 0 : i32
    %c0_i32_0 = arith.constant 0 : i32
    %c0_i32_1 = arith.constant 0 : i32
    return %c0_i32, %c0_i32_0 : i32, i32
  }
  func.func @transform_8(%arg0: i32) -> (i32, i32, i32) {
    %c0_i32 = arith.constant 0 : i32
    %c0_i32_0 = arith.constant 0 : i32
    %c0_i32_1 = arith.constant 0 : i32
    return %arg0, %c0_i32, %c0_i32_0 : i32, i32, i32
  }
}

module attributes {stable_mosaic.version = 11 : i64} {
  func.func @_block_kernel_s2(%arg0: i32, %arg1: memref<1x3x256xbf16, #tpu.memory_space<vmem>>, %arg2: memref<1x2x256xbf16, #tpu.memory_space<vmem>>, %arg3: memref<3x256x512xbf16, #tpu.memory_space<vmem>>, %arg4: memref<1x512xf32, #tpu.memory_space<vmem>>, %arg5: memref<3x512x512xbf16, #tpu.memory_space<vmem>>, %arg6: memref<1x512xf32, #tpu.memory_space<vmem>>, %arg7: memref<1x256x512xbf16, #tpu.memory_space<vmem>>, %arg8: memref<1x512xf32, #tpu.memory_space<vmem>>, %arg9: memref<1x1x512xf32, #tpu.memory_space<vmem>>, %arg10: memref<4x512xf32, #tpu.memory_space<vmem>>) attributes {dimension_semantics = [#tpu.dimension_semantics<parallel>], iteration_bounds = array<i64: 2>, scalar_prefetch = 0 : i64, scratch_operands = 1 : i64, tpu.core_type = #tpu.core_type<tc>, window_params = [{transform_indices = @transform_0, window_bounds = array<i64: 1, 3, 256>}, {transform_indices = @transform_1, window_bounds = array<i64: 1, 2, 256>}, {pipeline_mode = #tpu.pipeline_mode<synchronous>, transform_indices = @transform_2, window_bounds = array<i64: 3, 256, 512>}, {pipeline_mode = #tpu.pipeline_mode<synchronous>, transform_indices = @transform_3, window_bounds = array<i64: 1, 512>}, {pipeline_mode = #tpu.pipeline_mode<synchronous>, transform_indices = @transform_4, window_bounds = array<i64: 3, 512, 512>}, {pipeline_mode = #tpu.pipeline_mode<synchronous>, transform_indices = @transform_5, window_bounds = array<i64: 1, 512>}, {pipeline_mode = #tpu.pipeline_mode<synchronous>, transform_indices = @transform_6, window_bounds = array<i64: 1, 256, 512>}, {pipeline_mode = #tpu.pipeline_mode<synchronous>, transform_indices = @transform_7, window_bounds = array<i64: 1, 512>}, {transform_indices = @transform_8, window_bounds = array<i64: 1, 1, 512>}]} {
    %c0 = arith.constant 0 : index
    %c0_0 = arith.constant 0 : index
    %c0_1 = arith.constant 0 : index
    %0 = vector.load %arg1[%c0, %c0_0, %c0_1] : memref<1x3x256xbf16, #tpu.memory_space<vmem>>, vector<1x3x256xbf16>
    %1 = vector.shape_cast %0 : vector<1x3x256xbf16> to vector<3x256xbf16>
    %2 = arith.extf %1 : vector<3x256xbf16> to vector<3x256xf32>
    %c0_2 = arith.constant 0 : index
    %c0_3 = arith.constant 0 : index
    %c0_4 = arith.constant 0 : index
    %3 = vector.load %arg2[%c0_2, %c0_3, %c0_4] : memref<1x2x256xbf16, #tpu.memory_space<vmem>>, vector<1x2x256xbf16>
    %4 = vector.shape_cast %3 : vector<1x2x256xbf16> to vector<2x256xbf16>
    %5 = arith.extf %4 : vector<2x256xbf16> to vector<2x256xf32>
    %6 = vector.extract_strided_slice %2 {offsets = [0, 0], sizes = [2, 256], strides = [1, 1]} : vector<3x256xf32> to vector<2x256xf32>
    %7 = vector.extract_strided_slice %2 {offsets = [1, 0], sizes = [2, 256], strides = [1, 1]} : vector<3x256xf32> to vector<2x256xf32>
    %cst = arith.constant 0.000000e+00 : f32
    %8 = vector.broadcast %cst : f32 to vector<2x512xf32>
    %9 = arith.truncf %6 : vector<2x256xf32> to vector<2x256xbf16>
    %c0_5 = arith.constant 0 : index
    %c0_6 = arith.constant 0 : index
    %c0_7 = arith.constant 0 : index
    %10 = vector.load %arg3[%c0_5, %c0_6, %c0_7] : memref<3x256x512xbf16, #tpu.memory_space<vmem>>, vector<1x256x512xbf16>
    %11 = vector.shape_cast %10 : vector<1x256x512xbf16> to vector<256x512xbf16>
    %cst_8 = arith.constant dense<0.000000e+00> : vector<2x512xf32>
    %12 = tpu.matmul %9, %11, %cst_8 {dimension_numbers = #tpu.dot_dimension_numbers<[1], [0], [0], [1], [0, 0, 1, 1], [], []>} : vector<2x256xbf16>, vector<256x512xbf16>, vector<2x512xf32> -> vector<2x512xf32>
    %13 = arith.addf %8, %12 : vector<2x512xf32>
    %14 = arith.truncf %5 : vector<2x256xf32> to vector<2x256xbf16>
    %c1 = arith.constant 1 : index
    %c0_9 = arith.constant 0 : index
    %c0_10 = arith.constant 0 : index
    %15 = vector.load %arg3[%c1, %c0_9, %c0_10] : memref<3x256x512xbf16, #tpu.memory_space<vmem>>, vector<1x256x512xbf16>
    %16 = vector.shape_cast %15 : vector<1x256x512xbf16> to vector<256x512xbf16>
    %cst_11 = arith.constant dense<0.000000e+00> : vector<2x512xf32>
    %17 = tpu.matmul %14, %16, %cst_11 {dimension_numbers = #tpu.dot_dimension_numbers<[1], [0], [0], [1], [0, 0, 1, 1], [], []>} : vector<2x256xbf16>, vector<256x512xbf16>, vector<2x512xf32> -> vector<2x512xf32>
    %18 = arith.addf %13, %17 : vector<2x512xf32>
    %19 = arith.truncf %7 : vector<2x256xf32> to vector<2x256xbf16>
    %c2 = arith.constant 2 : index
    %c0_12 = arith.constant 0 : index
    %c0_13 = arith.constant 0 : index
    %20 = vector.load %arg3[%c2, %c0_12, %c0_13] : memref<3x256x512xbf16, #tpu.memory_space<vmem>>, vector<1x256x512xbf16>
    %21 = vector.shape_cast %20 : vector<1x256x512xbf16> to vector<256x512xbf16>
    %cst_14 = arith.constant dense<0.000000e+00> : vector<2x512xf32>
    %22 = tpu.matmul %19, %21, %cst_14 {dimension_numbers = #tpu.dot_dimension_numbers<[1], [0], [0], [1], [0, 0, 1, 1], [], []>} : vector<2x256xbf16>, vector<256x512xbf16>, vector<2x512xf32> -> vector<2x512xf32>
    %23 = arith.addf %18, %22 : vector<2x512xf32>
    %c0_15 = arith.constant 0 : index
    %c0_16 = arith.constant 0 : index
    %24 = vector.load %arg4[%c0_15, %c0_16] : memref<1x512xf32, #tpu.memory_space<vmem>>, vector<1x512xf32>
    %25 = vector.broadcast %24 : vector<1x512xf32> to vector<2x512xf32>
    %26 = arith.addf %23, %25 : vector<2x512xf32>
    %cst_17 = arith.constant 0.000000e+00 : f32
    %27 = vector.broadcast %cst_17 : f32 to vector<2x512xf32>
    %28 = arith.maximumf %26, %27 : vector<2x512xf32>
    %cst_18 = arith.constant 0.000000e+00 : f32
    %29 = vector.broadcast %cst_18 : f32 to vector<4x512xf32>
    %c0_19 = arith.constant 0 : index
    %c0_20 = arith.constant 0 : index
    %30 = vector.load %arg10[%c0_19, %c0_20] : memref<4x512xf32, #tpu.memory_space<vmem>>, vector<4x512xf32>
    tpu.vector_store %arg10[%c0_19, %c0_20], %29 {strides = array<i32>} : memref<4x512xf32, #tpu.memory_space<vmem>>, vector<4x512xf32>,
    %c1_21 = arith.constant 1 : index
    %c0_22 = arith.constant 0 : index
    %31 = vector.load %arg10[%c1_21, %c0_22] : memref<4x512xf32, #tpu.memory_space<vmem>>, vector<2x512xf32>
    tpu.vector_store %arg10[%c1_21, %c0_22], %28 {strides = array<i32>} : memref<4x512xf32, #tpu.memory_space<vmem>>, vector<2x512xf32>,
    %cst_23 = arith.constant 0.000000e+00 : f32
    %32 = vector.broadcast %cst_23 : f32 to vector<2x512xf32>
    %c0_24 = arith.constant 0 : index
    %c0_25 = arith.constant 0 : index
    %33 = vector.load %arg10[%c0_24, %c0_25] : memref<4x512xf32, #tpu.memory_space<vmem>>, vector<2x512xf32>
    %34 = arith.truncf %33 : vector<2x512xf32> to vector<2x512xbf16>
    %c0_26 = arith.constant 0 : index
    %c0_27 = arith.constant 0 : index
    %c0_28 = arith.constant 0 : index
    %35 = vector.load %arg5[%c0_26, %c0_27, %c0_28] : memref<3x512x512xbf16, #tpu.memory_space<vmem>>, vector<1x512x512xbf16>
    %36 = vector.shape_cast %35 : vector<1x512x512xbf16> to vector<512x512xbf16>
    %cst_29 = arith.constant dense<0.000000e+00> : vector<2x512xf32>
    %37 = tpu.matmul %34, %36, %cst_29 {dimension_numbers = #tpu.dot_dimension_numbers<[1], [0], [0], [1], [0, 0, 1, 1], [], []>} : vector<2x512xbf16>, vector<512x512xbf16>, vector<2x512xf32> -> vector<2x512xf32>
    %38 = arith.addf %32, %37 : vector<2x512xf32>
    %c1_30 = arith.constant 1 : index
    %c0_31 = arith.constant 0 : index
    %39 = vector.load %arg10[%c1_30, %c0_31] : memref<4x512xf32, #tpu.memory_space<vmem>>, vector<2x512xf32>
    %40 = arith.truncf %39 : vector<2x512xf32> to vector<2x512xbf16>
    %c1_32 = arith.constant 1 : index
    %c0_33 = arith.constant 0 : index
    %c0_34 = arith.constant 0 : index
    %41 = vector.load %arg5[%c1_32, %c0_33, %c0_34] : memref<3x512x512xbf16, #tpu.memory_space<vmem>>, vector<1x512x512xbf16>
    %42 = vector.shape_cast %41 : vector<1x512x512xbf16> to vector<512x512xbf16>
    %cst_35 = arith.constant dense<0.000000e+00> : vector<2x512xf32>
    %43 = tpu.matmul %40, %42, %cst_35 {dimension_numbers = #tpu.dot_dimension_numbers<[1], [0], [0], [1], [0, 0, 1, 1], [], []>} : vector<2x512xbf16>, vector<512x512xbf16>, vector<2x512xf32> -> vector<2x512xf32>
    %44 = arith.addf %38, %43 : vector<2x512xf32>
    %c2_36 = arith.constant 2 : index
    %c0_37 = arith.constant 0 : index
    %45 = vector.load %arg10[%c2_36, %c0_37] : memref<4x512xf32, #tpu.memory_space<vmem>>, vector<2x512xf32>
    %46 = arith.truncf %45 : vector<2x512xf32> to vector<2x512xbf16>
    %c2_38 = arith.constant 2 : index
    %c0_39 = arith.constant 0 : index
    %c0_40 = arith.constant 0 : index
    %47 = vector.load %arg5[%c2_38, %c0_39, %c0_40] : memref<3x512x512xbf16, #tpu.memory_space<vmem>>, vector<1x512x512xbf16>
    %48 = vector.shape_cast %47 : vector<1x512x512xbf16> to vector<512x512xbf16>
    %cst_41 = arith.constant dense<0.000000e+00> : vector<2x512xf32>
    %49 = tpu.matmul %46, %48, %cst_41 {dimension_numbers = #tpu.dot_dimension_numbers<[1], [0], [0], [1], [0, 0, 1, 1], [], []>} : vector<2x512xbf16>, vector<512x512xbf16>, vector<2x512xf32> -> vector<2x512xf32>
    %50 = arith.addf %44, %49 : vector<2x512xf32>
    %51 = arith.truncf %5 : vector<2x256xf32> to vector<2x256xbf16>
    %c0_42 = arith.constant 0 : index
    %c0_43 = arith.constant 0 : index
    %c0_44 = arith.constant 0 : index
    %52 = vector.load %arg7[%c0_42, %c0_43, %c0_44] : memref<1x256x512xbf16, #tpu.memory_space<vmem>>, vector<1x256x512xbf16>
    %53 = vector.shape_cast %52 : vector<1x256x512xbf16> to vector<256x512xbf16>
    %cst_45 = arith.constant dense<0.000000e+00> : vector<2x512xf32>
    %54 = tpu.matmul %51, %53, %cst_45 {dimension_numbers = #tpu.dot_dimension_numbers<[1], [0], [0], [1], [0, 0, 1, 1], [], []>} : vector<2x256xbf16>, vector<256x512xbf16>, vector<2x512xf32> -> vector<2x512xf32>
    %c0_46 = arith.constant 0 : index
    %c0_47 = arith.constant 0 : index
    %55 = vector.load %arg8[%c0_46, %c0_47] : memref<1x512xf32, #tpu.memory_space<vmem>>, vector<1x512xf32>
    %56 = vector.broadcast %55 : vector<1x512xf32> to vector<2x512xf32>
    %57 = arith.addf %54, %56 : vector<2x512xf32>
    %c0_48 = arith.constant 0 : index
    %c0_49 = arith.constant 0 : index
    %58 = vector.load %arg6[%c0_48, %c0_49] : memref<1x512xf32, #tpu.memory_space<vmem>>, vector<1x512xf32>
    %59 = vector.broadcast %58 : vector<1x512xf32> to vector<2x512xf32>
    %60 = arith.addf %50, %59 : vector<2x512xf32>
    %61 = arith.addf %60, %57 : vector<2x512xf32>
    %cst_50 = arith.constant 0.000000e+00 : f32
    %62 = vector.broadcast %cst_50 : f32 to vector<2x512xf32>
    %63 = arith.maximumf %61, %62 : vector<2x512xf32>
    %cst_51 = arith.constant dense<0.000000e+00> : vector<512xf32>
    %64 = vector.multi_reduction <add>, %63, %cst_51 [0] : vector<2x512xf32> to vector<512xf32>
    %65 = vector.shape_cast %64 : vector<512xf32> to vector<1x512xf32>
    %cst_52 = arith.constant 2.000000e+00 : f32
    %66 = vector.broadcast %cst_52 : f32 to vector<1x512xf32>
    %67 = arith.divf %65, %66 : vector<1x512xf32>
    %c0_53 = arith.constant 0 : index
    %c0_54 = arith.constant 0 : index
    %c0_55 = arith.constant 0 : index
    %68 = vector.load %arg9[%c0_53, %c0_54, %c0_55] : memref<1x1x512xf32, #tpu.memory_space<vmem>>, vector<1x1x512xf32>
    %69 = vector.shape_cast %68 : vector<1x1x512xf32> to vector<1x512xf32>
    %70 = vector.shape_cast %67 : vector<1x512xf32> to vector<1x1x512xf32>
    tpu.vector_store %arg9[%c0_53, %c0_54, %c0_55], %70 {strides = array<i32>} : memref<1x1x512xf32, #tpu.memory_space<vmem>>, vector<1x1x512xf32>,
    return
  }
  func.func @transform_0(%arg0: i32) -> (i32, i32, i32) {
    %c0_i32 = arith.constant 0 : i32
    %c0_i32_0 = arith.constant 0 : i32
    %c0_i32_1 = arith.constant 0 : i32
    return %arg0, %c0_i32, %c0_i32_0 : i32, i32, i32
  }
  func.func @transform_1(%arg0: i32) -> (i32, i32, i32) {
    %c0_i32 = arith.constant 0 : i32
    %c0_i32_0 = arith.constant 0 : i32
    %c0_i32_1 = arith.constant 0 : i32
    return %arg0, %c0_i32, %c0_i32_0 : i32, i32, i32
  }
  func.func @transform_2(%arg0: i32) -> (i32, i32, i32) {
    %c0_i32 = arith.constant 0 : i32
    %c0_i32_0 = arith.constant 0 : i32
    %c0_i32_1 = arith.constant 0 : i32
    %c0_i32_2 = arith.constant 0 : i32
    return %c0_i32, %c0_i32_0, %c0_i32_1 : i32, i32, i32
  }
  func.func @transform_3(%arg0: i32) -> (i32, i32) {
    %c0_i32 = arith.constant 0 : i32
    %c0_i32_0 = arith.constant 0 : i32
    %c0_i32_1 = arith.constant 0 : i32
    return %c0_i32, %c0_i32_0 : i32, i32
  }
  func.func @transform_4(%arg0: i32) -> (i32, i32, i32) {
    %c0_i32 = arith.constant 0 : i32
    %c0_i32_0 = arith.constant 0 : i32
    %c0_i32_1 = arith.constant 0 : i32
    %c0_i32_2 = arith.constant 0 : i32
    return %c0_i32, %c0_i32_0, %c0_i32_1 : i32, i32, i32
  }
  func.func @transform_5(%arg0: i32) -> (i32, i32) {
    %c0_i32 = arith.constant 0 : i32
    %c0_i32_0 = arith.constant 0 : i32
    %c0_i32_1 = arith.constant 0 : i32
    return %c0_i32, %c0_i32_0 : i32, i32
  }
  func.func @transform_6(%arg0: i32) -> (i32, i32, i32) {
    %c0_i32 = arith.constant 0 : i32
    %c0_i32_0 = arith.constant 0 : i32
    %c0_i32_1 = arith.constant 0 : i32
    %c0_i32_2 = arith.constant 0 : i32
    return %c0_i32, %c0_i32_0, %c0_i32_1 : i32, i32, i32
  }
  func.func @transform_7(%arg0: i32) -> (i32, i32) {
    %c0_i32 = arith.constant 0 : i32
    %c0_i32_0 = arith.constant 0 : i32
    %c0_i32_1 = arith.constant 0 : i32
    return %c0_i32, %c0_i32_0 : i32, i32
  }
  func.func @transform_8(%arg0: i32) -> (i32, i32, i32) {
    %c0_i32 = arith.constant 0 : i32
    %c0_i32_0 = arith.constant 0 : i32
    %c0_i32_1 = arith.constant 0 : i32
    return %arg0, %c0_i32, %c0_i32_0 : i32, i32, i32
  }
}

</mosaic_0001>

<bundles_post_ra>
// kernel: encoder_forward.5
= control target key start
LH: loop header
LB: loop body
LE: loop exit
PB: predicated region body
PF: predicated region fallthrough
CT: control target
= control target key end

     0   :  { %9 = vsyncpa [#allocation4], 0  ;;  %s740_s0 = inlined_call_operand.vmem [shape: bf16[2,16,128], index: 0, kind: input, shape index: {}]   ;;  %s741_s1 = inlined_call_operand.vmem [shape: bf16[2,16,128], index: 1, kind: input, shape index: {}]   ;;  %s742_s2 = inlined_call_operand.hbm [shape: bf16[128,128], index: 2, kind: input, shape index: {}]   ;;  %s743_s3 = inlined_call_operand.hbm [shape: f32[1,128], index: 3, kind: input, shape index: {}]   ;;  %s744_s4 = inlined_call_operand.vmem [shape: bf16[2,16,128], index: 4, kind: output, shape index: {}]  }
   0x1   :  { %10 = vsyncpa [#allocation6], 0  ;;  %s686_s15 = smov 0  }
   0x2 LB: > { %s152_s18 = sshll.u32 %s742_s2, 4  ;;  %s695_s19 = sadd.s32 4294967295, %s654_s15   ;;  %s654_s15 = sphi %s686_s15, %s16_s15   ;;  %s153_s18 = int_to_ptr.hbm [resolvable:$true] %s152_s18 }
   0x3   : > { %p474_p0 = scmp.ge.s32.totalorder %s654_s15, 1  ;;  %p141_p1 = scmp.lt.s32.totalorder %s654_s15, 3 }
   0x4   : > { %p562_p2 = scmp.eq.s32.totalorder %s695_s19, 0  ;;  %s656_s21 = smov [#allocation3]  }
   0x5   : > { %p700_p3 = pnand %p474_p0, %p141_p1  ;;  %s154_s22 = sshll.u32 %s656_s21, 4  ;;  %s155_s22 = int_to_ptr.vmem [resolvable:$true] %s154_s22 }
   0x6   : > { %s167_s25 = sshll.u32 %s743_s3, 4  ;;  %s657_s26 = smov [#allocation5]   ;;  %s168_s25 = int_to_ptr.hbm [resolvable:$true] %s167_s25 }
   0x7   : > { %p555_p4 = pneg %p700_p3  ;;  %s169_s27 = sshll.u32 %s657_s26, 4  ;;  %s170_s27 = int_to_ptr.vmem [resolvable:$true] %s169_s27 }
   0x8   : > { %s658_s28 = smov 64   ;;  %s659_s29 = smov 4  }
   0x9   : > { %p556_p5 = pnand %p562_p2, %p555_p4  ;;  %198 = sbr.rel (%p700_p3) target bundleno = 202 (0xca), region = 36 }
   0xb   : > { %558 = dma.hbm_to_vmem [thread:$0]  (!%p556_p5), %s153_s18, 1024, %s155_s22, [#allocation4], %s658_s28, %s658_s28, %s659_s29  }
   0xc   : > { %561 = dma.hbm_to_vmem [thread:$0]  (!%p556_p5), %s168_s25, 16, %s170_s27, [#allocation6]  }
   0xe   : > { %645 = dma.done.wait (%p562_p2), [#allocation4], 1024  }
   0xf   : > { %647 = vsyncadd (%p562_p2), [#allocation4], 4294966272 }
  0x10   : > { %649 = dma.done.wait (%p562_p2), [#allocation6], 16  }
  0x11   : > { %651 = vsyncadd (%p562_p2), [#allocation6], 4294967280  ;;  %v539_v0 = vld [vmem:[#allocation3 + $0x38] sm:$0xff]  ;;  %v538_v1 = vld [vmem:[#allocation3 + $0x30] sm:$0xff]  ;;  %p235_p6 = scmp.lt.s32.totalorder %s695_s19, 1  ;;  %v660_v10 = vmov 0.0  }
  0x12   : > { %326 = vmatpush.bf16.msra.mxu0 %v539_v0  ;;  %350 = vmatpush.bf16.msra.mxu1 %v539_v0  ;;  %v537_v2 = vld [vmem:[#allocation3 + $0x28] sm:$0xff]  ;;  %v536_v3 = vld [vmem:[#allocation3 + $0x20] sm:$0xff]  ;;  %v535_v4 = vld [vmem:[#allocation3 + $0x18] sm:$0xff]  ;;  %366 = vst [vmem:[#allocation2] sm:$0xff] %v660_v10 }
  0x13   : > { %v534_v5 = vld [vmem:[#allocation3 + $0x10] sm:$0xff]  ;;  %s747_s19 = smov (!%p235_p6, %s695_s19), 1  ;;  %v533_v6 = vld [vmem:[#allocation3 + $0x8] sm:$0xff]  ;;  %v532_v7 = vld [vmem:[#allocation3] sm:$0xff]  ;;  %367 = vst [vmem:[#allocation2 + $0x8] sm:$0xff] %v660_v10 }
  0x14   : > { %s723_s30 = sshll.u32 %s747_s19, 3  ;;  %v579_v11 = vld [vmem:[#allocation5] ss:$0 sm:$0xff] }
  0x15   : > { %s239_s7 = scalar_lea.vmem %s740_s0, %s723_s30  ;;  %s244_s10 = scalar_lea.vmem %s741_s1, %s723_s30 }
  0x16   : > { %327 = vmatpush.bf16.msra.mxu0 %v538_v1  ;;  %351 = vmatpush.bf16.msra.mxu1 %v538_v1  ;;  %v540_v8 = vld [vmem:[%s239_s7] sm:$0xff]  ;;  %s249_s13 = scalar_lea.vmem %s744_s4, %s723_s30 }
  0x17   : > { %v541_v9 = vld [vmem:[%s244_s10] sm:$0xff] }
  0x1a   : > { %328 = vmatpush.bf16.msra.mxu0 %v537_v2  ;;  %352 = vmatpush.bf16.msra.mxu1 %v537_v2 }
  0x1e   : > { %329 = vmatpush.bf16.msra.mxu0 %v536_v3  ;;  %353 = vmatpush.bf16.msra.mxu1 %v536_v3 }
  0x22   : > { %330 = vmatpush.bf16.msra.mxu0 %v535_v4  ;;  %354 = vmatpush.bf16.msra.mxu1 %v535_v4 }
  0x26   : > { %331 = vmatpush.bf16.msra.mxu0 %v534_v5  ;;  %355 = vmatpush.bf16.msra.mxu1 %v534_v5 }
  0x2a   : > { %332 = vmatpush.bf16.msra.mxu0 %v533_v6  ;;  %356 = vmatpush.bf16.msra.mxu1 %v533_v6 }
  0x2e   : > { %333 = vmatpush.bf16.msra.mxu0 %v532_v7  ;;  %357 = vmatpush.bf16.msra.mxu1 %v532_v7 }
  0x31   : > { %334 = vmatmul.bf16.vlgmr.msra.gmra.mxu0 %v540_v8  ;;  %358 = vmatmul.bf16.vlgmr.msra.gmra.mxu1 %v541_v9 }
  0xae   : > { %v359_v12 = vpop.f32.mrf.mxu1  ;;  %v335_v14 = vpop.f32.mrf.mxu0 }
  0xaf   : > { %v360_v13 = vadd.f32 %v579_v11, %v359_v12  ;;  %v336_v18 = vadd.f32 %v579_v11, %v335_v14 }
  0xb1   : > { %v364_v15 = vmax.f32 %v360_v13, 0.0  ;;  %v340_v21 = vmax.f32 %v336_v18, 0.0 }
  0xb3   : > { %369 = vst [vmem:[#allocation2 + $0x1] sm:$0xff] %v364_v15 }
  0xb6   : > { %v361_v16 = vpop.f32.mrf.mxu1  ;;  %v337_v20 = vpop.f32.mrf.mxu0 }
  0xb7   : > { %v362_v17 = vadd.f32 %v579_v11, %v361_v16  ;;  %v338_v22 = vadd.f32 %v579_v11, %v337_v20 }
  0xb9   : > { %v365_v19 = vmax.f32 %v362_v17, 0.0  ;;  %v341_v25 = vmax.f32 %v338_v22, 0.0 }
  0xba   : > { %v371_v23 = vld [vmem:[#allocation2] sm:$0xff] }
  0xbb   : > { %370 = vst [vmem:[#allocation2 + $0x9] sm:$0xff] %v365_v19  ;;  %v373_v24 = vmax.f32 %v371_v23, %v340_v21 }
  0xbd   : > { %v377_v28 = vmax.f32 %v373_v24, %v364_v15 }
  0xc2   : > { %v372_v26 = vld [vmem:[#allocation2 + $0x8] sm:$0xff] }
  0xc3   : > { %v374_v27 = vmax.f32 %v372_v26, %v341_v25 }
  0xc5   : > { %v378_v29 = vmax.f32 %v374_v27, %v365_v19 }
  0xc7   : > { %v545_v30 = vpack.c.bf16 %v378_v29, %v377_v28 }
  0xc9   : > { %546 = vst [vmem:[%s249_s13] sm:$0xff] %v545_v30  }
  0xca PF: > { %s16_s15 = sadd.s32 1, %s654_s15  }
  0xcb   : > { %p13_p7 = scmp.ge.s32.totalorder %s16_s15, 4  }
  0xcd   :  { %15 = sbr.rel (!%p13_p7) target bundleno = 2 (0x2), region = 78 }
  0xd2   :  { %404 = vsyncpa [#allocation4], 1 }
  0xd3   :  { %406 = vsyncpa [#allocation4 + $0x1], 1 }
  0xd4   :  { %407 = vsyncpa [#allocation6], 1 }

// kernel: encoder_forward.6
= control target key start
LH: loop header
LB: loop body
LE: loop exit
PB: predicated region body
PF: predicated region fallthrough
CT: control target
= control target key end

     0   :  { %10 = vsyncpa [#allocation4], 0  ;;  %s1517_s0 = inlined_call_operand.vmem [shape: bf16[2,18,128], index: 0, kind: input, shape index: {}]   ;;  %s1518_s1 = inlined_call_operand.hbm [shape: bf16[3,128,128], index: 1, kind: input, shape index: {}]   ;;  %s1519_s2 = inlined_call_operand.hbm [shape: f32[1,128], index: 2, kind: input, shape index: {}]   ;;  %s1520_s3 = inlined_call_operand.hbm [shape: bf16[3,128,128], index: 3, kind: input, shape index: {}]   ;;  %s1521_s4 = inlined_call_operand.hbm [shape: f32[1,128], index: 4, kind: input, shape index: {}]   ;;  %s1522_s5 = inlined_call_operand.vmem [shape: bf16[2,16,128], index: 5, kind: output, shape index: {}]  }
   0x1   :  { %11 = vsyncpa [#allocation6], 0 }
   0x2   :  { %12 = vsyncpa [#allocation9], 0  ;;  %s1436_s18 = smov 0  }
   0x3 LB: > { %s185_s21 = sshll.u32 %s1519_s2, 4  ;;  %s1445_s22 = sadd.s32 4294967295, %s1397_s18   ;;  %s1397_s18 = sphi %s1436_s18, %s18_s18   ;;  %s186_s21 = int_to_ptr.hbm [resolvable:$true] %s185_s21 }
   0x4   : > { %p938_p0 = scmp.ge.s32.totalorder %s1397_s18, 1  ;;  %p159_p1 = scmp.lt.s32.totalorder %s1397_s18, 3 }
   0x5   : > { %p1234_p2 = scmp.eq.s32.totalorder %s1445_s22, 0  ;;  %s1399_s24 = smov [#allocation5]  }
   0x6   : > { %p1450_p3 = pnand %p938_p0, %p159_p1  ;;  %s187_s25 = sshll.u32 %s1399_s24, 4  ;;  %s188_s25 = int_to_ptr.vmem [resolvable:$true] %s187_s25 }
   0x7   : > { %s170_s28 = sshll.u32 %s1518_s1, 4  ;;  %s1400_s30 = smov [#allocation3]   ;;  %s171_s28 = int_to_ptr.hbm [resolvable:$true] %s170_s28 }
   0x8   : > { %p1221_p4 = pneg %p1450_p3  ;;  %s172_s6 = sshll.u32 %s1400_s30, 4  ;;  %s173_s6 = int_to_ptr.vmem [resolvable:$true] %s172_s6 }
   0x9   : > { %s196_s9 = sshll.u32 %s1520_s3, 4  ;;  %s1401_s10 = smov 64   ;;  %s197_s9 = int_to_ptr.hbm [resolvable:$true] %s196_s9 }
   0xa   : > { %p1461_p5 = pnand %p1234_p2, %p1221_p4  ;;  %s1402_s11 = smov 4  }
   0xb   : > { %s1403_s12 = smov [#allocation7]   ;;  %s211_s16 = sshll.u32 %s1521_s4, 4  ;;  %s212_s16 = int_to_ptr.hbm [resolvable:$true] %s211_s16 }
   0xc   : > { %1227 = dma.hbm_to_vmem [thread:$0]  (!%p1461_p5), %s186_s21, 16, %s188_s25, [#allocation6]  }
   0xd   : > { %1224 = dma.hbm_to_vmem [thread:$0]  (!%p1461_p5), %s171_s28, 3072, %s173_s6, [#allocation4], %s1401_s10, %s1401_s10, %s1402_s11  }
   0xe   : > { %s198_s13 = sshll.u32 %s1403_s12, 4  ;;  %s1404_s17 = smov [#allocation8]   ;;  %s199_s13 = int_to_ptr.vmem [resolvable:$true] %s198_s13 }
   0xf   : > { %1230 = dma.hbm_to_vmem [thread:$0]  (!%p1461_p5), %s197_s9, 3072, %s199_s13, [#allocation6], %s1401_s10, %s1401_s10, %s1402_s11  }
  0x10   : > { %s213_s19 = sshll.u32 %s1404_s17, 4  ;;  %234 = sbr.rel (%p1450_p3) target bundleno = 363 (0x16b), region = 40  ;;  %s214_s19 = int_to_ptr.vmem [resolvable:$true] %s213_s19 }
  0x11   : > { %1233 = dma.hbm_to_vmem [thread:$0]  (!%p1461_p5), %s212_s16, 16, %s214_s19, [#allocation9]  }
  0x15   : > { %1384 = dma.done.wait (%p1234_p2), [#allocation4], 3072  }
  0x16   : > { %1386 = vsyncadd (%p1234_p2), [#allocation4], 4294964224 }
  0x17   : > { %1388 = dma.done.wait (%p1234_p2), [#allocation6], 3088  }
  0x18   : > { %1390 = vsyncadd (%p1234_p2), [#allocation6], 4294964208 }
  0x19   : > { %1392 = dma.done.wait (%p1234_p2), [#allocation9], 16  }
  0x1a   : > { %1394 = vsyncadd (%p1234_p2), [#allocation9], 4294967280  ;;  %p278_p6 = scmp.lt.s32.totalorder %s1445_s22, 1  ;;  %v1162_v0 = vld [vmem:[#allocation3 + $0x78] sm:$0xff]  ;;  %v1161_v3 = vld [vmem:[#allocation3 + $0x70] sm:$0xff]  ;;  %vm486_vm0 = vcmask 1046528  }
  0x1b   : > { %v1154_v1 = vld [vmem:[#allocation3 + $0x38] sm:$0xff]  ;;  %391 = vmatpush.bf16.msra.mxu0 %v1162_v0  ;;  %v1153_v4 = vld [vmem:[#allocation3 + $0x30] sm:$0xff]  ;;  %v1160_v6 = vld [vmem:[#allocation3 + $0x68] sm:$0xff]  ;;  %vm329_vm1 = vsmask.f32 7424  ;;  %v1405_v59 = vmov 0.0  }
  0x1c   : > { %s1526_s22 = smov (!%p278_p6, %s1445_s22), 1  ;;  %v1170_v2 = vld [vmem:[#allocation3 + $0xb8] sm:$0xff]  ;;  %453 = vmatpush.bf16.msra.mxu1 %v1154_v1  ;;  %v1169_v5 = vld [vmem:[#allocation3 + $0xb0] sm:$0xff]  ;;  %v1152_v7 = vld [vmem:[#allocation3 + $0x28] sm:$0xff]  ;;  %563 = vst [vmem:[#allocation2] sm:$0xff] %v1405_v59 }
  0x1d   : > { %s1204_s20 = smul.u32 12, %s1526_s22  ;;  %539 = vmatpush.bf16.msra.mxu2 %v1170_v2  ;;  %v1168_v8 = vld [vmem:[#allocation3 + $0xa8] sm:$0xff]  ;;  %v1159_v13 = vld [vmem:[#allocation3 + $0x60] sm:$0xff]  ;;  %v1158_v20 = vld [vmem:[#allocation3 + $0x58] sm:$0xff]  ;;  %564 = vst [vmem:[#allocation2 + $0x8] sm:$0xff] %v1405_v59  ;;  %s1146_s25 = sshll.u32 %s1526_s22, 3 }
  0x1e   : > { %v1151_v14 = vld [vmem:[#allocation3 + $0x20] sm:$0xff]  ;;  %v1150_v21 = vld [vmem:[#allocation3 + $0x18] sm:$0xff]  ;;  %v1157_v25 = vld [vmem:[#allocation3 + $0x50] sm:$0xff]  ;;  %565 = vst [vmem:[#allocation2 + $0x10] sm:$0x3] %v1405_v59  ;;  %s287_s28 = scalar_lea.vmem %s1522_s5, %s1146_s25 }
  0x1f   : > { %s282_s24 = scalar_lea.vmem %s1517_s0, %s1204_s20  ;;  %392 = vmatpush.bf16.msra.mxu0 %v1161_v3  ;;  %v1167_v16 = vld [vmem:[#allocation3 + $0xa0] sm:$0xff]  ;;  %v1166_v24 = vld [vmem:[#allocation3 + $0x98] sm:$0xff]  ;;  %v1149_v26 = vld [vmem:[#allocation3 + $0x10] sm:$0xff] }
  0x20   : > { %454 = vmatpush.bf16.msra.mxu1 %v1153_v4  ;;  %v1196_v9 = vld [vmem:[%s282_s24] sm:$0xff]   ;;  %v290_v10 = vld [vmem:[%s282_s24 + $0x8] sm:$0x1]  ;;  %v1155_v36 = vld [vmem:[#allocation3 + $0x40] sm:$0xff] }
  0x21   : > { %540 = vmatpush.bf16.msra.mxu2 %v1169_v5  ;;  %v293_v11 = vunpack.c.l.bf16 %v290_v10  ;;  %v1197_v12 = vunpack.c.l.bf16 %v1196_v9  ;;  %v1198_v15 = vunpack.c.h.bf16 %v1196_v9  ;;  %v333_v28 = vshll.u32 %v1196_v9, 16  ;;  %v1165_v29 = vld [vmem:[#allocation3 + $0x90] sm:$0xff]  ;;  %v1156_v30 = vld [vmem:[#allocation3 + $0x48] sm:$0xff]  ;;  %v1147_v37 = vld [vmem:[#allocation3] sm:$0xff] }
  0x22   : > { %v1148_v31 = vld [vmem:[#allocation3 + $0x8] sm:$0xff]  ;;  %v331_v32 = vshrl.u32 %v1196_v9, 16  ;;  %v1163_v40 = vld [vmem:[#allocation3 + $0x80] sm:$0xff]  ;;  %v487_v41 = vrot.slane %v1196_v9, 1  ;;  %v1185_v46 = vld [vmem:[#allocation7 + $0x70] sm:$0xff] }
  0x23   : > { %393 = vmatpush.bf16.msra.mxu0 %v1160_v6  ;;  %v825_v17 = vrot.slane %v1197_v12, 1  ;;  %v828_v18 = vrot.slane %v293_v11, 1  ;;  %v826_v19 = vrot.slane %v1198_v15, 1  ;;  %v311_v27 = vpack.c.bf16 %v293_v11, %v293_v11  ;;  %v1164_v35 = vld [vmem:[#allocation3 + $0x88] sm:$0xff]  ;;  %v1186_v45 = vld [vmem:[#allocation7 + $0x78] sm:$0xff]  ;;  %v1177_v50 = vld [vmem:[#allocation7 + $0x30] sm:$0xff] }
  0x24   : > { %455 = vmatpush.bf16.msra.mxu1 %v1152_v7  ;;  %v335_v33 = vrot.slane %v333_v28, 1  ;;  %655 = vmatpush.bf16.msra.mxu3 %v1186_v45  ;;  %v1178_v47 = vld [vmem:[#allocation7 + $0x38] sm:$0xff]  ;;  %v1184_v49 = vld [vmem:[#allocation7 + $0x68] sm:$0xff]  ;;  %v1193_v51 = vld [vmem:[#allocation7 + $0xb0] sm:$0xff] }
  0x25   : > { %541 = vmatpush.bf16.msra.mxu2 %v1168_v8  ;;  %v1502_v22 = vsel %vm486_vm0, %v825_v17, %v826_v19  ;;  %v1505_v23 = vsel %vm486_vm0, %v826_v19, %v828_v18  ;;  %v338_v34 = vshll.u32 %v311_v27, 16  ;;  %v488_v42 = vrot.slane %v311_v27, 1  ;;  %v1194_v48 = vld [vmem:[#allocation7 + $0xb8] sm:$0xff]  ;;  %v1183_v52 = vld [vmem:[#allocation7 + $0x60] sm:$0xff]  ;;  %v1176_v53 = vld [vmem:[#allocation7 + $0x28] sm:$0xff] }
  0x26   : > { %v336_v38 = vor.u32 %v335_v33, %v331_v32  ;;  %v1192_v54 = vld [vmem:[#allocation7 + $0xa8] sm:$0xff]  ;;  %v1182_v55 = vld [vmem:[#allocation7 + $0x58] sm:$0xff]  ;;  %v1175_v56 = vld [vmem:[#allocation7 + $0x20] sm:$0xff] }
  0x27   : > { %394 = vmatpush.bf16.msra.mxu0 %v1159_v13  ;;  %v340_v39 = vrot.slane %v338_v34, 1  ;;  %v489_v44 = vsel %vm486_vm0, %v487_v41, %v488_v42  ;;  %v1191_v57 = vld [vmem:[#allocation7 + $0xa0] sm:$0xff]  ;;  %v1181_v58 = vld [vmem:[#allocation7 + $0x50] sm:$0xff]  ;;  %v1174_v60 = vld [vmem:[#allocation7 + $0x18] sm:$0xff] }
  0x28   : > { %456 = vmatpush.bf16.msra.mxu1 %v1151_v14  ;;  %656 = vmatpush.bf16.msra.mxu3 %v1185_v46  ;;  %v1190_v61 = vld [vmem:[#allocation7 + $0x98] sm:$0xff]  ;;  %v1180_v62 = vld [vmem:[#allocation7 + $0x48] sm:$0xff]  ;;  %v1173_v63 = vld [vmem:[#allocation7 + $0x10] sm:$0xff] }
  0x29   : > { %542 = vmatpush.bf16.msra.mxu2 %v1167_v16  ;;  %v341_v43 = vsel %vm329_vm1, %v336_v38, %v340_v39  ;;  %v1189_v0 = vld [vmem:[#allocation7 + $0x90] sm:$0xff]  ;;  %v1179_v1 = vld [vmem:[#allocation7 + $0x40] sm:$0xff]  ;;  %v1172_v2 = vld [vmem:[#allocation7 + $0x8] sm:$0xff] }
  0x2a   : > { %v1188_v3 = vld [vmem:[#allocation7 + $0x88] sm:$0xff]  ;;  %v1171_v4 = vld [vmem:[#allocation7] sm:$0xff] }
  0x2b   : > { %395 = vmatpush.bf16.msra.mxu0 %v1158_v20  ;;  %v1187_v5 = vld [vmem:[#allocation7 + $0x80] sm:$0xff] }
  0x2c   : > { %457 = vmatpush.bf16.msra.mxu1 %v1150_v21  ;;  %657 = vmatpush.bf16.msra.mxu3 %v1184_v49 }
  0x2d   : > { %543 = vmatpush.bf16.msra.mxu2 %v1166_v24 }
  0x2f   : > { %396 = vmatpush.bf16.msra.mxu0 %v1157_v25 }
  0x30   : > { %458 = vmatpush.bf16.msra.mxu1 %v1149_v26  ;;  %658 = vmatpush.bf16.msra.mxu3 %v1183_v52 }
  0x31   : > { %544 = vmatpush.bf16.msra.mxu2 %v1165_v29 }
  0x33   : > { %397 = vmatpush.bf16.msra.mxu0 %v1156_v30 }
  0x34   : > { %459 = vmatpush.bf16.msra.mxu1 %v1148_v31  ;;  %659 = vmatpush.bf16.msra.mxu3 %v1182_v55 }
  0x35   : > { %545 = vmatpush.bf16.msra.mxu2 %v1164_v35  ;;  %v1258_v35 = vld [vmem:[#allocation8] ss:$0 sm:$0xff] }
  0x37   : > { %398 = vmatpush.bf16.msra.mxu0 %v1155_v36 }
  0x38   : > { %460 = vmatpush.bf16.msra.mxu1 %v1147_v37  ;;  %660 = vmatpush.bf16.msra.mxu3 %v1181_v58 }
  0x39   : > { %546 = vmatpush.bf16.msra.mxu2 %v1163_v40 }
  0x3a   : > { %399 = vmatmul.bf16.vlgmr.msra.gmra.mxu0 %v341_v43 }
  0x3b   : > { %461 = vmatmul.bf16.vlgmr.msra.gmra.mxu1 %v1196_v9  ;;  %717 = vmatpush.bf16.msrb.mxu0 %v1178_v47  ;;  %v1257_v9 = vld [vmem:[#allocation5] ss:$0 sm:$0xff] }
  0x3c   : > { %547 = vmatmul.bf16.vlgmr.msra.gmra.mxu2 %v489_v44  ;;  %799 = vmatpush.bf16.msrb.mxu1 %v1194_v48 }
  0x3d   : > { %661 = vmatpush.bf16.msra.mxu3 %v1180_v62 }
  0x3f   : > { %718 = vmatpush.bf16.msrb.mxu0 %v1177_v50 }
  0x40   : > { %800 = vmatpush.bf16.msrb.mxu1 %v1193_v51 }
  0x41   : > { %662 = vmatpush.bf16.msra.mxu3 %v1179_v1 }
  0x43   : > { %719 = vmatpush.bf16.msrb.mxu0 %v1176_v53 }
  0x44   : > { %801 = vmatpush.bf16.msrb.mxu1 %v1192_v54 }
  0x47   : > { %720 = vmatpush.bf16.msrb.mxu0 %v1175_v56 }
  0x48   : > { %802 = vmatpush.bf16.msrb.mxu1 %v1191_v57 }
  0x4b   : > { %721 = vmatpush.bf16.msrb.mxu0 %v1174_v60 }
  0x4c   : > { %803 = vmatpush.bf16.msrb.mxu1 %v1190_v61 }
  0x4f   : > { %722 = vmatpush.bf16.msrb.mxu0 %v1173_v63 }
  0x50   : > { %804 = vmatpush.bf16.msrb.mxu1 %v1189_v0 }
  0x53   : > { %723 = vmatpush.bf16.msrb.mxu0 %v1172_v2 }
  0x54   : > { %805 = vmatpush.bf16.msrb.mxu1 %v1188_v3 }
  0x57   : > { %724 = vmatpush.bf16.msrb.mxu0 %v1171_v4 }
  0x58   : > { %806 = vmatpush.bf16.msrb.mxu1 %v1187_v5 }
  0xb7   : > { %v400_v6 = vpop.f32.mrf.mxu0 }
  0xb8   : > { %v462_v7 = vpop.f32.mrf.mxu1 }
  0xb9   : > { %v463_v8 = vadd.f32 %v462_v7, %v400_v6 }
  0xbf   : > { %v548_v10 = vpop.f32.mrf.mxu2  ;;  %v402_v13 = vpop.f32.mrf.mxu0 }
  0xc0   : > { %v553_v11 = vadd.f32 %v548_v10, %v463_v8  ;;  %v464_v14 = vpop.f32.mrf.mxu1 }
  0xc1   : > { %v465_v16 = vadd.f32 %v464_v14, %v402_v13 }
  0xc2   : > { %v559_v12 = vadd.f32 %v1257_v9, %v553_v11 }
  0xc4   : > { %v561_v15 = vmax.f32 %v559_v12, 0.0 }
  0xc6   : > { %566 = vst [vmem:[#allocation2 + $0x1] sm:$0xff] %v561_v15 }
  0xc7   : > { %v550_v17 = vpop.f32.mrf.mxu2 }
  0xc8   : > { %v554_v18 = vadd.f32 %v550_v17, %v465_v16 }
  0xca   : > { %v560_v19 = vadd.f32 %v1257_v9, %v554_v18 }
  0xcc   : > { %v562_v20 = vmax.f32 %v560_v19, 0.0 }
  0xcd   : > { %v568_v24 = vld [vmem:[#allocation2] sm:$0xff] }
  0xce   : > { %567 = vst [vmem:[#allocation2 + $0x9] sm:$0xff] %v562_v20  ;;  %v589_v21 = vpack.c.bf16 %v562_v20, %v561_v15 }
  0xd0   : > { %663 = vmatmul.bf16.vlgmr.msra.gmra.mxu3 %v589_v21 }
  0xd5   : > { %v569_v25 = vld [vmem:[#allocation2 + $0x8] sm:$0xff] }
  0xd6   : > { %v731_v26 = vld [vmem:[#allocation2 + $0x2] sm:$0xff]  ;;  %v732_v27 = vld [vmem:[#allocation2 + $0xa] sm:$0xff]  ;;  %v570_v28 = vpack.c.bf16 %v569_v25, %v568_v24 }
  0xd7   : > { %v733_v29 = vpack.c.bf16 %v732_v27, %v731_v26 }
  0xd8   : > { %725 = vmatmul.bf16.vlgmr.msrb.gmra.mxu0 %v570_v28 }
  0xd9   : > { %807 = vmatmul.bf16.vlgmr.msrb.gmra.mxu1 %v733_v29 }
 0x153   : > { %v664_v30 = vpop.f32.mrf.mxu3 }
 0x155   : > { %v726_v31 = vpop.f32.mrf.mxu0 }
 0x156   : > { %v808_v32 = vpop.f32.mrf.mxu1  ;;  %v727_v33 = vadd.f32 %v726_v31, %v664_v30 }
 0x158   : > { %v813_v34 = vadd.f32 %v808_v32, %v727_v33 }
 0x15a   : > { %v819_v38 = vadd.f32 %v1258_v35, %v813_v34 }
 0x15b   : > { %v666_v37 = vpop.f32.mrf.mxu3 }
 0x15c   : > { %v832_v42 = vadd.f32 %v1502_v22, %v819_v38 }
 0x15d   : > { %v728_v36 = vpop.f32.mrf.mxu0 }
 0x15e   : > { %v729_v39 = vadd.f32 %v728_v36, %v666_v37  ;;  %v810_v40 = vpop.f32.mrf.mxu1  ;;  %v834_v45 = vmax.f32 %v832_v42, 0.0 }
 0x160   : > { %v814_v41 = vadd.f32 %v810_v40, %v729_v39 }
 0x162   : > { %v820_v43 = vadd.f32 %v1258_v35, %v814_v41 }
 0x164   : > { %v833_v44 = vadd.f32 %v1505_v23, %v820_v43 }
 0x166   : > { %v835_v46 = vmax.f32 %v833_v44, 0.0 }
 0x168   : > { %v1202_v47 = vpack.c.bf16 %v835_v46, %v834_v45 }
 0x16a   : > { %1203 = vst [vmem:[%s287_s28] sm:$0xff] %v1202_v47  }
 0x16b PF: > { %s18_s18 = sadd.s32 1, %s1397_s18  }
 0x16c   : > { %p15_p7 = scmp.ge.s32.totalorder %s18_s18, 4  }
 0x16e   :  { %17 = sbr.rel (!%p15_p7) target bundleno = 3 (0x3), region = 91 }
 0x173   :  { %861 = vsyncpa [#allocation4], 1 }
 0x174   :  { %863 = vsyncpa [#allocation4 + $0x1], 1 }
 0x175   :  { %864 = vsyncpa [#allocation6], 1 }
 0x176   :  { %865 = vsyncpa [#allocation9], 1 }

// kernel: encoder_forward.7
= control target key start
LH: loop header
LB: loop body
LE: loop exit
PB: predicated region body
PF: predicated region fallthrough
CT: control target
= control target key end

     0   :  { %13 = vsyncpa [#allocation4], 0  ;;  %s1858_s0 = inlined_call_operand.vmem [shape: bf16[2,9,128], index: 0, kind: input, shape index: {}]   ;;  %s1859_s1 = inlined_call_operand.vmem [shape: bf16[2,8,128], index: 1, kind: input, shape index: {}]   ;;  %s1860_s2 = inlined_call_operand.hbm [shape: bf16[3,128,128], index: 2, kind: input, shape index: {}]   ;;  %s1861_s3 = inlined_call_operand.hbm [shape: f32[1,128], index: 3, kind: input, shape index: {}]   ;;  %s1862_s4 = inlined_call_operand.hbm [shape: bf16[3,128,128], index: 4, kind: input, shape index: {}]   ;;  %s1863_s5 = inlined_call_operand.hbm [shape: f32[1,128], index: 5, kind: input, shape index: {}]   ;;  %s1864_s6 = inlined_call_operand.hbm [shape: bf16[1,128,128], index: 6, kind: input, shape index: {}]   ;;  %s1865_s7 = inlined_call_operand.hbm [shape: f32[1,128], index: 7, kind: input, shape index: {}]   ;;  %s1866_s8 = inlined_call_operand.vmem [shape: bf16[2,8,128], index: 8, kind: output, shape index: {}]  }
   0x1   :  { %14 = vsyncpa [#allocation6], 0 }
   0x2   :  { %15 = vsyncpa [#allocation9], 0 }
   0x3   :  { %16 = vsyncpa [#allocation12], 0  ;;  %s1765_s27 = smov 0  }
   0x4 LB: > { %s257_s30 = sshll.u32 %s1861_s3, 4  ;;  %s1774_s9 = sadd.s32 4294967295, %s1709_s27   ;;  %s1709_s27 = sphi %s1765_s27, %s22_s27   ;;  %s258_s30 = int_to_ptr.hbm [resolvable:$true] %s257_s30 }
   0x5   : > { %p1130_p0 = scmp.ge.s32.totalorder %s1709_s27, 1  ;;  %p231_p1 = scmp.lt.s32.totalorder %s1709_s27, 3 }
   0x6   : > { %p1475_p2 = scmp.eq.s32.totalorder %s1774_s9, 0  ;;  %s1711_s11 = smov [#allocation5]  }
   0x7   : > { %p1779_p3 = pnand %p1130_p0, %p231_p1  ;;  %s259_s12 = sshll.u32 %s1711_s11, 4  ;;  %s260_s12 = int_to_ptr.vmem [resolvable:$true] %s259_s12 }
   0x8   : > { %s283_s15 = sshll.u32 %s1863_s5, 4  ;;  %s242_s18 = sshll.u32 %s1860_s2, 4  ;;  %s284_s15 = int_to_ptr.hbm [resolvable:$true] %s283_s15  ;;  %s243_s18 = int_to_ptr.hbm [resolvable:$true] %s242_s18 }
   0x9   : > { %p1456_p4 = pneg %p1779_p3  ;;  %s1712_s20 = smov [#allocation8]  }
   0xa   : > { %s285_s21 = sshll.u32 %s1712_s20, 4  ;;  %s1713_s22 = smov [#allocation3]   ;;  %s286_s21 = int_to_ptr.vmem [resolvable:$true] %s285_s21 }
   0xb   : > { %p1793_p5 = pnand %p1475_p2, %p1456_p4  ;;  %s244_s23 = sshll.u32 %s1713_s22, 4  ;;  %s245_s23 = int_to_ptr.vmem [resolvable:$true] %s244_s23 }
   0xc   : > { %s1714_s24 = smov 64   ;;  %s1715_s25 = smov 4  }
   0xd   : > { %1462 = dma.hbm_to_vmem [thread:$0]  (!%p1793_p5), %s258_s30, 16, %s260_s12, [#allocation6]  }
   0xe   : > { %1468 = dma.hbm_to_vmem [thread:$0]  (!%p1793_p5), %s284_s15, 16, %s286_s21, [#allocation9]  }
   0xf   : > { %1459 = dma.hbm_to_vmem [thread:$0]  (!%p1793_p5), %s243_s18, 3072, %s245_s23, [#allocation4], %s1714_s24, %s1714_s24, %s1715_s25  }
  0x10   : > { %s268_s29 = sshll.u32 %s1862_s4, 4  ;;  %s1716_s11 = smov [#allocation7]   ;;  %s269_s29 = int_to_ptr.hbm [resolvable:$true] %s268_s29 }
  0x11   : > { %s270_s13 = sshll.u32 %s1716_s11, 4  ;;  %s294_s14 = sshll.u32 %s1864_s6, 4  ;;  %s271_s13 = int_to_ptr.vmem [resolvable:$true] %s270_s13  ;;  %s295_s14 = int_to_ptr.hbm [resolvable:$true] %s294_s14 }
  0x12   : > { %1465 = dma.hbm_to_vmem [thread:$0]  (!%p1793_p5), %s269_s29, 3072, %s271_s13, [#allocation6], %s1714_s24, %s1714_s24, %s1715_s25  }
  0x13   : > { %s1717_s15 = smov [#allocation10]   ;;  %s309_s20 = sshll.u32 %s1865_s7, 4  ;;  %s310_s20 = int_to_ptr.hbm [resolvable:$true] %s309_s20 }
  0x14   : > { %s296_s16 = sshll.u32 %s1717_s15, 4  ;;  %s1718_s21 = smov [#allocation11]   ;;  %s297_s16 = int_to_ptr.vmem [resolvable:$true] %s296_s16 }
  0x15   : > { %1471 = dma.hbm_to_vmem [thread:$0]  (!%p1793_p5), %s295_s14, 1024, %s297_s16, [#allocation9], %s1714_s24, %s1714_s24, %s1715_s25  }
  0x16   : > { %s311_s22 = sshll.u32 %s1718_s21, 4  ;;  %339 = sbr.rel (%p1779_p3) target bundleno = 355 (0x163), region = 52  ;;  %s312_s22 = int_to_ptr.vmem [resolvable:$true] %s311_s22 }
  0x17   : > { %1474 = dma.hbm_to_vmem [thread:$0]  (!%p1793_p5), %s310_s20, 16, %s312_s22, [#allocation12]  }
  0x1b   : > { %1692 = dma.done.wait (%p1475_p2), [#allocation4], 3072  }
  0x1c   : > { %1694 = vsyncadd (%p1475_p2), [#allocation4], 4294964224 }
  0x1d   : > { %1696 = dma.done.wait (%p1475_p2), [#allocation6], 3088  }
  0x1e   : > { %1698 = vsyncadd (%p1475_p2), [#allocation6], 4294964208 }
  0x1f   : > { %1700 = dma.done.wait (%p1475_p2), [#allocation9], 1040  }
  0x20   : > { %1702 = vsyncadd (%p1475_p2), [#allocation9], 4294966256 }
  0x21   : > { %1704 = dma.done.wait (%p1475_p2), [#allocation12], 16  }
  0x22   : > { %1706 = vsyncadd (%p1475_p2), [#allocation12], 4294967280  ;;  %p402_p6 = scmp.lt.s32.totalorder %s1774_s9, 1  ;;  %v1391_v0 = vld [vmem:[#allocation3 + $0x78] sm:$0xff]  ;;  %v1390_v3 = vld [vmem:[#allocation3 + $0x70] sm:$0xff]  ;;  %v1719_v63 = vmov 0.0  }
  0x23   : > { %v1383_v1 = vld [vmem:[#allocation3 + $0x38] sm:$0xff]  ;;  %502 = vmatpush.bf16.msra.mxu0 %v1391_v0  ;;  %v1382_v4 = vld [vmem:[#allocation3 + $0x30] sm:$0xff]  ;;  %v1389_v6 = vld [vmem:[#allocation3 + $0x68] sm:$0xff]  ;;  %670 = vst [vmem:[#allocation2] sm:$0xff] %v1719_v63 }
  0x24   : > { %v1399_v2 = vld [vmem:[#allocation3 + $0xb8] sm:$0xff]  ;;  %s1870_s9 = smov (!%p402_p6, %s1774_s9), 1  ;;  %563 = vmatpush.bf16.msra.mxu1 %v1383_v1  ;;  %v1398_v5 = vld [vmem:[#allocation3 + $0xb0] sm:$0xff]  ;;  %v1381_v7 = vld [vmem:[#allocation3 + $0x28] sm:$0xff]  ;;  %671 = vst [vmem:[#allocation2 + $0x8] sm:$0x3] %v1719_v63 }
  0x25   : > { %650 = vmatpush.bf16.msra.mxu2 %v1399_v2  ;;  %s1375_s10 = sshll.u32 %s1870_s9, 3  ;;  %v1397_v8 = vld [vmem:[#allocation3 + $0xa8] sm:$0xff]  ;;  %v1415_v9 = vld [vmem:[#allocation7 + $0x78] sm:$0xff]  ;;  %v1414_v15 = vld [vmem:[#allocation7 + $0x70] sm:$0xff]  ;;  %s1147_s25 = sshll.u32 %s1870_s9, 2 }
  0x26   : > { %s406_s24 = scalar_lea.vmem %s1858_s0, %s1375_s10  ;;  %v1388_v10 = vld [vmem:[#allocation3 + $0x60] sm:$0xff]  ;;  %758 = vmatpush.bf16.msra.mxu3 %v1415_v9  ;;  %v1387_v16 = vld [vmem:[#allocation3 + $0x58] sm:$0xff]  ;;  %v1386_v21 = vld [vmem:[#allocation3 + $0x50] sm:$0xff]  ;;  %s410_s29 = scalar_lea.vmem %s1859_s1, %s1147_s25 }
  0x27   : > { %503 = vmatpush.bf16.msra.mxu0 %v1390_v3  ;;  %v1380_v11 = vld [vmem:[#allocation3 + $0x20] sm:$0xff]  ;;  %v415_v13 = vld [vmem:[%s406_s24] sm:$0xf]  ;;  %v416_v14 = vld [vmem:[%s406_s24 + $0x4] sm:$0x1]  ;;  %s414_s30 = scalar_lea.vmem %s1866_s8, %s1147_s25 }
  0x28   : > { %564 = vmatpush.bf16.msra.mxu1 %v1382_v4  ;;  %v1396_v12 = vld [vmem:[#allocation3 + $0xa0] sm:$0xff]  ;;  %v1379_v17 = vld [vmem:[#allocation3 + $0x18] sm:$0xff]  ;;  %v417_v18 = vunpack.c.l.bf16 %v415_v13  ;;  %v418_v19 = vunpack.c.l.bf16 %v416_v14  ;;  %v1378_v22 = vld [vmem:[#allocation3 + $0x10] sm:$0xff] }
  0x29   : > { %651 = vmatpush.bf16.msra.mxu2 %v1398_v5  ;;  %v1395_v20 = vld [vmem:[#allocation3 + $0x98] sm:$0xff]  ;;  %v1394_v24 = vld [vmem:[#allocation3 + $0x90] sm:$0xff]  ;;  %v1385_v25 = vld [vmem:[#allocation3 + $0x48] sm:$0xff] }
  0x2a   : > { %759 = vmatpush.bf16.msra.mxu3 %v1414_v15  ;;  %v576_v23 = vpack.c.bf16 %v418_v19, %v417_v18  ;;  %v1377_v26 = vld [vmem:[#allocation3 + $0x8] sm:$0xff]  ;;  %v1384_v29 = vld [vmem:[#allocation3 + $0x40] sm:$0xff]  ;;  %v420_v37 = vpack.c.bf16 %v417_v18, %v417_v18  ;;  %v419_v38 = vld [vmem:[%s410_s29] sm:$0xf] }
  0x2b   : > { %504 = vmatpush.bf16.msra.mxu0 %v1389_v6  ;;  %v1393_v28 = vld [vmem:[#allocation3 + $0x88] sm:$0xff]  ;;  %v1376_v30 = vld [vmem:[#allocation3] sm:$0xff]  ;;  %v1406_v40 = vld [vmem:[#allocation7 + $0x30] sm:$0xff] }
  0x2c   : > { %565 = vmatpush.bf16.msra.mxu1 %v1381_v7  ;;  %v597_v27 = vshll.u32 %v576_v23, 16  ;;  %v595_v31 = vshrl.u32 %v576_v23, 16  ;;  %v1392_v33 = vld [vmem:[#allocation3 + $0x80] sm:$0xff]  ;;  %v1430_v41 = vld [vmem:[#allocation10 + $0x30] sm:$0xff]  ;;  %v1429_v43 = vld [vmem:[#allocation10 + $0x28] sm:$0xff] }
  0x2d   : > { %652 = vmatpush.bf16.msra.mxu2 %v1397_v8  ;;  %v1407_v34 = vld [vmem:[#allocation7 + $0x38] sm:$0xff]  ;;  %v1422_v42 = vld [vmem:[#allocation7 + $0xb0] sm:$0xff]  ;;  %v1413_v44 = vld [vmem:[#allocation7 + $0x68] sm:$0xff] }
  0x2e   : > { %v599_v32 = vrot.slane %v597_v27, 1  ;;  %v1431_v35 = vld [vmem:[#allocation10 + $0x38] sm:$0xff]  ;;  %760 = vmatpush.bf16.msra.mxu3 %v1413_v44  ;;  %v1428_v45 = vld [vmem:[#allocation10 + $0x20] sm:$0xff]  ;;  %v1426_v53 = vld [vmem:[#allocation10 + $0x10] sm:$0xff] }
  0x2f   : > { %505 = vmatpush.bf16.msra.mxu0 %v1388_v10  ;;  %v1423_v36 = vld [vmem:[#allocation7 + $0xb8] sm:$0xff]  ;;  %v1412_v46 = vld [vmem:[#allocation7 + $0x60] sm:$0xff]  ;;  %v1405_v48 = vld [vmem:[#allocation7 + $0x28] sm:$0xff] }
  0x30   : > { %566 = vmatpush.bf16.msra.mxu1 %v1380_v11  ;;  %v600_v39 = vor.u32 %v599_v32, %v595_v31  ;;  %v1427_v47 = vld [vmem:[#allocation10 + $0x18] sm:$0xff]  ;;  %v1421_v49 = vld [vmem:[#allocation7 + $0xa8] sm:$0xff]  ;;  %v1410_v54 = vld [vmem:[#allocation7 + $0x50] sm:$0xff] }
  0x31   : > { %653 = vmatpush.bf16.msra.mxu2 %v1396_v12  ;;  %v1411_v50 = vld [vmem:[#allocation7 + $0x58] sm:$0xff]  ;;  %v1404_v51 = vld [vmem:[#allocation7 + $0x20] sm:$0xff]  ;;  %v1425_v55 = vld [vmem:[#allocation10 + $0x8] sm:$0xff] }
  0x32   : > { %761 = vmatpush.bf16.msra.mxu3 %v1412_v46  ;;  %v1420_v52 = vld [vmem:[#allocation7 + $0xa0] sm:$0xff]  ;;  %v1403_v56 = vld [vmem:[#allocation7 + $0x18] sm:$0xff]  ;;  %v1409_v58 = vld [vmem:[#allocation7 + $0x48] sm:$0xff] }
  0x33   : > { %506 = vmatpush.bf16.msra.mxu0 %v1387_v16  ;;  %v1419_v57 = vld [vmem:[#allocation7 + $0x98] sm:$0xff]  ;;  %v1424_v59 = vld [vmem:[#allocation10] sm:$0xff]  ;;  %v1402_v60 = vld [vmem:[#allocation7 + $0x10] sm:$0xff] }
  0x34   : > { %567 = vmatpush.bf16.msra.mxu1 %v1379_v17  ;;  %v1418_v61 = vld [vmem:[#allocation7 + $0x90] sm:$0xff]  ;;  %v1408_v62 = vld [vmem:[#allocation7 + $0x40] sm:$0xff]  ;;  %v1401_v0 = vld [vmem:[#allocation7 + $0x8] sm:$0xff] }
  0x35   : > { %654 = vmatpush.bf16.msra.mxu2 %v1395_v20  ;;  %v1417_v1 = vld [vmem:[#allocation7 + $0x88] sm:$0xff]  ;;  %v1400_v2 = vld [vmem:[#allocation7] sm:$0xff]  ;;  %v1504_v7 = vld [vmem:[#allocation5] ss:$0 sm:$0xff] }
  0x36   : > { %762 = vmatpush.bf16.msra.mxu3 %v1411_v50  ;;  %v1416_v3 = vld [vmem:[#allocation7 + $0x80] sm:$0xff] }
  0x37   : > { %507 = vmatpush.bf16.msra.mxu0 %v1386_v21  ;;  %v1505_v23 = vld [vmem:[#allocation11] ss:$0 sm:$0xff]  ;;  %v1506_v27 = vld [vmem:[#allocation8] ss:$0 sm:$0xff] }
  0x38   : > { %568 = vmatpush.bf16.msra.mxu1 %v1378_v22 }
  0x39   : > { %655 = vmatpush.bf16.msra.mxu2 %v1394_v24 }
  0x3a   : > { %763 = vmatpush.bf16.msra.mxu3 %v1410_v54 }
  0x3b   : > { %508 = vmatpush.bf16.msra.mxu0 %v1385_v25 }
  0x3c   : > { %569 = vmatpush.bf16.msra.mxu1 %v1377_v26 }
  0x3d   : > { %656 = vmatpush.bf16.msra.mxu2 %v1393_v28 }
  0x3e   : > { %764 = vmatpush.bf16.msra.mxu3 %v1409_v58 }
  0x3f   : > { %509 = vmatpush.bf16.msra.mxu0 %v1384_v29 }
  0x40   : > { %570 = vmatpush.bf16.msra.mxu1 %v1376_v30 }
  0x41   : > { %657 = vmatpush.bf16.msra.mxu2 %v1392_v33 }
  0x42   : > { %510 = vmatmul.bf16.vlgmr.msra.gmra.mxu0 %v419_v38  ;;  %765 = vmatpush.bf16.msra.mxu3 %v1408_v62 }
  0x43   : > { %819 = vmatpush.bf16.msrb.mxu0 %v1407_v34  ;;  %571 = vmatmul.bf16.vlgmr.msra.gmra.mxu1 %v420_v37 }
  0x44   : > { %899 = vmatpush.bf16.msrb.mxu1 %v1423_v36  ;;  %658 = vmatmul.bf16.vlgmr.msra.gmra.mxu2 %v600_v39 }
  0x45   : > { %981 = vmatpush.bf16.msrb.mxu2 %v1431_v35 }
  0x47   : > { %820 = vmatpush.bf16.msrb.mxu0 %v1406_v40 }
  0x48   : > { %900 = vmatpush.bf16.msrb.mxu1 %v1422_v42 }
  0x49   : > { %982 = vmatpush.bf16.msrb.mxu2 %v1430_v41 }
  0x4b   : > { %821 = vmatpush.bf16.msrb.mxu0 %v1405_v48 }
  0x4c   : > { %901 = vmatpush.bf16.msrb.mxu1 %v1421_v49 }
  0x4d   : > { %983 = vmatpush.bf16.msrb.mxu2 %v1429_v43 }
  0x4f   : > { %822 = vmatpush.bf16.msrb.mxu0 %v1404_v51 }
  0x50   : > { %902 = vmatpush.bf16.msrb.mxu1 %v1420_v52 }
  0x51   : > { %984 = vmatpush.bf16.msrb.mxu2 %v1428_v45 }
  0x53   : > { %823 = vmatpush.bf16.msrb.mxu0 %v1403_v56 }
  0x54   : > { %903 = vmatpush.bf16.msrb.mxu1 %v1419_v57 }
  0x55   : > { %985 = vmatpush.bf16.msrb.mxu2 %v1427_v47 }
  0x57   : > { %824 = vmatpush.bf16.msrb.mxu0 %v1402_v60 }
  0x58   : > { %904 = vmatpush.bf16.msrb.mxu1 %v1418_v61 }
  0x59   : > { %986 = vmatpush.bf16.msrb.mxu2 %v1426_v53 }
  0x5b   : > { %825 = vmatpush.bf16.msrb.mxu0 %v1401_v0 }
  0x5c   : > { %905 = vmatpush.bf16.msrb.mxu1 %v1417_v1 }
  0x5d   : > { %987 = vmatpush.bf16.msrb.mxu2 %v1425_v55 }
  0x5f   : > { %826 = vmatpush.bf16.msrb.mxu0 %v1400_v2 }
  0x60   : > { %906 = vmatpush.bf16.msrb.mxu1 %v1416_v3 }
  0x61   : > { %988 = vmatpush.bf16.msrb.mxu2 %v1424_v59 }
  0x64   : > { %989 = vmatmul.bf16.vlgmr.msrb.gmra.mxu2 %v419_v38 }
  0xbf   : > { %v511_v4 = vpop.f32.mrf.mxu0 }
  0xc0   : > { %v572_v5 = vpop.f32.mrf.mxu1 }
  0xc1   : > { %v573_v6 = vadd.f32 %v572_v5, %v511_v4 }
  0xc7   : > { %v659_v8 = vpop.f32.mrf.mxu2  ;;  %v513_v10 = vpop.f32.mrf.mxu0 }
  0xc8   : > { %v663_v9 = vadd.f32 %v659_v8, %v573_v6  ;;  %v574_v11 = vpop.f32.mrf.mxu1 }
  0xca   : > { %v668_v12 = vadd.f32 %v1504_v7, %v663_v9 }
  0xcc   : > { %v669_v13 = vmax.f32 %v668_v12, 0.0 }
  0xce   : > { %672 = vst [vmem:[#allocation2 + $0x1] sm:$0xff] %v669_v13  ;;  %v692_v14 = vpack.c.bf16 %v669_v13, %v669_v13 }
  0xcf   : > { %v661_v15 = vpop.f32.mrf.mxu2 }
  0xd0   : > { %766 = vmatmul.bf16.vlgmr.msra.gmra.mxu3 %v692_v14 }
  0xd5   : > { %v673_v16 = vld [vmem:[#allocation2] sm:$0xff] }
  0xd6   : > { %v832_v17 = vld [vmem:[#allocation2 + $0x2] sm:$0xff]  ;;  %v674_v18 = vpack.c.bf16 %v673_v16, %v673_v16 }
  0xd7   : > { %v833_v19 = vpack.c.bf16 %v832_v17, %v832_v17 }
  0xd8   : > { %827 = vmatmul.bf16.vlgmr.msrb.gmra.mxu0 %v674_v18 }
  0xd9   : > { %907 = vmatmul.bf16.vlgmr.msrb.gmra.mxu1 %v833_v19 }
  0xe7   : > { %v990_v20 = vpop.f32.mrf.mxu2 }
  0xe8   : > { %v991_v28 = vadd.f32 %v1505_v23, %v990_v20 }
  0xef   : > { %v992_v21 = vpop.f32.mrf.mxu2 }
 0x153   : > { %v767_v22 = vpop.f32.mrf.mxu3 }
 0x155   : > { %v828_v24 = vpop.f32.mrf.mxu0 }
 0x156   : > { %v908_v25 = vpop.f32.mrf.mxu1  ;;  %v829_v26 = vadd.f32 %v828_v24, %v767_v22 }
 0x158   : > { %v912_v29 = vadd.f32 %v908_v25, %v829_v26 }
 0x15a   : > { %v998_v30 = vadd.f32 %v1506_v27, %v912_v29 }
 0x15b   : > { %v769_v31 = vpop.f32.mrf.mxu3 }
 0x15c   : > { %v999_v32 = vadd.f32 %v998_v30, %v991_v28 }
 0x15d   : > { %v830_v33 = vpop.f32.mrf.mxu0 }
 0x15e   : > { %v910_v34 = vpop.f32.mrf.mxu1  ;;  %v1000_v35 = vmax.f32 %v999_v32, 0.0 }
 0x160   : > { %v1001_v36 = vpack.c.bf16 %v1000_v35, %v1000_v35 }
 0x162   : > { %1002 = vst [vmem:[%s414_s30] sm:$0xf] %v1001_v36 }
 0x163 PF: > { %s22_s27 = sadd.s32 1, %s1709_s27  }
 0x164   : > { %p19_p7 = scmp.ge.s32.totalorder %s22_s27, 4  }
 0x166   :  { %21 = sbr.rel (!%p19_p7) target bundleno = 4 (0x4), region = 114 }
 0x16b   :  { %1022 = vsyncpa [#allocation4], 1 }
 0x16c   :  { %1024 = vsyncpa [#allocation4 + $0x1], 1 }
 0x16d   :  { %1025 = vsyncpa [#allocation6], 1 }
 0x16e   :  { %1026 = vsyncpa [#allocation9], 1 }
 0x16f   :  { %1027 = vsyncpa [#allocation12], 1 }

// kernel: encoder_forward.8
= control target key start
LH: loop header
LB: loop body
LE: loop exit
PB: predicated region body
PF: predicated region fallthrough
CT: control target
= control target key end

     0   :  { %13 = vsyncpa [#allocation4], 0  ;;  %s3130_s0 = inlined_call_operand.vmem [shape: bf16[2,5,128], index: 0, kind: input, shape index: {}]   ;;  %s3131_s1 = inlined_call_operand.vmem [shape: bf16[2,4,128], index: 1, kind: input, shape index: {}]   ;;  %s3132_s2 = inlined_call_operand.hbm [shape: bf16[3,128,256], index: 2, kind: input, shape index: {}]   ;;  %s3133_s3 = inlined_call_operand.hbm [shape: f32[1,256], index: 3, kind: input, shape index: {}]   ;;  %s3134_s4 = inlined_call_operand.hbm [shape: bf16[3,256,256], index: 4, kind: input, shape index: {}]   ;;  %s3135_s5 = inlined_call_operand.hbm [shape: f32[1,256], index: 5, kind: input, shape index: {}]   ;;  %s3136_s6 = inlined_call_operand.hbm [shape: bf16[1,128,256], index: 6, kind: input, shape index: {}]   ;;  %s3137_s7 = inlined_call_operand.hbm [shape: f32[1,256], index: 7, kind: input, shape index: {}]   ;;  %s3138_s8 = inlined_call_operand.vmem [shape: bf16[2,4,256], index: 8, kind: output, shape index: {}]  }
   0x1   :  { %14 = vsyncpa [#allocation6], 0 }
   0x2   :  { %15 = vsyncpa [#allocation9], 0 }
   0x3   :  { %16 = vsyncpa [#allocation12], 0  ;;  %s3017_s27 = smov 0  }
   0x4 LB: > { %s257_s30 = sshll.u32 %s3133_s3, 4  ;;  %s3026_s9 = sadd.s32 4294967295, %s2961_s27   ;;  %s2961_s27 = sphi %s3017_s27, %s22_s27   ;;  %s258_s30 = int_to_ptr.hbm [resolvable:$true] %s257_s30 }
   0x5   : > { %p1864_p0 = scmp.ge.s32.totalorder %s2961_s27, 1  ;;  %p231_p1 = scmp.lt.s32.totalorder %s2961_s27, 3 }
   0x6   : > { %p2729_p2 = scmp.eq.s32.totalorder %s3026_s9, 0  ;;  %s2963_s11 = smov [#allocation5]  }
   0x7   : > { %p3031_p3 = pnand %p1864_p0, %p231_p1  ;;  %s259_s12 = sshll.u32 %s2963_s11, 4  ;;  %s260_s12 = int_to_ptr.vmem [resolvable:$true] %s259_s12 }
   0x8   : > { %s283_s15 = sshll.u32 %s3135_s5, 4  ;;  %s242_s18 = sshll.u32 %s3132_s2, 4  ;;  %s284_s15 = int_to_ptr.hbm [resolvable:$true] %s283_s15  ;;  %s243_s18 = int_to_ptr.hbm [resolvable:$true] %s242_s18 }
   0x9   : > { %p2710_p4 = pneg %p3031_p3  ;;  %s2964_s20 = smov [#allocation8]  }
   0xa   : > { %s285_s21 = sshll.u32 %s2964_s20, 4  ;;  %s2965_s22 = smov [#allocation3]   ;;  %s286_s21 = int_to_ptr.vmem [resolvable:$true] %s285_s21 }
   0xb   : > { %p3045_p5 = pnand %p2729_p2, %p2710_p4  ;;  %s244_s23 = sshll.u32 %s2965_s22, 4  ;;  %s245_s23 = int_to_ptr.vmem [resolvable:$true] %s244_s23 }
   0xc   : > { %s2966_s24 = smov 128   ;;  %s2967_s25 = smov 8  }
   0xd   : > { %2716 = dma.hbm_to_vmem [thread:$0]  (!%p3045_p5), %s258_s30, 32, %s260_s12, [#allocation6]  }
   0xe   : > { %2722 = dma.hbm_to_vmem [thread:$0]  (!%p3045_p5), %s284_s15, 32, %s286_s21, [#allocation9]  }
   0xf   : > { %2713 = dma.hbm_to_vmem [thread:$0]  (!%p3045_p5), %s243_s18, 6144, %s245_s23, [#allocation4], %s2966_s24, %s2966_s24, %s2967_s25  }
  0x10   : > { %s268_s29 = sshll.u32 %s3134_s4, 4  ;;  %s2968_s11 = smov [#allocation7]   ;;  %s269_s29 = int_to_ptr.hbm [resolvable:$true] %s268_s29 }
  0x11   : > { %s270_s13 = sshll.u32 %s2968_s11, 4  ;;  %s294_s14 = sshll.u32 %s3136_s6, 4  ;;  %s271_s13 = int_to_ptr.vmem [resolvable:$true] %s270_s13  ;;  %s295_s14 = int_to_ptr.hbm [resolvable:$true] %s294_s14 }
  0x12   : > { %2719 = dma.hbm_to_vmem [thread:$0]  (!%p3045_p5), %s269_s29, 12288, %s271_s13, [#allocation6], %s2966_s24, %s2966_s24, %s2967_s25  }
  0x13   : > { %s2969_s15 = smov [#allocation10]   ;;  %s309_s20 = sshll.u32 %s3137_s7, 4  ;;  %s310_s20 = int_to_ptr.hbm [resolvable:$true] %s309_s20 }
  0x14   : > { %s296_s16 = sshll.u32 %s2969_s15, 4  ;;  %s2970_s21 = smov [#allocation11]   ;;  %s297_s16 = int_to_ptr.vmem [resolvable:$true] %s296_s16 }
  0x15   : > { %2725 = dma.hbm_to_vmem [thread:$0]  (!%p3045_p5), %s295_s14, 2048, %s297_s16, [#allocation9], %s2966_s24, %s2966_s24, %s2967_s25  }
  0x16   : > { %s311_s22 = sshll.u32 %s2970_s21, 4  ;;  %338 = sbr.rel (%p3031_p3) target bundleno = 459 (0x1cb), region = 52  ;;  %s312_s22 = int_to_ptr.vmem [resolvable:$true] %s311_s22 }
  0x17   : > { %2728 = dma.hbm_to_vmem [thread:$0]  (!%p3045_p5), %s310_s20, 32, %s312_s22, [#allocation12]  }
  0x1b   : > { %2944 = dma.done.wait (%p2729_p2), [#allocation4], 6144  }
  0x1c   : > { %2946 = vsyncadd (%p2729_p2), [#allocation4], 4294961152 }
  0x1d   : > { %2948 = dma.done.wait (%p2729_p2), [#allocation6], 12320  }
  0x1e   : > { %2950 = vsyncadd (%p2729_p2), [#allocation6], 4294954976 }
  0x1f   : > { %2952 = dma.done.wait (%p2729_p2), [#allocation9], 2080  }
  0x20   : > { %2954 = vsyncadd (%p2729_p2), [#allocation9], 4294965216 }
  0x21   : > { %2956 = dma.done.wait (%p2729_p2), [#allocation12], 32  }
  0x22   : > { %2958 = vsyncadd (%p2729_p2), [#allocation12], 4294967264  ;;  %v1941_v0 = vld [vmem:[#allocation3 + $0xf0] sm:$0xf]  ;;  %v2557_v1 = vld [vmem:[#allocation3 + $0xf4] sm:$0xf0] }
  0x23   : > { %v2556_v2 = vld [vmem:[#allocation3 + $0xf4] sm:$0xf]  ;;  %v1942_v3 = vor.u32 %v2557_v1, %v1941_v0  ;;  %v1943_v4 = vld [vmem:[#allocation3 + $0xf8] sm:$0xf0]  ;;  %v1933_v5 = vld [vmem:[#allocation3 + $0xe0] sm:$0xf] }
  0x24   : > { %v2555_v6 = vld [vmem:[#allocation3 + $0xe4] sm:$0xf0]  ;;  %v1946_v7 = vor.u32 %v2556_v2, %v1943_v4  ;;  %v2554_v8 = vld [vmem:[#allocation3 + $0xe4] sm:$0xf]  ;;  %v1935_v9 = vld [vmem:[#allocation3 + $0xe8] sm:$0xf0] }
  0x25   : > { %v2005_v10 = vld [vmem:[#allocation3 + $0x70] sm:$0xf]  ;;  %531 = vmatpush.bf16.msra.mxu0 %v1942_v3  ;;  %v1934_v11 = vor.u32 %v2555_v6, %v1933_v5  ;;  %v2541_v12 = vld [vmem:[#allocation3 + $0x74] sm:$0xf0]  ;;  %v2540_v13 = vld [vmem:[#allocation3 + $0x74] sm:$0xf]  ;;  %v1938_v15 = vor.u32 %v2554_v8, %v1935_v9 }
  0x26   : > { %v2007_v14 = vld [vmem:[#allocation3 + $0x78] sm:$0xf0]  ;;  %544 = vmatpush.bf16.msra.mxu1 %v1946_v7  ;;  %v2006_v16 = vor.u32 %v2541_v12, %v2005_v10  ;;  %v1925_v18 = vld [vmem:[#allocation3 + $0xd0] sm:$0xf]  ;;  %v2553_v19 = vld [vmem:[#allocation3 + $0xd4] sm:$0xf0] }
  0x27   : > { %v2010_v17 = vor.u32 %v2540_v13, %v2007_v14  ;;  %v2552_v20 = vld [vmem:[#allocation3 + $0xd4] sm:$0xf]  ;;  %v1927_v21 = vld [vmem:[#allocation3 + $0xd8] sm:$0xf0]  ;;  %v1997_v22 = vld [vmem:[#allocation3 + $0x60] sm:$0xf]  ;;  %v1926_v27 = vor.u32 %v2553_v19, %v1925_v18 }
  0x28   : > { %v2539_v23 = vld [vmem:[#allocation3 + $0x64] sm:$0xf0]  ;;  %637 = vmatpush.bf16.msra.mxu2 %v2006_v16  ;;  %v2538_v25 = vld [vmem:[#allocation3 + $0x64] sm:$0xf]  ;;  %v1999_v26 = vld [vmem:[#allocation3 + $0x68] sm:$0xf0]  ;;  %v1930_v31 = vor.u32 %v2552_v20, %v1927_v21 }
  0x29   : > { %650 = vmatpush.bf16.msra.mxu3 %v2010_v17  ;;  %v1998_v24 = vor.u32 %v2539_v23, %v1997_v22  ;;  %532 = vmatpush.bf16.msra.mxu0 %v1934_v11  ;;  %v2002_v28 = vor.u32 %v2538_v25, %v1999_v26  ;;  %v1917_v29 = vld [vmem:[#allocation3 + $0xc0] sm:$0xf]  ;;  %v2551_v30 = vld [vmem:[#allocation3 + $0xc4] sm:$0xf0]  ;;  %v1989_v32 = vld [vmem:[#allocation3 + $0x50] sm:$0xf] }
  0x2a   : > { %545 = vmatpush.bf16.msra.mxu1 %v1938_v15  ;;  %v2537_v33 = vld [vmem:[#allocation3 + $0x54] sm:$0xf0]  ;;  %v2536_v34 = vld [vmem:[#allocation3 + $0x54] sm:$0xf]  ;;  %v2550_v35 = vld [vmem:[#allocation3 + $0xc4] sm:$0xf]  ;;  %v1918_v41 = vor.u32 %v2551_v30, %v1917_v29 }
  0x2b   : > { %v1919_v36 = vld [vmem:[#allocation3 + $0xc8] sm:$0xf0]  ;;  %v1991_v37 = vld [vmem:[#allocation3 + $0x58] sm:$0xf0]  ;;  %v1990_v38 = vor.u32 %v2537_v33, %v1989_v32  ;;  %v1981_v40 = vld [vmem:[#allocation3 + $0x40] sm:$0xf] }
  0x2c   : > { %638 = vmatpush.bf16.msra.mxu2 %v1998_v24  ;;  %v1994_v39 = vor.u32 %v2536_v34, %v1991_v37  ;;  %v2535_v42 = vld [vmem:[#allocation3 + $0x44] sm:$0xf0]  ;;  %v2534_v43 = vld [vmem:[#allocation3 + $0x44] sm:$0xf]  ;;  %v1983_v44 = vld [vmem:[#allocation3 + $0x48] sm:$0xf0]  ;;  %v1922_v45 = vor.u32 %v2550_v35, %v1919_v36 }
  0x2d   : > { %651 = vmatpush.bf16.msra.mxu3 %v2002_v28  ;;  %533 = vmatpush.bf16.msra.mxu0 %v1926_v27  ;;  %v1909_v46 = vld [vmem:[#allocation3 + $0xb0] sm:$0xf]  ;;  %v2549_v47 = vld [vmem:[#allocation3 + $0xb4] sm:$0xf0]  ;;  %p401_p6 = scmp.lt.s32.totalorder %s3026_s9, 1  ;;  %v1982_v50 = vor.u32 %v2535_v42, %v1981_v40  ;;  %v1986_v51 = vor.u32 %v2534_v43, %v1983_v44  ;;  %vm1729_vm0 = vcmask 1041408  }
  0x2e   : > { %546 = vmatpush.bf16.msra.mxu1 %v1930_v31  ;;  %v2548_v48 = vld [vmem:[#allocation3 + $0xb4] sm:$0xf]  ;;  %v1911_v49 = vld [vmem:[#allocation3 + $0xb8] sm:$0xf0]  ;;  %v1973_v52 = vld [vmem:[#allocation3 + $0x30] sm:$0xf]  ;;  %v1910_v53 = vor.u32 %v2549_v47, %v1909_v46 }
  0x2f   : > { %v2533_v54 = vld [vmem:[#allocation3 + $0x34] sm:$0xf0]  ;;  %v2532_v55 = vld [vmem:[#allocation3 + $0x34] sm:$0xf]  ;;  %v1975_v56 = vld [vmem:[#allocation3 + $0x38] sm:$0xf0]  ;;  %v1914_v57 = vor.u32 %v2548_v48, %v1911_v49 }
  0x30   : > { %639 = vmatpush.bf16.msra.mxu2 %v1990_v38  ;;  %v1901_v58 = vld [vmem:[#allocation3 + $0xa0] sm:$0xf]  ;;  %v2547_v59 = vld [vmem:[#allocation3 + $0xa4] sm:$0xf0]  ;;  %s3142_s9 = smov (!%p401_p6, %s3026_s9), 1  ;;  %v1974_v62 = vor.u32 %v2533_v54, %v1973_v52  ;;  %v1978_v63 = vor.u32 %v2532_v55, %v1975_v56 }
  0x31   : > { %652 = vmatpush.bf16.msra.mxu3 %v1994_v39  ;;  %534 = vmatpush.bf16.msra.mxu0 %v1918_v41  ;;  %v2546_v60 = vld [vmem:[#allocation3 + $0xa4] sm:$0xf]  ;;  %v1903_v61 = vld [vmem:[#allocation3 + $0xa8] sm:$0xf0]  ;;  %v1965_v0 = vld [vmem:[#allocation3 + $0x20] sm:$0xf]  ;;  %v1902_v1 = vor.u32 %v2547_v59, %v1901_v58 }
  0x32   : > { %547 = vmatpush.bf16.msra.mxu1 %v1922_v45  ;;  %v2531_v2 = vld [vmem:[#allocation3 + $0x24] sm:$0xf0]  ;;  %v2530_v3 = vld [vmem:[#allocation3 + $0x24] sm:$0xf]  ;;  %v1967_v4 = vld [vmem:[#allocation3 + $0x28] sm:$0xf0]  ;;  %v1906_v5 = vor.u32 %v2546_v60, %v1903_v61 }
  0x33   : > { %v1893_v6 = vld [vmem:[#allocation3 + $0x90] sm:$0xf]  ;;  %v2545_v7 = vld [vmem:[#allocation3 + $0x94] sm:$0xf0]  ;;  %s1879_s10 = sshll.u32 %s3142_s9, 2  ;;  %v1966_v10 = vor.u32 %v2531_v2, %v1965_v0  ;;  %v1970_v11 = vor.u32 %v2530_v3, %v1967_v4  ;;  %s1880_s19 = sshll.u32 %s3142_s9, 1 }
  0x34   : > { %640 = vmatpush.bf16.msra.mxu2 %v1982_v50  ;;  %v2544_v8 = vld [vmem:[#allocation3 + $0x94] sm:$0xf]  ;;  %v1895_v9 = vld [vmem:[#allocation3 + $0x98] sm:$0xf0]  ;;  %v1885_v12 = vld [vmem:[#allocation3 + $0x80] sm:$0xf]  ;;  %v1894_v14 = vor.u32 %v2545_v7, %v1893_v6  ;;  %s404_s25 = scalar_lea.vmem %s3130_s0, %s1879_s10  ;;  %s3106_s29 = scalar_lea.vmem %s3131_s1, %s1880_s19 }
  0x35   : > { %653 = vmatpush.bf16.msra.mxu3 %v1986_v51  ;;  %535 = vmatpush.bf16.msra.mxu0 %v1910_v53  ;;  %v1957_v13 = vld [vmem:[#allocation3 + $0x10] sm:$0xf]  ;;  %v2529_v15 = vld [vmem:[#allocation3 + $0x14] sm:$0xf0]  ;;  %v2528_v16 = vld [vmem:[#allocation3 + $0x14] sm:$0xf]  ;;  %v1898_v18 = vor.u32 %v2544_v8, %v1895_v9  ;;  %s413_s30 = scalar_lea.vmem %s3138_s8, %s1879_s10 }
  0x36   : > { %548 = vmatpush.bf16.msra.mxu1 %v1914_v57  ;;  %v1959_v17 = vld [vmem:[#allocation3 + $0x18] sm:$0xf0]  ;;  %v2543_v19 = vld [vmem:[#allocation3 + $0x84] sm:$0xf0]  ;;  %v2542_v20 = vld [vmem:[#allocation3 + $0x84] sm:$0xf]  ;;  %v1958_v26 = vor.u32 %v2529_v15, %v1957_v13 }
  0x37   : > { %v1887_v21 = vld [vmem:[#allocation3 + $0x88] sm:$0xf0]  ;;  %v2069_v22 = vld [vmem:[#allocation3 + $0x170] sm:$0xf]  ;;  %v2573_v23 = vld [vmem:[#allocation3 + $0x174] sm:$0xf0]  ;;  %v1962_v27 = vor.u32 %v2528_v16, %v1959_v17  ;;  %v1886_v30 = vor.u32 %v2543_v19, %v1885_v12 }
  0x38   : > { %641 = vmatpush.bf16.msra.mxu2 %v1974_v62  ;;  %v2572_v24 = vld [vmem:[#allocation3 + $0x174] sm:$0xf]  ;;  %v2071_v25 = vld [vmem:[#allocation3 + $0x178] sm:$0xf0]  ;;  %v1949_v28 = vld [vmem:[#allocation3] sm:$0xf]  ;;  %v1890_v34 = vor.u32 %v2542_v20, %v1887_v21  ;;  %v2070_v35 = vor.u32 %v2573_v23, %v2069_v22 }
  0x39   : > { %654 = vmatpush.bf16.msra.mxu3 %v1978_v63  ;;  %536 = vmatpush.bf16.msra.mxu0 %v1902_v1  ;;  %v414_v29 = vld [vmem:[%s404_s25] sm:$0x7]  ;;  %v2527_v31 = vld [vmem:[#allocation3 + $0x4] sm:$0xf0]  ;;  %v2526_v32 = vld [vmem:[#allocation3 + $0x4] sm:$0xf]  ;;  %v2074_v36 = vor.u32 %v2572_v24, %v2071_v25 }
  0x3a   : > { %549 = vmatpush.bf16.msra.mxu1 %v1906_v5  ;;  %v1951_v33 = vld [vmem:[#allocation3 + $0x8] sm:$0xf0]  ;;  %v2061_v37 = vld [vmem:[#allocation3 + $0x160] sm:$0xf]  ;;  %v2571_v38 = vld [vmem:[#allocation3 + $0x164] sm:$0xf0]  ;;  %v415_v39 = vunpack.c.l.bf16 %v414_v29  ;;  %v1950_v42 = vor.u32 %v2527_v31, %v1949_v28 }
  0x3b   : > { %v2570_v40 = vld [vmem:[#allocation3 + $0x164] sm:$0xf]  ;;  %v2063_v41 = vld [vmem:[#allocation3 + $0x168] sm:$0xf0]  ;;  %v1954_v43 = vor.u32 %v2526_v32, %v1951_v33  ;;  %v2062_v44 = vor.u32 %v2571_v38, %v2061_v37  ;;  %v416_v45 = vld [vmem:[%s3106_s29] sm:$0x3] }
  0x3c   : > { %642 = vmatpush.bf16.msra.mxu2 %v1966_v10  ;;  %v2053_v46 = vld [vmem:[#allocation3 + $0x150] sm:$0xf]  ;;  %v2569_v47 = vld [vmem:[#allocation3 + $0x154] sm:$0xf0]  ;;  %v2066_v48 = vor.u32 %v2570_v40, %v2063_v41  ;;  %v3109_v49 = vpack.c.bf16 %v415_v39, %v415_v39  ;;  %v2568_v53 = vld [vmem:[#allocation3 + $0x154] sm:$0xf] }
  0x3d   : > { %655 = vmatpush.bf16.msra.mxu3 %v1970_v11  ;;  %537 = vmatpush.bf16.msra.mxu0 %v1894_v14  ;;  %v2133_v50 = vld [vmem:[#allocation7 + $0x170] sm:$0xf]  ;;  %v2621_v51 = vld [vmem:[#allocation7 + $0x174] sm:$0xf0]  ;;  %v2054_v58 = vor.u32 %v2569_v47, %v2053_v46  ;;  %v2125_v59 = vld [vmem:[#allocation7 + $0x160] sm:$0xf] }
  0x3e   : > { %550 = vmatpush.bf16.msra.mxu1 %v1898_v18  ;;  %v2197_v52 = vld [vmem:[#allocation7 + $0x1f0] sm:$0xf]  ;;  %v2055_v54 = vld [vmem:[#allocation3 + $0x158] sm:$0xf0]  ;;  %v2134_v55 = vor.u32 %v2621_v51, %v2133_v50  ;;  %v2619_v60 = vld [vmem:[#allocation7 + $0x164] sm:$0xf0] }
  0x3f   : > { %v2637_v56 = vld [vmem:[#allocation7 + $0x1f4] sm:$0xf0]  ;;  %v2189_v61 = vld [vmem:[#allocation7 + $0x1e0] sm:$0xf]  ;;  %v2058_v62 = vor.u32 %v2568_v53, %v2055_v54  ;;  %v2567_v0 = vld [vmem:[#allocation3 + $0x144] sm:$0xf0]  ;;  %v2126_v1 = vor.u32 %v2619_v60, %v2125_v59 }
  0x40   : > { %643 = vmatpush.bf16.msra.mxu2 %v1958_v26  ;;  %v2198_v57 = vor.u32 %v2637_v56, %v2197_v52  ;;  %v2045_v63 = vld [vmem:[#allocation3 + $0x140] sm:$0xf]  ;;  %v2635_v2 = vld [vmem:[#allocation7 + $0x1e4] sm:$0xf0]  ;;  %v2566_v3 = vld [vmem:[#allocation3 + $0x144] sm:$0xf] }
  0x41   : > { %656 = vmatpush.bf16.msra.mxu3 %v1962_v27  ;;  %538 = vmatpush.bf16.msra.mxu0 %v1886_v30  ;;  %v2047_v4 = vld [vmem:[#allocation3 + $0x148] sm:$0xf0]  ;;  %v2117_v5 = vld [vmem:[#allocation7 + $0x150] sm:$0xf]  ;;  %v2190_v6 = vor.u32 %v2635_v2, %v2189_v61  ;;  %v2617_v7 = vld [vmem:[#allocation7 + $0x154] sm:$0xf0]  ;;  %v2046_v8 = vor.u32 %v2567_v0, %v2045_v63 }
  0x42   : > { %551 = vmatpush.bf16.msra.mxu1 %v1890_v34  ;;  %v2118_v9 = vor.u32 %v2617_v7, %v2117_v5  ;;  %v2181_v10 = vld [vmem:[#allocation7 + $0x1d0] sm:$0xf]  ;;  %v2633_v11 = vld [vmem:[#allocation7 + $0x1d4] sm:$0xf0]  ;;  %v2050_v12 = vor.u32 %v2566_v3, %v2047_v4  ;;  %v2029_v20 = vld [vmem:[#allocation3 + $0x120] sm:$0xf] }
  0x43   : > { %v2037_v13 = vld [vmem:[#allocation3 + $0x130] sm:$0xf]  ;;  %v2565_v14 = vld [vmem:[#allocation3 + $0x134] sm:$0xf0]  ;;  %v2564_v15 = vld [vmem:[#allocation3 + $0x134] sm:$0xf]  ;;  %v2182_v17 = vor.u32 %v2633_v11, %v2181_v10 }
  0x44   : > { %644 = vmatpush.bf16.msra.mxu2 %v1950_v42  ;;  %539 = vmatmul.bf16.vlgmr.msra.gmra.mxu0 %v416_v45  ;;  %v2039_v16 = vld [vmem:[#allocation3 + $0x138] sm:$0xf0]  ;;  %v2038_v18 = vor.u32 %v2565_v14, %v2037_v13  ;;  %v2563_v21 = vld [vmem:[#allocation3 + $0x124] sm:$0xf0]  ;;  %v2562_v22 = vld [vmem:[#allocation3 + $0x124] sm:$0xf] }
  0x45   : > { %768 = vmatpush.bf16.msrb.mxu0 %v2070_v35  ;;  %657 = vmatpush.bf16.msra.mxu3 %v1954_v43  ;;  %v2042_v19 = vor.u32 %v2564_v15, %v2039_v16  ;;  %v2031_v23 = vld [vmem:[#allocation3 + $0x128] sm:$0xf0]  ;;  %v2030_v24 = vor.u32 %v2563_v21, %v2029_v20  ;;  %v2021_v26 = vld [vmem:[#allocation3 + $0x110] sm:$0xf]  ;;  %v2561_v27 = vld [vmem:[#allocation3 + $0x114] sm:$0xf0] }
  0x46   : > { %781 = vmatpush.bf16.msrb.mxu1 %v2074_v36  ;;  %v2034_v25 = vor.u32 %v2562_v22, %v2031_v23  ;;  %v2560_v28 = vld [vmem:[#allocation3 + $0x114] sm:$0xf]  ;;  %v2023_v29 = vld [vmem:[#allocation3 + $0x118] sm:$0xf0]  ;;  %v683_v30 = vshll.u32 %v3109_v49, 16  ;;  %v2022_v31 = vor.u32 %v2561_v27, %v2021_v26  ;;  %v681_v39 = vshrl.u32 %v3109_v49, 16 }
  0x47   : > { %552 = vmatmul.bf16.vlgmr.msra.gmra.mxu1 %v416_v45  ;;  %645 = vmatmul.bf16.vlgmr.msra.gmra.mxu2 %v3109_v49  ;;  %v2026_v32 = vor.u32 %v2560_v28, %v2023_v29  ;;  %v2013_v33 = vld [vmem:[#allocation3 + $0x100] sm:$0xf]  ;;  %v2559_v34 = vld [vmem:[#allocation3 + $0x104] sm:$0xf0]  ;;  %v2558_v35 = vld [vmem:[#allocation3 + $0x104] sm:$0xf] }
  0x48   : > { %1065 = vmatpush.bf16.msrb.mxu2 %v2134_v55  ;;  %658 = vmatmul.bf16.vlgmr.msra.gmra.mxu3 %v3109_v49  ;;  %v2015_v36 = vld [vmem:[#allocation3 + $0x108] sm:$0xf0]  ;;  %v2620_v37 = vld [vmem:[#allocation7 + $0x174] sm:$0xf]  ;;  %v2135_v38 = vld [vmem:[#allocation7 + $0x178] sm:$0xf0]  ;;  %v2014_v43 = vor.u32 %v2559_v34, %v2013_v33 }
  0x49   : > { %769 = vmatpush.bf16.msrb.mxu0 %v2062_v44  ;;  %1078 = vmatpush.bf16.msrb.mxu3 %v2198_v57  ;;  %v685_v40 = vrot.slane %v683_v30, 1  ;;  %v2636_v41 = vld [vmem:[#allocation7 + $0x1f4] sm:$0xf]  ;;  %v2199_v42 = vld [vmem:[#allocation7 + $0x1f8] sm:$0xf0]  ;;  %v2018_v44 = vor.u32 %v2558_v35, %v2015_v36  ;;  %v2138_v45 = vor.u32 %v2620_v37, %v2135_v38 }
  0x4a   : > { %782 = vmatpush.bf16.msrb.mxu1 %v2066_v48  ;;  %v2202_v46 = vor.u32 %v2636_v41, %v2199_v42  ;;  %v2618_v47 = vld [vmem:[#allocation7 + $0x164] sm:$0xf]  ;;  %v2127_v48 = vld [vmem:[#allocation7 + $0x168] sm:$0xf0]  ;;  %v2616_v54 = vld [vmem:[#allocation7 + $0x154] sm:$0xf] }
  0x4b   : > { %v686_v50 = vor.u32 %v685_v40, %v681_v39  ;;  %v2634_v51 = vld [vmem:[#allocation7 + $0x1e4] sm:$0xf]  ;;  %v2191_v52 = vld [vmem:[#allocation7 + $0x1e8] sm:$0xf0]  ;;  %v2130_v53 = vor.u32 %v2618_v47, %v2127_v48  ;;  %v2119_v55 = vld [vmem:[#allocation7 + $0x158] sm:$0xf0] }
  0x4c   : > { %1066 = vmatpush.bf16.msrb.mxu2 %v2126_v1  ;;  %v2194_v49 = vor.u32 %v2634_v51, %v2191_v52  ;;  %v2632_v56 = vld [vmem:[#allocation7 + $0x1d4] sm:$0xf]  ;;  %v2122_v57 = vor.u32 %v2616_v54, %v2119_v55  ;;  %v2109_v59 = vld [vmem:[#allocation7 + $0x140] sm:$0xf]  ;;  %v2615_v60 = vld [vmem:[#allocation7 + $0x144] sm:$0xf0] }
  0x4d   : > { %770 = vmatpush.bf16.msrb.mxu0 %v2054_v58  ;;  %1079 = vmatpush.bf16.msrb.mxu3 %v2190_v6  ;;  %v2183_v58 = vld [vmem:[#allocation7 + $0x1d8] sm:$0xf0]  ;;  %v2173_v63 = vld [vmem:[#allocation7 + $0x1c0] sm:$0xf]  ;;  %v2631_v0 = vld [vmem:[#allocation7 + $0x1c4] sm:$0xf0] }
  0x4e   : > { %783 = vmatpush.bf16.msrb.mxu1 %v2058_v62  ;;  %v2186_v61 = vor.u32 %v2632_v56, %v2183_v58  ;;  %v2110_v62 = vor.u32 %v2615_v60, %v2109_v59  ;;  %v2614_v1 = vld [vmem:[#allocation7 + $0x144] sm:$0xf]  ;;  %v2174_v2 = vor.u32 %v2631_v0, %v2173_v63  ;;  %v2111_v3 = vld [vmem:[#allocation7 + $0x148] sm:$0xf0]  ;;  %v2165_v10 = vld [vmem:[#allocation7 + $0x1b0] sm:$0xf] }
  0x4f   : > { %v2630_v4 = vld [vmem:[#allocation7 + $0x1c4] sm:$0xf]  ;;  %v2175_v5 = vld [vmem:[#allocation7 + $0x1c8] sm:$0xf0]  ;;  %v2114_v6 = vor.u32 %v2614_v1, %v2111_v3  ;;  %v2612_v14 = vld [vmem:[#allocation7 + $0x134] sm:$0xf] }
  0x50   : > { %1067 = vmatpush.bf16.msrb.mxu2 %v2118_v9  ;;  %v2178_v7 = vor.u32 %v2630_v4, %v2175_v5  ;;  %v2613_v9 = vld [vmem:[#allocation7 + $0x134] sm:$0xf0]  ;;  %v2103_v15 = vld [vmem:[#allocation7 + $0x138] sm:$0xf0]  ;;  %v2628_v16 = vld [vmem:[#allocation7 + $0x1b4] sm:$0xf] }
  0x51   : > { %771 = vmatpush.bf16.msrb.mxu0 %v2046_v8  ;;  %1080 = vmatpush.bf16.msrb.mxu3 %v2182_v17  ;;  %v2101_v8 = vld [vmem:[#allocation7 + $0x130] sm:$0xf]  ;;  %v2106_v17 = vor.u32 %v2612_v14, %v2103_v15  ;;  %v2611_v20 = vld [vmem:[#allocation7 + $0x124] sm:$0xf0]  ;;  %v2157_v23 = vld [vmem:[#allocation7 + $0x1a0] sm:$0xf] }
  0x52   : > { %784 = vmatpush.bf16.msrb.mxu1 %v2050_v12  ;;  %v2102_v11 = vor.u32 %v2613_v9, %v2101_v8  ;;  %v2629_v12 = vld [vmem:[#allocation7 + $0x1b4] sm:$0xf0]  ;;  %v2095_v27 = vld [vmem:[#allocation7 + $0x128] sm:$0xf0]  ;;  %v2626_v28 = vld [vmem:[#allocation7 + $0x1a4] sm:$0xf] }
  0x53   : > { %v2166_v13 = vor.u32 %v2629_v12, %v2165_v10  ;;  %v2159_v29 = vld [vmem:[#allocation7 + $0x1a8] sm:$0xf0]  ;;  %v2609_v33 = vld [vmem:[#allocation7 + $0x114] sm:$0xf0]  ;;  %v2149_v34 = vld [vmem:[#allocation7 + $0x190] sm:$0xf] }
  0x54   : > { %1068 = vmatpush.bf16.msrb.mxu2 %v2110_v62  ;;  %v2625_v36 = vld [vmem:[#allocation7 + $0x194] sm:$0xf0]  ;;  %v2608_v37 = vld [vmem:[#allocation7 + $0x114] sm:$0xf]  ;;  %v2087_v38 = vld [vmem:[#allocation7 + $0x118] sm:$0xf0] }
  0x55   : > { %772 = vmatpush.bf16.msrb.mxu0 %v2038_v18  ;;  %1081 = vmatpush.bf16.msrb.mxu3 %v2174_v2  ;;  %v2167_v18 = vld [vmem:[#allocation7 + $0x1b8] sm:$0xf0]  ;;  %v2150_v39 = vor.u32 %v2625_v36, %v2149_v34  ;;  %v2624_v40 = vld [vmem:[#allocation7 + $0x194] sm:$0xf]  ;;  %v2077_v42 = vld [vmem:[#allocation7 + $0x100] sm:$0xf] }
  0x56   : > { %785 = vmatpush.bf16.msrb.mxu1 %v2042_v19  ;;  %v2093_v19 = vld [vmem:[#allocation7 + $0x120] sm:$0xf]  ;;  %v2170_v21 = vor.u32 %v2628_v16, %v2167_v18  ;;  %v2151_v41 = vld [vmem:[#allocation7 + $0x198] sm:$0xf0]  ;;  %v2079_v51 = vld [vmem:[#allocation7 + $0x108] sm:$0xf0] }
  0x57   : > { %v2094_v22 = vor.u32 %v2611_v20, %v2093_v19  ;;  %v2154_v47 = vor.u32 %v2624_v40, %v2151_v41  ;;  %v2622_v52 = vld [vmem:[#allocation7 + $0x184] sm:$0xf]  ;;  %v2261_v54 = vld [vmem:[#allocation7 + $0x70] sm:$0xf]  ;;  %v2589_v55 = vld [vmem:[#allocation7 + $0x74] sm:$0xf0] }
  0x58   : > { %1069 = vmatpush.bf16.msrb.mxu2 %v2102_v11  ;;  %v2262_v56 = vor.u32 %v2589_v55, %v2261_v54  ;;  %v2605_v58 = vld [vmem:[#allocation7 + $0xf4] sm:$0xf0]  ;;  %v2588_v59 = vld [vmem:[#allocation7 + $0x74] sm:$0xf]  ;;  %v2263_v62 = vld [vmem:[#allocation7 + $0x78] sm:$0xf0] }
  0x59   : > { %773 = vmatpush.bf16.msrb.mxu0 %v2030_v24  ;;  %1082 = vmatpush.bf16.msrb.mxu3 %v2166_v13  ;;  %v2627_v24 = vld [vmem:[#allocation7 + $0x1a4] sm:$0xf0]  ;;  %v2604_v63 = vld [vmem:[#allocation7 + $0xf4] sm:$0xf]  ;;  %v2327_v0 = vld [vmem:[#allocation7 + $0xf8] sm:$0xf0]  ;;  %v2266_v2 = vor.u32 %v2588_v59, %v2263_v62 }
  0x5a   : > { %786 = vmatpush.bf16.msrb.mxu1 %v2034_v25  ;;  %v2610_v25 = vld [vmem:[#allocation7 + $0x124] sm:$0xf]  ;;  %v2158_v26 = vor.u32 %v2627_v24, %v2157_v23  ;;  %v2330_v3 = vor.u32 %v2604_v63, %v2327_v0  ;;  %v2253_v4 = vld [vmem:[#allocation7 + $0x60] sm:$0xf]  ;;  %v2587_v5 = vld [vmem:[#allocation7 + $0x64] sm:$0xf0] }
  0x5b   : > { %v2098_v30 = vor.u32 %v2610_v25, %v2095_v27  ;;  %v2603_v8 = vld [vmem:[#allocation7 + $0xe4] sm:$0xf0]  ;;  %v2586_v9 = vld [vmem:[#allocation7 + $0x64] sm:$0xf]  ;;  %v2255_v10 = vld [vmem:[#allocation7 + $0x68] sm:$0xf0] }
  0x5c   : > { %1070 = vmatpush.bf16.msrb.mxu2 %v2094_v22  ;;  %v2258_v12 = vor.u32 %v2586_v9, %v2255_v10  ;;  %v2602_v13 = vld [vmem:[#allocation7 + $0xe4] sm:$0xf]  ;;  %v2319_v14 = vld [vmem:[#allocation7 + $0xe8] sm:$0xf0]  ;;  %v2245_v16 = vld [vmem:[#allocation7 + $0x50] sm:$0xf] }
  0x5d   : > { %774 = vmatpush.bf16.msrb.mxu0 %v2022_v31  ;;  %v2162_v31 = vor.u32 %v2626_v28, %v2159_v29  ;;  %1083 = vmatpush.bf16.msrb.mxu3 %v2158_v26  ;;  %v2322_v15 = vor.u32 %v2602_v13, %v2319_v14  ;;  %v2309_v19 = vld [vmem:[#allocation7 + $0xd0] sm:$0xf]  ;;  %v2601_v20 = vld [vmem:[#allocation7 + $0xd4] sm:$0xf0]  ;;  %v2247_v25 = vld [vmem:[#allocation7 + $0x58] sm:$0xf0] }
  0x5e   : > { %787 = vmatpush.bf16.msrb.mxu1 %v2026_v32  ;;  %v2085_v32 = vld [vmem:[#allocation7 + $0x110] sm:$0xf]  ;;  %v2310_v24 = vor.u32 %v2601_v20, %v2309_v19  ;;  %v2600_v26 = vld [vmem:[#allocation7 + $0xd4] sm:$0xf]  ;;  %v2311_v27 = vld [vmem:[#allocation7 + $0xd8] sm:$0xf0] }
  0x5f   : > { %v2086_v35 = vor.u32 %v2609_v33, %v2085_v32  ;;  %v2314_v29 = vor.u32 %v2600_v26, %v2311_v27  ;;  %v2583_v32 = vld [vmem:[#allocation7 + $0x44] sm:$0xf0]  ;;  %v2301_v34 = vld [vmem:[#allocation7 + $0xc0] sm:$0xf]  ;;  %v2303_v41 = vld [vmem:[#allocation7 + $0xc8] sm:$0xf0] }
  0x60   : > { %v2596_v54 = vld [vmem:[#allocation7 + $0xb4] sm:$0xf]  ;;  %v2295_v55 = vld [vmem:[#allocation7 + $0xb8] sm:$0xf0]  ;;  %v2595_v62 = vld [vmem:[#allocation7 + $0xa4] sm:$0xf0] }
  0x61   : > { %775 = vmatpush.bf16.msrb.mxu0 %v2014_v43  ;;  %v2090_v43 = vor.u32 %v2608_v37, %v2087_v38  ;;  %1071 = vmatpush.bf16.msrb.mxu2 %v2086_v35  ;;  %v2599_v35 = vld [vmem:[#allocation7 + $0xc4] sm:$0xf0]  ;;  %v2582_v37 = vld [vmem:[#allocation7 + $0x44] sm:$0xf]  ;;  %v2239_v38 = vld [vmem:[#allocation7 + $0x48] sm:$0xf0]  ;;  %v2298_v59 = vor.u32 %v2596_v54, %v2295_v55 }
  0x62   : > { %788 = vmatpush.bf16.msrb.mxu1 %v2018_v44  ;;  %v2607_v44 = vld [vmem:[#allocation7 + $0x104] sm:$0xf0]  ;;  %1084 = vmatpush.bf16.msrb.mxu3 %v2150_v39  ;;  %v2302_v36 = vor.u32 %v2599_v35, %v2301_v34  ;;  %v2598_v39 = vld [vmem:[#allocation7 + $0xc4] sm:$0xf]  ;;  %v2242_v40 = vor.u32 %v2582_v37, %v2239_v38  ;;  %v2277_v9 = vld [vmem:[#allocation7 + $0x90] sm:$0xf] }
  0x63   : > { %v2078_v48 = vor.u32 %v2607_v44, %v2077_v42  ;;  %v2306_v42 = vor.u32 %v2598_v39, %v2303_v41  ;;  %v2581_v44 = vld [vmem:[#allocation7 + $0x34] sm:$0xf0]  ;;  %v2215_v13 = vld [vmem:[#allocation7 + $0x18] sm:$0xf0]  ;;  %v2592_v14 = vld [vmem:[#allocation7 + $0x94] sm:$0xf] }
  0x64   : > { %776 = vmatmul.bf16.vlgmr.msrb.gmra.mxu0 %v686_v50  ;;  %v2593_v10 = vld [vmem:[#allocation7 + $0x94] sm:$0xf0]  ;;  %v2269_v20 = vld [vmem:[#allocation7 + $0x80] sm:$0xf]  ;;  %v796_v35 = vld [vmem:[#allocation5] sm:$0x3] }
  0x65   : > { %1091 = vmatpush.bf16.msra.mxu0 %v2138_v45  ;;  %789 = vmatmul.bf16.vlgmr.msrb.gmra.mxu1 %v686_v50  ;;  %v2141_v45 = vld [vmem:[#allocation7 + $0x180] sm:$0xf]  ;;  %v2606_v50 = vld [vmem:[#allocation7 + $0x104] sm:$0xf]  ;;  %v798_v37 = vperm.slane %v796_v35, 0 }
  0x66   : > { %1104 = vmatpush.bf16.msra.mxu1 %v2202_v46  ;;  %v2623_v46 = vld [vmem:[#allocation7 + $0x184] sm:$0xf0]  ;;  %v2082_v60 = vor.u32 %v2606_v50, %v2079_v51  ;;  %1072 = vmatpush.bf16.msrb.mxu2 %v2078_v48  ;;  %v2580_v48 = vld [vmem:[#allocation7 + $0x34] sm:$0xf]  ;;  %v2231_v50 = vld [vmem:[#allocation7 + $0x38] sm:$0xf0] }
  0x67   : > { %v2653_v55 = vld [vmem:[#allocation7 + $0x274] sm:$0xf0] }
  0x69   : > { %1092 = vmatpush.bf16.msra.mxu0 %v2130_v53  ;;  %v2142_v53 = vor.u32 %v2623_v46, %v2141_v45  ;;  %v2293_v45 = vld [vmem:[#allocation7 + $0xb0] sm:$0xf] }
  0x6a   : > { %1105 = vmatpush.bf16.msra.mxu1 %v2194_v49  ;;  %v2143_v49 = vld [vmem:[#allocation7 + $0x188] sm:$0xf0]  ;;  %1277 = vmatpush.bf16.msra.mxu2 %v2262_v56  ;;  %v2221_v56 = vld [vmem:[#allocation7 + $0x20] sm:$0xf] }
  0x6b   : > { %v2146_v1 = vor.u32 %v2622_v52, %v2143_v49  ;;  %1085 = vmatpush.bf16.msrb.mxu3 %v2142_v53  ;;  %v2234_v49 = vor.u32 %v2580_v48, %v2231_v50 }
  0x6d   : > { %1093 = vmatpush.bf16.msra.mxu0 %v2122_v57  ;;  %v2325_v57 = vld [vmem:[#allocation7 + $0xf0] sm:$0xf] }
  0x6e   : > { %1106 = vmatpush.bf16.msra.mxu1 %v2186_v61  ;;  %v2326_v61 = vor.u32 %v2605_v58, %v2325_v57 }
  0x70   : > { %1290 = vmatpush.bf16.msra.mxu3 %v2326_v61  ;;  %v2285_v61 = vld [vmem:[#allocation7 + $0xa0] sm:$0xf] }
  0x71   : > { %1094 = vmatpush.bf16.msra.mxu0 %v2114_v6  ;;  %v2317_v6 = vld [vmem:[#allocation7 + $0xe0] sm:$0xf]  ;;  %v2286_v0 = vor.u32 %v2595_v62, %v2285_v61  ;;  %v2391_v61 = vld [vmem:[#allocation7 + $0x278] sm:$0xf0] }
  0x72   : > { %1107 = vmatpush.bf16.msra.mxu1 %v2178_v7  ;;  %v2254_v7 = vor.u32 %v2587_v5, %v2253_v4  ;;  %v2318_v11 = vor.u32 %v2603_v8, %v2317_v6  ;;  %v2287_v5 = vld [vmem:[#allocation7 + $0xa8] sm:$0xf0]  ;;  %v2213_v6 = vld [vmem:[#allocation7 + $0x10] sm:$0xf] }
  0x74   : > { %1278 = vmatpush.bf16.msra.mxu2 %v2254_v7  ;;  %1291 = vmatpush.bf16.msra.mxu3 %v2318_v11  ;;  %v2577_v7 = vld [vmem:[#allocation7 + $0x14] sm:$0xf0]  ;;  %v2576_v11 = vld [vmem:[#allocation7 + $0x14] sm:$0xf] }
  0x75   : > { %1095 = vmatpush.bf16.msra.mxu0 %v2106_v17  ;;  %v2585_v17 = vld [vmem:[#allocation7 + $0x54] sm:$0xf0]  ;;  %v2218_v19 = vor.u32 %v2576_v11, %v2215_v13  ;;  %v2667_v13 = vld [vmem:[#allocation7 + $0x2e4] sm:$0xf0] }
  0x76   : > { %1108 = vmatpush.bf16.msra.mxu1 %v2170_v21  ;;  %v2246_v18 = vor.u32 %v2585_v17, %v2245_v16  ;;  %v2584_v21 = vld [vmem:[#allocation7 + $0x54] sm:$0xf]  ;;  %v2278_v16 = vor.u32 %v2593_v10, %v2277_v9  ;;  %v2205_v17 = vld [vmem:[#allocation7] sm:$0xf] }
  0x77   : > { %v2250_v28 = vor.u32 %v2584_v21, %v2247_v25  ;;  %v2591_v21 = vld [vmem:[#allocation7 + $0x84] sm:$0xf0] }
  0x78   : > { %1279 = vmatpush.bf16.msra.mxu2 %v2246_v18  ;;  %1292 = vmatpush.bf16.msra.mxu3 %v2310_v24  ;;  %v2575_v18 = vld [vmem:[#allocation7 + $0x4] sm:$0xf0] }
  0x79   : > { %1096 = vmatpush.bf16.msra.mxu0 %v2098_v30  ;;  %v2971_v30 = vmov 0.0   ;;  %v2206_v27 = vor.u32 %v2575_v18, %v2205_v17  ;;  %v2447_v17 = vld [vmem:[#allocation7 + $0x2e8] sm:$0xf0] }
  0x7a   : > { %1109 = vmatpush.bf16.msra.mxu1 %v2162_v31  ;;  %806 = vst [vmem:[#allocation2] sm:$0x3f] %v2971_v30  ;;  %v2237_v31 = vld [vmem:[#allocation7 + $0x40] sm:$0xf] }
  0x7b   : > { %807 = vst [vmem:[#allocation2 + $0x8] sm:$0x3f] %v2971_v30  ;;  %v2238_v33 = vor.u32 %v2583_v32, %v2237_v31  ;;  %v2207_v30 = vld [vmem:[#allocation7 + $0x8] sm:$0xf0]  ;;  %v2590_v31 = vld [vmem:[#allocation7 + $0x84] sm:$0xf] }
  0x7c   : > { %1293 = vmatpush.bf16.msra.mxu3 %v2302_v36 }
  0x7d   : > { %1097 = vmatpush.bf16.msra.mxu0 %v2090_v43  ;;  %1280 = vmatpush.bf16.msra.mxu2 %v2238_v33  ;;  %v2229_v43 = vld [vmem:[#allocation7 + $0x30] sm:$0xf]  ;;  %v2271_v33 = vld [vmem:[#allocation7 + $0x88] sm:$0xf0] }
  0x7e   : > { %1110 = vmatpush.bf16.msra.mxu1 %v2154_v47  ;;  %v2230_v46 = vor.u32 %v2581_v44, %v2229_v43  ;;  %v2597_v47 = vld [vmem:[#allocation7 + $0xb4] sm:$0xf0]  ;;  %v2274_v34 = vor.u32 %v2590_v31, %v2271_v33  ;;  %v2439_v31 = vld [vmem:[#allocation7 + $0x2d8] sm:$0xf0] }
  0x7f   : > { %v2294_v53 = vor.u32 %v2597_v47, %v2293_v45 }
  0x81   : > { %1098 = vmatpush.bf16.msra.mxu0 %v2082_v60  ;;  %1281 = vmatpush.bf16.msra.mxu2 %v2230_v46  ;;  %v2579_v60 = vld [vmem:[#allocation7 + $0x24] sm:$0xf0] }
  0x82   : > { %1111 = vmatpush.bf16.msra.mxu1 %v2146_v1  ;;  %1294 = vmatpush.bf16.msra.mxu3 %v2294_v53  ;;  %v2222_v63 = vor.u32 %v2579_v60, %v2221_v56  ;;  %v2578_v1 = vld [vmem:[#allocation7 + $0x24] sm:$0xf]  ;;  %v2652_v60 = vld [vmem:[#allocation7 + $0x274] sm:$0xf] }
  0x83   : > { %v2394_v10 = vor.u32 %v2652_v60, %v2391_v61  ;;  %v2643_v60 = vld [vmem:[#allocation7 + $0x224] sm:$0xf0] }
  0x85   : > { %1303 = vmatpush.bf16.msrb.mxu0 %v2266_v2  ;;  %v2223_v2 = vld [vmem:[#allocation7 + $0x28] sm:$0xf0]  ;;  %1282 = vmatpush.bf16.msra.mxu2 %v2222_v63 }
  0x86   : > { %1316 = vmatpush.bf16.msrb.mxu1 %v2330_v3  ;;  %v2594_v3 = vld [vmem:[#allocation7 + $0xa4] sm:$0xf]  ;;  %v2226_v4 = vor.u32 %v2578_v1, %v2223_v2  ;;  %1295 = vmatpush.bf16.msra.mxu3 %v2286_v0  ;;  %v2668_v0 = vld [vmem:[#allocation7 + $0x2f4] sm:$0xf]  ;;  %v2455_v1 = vld [vmem:[#allocation7 + $0x2f8] sm:$0xf0] }
  0x87   : > { %v2290_v8 = vor.u32 %v2594_v3, %v2287_v5  ;;  %v2458_v11 = vor.u32 %v2668_v0, %v2455_v1  ;;  %v2413_v0 = vld [vmem:[#allocation7 + $0x2a0] sm:$0xf]  ;;  %v2659_v1 = vld [vmem:[#allocation7 + $0x2a4] sm:$0xf0] }
  0x89   : > { %1304 = vmatpush.bf16.msrb.mxu0 %v2258_v12  ;;  %v2214_v12 = vor.u32 %v2577_v7, %v2213_v6  ;;  %v2381_v7 = vld [vmem:[#allocation7 + $0x260] sm:$0xf] }
  0x8a   : > { %1317 = vmatpush.bf16.msrb.mxu1 %v2322_v15  ;;  %v2279_v15 = vld [vmem:[#allocation7 + $0x98] sm:$0xf0]  ;;  %1296 = vmatpush.bf16.msra.mxu3 %v2278_v16  ;;  %v2666_v16 = vld [vmem:[#allocation7 + $0x2e4] sm:$0xf] }
  0x8b   : > { %v2282_v24 = vor.u32 %v2592_v14, %v2279_v15  ;;  %1283 = vmatpush.bf16.msra.mxu2 %v2214_v12  ;;  %v2445_v12 = vld [vmem:[#allocation7 + $0x2e0] sm:$0xf]  ;;  %v2650_v14 = vld [vmem:[#allocation7 + $0x264] sm:$0xf]  ;;  %v2383_v15 = vld [vmem:[#allocation7 + $0x268] sm:$0xf0] }
  0x8d   : > { %1305 = vmatpush.bf16.msrb.mxu0 %v2250_v28  ;;  %v2270_v28 = vor.u32 %v2591_v21, %v2269_v20  ;;  %v2373_v20 = vld [vmem:[#allocation7 + $0x250] sm:$0xf]  ;;  %v2649_v21 = vld [vmem:[#allocation7 + $0x254] sm:$0xf0] }
  0x8e   : > { %1318 = vmatpush.bf16.msrb.mxu1 %v2314_v29  ;;  %v2574_v29 = vld [vmem:[#allocation7 + $0x4] sm:$0xf] }
  0x8f   : > { %v2210_v32 = vor.u32 %v2574_v29, %v2207_v30  ;;  %1284 = vmatpush.bf16.msra.mxu2 %v2206_v27  ;;  %1297 = vmatpush.bf16.msra.mxu3 %v2270_v28  ;;  %v2665_v27 = vld [vmem:[#allocation7 + $0x2d4] sm:$0xf0]  ;;  %v2648_v28 = vld [vmem:[#allocation7 + $0x254] sm:$0xf]  ;;  %v2375_v29 = vld [vmem:[#allocation7 + $0x258] sm:$0xf0] }
  0x90   : > { %v2664_v30 = vld [vmem:[#allocation7 + $0x2d4] sm:$0xf] }
  0x91   : > { %1306 = vmatpush.bf16.msrb.mxu0 %v2242_v40  ;;  %v799_v40 = vperm.slane %v796_v35, 1  ;;  %v2647_v35 = vld [vmem:[#allocation7 + $0x244] sm:$0xf0] }
  0x92   : > { %1319 = vmatpush.bf16.msrb.mxu1 %v2306_v42 }
  0x95   : > { %1307 = vmatpush.bf16.msrb.mxu0 %v2234_v49 }
  0x96   : > { %1320 = vmatpush.bf16.msrb.mxu1 %v2298_v59 }
  0x99   : > { %1308 = vmatpush.bf16.msrb.mxu0 %v2226_v4 }
  0x9a   : > { %1321 = vmatpush.bf16.msrb.mxu1 %v2290_v8  ;;  %v2651_v8 = vld [vmem:[#allocation7 + $0x264] sm:$0xf0] }
  0x9b   : > { %v2382_v18 = vor.u32 %v2651_v8, %v2381_v7  ;;  %v2414_v7 = vor.u32 %v2659_v1, %v2413_v0  ;;  %v2341_v8 = vld [vmem:[#allocation7 + $0x210] sm:$0xf]  ;;  %v2677_v1 = vld [vmem:[#allocation10 + $0x34] sm:$0xf0] }
  0x9c   : > { %v2485_v0 = vld [vmem:[#allocation10 + $0x30] sm:$0xf] }
  0x9d   : > { %1309 = vmatpush.bf16.msrb.mxu0 %v2218_v19  ;;  %v2446_v19 = vor.u32 %v2667_v13, %v2445_v12  ;;  %v2405_v12 = vld [vmem:[#allocation7 + $0x290] sm:$0xf]  ;;  %v2657_v13 = vld [vmem:[#allocation7 + $0x294] sm:$0xf0] }
  0x9e   : > { %1322 = vmatpush.bf16.msrb.mxu1 %v2282_v24  ;;  %v2386_v24 = vor.u32 %v2650_v14, %v2383_v15  ;;  %v2640_v14 = vld [vmem:[#allocation7 + $0x214] sm:$0xf]  ;;  %v2343_v15 = vld [vmem:[#allocation7 + $0x218] sm:$0xf0] }
  0xa1   : > { %1310 = vmatpush.bf16.msrb.mxu0 %v2210_v32  ;;  %v2374_v32 = vor.u32 %v2649_v21, %v2373_v20  ;;  %v2406_v21 = vor.u32 %v2657_v13, %v2405_v12  ;;  %v2469_v12 = vld [vmem:[#allocation10 + $0x10] sm:$0xf]  ;;  %v2673_v13 = vld [vmem:[#allocation10 + $0x14] sm:$0xf0] }
  0xa2   : > { %1323 = vmatpush.bf16.msrb.mxu1 %v2274_v34  ;;  %v2365_v34 = vld [vmem:[#allocation7 + $0x240] sm:$0xf] }
  0xc1   : > { %v3115_v22 = vpop.f32.mrf.mxu0 }
  0xc4   : > { %v3117_v23 = vpop.f32.mrf.mxu1 }
  0xc9   : > { %v542_v51 = vpop.f32.mrf.mxu0 }
  0xca   : > { %v646_v57 = vpop.f32.mrf.mxu2 }
  0xcb   : > { %v659_v58 = vpop.f32.mrf.mxu3  ;;  %v647_v36 = vadd.f32 %v646_v57, %v3115_v22  ;;  %v2453_v57 = vld [vmem:[#allocation7 + $0x2f0] sm:$0xf] }
  0xcc   : > { %v555_v52 = vpop.f32.mrf.mxu1  ;;  %v660_v38 = vadd.f32 %v659_v58, %v3117_v23  ;;  %v2389_v23 = vld [vmem:[#allocation7 + $0x270] sm:$0xf]  ;;  %v2669_v58 = vld [vmem:[#allocation7 + $0x2f4] sm:$0xf0] }
  0xcd   : > { %v2390_v5 = vor.u32 %v2653_v55, %v2389_v23  ;;  %v2454_v6 = vor.u32 %v2669_v58, %v2453_v57  ;;  %v2660_v23 = vld [vmem:[#allocation7 + $0x2b4] sm:$0xf]  ;;  %v2423_v55 = vld [vmem:[#allocation7 + $0x2b8] sm:$0xf0] }
  0xd2   : > { %v648_v25 = vpop.f32.mrf.mxu2 }
  0xd3   : > { %v661_v26 = vpop.f32.mrf.mxu3  ;;  %v2450_v25 = vor.u32 %v2666_v16, %v2447_v17  ;;  %v2656_v16 = vld [vmem:[#allocation7 + $0x294] sm:$0xf]  ;;  %v2407_v17 = vld [vmem:[#allocation7 + $0x298] sm:$0xf0] }
  0xd4   : > { %v2437_v26 = vld [vmem:[#allocation7 + $0x2d0] sm:$0xf] }
  0xd5   : > { %v2438_v33 = vor.u32 %v2665_v27, %v2437_v26  ;;  %v2638_v26 = vld [vmem:[#allocation7 + $0x204] sm:$0xf]  ;;  %v2346_v27 = vor.u32 %v2640_v14, %v2343_v15  ;;  %v2672_v14 = vld [vmem:[#allocation10 + $0x14] sm:$0xf]  ;;  %v2471_v15 = vld [vmem:[#allocation10 + $0x18] sm:$0xf0] }
  0xe1   : > { %v777_v39 = vpop.f32.mrf.mxu0 }
  0xe2   : > { %v794_v41 = vadd.f32 %v777_v39, %v647_v36  ;;  %v790_v42 = vpop.f32.mrf.mxu1  ;;  %v2378_v36 = vor.u32 %v2648_v28, %v2375_v29  ;;  %v2663_v39 = vld [vmem:[#allocation7 + $0x2c4] sm:$0xf0]  ;;  %v2410_v28 = vor.u32 %v2656_v16, %v2407_v17  ;;  %v2335_v29 = vld [vmem:[#allocation7 + $0x208] sm:$0xf0]  ;;  %v2470_v16 = vor.u32 %v2673_v13, %v2469_v12 }
  0xe3   : > { %v795_v43 = vadd.f32 %v790_v42, %v660_v38  ;;  %v2429_v38 = vld [vmem:[#allocation7 + $0x2c0] sm:$0xf]  ;;  %v2662_v42 = vld [vmem:[#allocation7 + $0x2c4] sm:$0xf]  ;;  %v2474_v17 = vor.u32 %v2672_v14, %v2471_v15 }
  0xe4   : > { %v802_v44 = vadd.f32 %v798_v37, %v794_v41  ;;  %v2442_v37 = vor.u32 %v2664_v30, %v2439_v31  ;;  %v2367_v41 = vld [vmem:[#allocation7 + $0x248] sm:$0xf0]  ;;  %v2654_v30 = vld [vmem:[#allocation7 + $0x284] sm:$0xf] }
  0xe5   : > { %v803_v45 = vadd.f32 %v799_v40, %v795_v43  ;;  %v2646_v40 = vld [vmem:[#allocation7 + $0x244] sm:$0xf]  ;;  %v2431_v43 = vld [vmem:[#allocation7 + $0x2c8] sm:$0xf0] }
  0xe6   : > { %v804_v46 = vmax.f32 %v802_v44, 0.0  ;;  %v2357_v44 = vld [vmem:[#allocation7 + $0x230] sm:$0xf]  ;;  %v2399_v31 = vld [vmem:[#allocation7 + $0x288] sm:$0xf0] }
  0xe7   : > { %v805_v47 = vmax.f32 %v803_v45, 0.0  ;;  %v2366_v45 = vor.u32 %v2647_v35, %v2365_v34  ;;  %v2685_v35 = vld [vmem:[#allocation10 + $0x74] sm:$0xf0] }
  0xe8   : > { %v810_v48 = vrot.slane %v804_v46, 7  ;;  %v2430_v46 = vor.u32 %v2663_v39, %v2429_v38 }
  0xe9   : > { %v811_v50 = vrot.slane %v805_v47, 7  ;;  %v779_v51 = vpop.f32.mrf.mxu0  ;;  %v2645_v47 = vld [vmem:[#allocation7 + $0x234] sm:$0xf0] }
  0xea   : > { %814 = vst [vmem:[#allocation2] sm:$0x1e] %v810_v48  ;;  %v792_v52 = vpop.f32.mrf.mxu1  ;;  %v2421_v48 = vld [vmem:[#allocation7 + $0x2b0] sm:$0xf]  ;;  %v2370_v51 = vor.u32 %v2646_v40, %v2367_v41  ;;  %v2358_v57 = vor.u32 %v2645_v47, %v2357_v44  ;;  %v2338_v40 = vor.u32 %v2638_v26, %v2335_v29  ;;  %v2402_v41 = vor.u32 %v2654_v30, %v2399_v31  ;;  %v2683_v47 = vld [vmem:[#allocation10 + $0x64] sm:$0xf0] }
  0xeb   : > { %815 = vst [vmem:[#allocation2 + $0x8] sm:$0x1e] %v811_v50  ;;  %v2661_v50 = vld [vmem:[#allocation7 + $0x2b4] sm:$0xf0]  ;;  %v2434_v52 = vor.u32 %v2662_v42, %v2431_v43  ;;  %v2758_v26 = vld [vmem:[%s3106_s29] sm:$0x3] }
  0xec   : > { %v2422_v58 = vor.u32 %v2661_v50, %v2421_v48  ;;  %v2682_v48 = vld [vmem:[#allocation10 + $0x64] sm:$0xf]  ;;  %v2511_v50 = vld [vmem:[#allocation10 + $0x68] sm:$0xf0] }
  0xf1   : > { %v852_v53 = vld [vmem:[#allocation2] sm:$0x1e] }
  0xf2   : > { %v854_v22 = vpack.c.bf16 %v852_v53, %v852_v53  ;;  %v853_v49 = vld [vmem:[#allocation2 + $0x8] sm:$0x1e]  ;;  %v816_v53 = vld [vmem:[#allocation2] sm:$0xf] }
  0xf3   : > { %v855_v54 = vpack.c.bf16 %v853_v49, %v853_v49  ;;  %v2359_v49 = vld [vmem:[#allocation7 + $0x238] sm:$0xf0]  ;;  %v1330_v34 = vld [vmem:[#allocation2 + $0x8] sm:$0x3c] }
  0xf4   : > { %v892_v56 = vshll.u32 %v854_v22, 16  ;;  %v890_v62 = vshrl.u32 %v854_v22, 16  ;;  %v2644_v22 = vld [vmem:[#allocation7 + $0x234] sm:$0xf]  ;;  %v1332_v43 = vpack.c.bf16 %v1330_v34, %v1330_v34 }
  0xf5   : > { %v899_v59 = vshll.u32 %v855_v54, 16  ;;  %v897_v2 = vshrl.u32 %v855_v54, 16  ;;  %v817_v54 = vld [vmem:[#allocation2 + $0x8] sm:$0xf] }
  0xf6   : > { %v894_v63 = vrot.slane %v892_v56, 1  ;;  %v818_v56 = vpack.c.bf16 %v816_v53, %v816_v53  ;;  %v819_v61 = vpack.c.bf16 %v817_v54, %v817_v54  ;;  %v2681_v54 = vld [vmem:[#allocation10 + $0x54] sm:$0xf0] }
  0xf7   : > { %v901_v3 = vrot.slane %v899_v59, 1  ;;  %v2349_v59 = vld [vmem:[#allocation7 + $0x220] sm:$0xf] }
  0xf8   : > { %v895_v4 = vor.u32 %v894_v63, %v890_v62  ;;  %v2362_v62 = vor.u32 %v2644_v22, %v2359_v49  ;;  %v2426_v63 = vor.u32 %v2660_v23, %v2423_v55  ;;  %v2514_v22 = vor.u32 %v2682_v48, %v2511_v50  ;;  %v2501_v49 = vld [vmem:[#allocation10 + $0x50] sm:$0xf]  ;;  %v2680_v23 = vld [vmem:[#allocation10 + $0x54] sm:$0xf]  ;;  %v2503_v55 = vld [vmem:[#allocation10 + $0x58] sm:$0xf0] }
  0xf9   : > { %v902_v9 = vor.u32 %v901_v3, %v897_v2  ;;  %v2642_v2 = vld [vmem:[#allocation7 + $0x224] sm:$0xf]  ;;  %v2351_v3 = vld [vmem:[#allocation7 + $0x228] sm:$0xf0] }
  0xfa   : > { %1073 = vmatmul.bf16.vlgmr.msrb.gmra.mxu2 %v895_v4  ;;  %1099 = vmatmul.bf16.vlgmr.msra.gmra.mxu0 %v895_v4  ;;  %v2658_v4 = vld [vmem:[#allocation7 + $0x2a4] sm:$0xf] }
  0xfb   : > { %1086 = vmatmul.bf16.vlgmr.msrb.gmra.mxu3 %v902_v9  ;;  %1112 = vmatmul.bf16.vlgmr.msra.gmra.mxu1 %v902_v9  ;;  %v2641_v9 = vld [vmem:[#allocation7 + $0x214] sm:$0xf0] }
  0xfc   : > { %1532 = vmatpush.bf16.msrb.mxu2 %v2390_v5  ;;  %1545 = vmatpush.bf16.msrb.mxu3 %v2454_v6  ;;  %v2415_v5 = vld [vmem:[#allocation7 + $0x2a8] sm:$0xf0]  ;;  %v2350_v6 = vor.u32 %v2643_v60, %v2349_v59  ;;  %v2342_v20 = vor.u32 %v2641_v9, %v2341_v8  ;;  %v2678_v60 = vld [vmem:[#allocation10 + $0x44] sm:$0xf] }
  0xfd   : > { %1558 = vmatpush.bf16.msra.mxu0 %v2394_v10  ;;  %1571 = vmatpush.bf16.msra.mxu1 %v2458_v11  ;;  %v2354_v10 = vor.u32 %v2642_v2, %v2351_v3  ;;  %v2418_v11 = vor.u32 %v2658_v4, %v2415_v5  ;;  %v2679_v59 = vld [vmem:[#allocation10 + $0x44] sm:$0xf0]  ;;  %v2676_v2 = vld [vmem:[#allocation10 + $0x34] sm:$0xf]  ;;  %v2487_v3 = vld [vmem:[#allocation10 + $0x38] sm:$0xf0]  ;;  %v2486_v4 = vor.u32 %v2677_v1, %v2485_v0 }
  0xfe   : > { %v2490_v5 = vor.u32 %v2676_v2, %v2487_v3  ;;  %v2674_v8 = vld [vmem:[#allocation10 + $0x24] sm:$0xf]  ;;  %v2479_v9 = vld [vmem:[#allocation10 + $0x28] sm:$0xf0] }
 0x100   : > { %1533 = vmatpush.bf16.msrb.mxu2 %v2382_v18  ;;  %1546 = vmatpush.bf16.msrb.mxu3 %v2446_v19  ;;  %v2333_v18 = vld [vmem:[#allocation7 + $0x200] sm:$0xf]  ;;  %v2639_v19 = vld [vmem:[#allocation7 + $0x204] sm:$0xf0] }
 0x101   : > { %1559 = vmatpush.bf16.msra.mxu0 %v2386_v24  ;;  %1572 = vmatpush.bf16.msra.mxu1 %v2450_v25  ;;  %v2397_v24 = vld [vmem:[#allocation7 + $0x280] sm:$0xf]  ;;  %v2655_v25 = vld [vmem:[#allocation7 + $0x284] sm:$0xf0]  ;;  %v2334_v38 = vor.u32 %v2639_v19, %v2333_v18 }
 0x102   : > { %v2398_v39 = vor.u32 %v2655_v25, %v2397_v24  ;;  %v2461_v18 = vld [vmem:[#allocation10] sm:$0xf]  ;;  %v2671_v19 = vld [vmem:[#allocation10 + $0x4] sm:$0xf0] }
 0x103   : > { %v2462_v24 = vor.u32 %v2671_v19, %v2461_v18 }
 0x104   : > { %1534 = vmatpush.bf16.msrb.mxu2 %v2374_v32  ;;  %1547 = vmatpush.bf16.msrb.mxu3 %v2438_v33  ;;  %v2517_v32 = vld [vmem:[#allocation10 + $0x70] sm:$0xf] }
 0x105   : > { %1560 = vmatpush.bf16.msra.mxu0 %v2378_v36  ;;  %1573 = vmatpush.bf16.msra.mxu1 %v2442_v37  ;;  %v1329_v33 = vld [vmem:[#allocation2] sm:$0x3c]  ;;  %v2684_v36 = vld [vmem:[#allocation10 + $0x74] sm:$0xf]  ;;  %v2519_v37 = vld [vmem:[#allocation10 + $0x78] sm:$0xf0]  ;;  %v2518_v44 = vor.u32 %v2685_v35, %v2517_v32 }
 0x106   : > { %v1331_v42 = vpack.c.bf16 %v1329_v33, %v1329_v33 }
 0x108   : > { %1535 = vmatpush.bf16.msrb.mxu2 %v2366_v45  ;;  %1548 = vmatpush.bf16.msrb.mxu3 %v2430_v46  ;;  %v2522_v45 = vor.u32 %v2684_v36, %v2519_v37  ;;  %v2509_v46 = vld [vmem:[#allocation10 + $0x60] sm:$0xf] }
 0x109   : > { %1561 = vmatpush.bf16.msra.mxu0 %v2370_v51  ;;  %1574 = vmatpush.bf16.msra.mxu1 %v2434_v52  ;;  %v1368_v51 = vrot.slane %v1331_v42, 1  ;;  %v1369_v52 = vrot.slane %v1332_v43, 1  ;;  %v2510_v53 = vor.u32 %v2683_v47, %v2509_v46 }
 0x10a   : > { %1285 = vmatmul.bf16.vlgmr.msra.gmra.mxu2 %v818_v56  ;;  %1311 = vmatmul.bf16.vlgmr.msrb.gmra.mxu0 %v818_v56  ;;  %v2502_v56 = vor.u32 %v2681_v54, %v2501_v49 }
 0x10b   : > { %1298 = vmatmul.bf16.vlgmr.msra.gmra.mxu3 %v819_v61  ;;  %1324 = vmatmul.bf16.vlgmr.msrb.gmra.mxu1 %v819_v61  ;;  %v2495_v61 = vld [vmem:[#allocation10 + $0x48] sm:$0xf0] }
 0x10c   : > { %1536 = vmatpush.bf16.msrb.mxu2 %v2358_v57  ;;  %1549 = vmatpush.bf16.msrb.mxu3 %v2422_v58  ;;  %v2506_v57 = vor.u32 %v2680_v23, %v2503_v55  ;;  %v2493_v58 = vld [vmem:[#allocation10 + $0x40] sm:$0xf] }
 0x10d   : > { %1562 = vmatpush.bf16.msra.mxu0 %v2362_v62  ;;  %1575 = vmatpush.bf16.msra.mxu1 %v2426_v63  ;;  %v2494_v62 = vor.u32 %v2679_v59, %v2493_v58  ;;  %v2498_v63 = vor.u32 %v2678_v60, %v2495_v61  ;;  %v1602_v55 = vld [vmem:[#allocation11] sm:$0x3] }
 0x10e   : > { %v1604_v59 = vperm.slane %v1602_v55, 0  ;;  %v1605_v0 = vperm.slane %v1602_v55, 1 }
 0x110   : > { %1537 = vmatpush.bf16.msrb.mxu2 %v2350_v6  ;;  %1550 = vmatpush.bf16.msrb.mxu3 %v2414_v7  ;;  %v2477_v6 = vld [vmem:[#allocation10 + $0x20] sm:$0xf]  ;;  %v2675_v7 = vld [vmem:[#allocation10 + $0x24] sm:$0xf0] }
 0x111   : > { %1563 = vmatpush.bf16.msra.mxu0 %v2354_v10  ;;  %1576 = vmatpush.bf16.msra.mxu1 %v2418_v11  ;;  %v2478_v10 = vor.u32 %v2675_v7, %v2477_v6  ;;  %v2482_v11 = vor.u32 %v2674_v8, %v2479_v9 }
 0x114   : > { %1538 = vmatpush.bf16.msrb.mxu2 %v2342_v20  ;;  %1551 = vmatpush.bf16.msrb.mxu3 %v2406_v21  ;;  %v2670_v20 = vld [vmem:[#allocation10 + $0x4] sm:$0xf]  ;;  %v2463_v21 = vld [vmem:[#allocation10 + $0x8] sm:$0xf0] }
 0x115   : > { %1564 = vmatpush.bf16.msra.mxu0 %v2346_v27  ;;  %1577 = vmatpush.bf16.msra.mxu1 %v2410_v28  ;;  %v2466_v25 = vor.u32 %v2670_v20, %v2463_v21 }
 0x118   : > { %1539 = vmatpush.bf16.msrb.mxu2 %v2334_v38  ;;  %1552 = vmatpush.bf16.msrb.mxu3 %v2398_v39 }
 0x119   : > { %1565 = vmatpush.bf16.msra.mxu0 %v2338_v40  ;;  %1578 = vmatpush.bf16.msra.mxu1 %v2402_v41 }
 0x11b   : > { %1540 = vmatmul.bf16.vlgmr.msrb.gmra.mxu2 %v1368_v51  ;;  %1553 = vmatmul.bf16.vlgmr.msrb.gmra.mxu3 %v1369_v52 }
 0x11c   : > { %1688 = vmatpush.bf16.msra.mxu2 %v2518_v44  ;;  %1701 = vmatpush.bf16.msra.mxu3 %v2522_v45 }
 0x11d   : > { %1566 = vmatmul.bf16.vlgmr.msra.gmra.mxu0 %v1368_v51  ;;  %1579 = vmatmul.bf16.vlgmr.msra.gmra.mxu1 %v1369_v52 }
 0x120   : > { %1689 = vmatpush.bf16.msra.mxu2 %v2510_v53  ;;  %1702 = vmatpush.bf16.msra.mxu3 %v2514_v22 }
 0x124   : > { %1690 = vmatpush.bf16.msra.mxu2 %v2502_v56  ;;  %1703 = vmatpush.bf16.msra.mxu3 %v2506_v57  ;;  %v1714_v56 = vld [vmem:[#allocation8] sm:$0x3] }
 0x125   : > { %v1717_v60 = vperm.slane %v1714_v56, 1 }
 0x128   : > { %1691 = vmatpush.bf16.msra.mxu2 %v2494_v62  ;;  %1704 = vmatpush.bf16.msra.mxu3 %v2498_v63  ;;  %v1716_v63 = vperm.slane %v1714_v56, 0 }
 0x12c   : > { %1692 = vmatpush.bf16.msra.mxu2 %v2486_v4  ;;  %1705 = vmatpush.bf16.msra.mxu3 %v2490_v5 }
 0x130   : > { %1693 = vmatpush.bf16.msra.mxu2 %v2478_v10  ;;  %1706 = vmatpush.bf16.msra.mxu3 %v2482_v11 }
 0x134   : > { %1694 = vmatpush.bf16.msra.mxu2 %v2470_v16  ;;  %1707 = vmatpush.bf16.msra.mxu3 %v2474_v17 }
 0x138   : > { %1695 = vmatpush.bf16.msra.mxu2 %v2462_v24  ;;  %1708 = vmatpush.bf16.msra.mxu3 %v2466_v25 }
 0x13b   : > { %1696 = vmatmul.bf16.vlgmr.msra.gmra.mxu2 %v2758_v26  ;;  %1709 = vmatmul.bf16.vlgmr.msra.gmra.mxu3 %v2758_v26 }
 0x177   : > { %v1100_v27 = vpop.f32.mrf.mxu0 }
 0x178   : > { %v1113_v28 = vpop.f32.mrf.mxu1 }
 0x179   : > { %v1114_v52 = vadd.f32 %v1113_v28, %v1100_v27 }
 0x17d   : > { %v1074_v29 = vpop.f32.mrf.mxu2 }
 0x17e   : > { %v1087_v30 = vpop.f32.mrf.mxu3 }
 0x17f   : > { %v1102_v31 = vpop.f32.mrf.mxu0  ;;  %v1088_v53 = vadd.f32 %v1087_v30, %v1074_v29 }
 0x180   : > { %v1115_v32 = vpop.f32.mrf.mxu1 }
 0x185   : > { %v1076_v33 = vpop.f32.mrf.mxu2 }
 0x186   : > { %v1089_v34 = vpop.f32.mrf.mxu3 }
 0x187   : > { %v1312_v35 = vpop.f32.mrf.mxu0 }
 0x188   : > { %v1325_v36 = vpop.f32.mrf.mxu1  ;;  %v1313_v22 = vadd.f32 %v1312_v35, %v1114_v52 }
 0x18a   : > { %v1326_v57 = vadd.f32 %v1325_v36, %v1313_v22 }
 0x18d   : > { %v1286_v37 = vpop.f32.mrf.mxu2 }
 0x18e   : > { %v1299_v38 = vpop.f32.mrf.mxu3  ;;  %v1287_v49 = vadd.f32 %v1286_v37, %v1088_v53 }
 0x18f   : > { %v1314_v39 = vpop.f32.mrf.mxu0 }
 0x190   : > { %v1327_v40 = vpop.f32.mrf.mxu1  ;;  %v1300_v58 = vadd.f32 %v1299_v38, %v1287_v49 }
 0x195   : > { %v1288_v41 = vpop.f32.mrf.mxu2 }
 0x196   : > { %v1301_v42 = vpop.f32.mrf.mxu3 }
 0x19a   : > { %v1567_v43 = vpop.f32.mrf.mxu0  ;;  %v1580_v44 = vpop.f32.mrf.mxu1 }
 0x19b   : > { %v1581_v54 = vadd.f32 %v1580_v44, %v1567_v43 }
 0x19d   : > { %v1585_v61 = vadd.f32 %v1581_v54, %v1326_v57 }
 0x19e   : > { %v1541_v45 = vpop.f32.mrf.mxu2  ;;  %v1554_v46 = vpop.f32.mrf.mxu3 }
 0x19f   : > { %v1555_v23 = vadd.f32 %v1554_v46, %v1541_v45  ;;  %v1721_v6 = vadd.f32 %v1717_v60, %v1585_v61 }
 0x1a1   : > { %v1584_v62 = vadd.f32 %v1555_v23, %v1300_v58 }
 0x1a2   : > { %v1569_v47 = vpop.f32.mrf.mxu0  ;;  %v1582_v48 = vpop.f32.mrf.mxu1 }
 0x1a3   : > { %v1720_v4 = vadd.f32 %v1716_v63, %v1584_v62 }
 0x1a6   : > { %v1543_v50 = vpop.f32.mrf.mxu2  ;;  %v1556_v51 = vpop.f32.mrf.mxu3 }
 0x1be   : > { %v1697_v1 = vpop.f32.mrf.mxu2  ;;  %v1710_v2 = vpop.f32.mrf.mxu3 }
 0x1bf   : > { %v1698_v3 = vadd.f32 %v1697_v1, %v1604_v59  ;;  %v1711_v5 = vadd.f32 %v1710_v2, %v1605_v0 }
 0x1c1   : > { %v1722_v7 = vadd.f32 %v1720_v4, %v1698_v3  ;;  %v1723_v8 = vadd.f32 %v1721_v6, %v1711_v5 }
 0x1c3   : > { %v1724_v9 = vmax.f32 %v1722_v7, 0.0  ;;  %v1725_v10 = vmax.f32 %v1723_v8, 0.0 }
 0x1c5   : > { %v1726_v11 = vpack.c.bf16 %v1725_v10, %v1724_v9 }
 0x1c6   : > { %v1699_v12 = vpop.f32.mrf.mxu2  ;;  %v1712_v13 = vpop.f32.mrf.mxu3 }
 0x1c7   : > { %v1728_v14 = vrot.slane %v1726_v11, 2 }
 0x1c9   : > { %v1732_v15 = vsel %vm1729_vm0, %v1726_v11, %v1728_v14 }
 0x1ca   : > { %1734 = vst [vmem:[%s413_s30] sm:$0xf] %v1732_v15 }
 0x1cb PF: > { %s22_s27 = sadd.s32 1, %s2961_s27  }
 0x1cc   : > { %p19_p7 = scmp.ge.s32.totalorder %s22_s27, 4  }
 0x1ce   :  { %21 = sbr.rel (!%p19_p7) target bundleno = 4 (0x4), region = 114 }
 0x1d3   :  { %1756 = vsyncpa [#allocation4], 1 }
 0x1d4   :  { %1758 = vsyncpa [#allocation4 + $0x1], 1 }
 0x1d5   :  { %1759 = vsyncpa [#allocation6], 1 }
 0x1d6   :  { %1760 = vsyncpa [#allocation9], 1 }
 0x1d7   :  { %1761 = vsyncpa [#allocation12], 1 }

// kernel: encoder_forward.9
= control target key start
LH: loop header
LB: loop body
LE: loop exit
PB: predicated region body
PF: predicated region fallthrough
CT: control target
= control target key end

     0   :  { %13 = vsyncpa [#allocation4], 0  ;;  %s9630_s0 = inlined_call_operand.vmem [shape: bf16[2,3,256], index: 0, kind: input, shape index: {}]   ;;  %s9631_s1 = inlined_call_operand.vmem [shape: bf16[2,2,256], index: 1, kind: input, shape index: {}]   ;;  %s9632_s2 = inlined_call_operand.hbm [shape: bf16[3,256,512], index: 2, kind: input, shape index: {}]   ;;  %s9633_s3 = inlined_call_operand.hbm [shape: f32[1,512], index: 3, kind: input, shape index: {}]   ;;  %s9634_s4 = inlined_call_operand.hbm [shape: bf16[3,512,512], index: 4, kind: input, shape index: {}]   ;;  %s9635_s5 = inlined_call_operand.hbm [shape: f32[1,512], index: 5, kind: input, shape index: {}]   ;;  %s9636_s6 = inlined_call_operand.hbm [shape: bf16[1,256,512], index: 6, kind: input, shape index: {}]   ;;  %s9637_s7 = inlined_call_operand.hbm [shape: f32[1,512], index: 7, kind: input, shape index: {}]   ;;  %s9638_s8 = inlined_call_operand.vmem [shape: f32[2,1,512], index: 8, kind: output, shape index: {}]  }
   0x1   :  { %14 = vsyncpa [#allocation6], 0 }
   0x2   :  { %15 = vsyncpa [#allocation9], 0 }
   0x3   :  { %16 = vsyncpa [#allocation12], 0  ;;  %s9261_s27 = smov 0  }
   0x4 LB: > { %s257_s30 = sshll.u32 %s9633_s3, 4  ;;  %s9270_s9 = sadd.s32 4294967295, %s9204_s27   ;;  %s9204_s27 = sphi %s9261_s27, %s22_s27   ;;  %s258_s30 = int_to_ptr.hbm [resolvable:$true] %s257_s30 }
   0x5   : > { %p5705_p0 = scmp.ge.s32.totalorder %s9204_s27, 1  ;;  %p231_p1 = scmp.lt.s32.totalorder %s9204_s27, 3 }
   0x6   : > { %p8970_p2 = scmp.eq.s32.totalorder %s9270_s9, 0  ;;  %s9206_s11 = smov [#allocation5]  }
   0x7   : > { %p9275_p3 = pnand %p5705_p0, %p231_p1  ;;  %s259_s12 = sshll.u32 %s9206_s11, 4  ;;  %s260_s12 = int_to_ptr.vmem [resolvable:$true] %s259_s12 }
   0x8   : > { %s283_s15 = sshll.u32 %s9635_s5, 4  ;;  %s242_s18 = sshll.u32 %s9632_s2, 4  ;;  %s284_s15 = int_to_ptr.hbm [resolvable:$true] %s283_s15  ;;  %s243_s18 = int_to_ptr.hbm [resolvable:$true] %s242_s18 }
   0x9   : > { %p8951_p4 = pneg %p9275_p3  ;;  %s9207_s20 = smov [#allocation8]  }
   0xa   : > { %s285_s21 = sshll.u32 %s9207_s20, 4  ;;  %s9208_s22 = smov [#allocation3]   ;;  %s286_s21 = int_to_ptr.vmem [resolvable:$true] %s285_s21 }
   0xb   : > { %p9289_p5 = pnand %p8970_p2, %p8951_p4  ;;  %s244_s23 = sshll.u32 %s9208_s22, 4  ;;  %s245_s23 = int_to_ptr.vmem [resolvable:$true] %s244_s23 }
   0xc   : > { %s9209_s24 = smov 256   ;;  %s9210_s25 = smov 16  }
   0xd   : > { %8957 = dma.hbm_to_vmem [thread:$0]  (!%p9289_p5), %s258_s30, 64, %s260_s12, [#allocation6]  }
   0xe   : > { %8963 = dma.hbm_to_vmem [thread:$0]  (!%p9289_p5), %s284_s15, 64, %s286_s21, [#allocation9]  }
   0xf   : > { %8954 = dma.hbm_to_vmem [thread:$0]  (!%p9289_p5), %s243_s18, 24576, %s245_s23, [#allocation4], %s9209_s24, %s9209_s24, %s9210_s25  }
  0x10   : > { %s268_s29 = sshll.u32 %s9634_s4, 4  ;;  %s9211_s11 = smov [#allocation7]   ;;  %s269_s29 = int_to_ptr.hbm [resolvable:$true] %s268_s29 }
  0x11   : > { %s270_s13 = sshll.u32 %s9211_s11, 4  ;;  %s294_s14 = sshll.u32 %s9636_s6, 4  ;;  %s271_s13 = int_to_ptr.vmem [resolvable:$true] %s270_s13  ;;  %s295_s14 = int_to_ptr.hbm [resolvable:$true] %s294_s14 }
  0x12   : > { %8960 = dma.hbm_to_vmem [thread:$0]  (!%p9289_p5), %s269_s29, 49152, %s271_s13, [#allocation6], %s9209_s24, %s9209_s24, %s9210_s25  }
  0x13   : > { %s9212_s15 = smov [#allocation10]   ;;  %s309_s20 = sshll.u32 %s9637_s7, 4  ;;  %s310_s20 = int_to_ptr.hbm [resolvable:$true] %s309_s20 }
  0x14   : > { %s296_s16 = sshll.u32 %s9212_s15, 4  ;;  %s9213_s21 = smov [#allocation11]   ;;  %s297_s16 = int_to_ptr.vmem [resolvable:$true] %s296_s16 }
  0x15   : > { %8966 = dma.hbm_to_vmem [thread:$0]  (!%p9289_p5), %s295_s14, 8192, %s297_s16, [#allocation9], %s9209_s24, %s9209_s24, %s9210_s25  }
  0x16   : > { %s311_s22 = sshll.u32 %s9213_s21, 4  ;;  %339 = sbr.rel (%p9275_p3) target bundleno = 952 (0x3b8), region = 52  ;;  %s312_s22 = int_to_ptr.vmem [resolvable:$true] %s311_s22 }
  0x17   : > { %8969 = dma.hbm_to_vmem [thread:$0]  (!%p9289_p5), %s310_s20, 64, %s312_s22, [#allocation12]  }
  0x1b   : > { %9187 = dma.done.wait (%p8970_p2), [#allocation4], 24576  }
  0x1c   : > { %9189 = vsyncadd (%p8970_p2), [#allocation4], 4294942720 }
  0x1d   : > { %9191 = dma.done.wait (%p8970_p2), [#allocation6], 49216  }
  0x1e   : > { %9193 = vsyncadd (%p8970_p2), [#allocation6], 4294918080 }
  0x1f   : > { %9195 = dma.done.wait (%p8970_p2), [#allocation9], 8256  }
  0x20   : > { %9197 = vsyncadd (%p8970_p2), [#allocation9], 4294959040 }
  0x21   : > { %9199 = dma.done.wait (%p8970_p2), [#allocation12], 64  }
  0x22   : > { %9201 = vsyncadd (%p8970_p2), [#allocation12], 4294967232  ;;  %v5838_v0 = vld [vmem:[#allocation3 + $0x2e0] sm:$0xf]  ;;  %v8381_v1 = vld [vmem:[#allocation3 + $0x2ec] sm:$0xf0] }
  0x23   : > { %v5966_v2 = vld [vmem:[#allocation3 + $0x3e0] sm:$0xf]  ;;  %v5839_v3 = vor.u32 %v8381_v1, %v5838_v0  ;;  %v8413_v4 = vld [vmem:[#allocation3 + $0x3ec] sm:$0xf0]  ;;  %v8379_v5 = vld [vmem:[#allocation3 + $0x2e4] sm:$0xf] }
  0x24   : > { %v5840_v6 = vld [vmem:[#allocation3 + $0x2f0] sm:$0xf0]  ;;  %v5967_v7 = vor.u32 %v8413_v4, %v5966_v2  ;;  %v8411_v9 = vld [vmem:[#allocation3 + $0x3e4] sm:$0xf]  ;;  %v5822_v11 = vld [vmem:[#allocation3 + $0x2c0] sm:$0xf] }
  0x25   : > { %v5843_v8 = vor.u32 %v8379_v5, %v5840_v6  ;;  %v5968_v10 = vld [vmem:[#allocation3 + $0x3f0] sm:$0xf0]  ;;  %881 = vmatpush.bf16.msra.mxu0 %v5839_v3  ;;  %v8377_v13 = vld [vmem:[#allocation3 + $0x2cc] sm:$0xf0]  ;;  %v5950_v14 = vld [vmem:[#allocation3 + $0x3c0] sm:$0xf] }
  0x26   : > { %v5971_v12 = vor.u32 %v8411_v9, %v5968_v10  ;;  %v8409_v15 = vld [vmem:[#allocation3 + $0x3cc] sm:$0xf0]  ;;  %894 = vmatpush.bf16.msra.mxu1 %v5967_v7  ;;  %v5823_v16 = vor.u32 %v8377_v13, %v5822_v11  ;;  %v8375_v18 = vld [vmem:[#allocation3 + $0x2c4] sm:$0xf]  ;;  %v5824_v19 = vld [vmem:[#allocation3 + $0x2d0] sm:$0xf0] }
  0x27   : > { %907 = vmatpush.bf16.msra.mxu2 %v5843_v8  ;;  %v5951_v17 = vor.u32 %v8409_v15, %v5950_v14  ;;  %v8407_v20 = vld [vmem:[#allocation3 + $0x3c4] sm:$0xf]  ;;  %v5827_v21 = vor.u32 %v8375_v18, %v5824_v19  ;;  %v5952_v22 = vld [vmem:[#allocation3 + $0x3d0] sm:$0xf0]  ;;  %v5806_v23 = vld [vmem:[#allocation3 + $0x2a0] sm:$0xf] }
  0x28   : > { %920 = vmatpush.bf16.msra.mxu3 %v5971_v12  ;;  %v8373_v24 = vld [vmem:[#allocation3 + $0x2ac] sm:$0xf0]  ;;  %v5955_v25 = vor.u32 %v8407_v20, %v5952_v22  ;;  %v5934_v26 = vld [vmem:[#allocation3 + $0x3a0] sm:$0xf]  ;;  %v8371_v28 = vld [vmem:[#allocation3 + $0x2a4] sm:$0xf] }
  0x29   : > { %v8405_v27 = vld [vmem:[#allocation3 + $0x3ac] sm:$0xf0]  ;;  %882 = vmatpush.bf16.msra.mxu0 %v5823_v16  ;;  %v5807_v29 = vor.u32 %v8373_v24, %v5806_v23  ;;  %v5808_v30 = vld [vmem:[#allocation3 + $0x2b0] sm:$0xf0]  ;;  %v8403_v31 = vld [vmem:[#allocation3 + $0x3a4] sm:$0xf] }
  0x2a   : > { %v5936_v32 = vld [vmem:[#allocation3 + $0x3b0] sm:$0xf0]  ;;  %895 = vmatpush.bf16.msra.mxu1 %v5951_v17  ;;  %v5935_v33 = vor.u32 %v8405_v27, %v5934_v26  ;;  %v5811_v34 = vor.u32 %v8371_v28, %v5808_v30  ;;  %v5790_v35 = vld [vmem:[#allocation3 + $0x280] sm:$0xf]  ;;  %v8369_v36 = vld [vmem:[#allocation3 + $0x28c] sm:$0xf0] }
  0x2b   : > { %908 = vmatpush.bf16.msra.mxu2 %v5827_v21  ;;  %v5918_v37 = vld [vmem:[#allocation3 + $0x380] sm:$0xf]  ;;  %v5939_v38 = vor.u32 %v8403_v31, %v5936_v32  ;;  %v8401_v39 = vld [vmem:[#allocation3 + $0x38c] sm:$0xf0]  ;;  %v8367_v40 = vld [vmem:[#allocation3 + $0x284] sm:$0xf]  ;;  %v5791_v44 = vor.u32 %v8369_v36, %v5790_v35 }
  0x2c   : > { %921 = vmatpush.bf16.msra.mxu3 %v5955_v25  ;;  %v5792_v41 = vld [vmem:[#allocation3 + $0x290] sm:$0xf0]  ;;  %v8399_v42 = vld [vmem:[#allocation3 + $0x384] sm:$0xf]  ;;  %v5919_v45 = vor.u32 %v8401_v39, %v5918_v37  ;;  %v5774_v47 = vld [vmem:[#allocation3 + $0x260] sm:$0xf] }
  0x2d   : > { %v5920_v43 = vld [vmem:[#allocation3 + $0x390] sm:$0xf0]  ;;  %883 = vmatpush.bf16.msra.mxu0 %v5807_v29  ;;  %v5795_v46 = vor.u32 %v8367_v40, %v5792_v41  ;;  %v8365_v48 = vld [vmem:[#allocation3 + $0x26c] sm:$0xf0]  ;;  %v5902_v49 = vld [vmem:[#allocation3 + $0x360] sm:$0xf] }
  0x2e   : > { %896 = vmatpush.bf16.msra.mxu1 %v5935_v33  ;;  %v5923_v50 = vor.u32 %v8399_v42, %v5920_v43  ;;  %v8397_v51 = vld [vmem:[#allocation3 + $0x36c] sm:$0xf0]  ;;  %v8363_v52 = vld [vmem:[#allocation3 + $0x264] sm:$0xf]  ;;  %v5776_v53 = vld [vmem:[#allocation3 + $0x270] sm:$0xf0]  ;;  %v5775_v56 = vor.u32 %v8365_v48, %v5774_v47 }
  0x2f   : > { %909 = vmatpush.bf16.msra.mxu2 %v5811_v34  ;;  %v8395_v54 = vld [vmem:[#allocation3 + $0x364] sm:$0xf]  ;;  %v5904_v55 = vld [vmem:[#allocation3 + $0x370] sm:$0xf0]  ;;  %v5903_v57 = vor.u32 %v8397_v51, %v5902_v49  ;;  %v5779_v58 = vor.u32 %v8363_v52, %v5776_v53  ;;  %v5758_v59 = vld [vmem:[#allocation3 + $0x240] sm:$0xf] }
  0x30   : > { %922 = vmatpush.bf16.msra.mxu3 %v5939_v38  ;;  %v8361_v60 = vld [vmem:[#allocation3 + $0x24c] sm:$0xf0]  ;;  %v5886_v61 = vld [vmem:[#allocation3 + $0x340] sm:$0xf]  ;;  %v5907_v62 = vor.u32 %v8395_v54, %v5904_v55  ;;  %v8359_v0 = vld [vmem:[#allocation3 + $0x244] sm:$0xf] }
  0x31   : > { %884 = vmatpush.bf16.msra.mxu0 %v5791_v44  ;;  %v8393_v63 = vld [vmem:[#allocation3 + $0x34c] sm:$0xf0]  ;;  %v5760_v1 = vld [vmem:[#allocation3 + $0x250] sm:$0xf0]  ;;  %v8391_v2 = vld [vmem:[#allocation3 + $0x344] sm:$0xf]  ;;  %v5759_v4 = vor.u32 %v8361_v60, %v5758_v59 }
  0x32   : > { %897 = vmatpush.bf16.msra.mxu1 %v5919_v45  ;;  %v5888_v3 = vld [vmem:[#allocation3 + $0x350] sm:$0xf0]  ;;  %p402_p6 = scmp.lt.s32.totalorder %s9270_s9, 1  ;;  %v5887_v5 = vor.u32 %v8393_v63, %v5886_v61  ;;  %v5763_v6 = vor.u32 %v8359_v0, %v5760_v1  ;;  %v5742_v7 = vld [vmem:[#allocation3 + $0x220] sm:$0xf]  ;;  %vm1951_vm0 = vcmask 1043456  }
  0x33   : > { %910 = vmatpush.bf16.msra.mxu2 %v5795_v46  ;;  %v8357_v8 = vld [vmem:[#allocation3 + $0x22c] sm:$0xf0]  ;;  %v5870_v9 = vld [vmem:[#allocation3 + $0x320] sm:$0xf]  ;;  %v5891_v10 = vor.u32 %v8391_v2, %v5888_v3  ;;  %v8355_v12 = vld [vmem:[#allocation3 + $0x224] sm:$0xf] }
  0x34   : > { %923 = vmatpush.bf16.msra.mxu3 %v5923_v50  ;;  %v8389_v11 = vld [vmem:[#allocation3 + $0x32c] sm:$0xf0]  ;;  %v5744_v13 = vld [vmem:[#allocation3 + $0x230] sm:$0xf0]  ;;  %v8387_v14 = vld [vmem:[#allocation3 + $0x324] sm:$0xf]  ;;  %v5743_v16 = vor.u32 %v8357_v8, %v5742_v7 }
  0x35   : > { %885 = vmatpush.bf16.msra.mxu0 %v5775_v56  ;;  %v5872_v15 = vld [vmem:[#allocation3 + $0x330] sm:$0xf0]  ;;  %v5726_v17 = vld [vmem:[#allocation3 + $0x200] sm:$0xf]  ;;  %v8353_v18 = vld [vmem:[#allocation3 + $0x20c] sm:$0xf0]  ;;  %v5871_v19 = vor.u32 %v8389_v11, %v5870_v9  ;;  %v5747_v20 = vor.u32 %v8355_v12, %v5744_v13 }
  0x36   : > { %898 = vmatpush.bf16.msra.mxu1 %v5903_v57  ;;  %s9642_s9 = smov (!%p402_p6, %s9270_s9), 1  ;;  %v5854_v21 = vld [vmem:[#allocation3 + $0x300] sm:$0xf]  ;;  %v8385_v22 = vld [vmem:[#allocation3 + $0x30c] sm:$0xf0]  ;;  %v5875_v24 = vor.u32 %v8387_v14, %v5872_v15  ;;  %v5727_v31 = vor.u32 %v8353_v18, %v5726_v17  ;;  %vm5520_vm1 = vcmask 1041408  }
  0x37   : > { %911 = vmatpush.bf16.msra.mxu2 %v5779_v58  ;;  %v8351_v23 = vld [vmem:[#allocation3 + $0x204] sm:$0xf]  ;;  %v5728_v25 = vld [vmem:[#allocation3 + $0x210] sm:$0xf0]  ;;  %v5846_v28 = vld [vmem:[#allocation3 + $0x2e8] sm:$0xf]  ;;  %v5855_v35 = vor.u32 %v8385_v22, %v5854_v21 }
  0x38   : > { %924 = vmatpush.bf16.msra.mxu3 %v5907_v62  ;;  %v8383_v26 = vld [vmem:[#allocation3 + $0x304] sm:$0xf]  ;;  %v5856_v27 = vld [vmem:[#allocation3 + $0x310] sm:$0xf0]  ;;  %v8382_v29 = vld [vmem:[#allocation3 + $0x2f4] sm:$0xf0]  ;;  %v5731_v36 = vor.u32 %v8351_v23, %v5728_v25 }
  0x39   : > { %886 = vmatpush.bf16.msra.mxu0 %v5759_v4  ;;  %v5974_v30 = vld [vmem:[#allocation3 + $0x3e8] sm:$0xf]  ;;  %v8414_v32 = vld [vmem:[#allocation3 + $0x3f4] sm:$0xf0]  ;;  %v8380_v33 = vld [vmem:[#allocation3 + $0x2ec] sm:$0xf]  ;;  %v5859_v39 = vor.u32 %v8383_v26, %v5856_v27  ;;  %v5847_v40 = vor.u32 %v8382_v29, %v5846_v28 }
  0x3a   : > { %899 = vmatpush.bf16.msra.mxu1 %v5887_v5  ;;  %v5848_v34 = vld [vmem:[#allocation3 + $0x2f8] sm:$0xf0]  ;;  %v8412_v37 = vld [vmem:[#allocation3 + $0x3ec] sm:$0xf]  ;;  %s8286_s10 = sshll.u32 %s9642_s9, 2  ;;  %v5975_v41 = vor.u32 %v8414_v32, %v5974_v30  ;;  %s5722_s25 = sshll.u32 %s9642_s9, 1 }
  0x3b   : > { %912 = vmatpush.bf16.msra.mxu2 %v5763_v6  ;;  %v5976_v38 = vld [vmem:[#allocation3 + $0x3f8] sm:$0xf0]  ;;  %v5851_v42 = vor.u32 %v8380_v33, %v5848_v34  ;;  %v5830_v43 = vld [vmem:[#allocation3 + $0x2c8] sm:$0xf]  ;;  %v8378_v44 = vld [vmem:[#allocation3 + $0x2d4] sm:$0xf0]  ;;  %s406_s24 = scalar_lea.vmem %s9630_s0, %s8286_s10  ;;  %s410_s29 = scalar_lea.vmem %s9631_s1, %s5722_s25 }
  0x3c   : > { %925 = vmatpush.bf16.msra.mxu3 %v5891_v10  ;;  %v5958_v45 = vld [vmem:[#allocation3 + $0x3c8] sm:$0xf]  ;;  %v5979_v46 = vor.u32 %v8412_v37, %v5976_v38  ;;  %v8410_v47 = vld [vmem:[#allocation3 + $0x3d4] sm:$0xf0]  ;;  %v8376_v48 = vld [vmem:[#allocation3 + $0x2cc] sm:$0xf]  ;;  %v5831_v52 = vor.u32 %v8378_v44, %v5830_v43  ;;  %s414_s30 = scalar_lea.vmem %s9638_s8, %s8286_s10 }
  0x3d   : > { %887 = vmatpush.bf16.msra.mxu0 %v5743_v16  ;;  %v5832_v49 = vld [vmem:[#allocation3 + $0x2d8] sm:$0xf0]  ;;  %v8408_v50 = vld [vmem:[#allocation3 + $0x3cc] sm:$0xf]  ;;  %v5959_v53 = vor.u32 %v8410_v47, %v5958_v45  ;;  %v5814_v55 = vld [vmem:[#allocation3 + $0x2a8] sm:$0xf] }
  0x3e   : > { %900 = vmatpush.bf16.msra.mxu1 %v5871_v19  ;;  %v5960_v51 = vld [vmem:[#allocation3 + $0x3d8] sm:$0xf0]  ;;  %v5835_v54 = vor.u32 %v8376_v48, %v5832_v49  ;;  %v8374_v56 = vld [vmem:[#allocation3 + $0x2b4] sm:$0xf0]  ;;  %v5942_v57 = vld [vmem:[#allocation3 + $0x3a8] sm:$0xf] }
  0x3f   : > { %913 = vmatpush.bf16.msra.mxu2 %v5747_v20  ;;  %v5963_v58 = vor.u32 %v8408_v50, %v5960_v51  ;;  %v8406_v59 = vld [vmem:[#allocation3 + $0x3b4] sm:$0xf0]  ;;  %v8372_v60 = vld [vmem:[#allocation3 + $0x2ac] sm:$0xf]  ;;  %v5816_v61 = vld [vmem:[#allocation3 + $0x2b8] sm:$0xf0]  ;;  %v5815_v0 = vor.u32 %v8374_v56, %v5814_v55 }
  0x40   : > { %926 = vmatpush.bf16.msra.mxu3 %v5875_v24  ;;  %v8404_v62 = vld [vmem:[#allocation3 + $0x3ac] sm:$0xf]  ;;  %v5944_v63 = vld [vmem:[#allocation3 + $0x3b8] sm:$0xf0]  ;;  %v9345_v1 = vld [vmem:[%s406_s24] sm:$0xf]  ;;  %v5943_v2 = vor.u32 %v8406_v59, %v5942_v57  ;;  %v5819_v3 = vor.u32 %v8372_v60, %v5816_v61 }
  0x41   : > { %888 = vmatpush.bf16.msra.mxu0 %v5727_v31  ;;  %v5798_v4 = vld [vmem:[#allocation3 + $0x288] sm:$0xf]  ;;  %v8370_v5 = vld [vmem:[#allocation3 + $0x294] sm:$0xf0]  ;;  %v416_v7 = vunpack.c.l.bf16 %v9345_v1  ;;  %v5947_v8 = vor.u32 %v8404_v62, %v5944_v63  ;;  %v8368_v10 = vld [vmem:[#allocation3 + $0x28c] sm:$0xf] }
  0x42   : > { %901 = vmatpush.bf16.msra.mxu1 %v5855_v35  ;;  %v5926_v6 = vld [vmem:[#allocation3 + $0x388] sm:$0xf]  ;;  %v8402_v9 = vld [vmem:[#allocation3 + $0x394] sm:$0xf0]  ;;  %v5800_v11 = vld [vmem:[#allocation3 + $0x298] sm:$0xf0]  ;;  %v5799_v14 = vor.u32 %v8370_v5, %v5798_v4 }
  0x43   : > { %914 = vmatpush.bf16.msra.mxu2 %v5731_v36  ;;  %v8400_v12 = vld [vmem:[#allocation3 + $0x38c] sm:$0xf]  ;;  %v5928_v13 = vld [vmem:[#allocation3 + $0x398] sm:$0xf0]  ;;  %419 = vst [vmem:[#allocation1] ss:$2 sm:$0xff] %v416_v7  ;;  %v5927_v15 = vor.u32 %v8402_v9, %v5926_v6  ;;  %v5803_v16 = vor.u32 %v8368_v10, %v5800_v11 }
  0x44   : > { %927 = vmatpush.bf16.msra.mxu3 %v5859_v39  ;;  %v5782_v17 = vld [vmem:[#allocation3 + $0x268] sm:$0xf]  ;;  %v8366_v18 = vld [vmem:[#allocation3 + $0x274] sm:$0xf0]  ;;  %v5931_v20 = vor.u32 %v8400_v12, %v5928_v13  ;;  %v8364_v22 = vld [vmem:[#allocation3 + $0x26c] sm:$0xf] }
  0x45   : > { %933 = vmatpush.bf16.msrb.mxu0 %v5847_v40  ;;  %v5910_v19 = vld [vmem:[#allocation3 + $0x368] sm:$0xf]  ;;  %v8398_v21 = vld [vmem:[#allocation3 + $0x374] sm:$0xf0]  ;;  %v5784_v23 = vld [vmem:[#allocation3 + $0x278] sm:$0xf0]  ;;  %v5783_v27 = vor.u32 %v8366_v18, %v5782_v17 }
  0x46   : > { %946 = vmatpush.bf16.msrb.mxu1 %v5975_v41  ;;  %v8396_v24 = vld [vmem:[#allocation3 + $0x36c] sm:$0xf]  ;;  %v5912_v25 = vld [vmem:[#allocation3 + $0x378] sm:$0xf0]  ;;  %v5766_v26 = vld [vmem:[#allocation3 + $0x248] sm:$0xf]  ;;  %v5911_v31 = vor.u32 %v8398_v21, %v5910_v19  ;;  %v5787_v32 = vor.u32 %v8364_v22, %v5784_v23 }
  0x47   : > { %959 = vmatpush.bf16.msrb.mxu2 %v5851_v42  ;;  %v8362_v28 = vld [vmem:[#allocation3 + $0x254] sm:$0xf0]  ;;  %v5894_v29 = vld [vmem:[#allocation3 + $0x348] sm:$0xf]  ;;  %v8360_v34 = vld [vmem:[#allocation3 + $0x24c] sm:$0xf]  ;;  %v5915_v36 = vor.u32 %v8396_v24, %v5912_v25 }
  0x48   : > { %972 = vmatpush.bf16.msrb.mxu3 %v5979_v46  ;;  %v9353_v30 = vld [vmem:[%s410_s29] sm:$0x3]  ;;  %v8394_v33 = vld [vmem:[#allocation3 + $0x354] sm:$0xf0]  ;;  %v5768_v35 = vld [vmem:[#allocation3 + $0x258] sm:$0xf0]  ;;  %v5767_v41 = vor.u32 %v8362_v28, %v5766_v26 }
  0x49   : > { %934 = vmatpush.bf16.msrb.mxu0 %v5831_v52  ;;  %v8392_v39 = vld [vmem:[#allocation3 + $0x34c] sm:$0xf]  ;;  %v5896_v40 = vld [vmem:[#allocation3 + $0x358] sm:$0xf0]  ;;  %v5750_v42 = vld [vmem:[#allocation3 + $0x228] sm:$0xf]  ;;  %v5895_v43 = vor.u32 %v8394_v33, %v5894_v29  ;;  %v5771_v44 = vor.u32 %v8360_v34, %v5768_v35 }
  0x4a   : > { %947 = vmatpush.bf16.msrb.mxu1 %v5959_v53  ;;  %v9355_v37 = vld.sshfl [vmem:[#allocation1] sm:$0xff pattern:$0x75316420]  ;;  %v9357_v38 = vld.sshfl [vmem:[#allocation1 + $0x8] sm:$0xff pattern:$0x75316420]  ;;  %v5899_v48 = vor.u32 %v8392_v39, %v5896_v40 }
  0x4b   : > { %960 = vmatpush.bf16.msrb.mxu2 %v5835_v54  ;;  %556 = vst [vmem:[#allocation1] ss:$9 sm:$0xff] %v9353_v30  ;;  %v8358_v45 = vld [vmem:[#allocation3 + $0x234] sm:$0xf0]  ;;  %v5878_v46 = vld [vmem:[#allocation3 + $0x328] sm:$0xf] }
  0x4c   : > { %973 = vmatpush.bf16.msrb.mxu3 %v5963_v58  ;;  %v8390_v47 = vld [vmem:[#allocation3 + $0x334] sm:$0xf0]  ;;  %v8356_v49 = vld [vmem:[#allocation3 + $0x22c] sm:$0xf]  ;;  %v5752_v50 = vld [vmem:[#allocation3 + $0x238] sm:$0xf0]  ;;  %v5751_v55 = vor.u32 %v8358_v45, %v5750_v42 }
  0x4d   : > { %935 = vmatpush.bf16.msrb.mxu0 %v5815_v0  ;;  %v8388_v51 = vld [vmem:[#allocation3 + $0x32c] sm:$0xf]  ;;  %v5880_v52 = vld [vmem:[#allocation3 + $0x338] sm:$0xf0]  ;;  %v5734_v53 = vld [vmem:[#allocation3 + $0x208] sm:$0xf]  ;;  %v5879_v59 = vor.u32 %v8390_v47, %v5878_v46  ;;  %v5755_v60 = vor.u32 %v8356_v49, %v5752_v50 }
  0x4e   : > { %948 = vmatpush.bf16.msrb.mxu1 %v5943_v2  ;;  %v8354_v54 = vld [vmem:[#allocation3 + $0x214] sm:$0xf0]  ;;  %v5862_v56 = vld [vmem:[#allocation3 + $0x308] sm:$0xf]  ;;  %v8352_v58 = vld [vmem:[#allocation3 + $0x20c] sm:$0xf] }
  0x4f   : > { %961 = vmatpush.bf16.msrb.mxu2 %v5819_v3  ;;  %v8386_v57 = vld [vmem:[#allocation3 + $0x314] sm:$0xf0]  ;;  %v5736_v61 = vld [vmem:[#allocation3 + $0x218] sm:$0xf0]  ;;  %v8384_v62 = vld [vmem:[#allocation3 + $0x30c] sm:$0xf]  ;;  %v5883_v3 = vor.u32 %v8388_v51, %v5880_v52 }
  0x50   : > { %974 = vmatpush.bf16.msrb.mxu3 %v5947_v8  ;;  %v5864_v63 = vld [vmem:[#allocation3 + $0x318] sm:$0xf0]  ;;  %v6094_v4 = vld [vmem:[#allocation3 + $0xe0] sm:$0xf]  ;;  %v8317_v5 = vld [vmem:[#allocation3 + $0xec] sm:$0xf0]  ;;  %v5735_v8 = vor.u32 %v8354_v54, %v5734_v53  ;;  %v5863_v12 = vor.u32 %v8386_v57, %v5862_v56  ;;  %v5739_v13 = vor.u32 %v8352_v58, %v5736_v61 }
  0x51   : > { %936 = vmatpush.bf16.msrb.mxu0 %v5799_v14  ;;  %v6222_v6 = vld [vmem:[#allocation3 + $0x1e0] sm:$0xf]  ;;  %v8349_v9 = vld [vmem:[#allocation3 + $0x1ec] sm:$0xf0]  ;;  %v8315_v10 = vld [vmem:[#allocation3 + $0xe4] sm:$0xf]  ;;  %v5867_v1 = vor.u32 %v8384_v62, %v5864_v63 }
  0x52   : > { %949 = vmatpush.bf16.msrb.mxu1 %v5927_v15  ;;  %v9360_v0 = vld [vmem:[#allocation1] sm:$0xff]  ;;  %v9362_v2 = vld [vmem:[#allocation1 + $0x9] sm:$0xff]  ;;  %v8347_v14 = vld [vmem:[#allocation3 + $0x1e4] sm:$0xf]  ;;  %vm5567_vm3 = vcmask 1040384   ;;  %vm5569_vm4 = vcmask 1042434  }
  0x53   : > { %962 = vmatpush.bf16.msrb.mxu2 %v5803_v16  ;;  %928 = vmatmul.bf16.vlgmr.msra.gmra.mxu3 %v9362_v2  ;;  %1409 = vst [vmem:[#allocation1] ss:$2 sm:$0xff] %v416_v7  ;;  %v6096_v11 = vld [vmem:[#allocation3 + $0xf0] sm:$0xf0]  ;;  %v6095_v7 = vor.u32 %v8317_v5, %v6094_v4  ;;  %v6223_v16 = vor.u32 %v8349_v9, %v6222_v6  ;;  %v6078_v18 = vld [vmem:[#allocation3 + $0xc0] sm:$0xf] }
  0x54   : > { %975 = vmatpush.bf16.msrb.mxu3 %v5931_v20  ;;  %915 = vmatmul.bf16.vlgmr.msra.gmra.mxu2 %v9360_v0  ;;  %v6224_v15 = vld [vmem:[#allocation3 + $0x1f0] sm:$0xf0]  ;;  %v6099_v17 = vor.u32 %v8315_v10, %v6096_v11  ;;  %v8313_v19 = vld [vmem:[#allocation3 + $0xcc] sm:$0xf0]  ;;  %v6206_v20 = vld [vmem:[#allocation3 + $0x1c0] sm:$0xf] }
  0x55   : > { %937 = vmatpush.bf16.msrb.mxu0 %v5783_v27  ;;  %902 = vmatmul.bf16.vlgmr.msra.gmra.mxu1 %v9362_v2  ;;  %v6227_v21 = vor.u32 %v8347_v14, %v6224_v15  ;;  %v8345_v22 = vld [vmem:[#allocation3 + $0x1cc] sm:$0xf0]  ;;  %v8311_v23 = vld [vmem:[#allocation3 + $0xc4] sm:$0xf]  ;;  %v6080_v24 = vld [vmem:[#allocation3 + $0xd0] sm:$0xf0]  ;;  %v6079_v27 = vor.u32 %v8313_v19, %v6078_v18 }
  0x56   : > { %950 = vmatpush.bf16.msrb.mxu1 %v5911_v31  ;;  %889 = vmatmul.bf16.vlgmr.msra.gmra.mxu0 %v9360_v0  ;;  %v8343_v25 = vld [vmem:[#allocation3 + $0x1c4] sm:$0xf]  ;;  %v6208_v26 = vld [vmem:[#allocation3 + $0x1d0] sm:$0xf0]  ;;  %v6207_v28 = vor.u32 %v8345_v22, %v6206_v20  ;;  %v6083_v29 = vor.u32 %v8311_v23, %v6080_v24  ;;  %v6062_v31 = vld [vmem:[#allocation3 + $0xa0] sm:$0xf] }
  0x57   : > { %963 = vmatpush.bf16.msrb.mxu2 %v5787_v32  ;;  %v8309_v32 = vld [vmem:[#allocation3 + $0xac] sm:$0xf0]  ;;  %v6190_v33 = vld [vmem:[#allocation3 + $0x1a0] sm:$0xf]  ;;  %v6211_v34 = vor.u32 %v8343_v25, %v6208_v26  ;;  %v6064_v39 = vld [vmem:[#allocation3 + $0xb0] sm:$0xf0] }
  0x58   : > { %976 = vmatpush.bf16.msrb.mxu3 %v5915_v36  ;;  %v8341_v35 = vld [vmem:[#allocation3 + $0x1ac] sm:$0xf0]  ;;  %v8307_v36 = vld [vmem:[#allocation3 + $0xa4] sm:$0xf]  ;;  %v6063_v42 = vor.u32 %v8309_v32, %v6062_v31  ;;  %v6046_v45 = vld [vmem:[#allocation3 + $0x80] sm:$0xf] }
  0x59   : > { %938 = vmatpush.bf16.msrb.mxu0 %v5767_v41  ;;  %v8339_v40 = vld [vmem:[#allocation3 + $0x1a4] sm:$0xf]  ;;  %v6192_v41 = vld [vmem:[#allocation3 + $0x1b0] sm:$0xf0]  ;;  %v8305_v46 = vld [vmem:[#allocation3 + $0x8c] sm:$0xf0] }
  0x5a   : > { %951 = vmatpush.bf16.msrb.mxu1 %v5895_v43  ;;  %v6191_v43 = vor.u32 %v8341_v35, %v6190_v33  ;;  %v6174_v47 = vld [vmem:[#allocation3 + $0x180] sm:$0xf]  ;;  %v8337_v49 = vld [vmem:[#allocation3 + $0x18c] sm:$0xf0]  ;;  %v8303_v50 = vld [vmem:[#allocation3 + $0x84] sm:$0xf]  ;;  %v6047_v54 = vor.u32 %v8305_v46, %v6046_v45 }
  0x5b   : > { %964 = vmatpush.bf16.msrb.mxu2 %v5771_v44  ;;  %v6067_v44 = vor.u32 %v8307_v36, %v6064_v39  ;;  %v6048_v51 = vld [vmem:[#allocation3 + $0x90] sm:$0xf0]  ;;  %v8335_v52 = vld [vmem:[#allocation3 + $0x184] sm:$0xf]  ;;  %v6030_v57 = vld [vmem:[#allocation3 + $0x60] sm:$0xf] }
  0x5c   : > { %977 = vmatpush.bf16.msrb.mxu3 %v5899_v48  ;;  %v6195_v48 = vor.u32 %v8339_v40, %v6192_v41  ;;  %v6176_v53 = vld [vmem:[#allocation3 + $0x190] sm:$0xf0]  ;;  %v6051_v56 = vor.u32 %v8303_v50, %v6048_v51  ;;  %v8301_v58 = vld [vmem:[#allocation3 + $0x6c] sm:$0xf0]  ;;  %v8299_v62 = vld [vmem:[#allocation3 + $0x64] sm:$0xf] }
  0x5d   : > { %939 = vmatpush.bf16.msrb.mxu0 %v5751_v55  ;;  %v6175_v55 = vor.u32 %v8337_v49, %v6174_v47  ;;  %v8333_v61 = vld [vmem:[#allocation3 + $0x16c] sm:$0xf0]  ;;  %v6032_v63 = vld [vmem:[#allocation3 + $0x70] sm:$0xf0]  ;;  %v6031_v5 = vor.u32 %v8301_v58, %v6030_v57  ;;  %v6014_v9 = vld [vmem:[#allocation3 + $0x40] sm:$0xf] }
  0x5e   : > { %952 = vmatpush.bf16.msrb.mxu1 %v5879_v59  ;;  %v6158_v59 = vld [vmem:[#allocation3 + $0x160] sm:$0xf]  ;;  %v6160_v4 = vld [vmem:[#allocation3 + $0x170] sm:$0xf0]  ;;  %v8297_v10 = vld [vmem:[#allocation3 + $0x4c] sm:$0xf0] }
  0x5f   : > { %965 = vmatpush.bf16.msrb.mxu2 %v5755_v60  ;;  %v6179_v60 = vor.u32 %v8335_v52, %v6176_v53  ;;  %v6159_v6 = vor.u32 %v8333_v61, %v6158_v59  ;;  %v6142_v11 = vld [vmem:[#allocation3 + $0x140] sm:$0xf]  ;;  %v8295_v14 = vld [vmem:[#allocation3 + $0x44] sm:$0xf]  ;;  %v6016_v15 = vld [vmem:[#allocation3 + $0x50] sm:$0xf0] }
  0x60   : > { %978 = vmatpush.bf16.msrb.mxu3 %v5883_v3  ;;  %v8331_v3 = vld [vmem:[#allocation3 + $0x164] sm:$0xf]  ;;  %v5998_v18 = vld [vmem:[#allocation3 + $0x20] sm:$0xf]  ;;  %v8293_v19 = vld [vmem:[#allocation3 + $0x2c] sm:$0xf0] }
  0x61   : > { %940 = vmatpush.bf16.msrb.mxu0 %v5735_v8  ;;  %v6035_v8 = vor.u32 %v8299_v62, %v6032_v63  ;;  %v6126_v20 = vld [vmem:[#allocation3 + $0x120] sm:$0xf]  ;;  %v8325_v22 = vld [vmem:[#allocation3 + $0x12c] sm:$0xf0]  ;;  %v8291_v23 = vld [vmem:[#allocation3 + $0x24] sm:$0xf]  ;;  %v5999_v26 = vor.u32 %v8293_v19, %v5998_v18 }
  0x62   : > { %953 = vmatpush.bf16.msrb.mxu1 %v5863_v12  ;;  %v6163_v12 = vor.u32 %v8331_v3, %v6160_v4  ;;  %v8323_v24 = vld [vmem:[#allocation3 + $0x124] sm:$0xf]  ;;  %v6128_v25 = vld [vmem:[#allocation3 + $0x130] sm:$0xf0]  ;;  %v6110_v32 = vld [vmem:[#allocation3 + $0x100] sm:$0xf]  ;;  %v9380_v3 = vpack.c.bf16 %v9357_v38, %v9357_v38 }
  0x63   : > { %966 = vmatpush.bf16.msrb.mxu2 %v5739_v13  ;;  %v8329_v13 = vld [vmem:[#allocation3 + $0x14c] sm:$0xf0]  ;;  %v6131_v35 = vor.u32 %v8323_v24, %v6128_v25  ;;  %v5984_v36 = vld [vmem:[#allocation3 + $0x10] sm:$0xf0]  ;;  %v8319_v39 = vld [vmem:[#allocation3 + $0x104] sm:$0xf] }
  0x64   : > { %979 = vmatpush.bf16.msrb.mxu3 %v5867_v1  ;;  %v8327_v1 = vld [vmem:[#allocation3 + $0x144] sm:$0xf]  ;;  %v8321_v33 = vld [vmem:[#allocation3 + $0x10c] sm:$0xf0]  ;;  %v6112_v40 = vld [vmem:[#allocation3 + $0x110] sm:$0xf0] }
  0x65   : > { %1305 = vmatpush.bf16.msra.mxu0 %v6095_v7  ;;  %954 = vmatmul.bf16.vlgmr.msrb.gmra.mxu1 %v9362_v2  ;;  %v6144_v7 = vld [vmem:[#allocation3 + $0x150] sm:$0xf0]  ;;  %v6102_v41 = vld [vmem:[#allocation3 + $0xe8] sm:$0xf]  ;;  %v8350_v45 = vld [vmem:[#allocation3 + $0x1f4] sm:$0xf0]  ;;  %v6115_v52 = vor.u32 %v8319_v39, %v6112_v40 }
  0x66   : > { %1318 = vmatpush.bf16.msra.mxu1 %v6223_v16  ;;  %967 = vmatmul.bf16.vlgmr.msrb.gmra.mxu2 %v9360_v0  ;;  %v6143_v16 = vor.u32 %v8329_v13, %v6142_v11  ;;  %v8316_v46 = vld [vmem:[#allocation3 + $0xec] sm:$0xf]  ;;  %v6104_v47 = vld [vmem:[#allocation3 + $0xf8] sm:$0xf0]  ;;  %v8314_v57 = vld [vmem:[#allocation3 + $0xd4] sm:$0xf0] }
  0x67   : > { %1331 = vmatpush.bf16.msra.mxu2 %v6099_v17  ;;  %980 = vmatmul.bf16.vlgmr.msrb.gmra.mxu3 %v9362_v2  ;;  %v6015_v2 = vor.u32 %v8297_v10, %v6014_v9  ;;  %v6019_v17 = vor.u32 %v8295_v14, %v6016_v15  ;;  %v8348_v50 = vld [vmem:[#allocation3 + $0x1ec] sm:$0xf]  ;;  %v6232_v51 = vld [vmem:[#allocation3 + $0x1f8] sm:$0xf0]  ;;  %v6214_v58 = vld [vmem:[#allocation3 + $0x1c8] sm:$0xf] }
  0x68   : > { %1344 = vmatpush.bf16.msra.mxu3 %v6227_v21  ;;  %941 = vmatmul.bf16.vlgmr.msrb.gmra.mxu0 %v9360_v0  ;;  %v6147_v21 = vor.u32 %v8327_v1, %v6144_v7  ;;  %v6000_v0 = vld [vmem:[#allocation3 + $0x30] sm:$0xf0]  ;;  %v6235_v59 = vor.u32 %v8348_v50, %v6232_v51  ;;  %v8346_v61 = vld [vmem:[#allocation3 + $0x1d4] sm:$0xf0]  ;;  %v8312_v62 = vld [vmem:[#allocation3 + $0xcc] sm:$0xf] }
  0x69   : > { %1306 = vmatpush.bf16.msra.mxu0 %v6079_v27  ;;  %v5982_v27 = vld [vmem:[#allocation3] sm:$0xf]  ;;  %v6003_v31 = vor.u32 %v8291_v23, %v6000_v0  ;;  %v6088_v63 = vld [vmem:[#allocation3 + $0xd8] sm:$0xf0]  ;;  %v8344_v4 = vld [vmem:[#allocation3 + $0x1cc] sm:$0xf] }
  0x6a   : > { %1319 = vmatpush.bf16.msra.mxu1 %v6207_v28  ;;  %v8289_v28 = vld [vmem:[#allocation3 + $0xc] sm:$0xf0]  ;;  %v6091_v9 = vor.u32 %v8312_v62, %v6088_v63  ;;  %v8310_v10 = vld [vmem:[#allocation3 + $0xb4] sm:$0xf0]  ;;  %v6198_v11 = vld [vmem:[#allocation3 + $0x1a8] sm:$0xf] }
  0x6b   : > { %1332 = vmatpush.bf16.msra.mxu2 %v6083_v29  ;;  %v6127_v29 = vor.u32 %v8325_v22, %v6126_v20  ;;  %v8342_v13 = vld [vmem:[#allocation3 + $0x1b4] sm:$0xf0]  ;;  %v8308_v14 = vld [vmem:[#allocation3 + $0xac] sm:$0xf]  ;;  %v6072_v38 = vld [vmem:[#allocation3 + $0xb8] sm:$0xf0] }
  0x6c   : > { %1345 = vmatpush.bf16.msra.mxu3 %v6211_v34  ;;  %v8287_v34 = vld [vmem:[#allocation3 + $0x4] sm:$0xf]  ;;  %v8340_v15 = vld [vmem:[#allocation3 + $0x1ac] sm:$0xf]  ;;  %v6200_v1 = vld [vmem:[#allocation3 + $0x1b8] sm:$0xf0] }
  0x6d   : > { %1307 = vmatpush.bf16.msra.mxu0 %v6063_v42  ;;  %v8318_v42 = vld [vmem:[#allocation3 + $0xf4] sm:$0xf0]  ;;  %v5987_v49 = vor.u32 %v8287_v34, %v5984_v36  ;;  %v6182_v19 = vld [vmem:[#allocation3 + $0x188] sm:$0xf]  ;;  %v6203_v20 = vor.u32 %v8340_v15, %v6200_v1  ;;  %v8304_v22 = vld [vmem:[#allocation3 + $0x8c] sm:$0xf] }
  0x6e   : > { %1320 = vmatpush.bf16.msra.mxu1 %v6191_v43  ;;  %v6230_v43 = vld [vmem:[#allocation3 + $0x1e8] sm:$0xf]  ;;  %v6103_v53 = vor.u32 %v8318_v42, %v6102_v41  ;;  %v8306_v18 = vld [vmem:[#allocation3 + $0x94] sm:$0xf0]  ;;  %v6056_v23 = vld [vmem:[#allocation3 + $0x98] sm:$0xf0] }
  0x6f   : > { %1333 = vmatpush.bf16.msra.mxu2 %v6067_v44  ;;  %v5983_v44 = vor.u32 %v8289_v28, %v5982_v27  ;;  %v8336_v0 = vld [vmem:[#allocation3 + $0x18c] sm:$0xf]  ;;  %v6184_v24 = vld [vmem:[#allocation3 + $0x198] sm:$0xf0]  ;;  %v6059_v27 = vor.u32 %v8304_v22, %v6056_v23  ;;  %v6038_v28 = vld [vmem:[#allocation3 + $0x68] sm:$0xf] }
  0x70   : > { %1346 = vmatpush.bf16.msra.mxu3 %v6195_v48  ;;  %v6111_v48 = vor.u32 %v8321_v33, %v6110_v32  ;;  %v6187_v32 = vor.u32 %v8336_v0, %v6184_v24  ;;  %v8334_v33 = vld [vmem:[#allocation3 + $0x174] sm:$0xf0]  ;;  %v8300_v34 = vld [vmem:[#allocation3 + $0x6c] sm:$0xf]  ;;  %v6168_v39 = vld [vmem:[#allocation3 + $0x178] sm:$0xf0] }
  0x71   : > { %1308 = vmatpush.bf16.msra.mxu0 %v6047_v54  ;;  %v6231_v54 = vor.u32 %v8350_v45, %v6230_v43  ;;  %v8332_v36 = vld [vmem:[#allocation3 + $0x16c] sm:$0xf]  ;;  %v6022_v43 = vld [vmem:[#allocation3 + $0x48] sm:$0xf]  ;;  %v6152_v51 = vld [vmem:[#allocation3 + $0x158] sm:$0xf0] }
  0x72   : > { %1321 = vmatpush.bf16.msra.mxu1 %v6175_v55  ;;  %v6107_v55 = vor.u32 %v8316_v46, %v6104_v47  ;;  %v6150_v45 = vld [vmem:[#allocation3 + $0x148] sm:$0xf]  ;;  %v6171_v46 = vor.u32 %v8332_v36, %v6168_v39  ;;  %v8330_v47 = vld [vmem:[#allocation3 + $0x154] sm:$0xf0]  ;;  %v8328_v50 = vld [vmem:[#allocation3 + $0x14c] sm:$0xf] }
  0x73   : > { %1334 = vmatpush.bf16.msra.mxu2 %v6051_v56  ;;  %v6086_v56 = vld [vmem:[#allocation3 + $0xc8] sm:$0xf]  ;;  %v6008_v62 = vld [vmem:[#allocation3 + $0x38] sm:$0xf0]  ;;  %v8324_v63 = vld [vmem:[#allocation3 + $0x12c] sm:$0xf] }
  0x74   : > { %1347 = vmatpush.bf16.msra.mxu3 %v6179_v60  ;;  %v9376_v60 = vpack.c.bf16 %v9355_v37, %v9355_v37  ;;  %v6070_v37 = vld [vmem:[#allocation3 + $0xa8] sm:$0xf]  ;;  %v6120_v15 = vld [vmem:[#allocation3 + $0x118] sm:$0xf0]  ;;  %v6350_v1 = vld [vmem:[#allocation3 + $0x4e0] sm:$0xf] }
  0x75   : > { %1309 = vmatpush.bf16.msra.mxu0 %v6031_v5  ;;  %v6216_v5 = vld [vmem:[#allocation3 + $0x1d8] sm:$0xf0]  ;;  %v6071_v7 = vor.u32 %v8310_v10, %v6070_v37  ;;  %v6118_v10 = vld [vmem:[#allocation3 + $0x108] sm:$0xf]  ;;  %v8475_v22 = vld [vmem:[#allocation3 + $0x5e4] sm:$0xf] }
  0x76   : > { %1322 = vmatpush.bf16.msra.mxu1 %v6159_v6  ;;  %v6087_v6 = vor.u32 %v8314_v57, %v6086_v56  ;;  %v8294_v56 = vld [vmem:[#allocation3 + $0x34] sm:$0xf0]  ;;  %v6134_v57 = vld [vmem:[#allocation3 + $0x128] sm:$0xf]  ;;  %v6480_v23 = vld [vmem:[#allocation3 + $0x5f0] sm:$0xf0] }
  0x77   : > { %1335 = vmatpush.bf16.msra.mxu2 %v6035_v8  ;;  %v6215_v8 = vor.u32 %v8346_v61, %v6214_v58  ;;  %v6155_v58 = vor.u32 %v8328_v50, %v6152_v51  ;;  %v8292_v61 = vld [vmem:[#allocation3 + $0x2c] sm:$0xf]  ;;  %v6464_v36 = vld [vmem:[#allocation3 + $0x5d0] sm:$0xf0] }
  0x78   : > { %1348 = vmatpush.bf16.msra.mxu3 %v6163_v12  ;;  %v6219_v12 = vor.u32 %v8344_v4, %v6216_v5  ;;  %v6136_v4 = vld [vmem:[#allocation3 + $0x138] sm:$0xf0]  ;;  %v6011_v37 = vor.u32 %v8292_v61, %v6008_v62  ;;  %v6448_v50 = vld [vmem:[#allocation3 + $0x5b0] sm:$0xf0]  ;;  %v8463_v61 = vld [vmem:[#allocation3 + $0x584] sm:$0xf] }
  0x79   : > { %1310 = vmatpush.bf16.msra.mxu0 %v6015_v2  ;;  %v6199_v2 = vor.u32 %v8342_v13, %v6198_v11  ;;  %v8322_v11 = vld [vmem:[#allocation3 + $0x114] sm:$0xf0]  ;;  %v6139_v13 = vor.u32 %v8324_v63, %v6136_v4  ;;  %v6432_v62 = vld [vmem:[#allocation3 + $0x590] sm:$0xf0] }
  0x7a   : > { %1323 = vmatpush.bf16.msra.mxu1 %v6143_v16  ;;  %v6075_v16 = vor.u32 %v8308_v14, %v6072_v38  ;;  %v5992_v14 = vld [vmem:[#allocation3 + $0x18] sm:$0xf0]  ;;  %v8320_v38 = vld [vmem:[#allocation3 + $0x10c] sm:$0xf] }
  0x7b   : > { %1336 = vmatpush.bf16.msra.mxu2 %v6019_v17  ;;  %v6054_v17 = vld [vmem:[#allocation3 + $0x88] sm:$0xf]  ;;  %v6123_v0 = vor.u32 %v8320_v38, %v6120_v15  ;;  %v8425_v15 = vld [vmem:[#allocation3 + $0x44c] sm:$0xf0] }
  0x7c   : > { %1349 = vmatpush.bf16.msra.mxu3 %v6147_v21  ;;  %v8338_v21 = vld [vmem:[#allocation3 + $0x194] sm:$0xf0]  ;;  %v6055_v25 = vor.u32 %v8306_v18, %v6054_v17  ;;  %v8477_v17 = vld [vmem:[#allocation3 + $0x5ec] sm:$0xf0]  ;;  %v8443_v18 = vld [vmem:[#allocation3 + $0x4e4] sm:$0xf] }
  0x7d   : > { %1311 = vmatpush.bf16.msra.mxu0 %v5999_v26  ;;  %v6183_v26 = vor.u32 %v8338_v21, %v6182_v19  ;;  %v6352_v19 = vld [vmem:[#allocation3 + $0x4f0] sm:$0xf0] }
  0x7e   : > { %1324 = vmatpush.bf16.msra.mxu1 %v6127_v29  ;;  %v8302_v29 = vld [vmem:[#allocation3 + $0x74] sm:$0xf0] }
  0x7f   : > { %1337 = vmatpush.bf16.msra.mxu2 %v6003_v31  ;;  %v6166_v31 = vld [vmem:[#allocation3 + $0x168] sm:$0xf]  ;;  %v6039_v40 = vor.u32 %v8302_v29, %v6038_v28  ;;  %v8441_v28 = vld [vmem:[#allocation3 + $0x4cc] sm:$0xf0]  ;;  %v6462_v29 = vld [vmem:[#allocation3 + $0x5c0] sm:$0xf] }
  0x80   : > { %1350 = vmatpush.bf16.msra.mxu3 %v6131_v35  ;;  %v6040_v35 = vld [vmem:[#allocation3 + $0x78] sm:$0xf0]  ;;  %v6167_v41 = vor.u32 %v8334_v33, %v6166_v31  ;;  %v6483_v31 = vor.u32 %v8475_v22, %v6480_v23  ;;  %v8439_v33 = vld [vmem:[#allocation3 + $0x4c4] sm:$0xf]  ;;  %v6400_v23 = vld [vmem:[#allocation3 + $0x550] sm:$0xf0] }
  0x81   : > { %1312 = vmatpush.bf16.msra.mxu0 %v5983_v44  ;;  %v6043_v42 = vor.u32 %v8300_v34, %v6040_v35  ;;  %v8298_v44 = vld [vmem:[#allocation3 + $0x54] sm:$0xf0]  ;;  %v6336_v34 = vld [vmem:[#allocation3 + $0x4d0] sm:$0xf0]  ;;  %v8471_v35 = vld [vmem:[#allocation3 + $0x5c4] sm:$0xf] }
  0x82   : > { %1325 = vmatpush.bf16.msra.mxu1 %v6111_v48  ;;  %v8296_v48 = vld [vmem:[#allocation3 + $0x4c] sm:$0xf]  ;;  %v8455_v22 = vld [vmem:[#allocation3 + $0x544] sm:$0xf] }
  0x83   : > { %1338 = vmatpush.bf16.msra.mxu2 %v5987_v49  ;;  %v6024_v49 = vld [vmem:[#allocation3 + $0x58] sm:$0xf0] }
  0x84   : > { %1351 = vmatpush.bf16.msra.mxu3 %v6115_v52  ;;  %1313 = vmatmul.bf16.vlgmr.msra.gmra.mxu0 %v9376_v60  ;;  %v6023_v52 = vor.u32 %v8298_v44, %v6022_v43  ;;  %v8437_v43 = vld [vmem:[#allocation3 + $0x4ac] sm:$0xf0]  ;;  %v6446_v44 = vld [vmem:[#allocation3 + $0x5a0] sm:$0xf] }
  0x85   : > { %1357 = vmatpush.bf16.msrb.mxu0 %v6103_v53  ;;  %1326 = vmatmul.bf16.vlgmr.msra.gmra.mxu1 %v9380_v3  ;;  %v6151_v53 = vor.u32 %v8330_v47, %v6150_v45  ;;  %v6467_v45 = vor.u32 %v8471_v35, %v6464_v36  ;;  %v8435_v47 = vld [vmem:[#allocation3 + $0x4a4] sm:$0xf]  ;;  %v6256_v35 = vld [vmem:[#allocation3 + $0x430] sm:$0xf0] }
  0x86   : > { %1370 = vmatpush.bf16.msrb.mxu1 %v6231_v54  ;;  %1339 = vmatmul.bf16.vlgmr.msra.gmra.mxu2 %v9376_v60  ;;  %v6027_v54 = vor.u32 %v8296_v48, %v6024_v49  ;;  %v6320_v48 = vld [vmem:[#allocation3 + $0x4b0] sm:$0xf0]  ;;  %v8467_v49 = vld [vmem:[#allocation3 + $0x5a4] sm:$0xf] }
  0x87   : > { %1383 = vmatpush.bf16.msrb.mxu2 %v6107_v55  ;;  %1352 = vmatmul.bf16.vlgmr.msra.gmra.mxu3 %v9380_v3  ;;  %v6006_v55 = vld [vmem:[#allocation3 + $0x28] sm:$0xf]  ;;  %v8451_v36 = vld [vmem:[#allocation3 + $0x524] sm:$0xf] }
  0x88   : > { %1396 = vmatpush.bf16.msrb.mxu3 %v6235_v59  ;;  %v8326_v59 = vld [vmem:[#allocation3 + $0x134] sm:$0xf0]  ;;  %v6007_v5 = vor.u32 %v8294_v56, %v6006_v55  ;;  %v8433_v55 = vld [vmem:[#allocation3 + $0x48c] sm:$0xf0]  ;;  %v6430_v56 = vld [vmem:[#allocation3 + $0x580] sm:$0xf] }
  0x89   : > { %1358 = vmatpush.bf16.msrb.mxu0 %v6087_v6  ;;  %v5990_v6 = vld [vmem:[#allocation3 + $0x8] sm:$0xf] }
  0x8a   : > { %1371 = vmatpush.bf16.msrb.mxu1 %v6215_v8  ;;  %v8290_v8 = vld [vmem:[#allocation3 + $0x14] sm:$0xf0] }
  0x8b   : > { %1384 = vmatpush.bf16.msrb.mxu2 %v6091_v9  ;;  %v6135_v9 = vor.u32 %v8326_v59, %v6134_v57  ;;  %v6451_v57 = vor.u32 %v8467_v49, %v6448_v50  ;;  %v8431_v59 = vld [vmem:[#allocation3 + $0x484] sm:$0xf]  ;;  %v6240_v49 = vld [vmem:[#allocation3 + $0x410] sm:$0xf0] }
  0x8c   : > { %1397 = vmatpush.bf16.msrb.mxu3 %v6219_v12  ;;  %v8288_v12 = vld [vmem:[#allocation3 + $0xc] sm:$0xf] }
  0x8d   : > { %1359 = vmatpush.bf16.msrb.mxu0 %v6071_v7  ;;  %v8445_v7 = vld [vmem:[#allocation3 + $0x4ec] sm:$0xf0]  ;;  %v5995_v21 = vor.u32 %v8288_v12, %v5992_v14  ;;  %v8459_v12 = vld [vmem:[#allocation3 + $0x564] sm:$0xf]  ;;  %v6270_v14 = vld [vmem:[#allocation3 + $0x440] sm:$0xf] }
  0x8e   : > { %1372 = vmatpush.bf16.msrb.mxu1 %v6199_v2  ;;  %v6478_v2 = vld [vmem:[#allocation3 + $0x5e0] sm:$0xf]  ;;  %v6351_v24 = vor.u32 %v8445_v7, %v6350_v1  ;;  %v8457_v7 = vld [vmem:[#allocation3 + $0x54c] sm:$0xf0] }
  0x8f   : > { %1385 = vmatpush.bf16.msrb.mxu2 %v6075_v16  ;;  %v5991_v16 = vor.u32 %v8290_v8, %v5990_v6  ;;  %v8429_v6 = vld [vmem:[#allocation3 + $0x46c] sm:$0xf0]  ;;  %v6414_v8 = vld [vmem:[#allocation3 + $0x560] sm:$0xf] }
  0x90   : > { %1398 = vmatpush.bf16.msrb.mxu3 %v6203_v20  ;;  %v6119_v20 = vor.u32 %v8322_v11, %v6118_v10  ;;  %v8427_v10 = vld [vmem:[#allocation3 + $0x464] sm:$0xf]  ;;  %v6288_v11 = vld [vmem:[#allocation3 + $0x470] sm:$0xf0]  ;;  %v6398_v1 = vld [vmem:[#allocation3 + $0x540] sm:$0xf] }
  0x91   : > { %1360 = vmatpush.bf16.msrb.mxu0 %v6055_v25  ;;  %v6479_v25 = vor.u32 %v8477_v17, %v6478_v2  ;;  %v8423_v17 = vld [vmem:[#allocation3 + $0x444] sm:$0xf] }
  0x92   : > { %1373 = vmatpush.bf16.msrb.mxu1 %v6183_v26  ;;  %v6355_v26 = vor.u32 %v8443_v18, %v6352_v19  ;;  %v1410_v18 = vld.sshfl [vmem:[#allocation1] sm:$0xff pattern:$0x75316420] }
  0x93   : > { %1386 = vmatpush.bf16.msrb.mxu2 %v6059_v27  ;;  %v6334_v27 = vld [vmem:[#allocation3 + $0x4c0] sm:$0xf] }
  0x94   : > { %1399 = vmatpush.bf16.msrb.mxu3 %v6187_v32  ;;  %v8473_v32 = vld [vmem:[#allocation3 + $0x5cc] sm:$0xf0]  ;;  %v6335_v39 = vor.u32 %v8441_v28, %v6334_v27 }
  0x95   : > { %1361 = vmatpush.bf16.msrb.mxu0 %v6039_v40  ;;  %v6463_v40 = vor.u32 %v8473_v32, %v6462_v29  ;;  %v8421_v28 = vld [vmem:[#allocation3 + $0x42c] sm:$0xf0]  ;;  %v6382_v29 = vld [vmem:[#allocation3 + $0x520] sm:$0xf] }
  0x96   : > { %1374 = vmatpush.bf16.msrb.mxu1 %v6167_v41  ;;  %v6339_v41 = vor.u32 %v8439_v33, %v6336_v34  ;;  %v6403_v33 = vor.u32 %v8455_v22, %v6400_v23  ;;  %v8419_v34 = vld [vmem:[#allocation3 + $0x424] sm:$0xf]  ;;  %v6326_v22 = vld [vmem:[#allocation3 + $0x4a8] sm:$0xf]  ;;  %v8438_v23 = vld [vmem:[#allocation3 + $0x4b4] sm:$0xf0] }
  0x97   : > { %1387 = vmatpush.bf16.msrb.mxu2 %v6043_v42  ;;  %v6318_v42 = vld [vmem:[#allocation3 + $0x4a0] sm:$0xf] }
  0x98   : > { %1400 = vmatpush.bf16.msrb.mxu3 %v6171_v46  ;;  %v8469_v46 = vld [vmem:[#allocation3 + $0x5ac] sm:$0xf0]  ;;  %v6319_v51 = vor.u32 %v8437_v43, %v6318_v42  ;;  %v6366_v43 = vld [vmem:[#allocation3 + $0x500] sm:$0xf] }
  0x99   : > { %1362 = vmatpush.bf16.msrb.mxu0 %v6023_v52  ;;  %v6447_v52 = vor.u32 %v8469_v46, %v6446_v44  ;;  %v8449_v44 = vld [vmem:[#allocation3 + $0x50c] sm:$0xf0] }
  0x9a   : > { %1375 = vmatpush.bf16.msrb.mxu1 %v6151_v53  ;;  %v6323_v53 = vor.u32 %v8435_v47, %v6320_v48  ;;  %v6259_v47 = vor.u32 %v8419_v34, %v6256_v35  ;;  %v8415_v48 = vld [vmem:[#allocation3 + $0x404] sm:$0xf]  ;;  %v6310_v34 = vld [vmem:[#allocation3 + $0x488] sm:$0xf]  ;;  %v8434_v35 = vld [vmem:[#allocation3 + $0x494] sm:$0xf0] }
  0x9b   : > { %1388 = vmatpush.bf16.msrb.mxu2 %v6027_v54  ;;  %v6302_v54 = vld [vmem:[#allocation3 + $0x480] sm:$0xf] }
  0x9c   : > { %1401 = vmatpush.bf16.msrb.mxu3 %v6155_v58  ;;  %v8465_v58 = vld [vmem:[#allocation3 + $0x58c] sm:$0xf0]  ;;  %v6303_v63 = vor.u32 %v8433_v55, %v6302_v54  ;;  %v6358_v54 = vld [vmem:[#allocation3 + $0x4e8] sm:$0xf]  ;;  %v8446_v55 = vld [vmem:[#allocation3 + $0x4f4] sm:$0xf0] }
  0x9d   : > { %1363 = vmatpush.bf16.msrb.mxu0 %v6007_v5  ;;  %v6286_v5 = vld [vmem:[#allocation3 + $0x460] sm:$0xf] }
  0x9e   : > { %1376 = vmatpush.bf16.msrb.mxu1 %v6135_v9  ;;  %v6435_v9 = vor.u32 %v8463_v61, %v6432_v62  ;;  %v6287_v38 = vor.u32 %v8429_v6, %v6286_v5  ;;  %v6488_v5 = vld [vmem:[#allocation3 + $0x5f8] sm:$0xf0] }
  0x9f   : > { %1389 = vmatpush.bf16.msrb.mxu2 %v6011_v37  ;;  %v8461_v37 = vld [vmem:[#allocation3 + $0x56c] sm:$0xf0] }
  0xa0   : > { %1402 = vmatpush.bf16.msrb.mxu3 %v6139_v13  ;;  %v6416_v13 = vld [vmem:[#allocation3 + $0x570] sm:$0xf0]  ;;  %v6415_v2 = vor.u32 %v8461_v37, %v6414_v8  ;;  %v6359_v37 = vor.u32 %v8446_v55, %v6358_v54  ;;  %v6296_v54 = vld [vmem:[#allocation3 + $0x478] sm:$0xf0]  ;;  %v8460_v55 = vld [vmem:[#allocation3 + $0x56c] sm:$0xf] }
  0xa1   : > { %1364 = vmatpush.bf16.msrb.mxu0 %v5991_v16  ;;  %v6291_v16 = vor.u32 %v8427_v10, %v6288_v11  ;;  %v6419_v19 = vor.u32 %v8459_v12, %v6416_v13  ;;  %v6342_v12 = vld [vmem:[#allocation3 + $0x4c8] sm:$0xf]  ;;  %v8442_v13 = vld [vmem:[#allocation3 + $0x4d4] sm:$0xf0] }
  0xa2   : > { %1377 = vmatpush.bf16.msrb.mxu1 %v6119_v20  ;;  %v6272_v20 = vld [vmem:[#allocation3 + $0x450] sm:$0xf0] }
  0xa3   : > { %1390 = vmatpush.bf16.msrb.mxu2 %v5995_v21  ;;  %v1411_v21 = vld.sshfl [vmem:[#allocation1 + $0x8] sm:$0xff pattern:$0x75316420]  ;;  %v6275_v27 = vor.u32 %v8423_v17, %v6272_v20  ;;  %v8472_v17 = vld [vmem:[#allocation3 + $0x5cc] sm:$0xf] }
  0xa4   : > { %1403 = vmatpush.bf16.msrb.mxu3 %v6123_v0  ;;  %1365 = vmatmul.bf16.vlgmr.msrb.gmra.mxu0 %v9376_v60  ;;  %v6271_v0 = vor.u32 %v8425_v15, %v6270_v14  ;;  %v1415_v32 = vpack.c.bf16 %v1411_v21, %v1411_v21  ;;  %v6470_v14 = vld [vmem:[#allocation3 + $0x5c8] sm:$0xf] }
  0xa5   : > { %1817 = vmatpush.bf16.msra.mxu0 %v6351_v24  ;;  %1378 = vmatmul.bf16.vlgmr.msrb.gmra.mxu1 %v9380_v3  ;;  %v6254_v24 = vld [vmem:[#allocation3 + $0x420] sm:$0xf] }
  0xa6   : > { %1830 = vmatpush.bf16.msra.mxu1 %v6479_v25  ;;  %1391 = vmatmul.bf16.vlgmr.msrb.gmra.mxu2 %v9376_v60  ;;  %v6304_v60 = vld [vmem:[#allocation3 + $0x490] sm:$0xf0]  ;;  %v1414_v25 = vpack.c.bf16 %v1410_v18, %v1410_v18  ;;  %v6255_v42 = vor.u32 %v8421_v28, %v6254_v24  ;;  %v1491_v50 = vshll.u32 %v1415_v32, 16  ;;  %v1489_v6 = vshrl.u32 %v1415_v32, 16  ;;  %v6472_v18 = vld [vmem:[#allocation3 + $0x5d8] sm:$0xf0] }
  0xa7   : > { %1843 = vmatpush.bf16.msra.mxu2 %v6355_v26  ;;  %1404 = vmatmul.bf16.vlgmr.msrb.gmra.mxu3 %v9380_v3  ;;  %v6431_v3 = vor.u32 %v8465_v58, %v6430_v56  ;;  %v6307_v4 = vor.u32 %v8431_v59, %v6304_v60  ;;  %v6399_v26 = vor.u32 %v8457_v7, %v6398_v1  ;;  %v6486_v56 = vld [vmem:[#allocation3 + $0x5e8] sm:$0xf]  ;;  %v8444_v59 = vld [vmem:[#allocation3 + $0x4ec] sm:$0xf]  ;;  %v6360_v60 = vld [vmem:[#allocation3 + $0x4f8] sm:$0xf0] }
  0xa8   : > { %1856 = vmatpush.bf16.msra.mxu3 %v6483_v31  ;;  %v8453_v31 = vld [vmem:[#allocation3 + $0x52c] sm:$0xf0]  ;;  %v1482_v61 = vshrl.u32 %v1414_v25, 16  ;;  %v1493_v8 = vrot.slane %v1491_v50, 1  ;;  %v6363_v11 = vor.u32 %v8444_v59, %v6360_v60  ;;  %v8474_v1 = vld [vmem:[#allocation3 + $0x5d4] sm:$0xf0]  ;;  %v6475_v24 = vor.u32 %v8472_v17, %v6472_v18 }
  0xa9   : > { %1818 = vmatpush.bf16.msra.mxu0 %v6335_v39  ;;  %v6384_v39 = vld [vmem:[#allocation3 + $0x530] sm:$0xf0]  ;;  %v6383_v46 = vor.u32 %v8453_v31, %v6382_v29  ;;  %v8440_v7 = vld [vmem:[#allocation3 + $0x4cc] sm:$0xf]  ;;  %v6471_v20 = vor.u32 %v8474_v1, %v6470_v14  ;;  %v6456_v29 = vld [vmem:[#allocation3 + $0x5b8] sm:$0xf0]  ;;  %v6327_v31 = vor.u32 %v8438_v23, %v6326_v22 }
  0xaa   : > { %1831 = vmatpush.bf16.msra.mxu1 %v6463_v40  ;;  %v6238_v40 = vld [vmem:[#allocation3 + $0x400] sm:$0xf]  ;;  %v8468_v28 = vld [vmem:[#allocation3 + $0x5ac] sm:$0xf]  ;;  %v6422_v50 = vld [vmem:[#allocation3 + $0x568] sm:$0xf] }
  0xab   : > { %1844 = vmatpush.bf16.msra.mxu2 %v6339_v41  ;;  %v8417_v41 = vld [vmem:[#allocation3 + $0x40c] sm:$0xf0]  ;;  %v6278_v60 = vld [vmem:[#allocation3 + $0x448] sm:$0xf]  ;;  %v8420_v1 = vld [vmem:[#allocation3 + $0x42c] sm:$0xf] }
  0xac   : > { %1857 = vmatpush.bf16.msra.mxu3 %v6467_v45  ;;  %v1484_v45 = vshll.u32 %v1414_v25, 16  ;;  %v6239_v58 = vor.u32 %v8417_v41, %v6238_v40  ;;  %v8470_v25 = vld [vmem:[#allocation3 + $0x5b4] sm:$0xf0]  ;;  %v8432_v41 = vld [vmem:[#allocation3 + $0x48c] sm:$0xf] }
  0xad   : > { %1819 = vmatpush.bf16.msra.mxu0 %v6319_v51  ;;  %v6387_v51 = vor.u32 %v8451_v36, %v6384_v39  ;;  %v6438_v36 = vld [vmem:[#allocation3 + $0x588] sm:$0xf]  ;;  %v6459_v39 = vor.u32 %v8468_v28, %v6456_v29  ;;  %v8466_v40 = vld [vmem:[#allocation3 + $0x594] sm:$0xf0]  ;;  %v6392_v17 = vld [vmem:[#allocation3 + $0x538] sm:$0xf0] }
  0xae   : > { %1832 = vmatpush.bf16.msra.mxu1 %v6447_v52  ;;  %v8447_v52 = vld [vmem:[#allocation3 + $0x504] sm:$0xf]  ;;  %v1486_v62 = vrot.slane %v1484_v45, 1  ;;  %v6311_v45 = vor.u32 %v8434_v35, %v6310_v34  ;;  %v8418_v22 = vld [vmem:[#allocation3 + $0x414] sm:$0xf0] }
  0xaf   : > { %1845 = vmatpush.bf16.msra.mxu2 %v6323_v53  ;;  %v6368_v53 = vld [vmem:[#allocation3 + $0x510] sm:$0xf0]  ;;  %v6374_v23 = vld [vmem:[#allocation3 + $0x508] sm:$0xf]  ;;  %v6376_v28 = vld [vmem:[#allocation3 + $0x518] sm:$0xf0] }
  0xb0   : > { %1858 = vmatpush.bf16.msra.mxu3 %v6451_v57  ;;  %v8478_v57 = vld [vmem:[#allocation3 + $0x5f4] sm:$0xf0]  ;;  %v9390_v15 = vor.u32 %v1486_v62, %v1482_v61  ;;  %v6406_v62 = vld [vmem:[#allocation3 + $0x548] sm:$0xf] }
  0xb1   : > { %1820 = vmatpush.bf16.msra.mxu0 %v6303_v63  ;;  %v6367_v63 = vor.u32 %v8449_v44, %v6366_v43  ;;  %v6487_v10 = vor.u32 %v8478_v57, %v6486_v56  ;;  %v8464_v43 = vld [vmem:[#allocation3 + $0x58c] sm:$0xf]  ;;  %v6440_v44 = vld [vmem:[#allocation3 + $0x598] sm:$0xf0]  ;;  %v8426_v61 = vld [vmem:[#allocation3 + $0x454] sm:$0xf0] }
  0xb2   : > { %1833 = vmatpush.bf16.msra.mxu1 %v6431_v3  ;;  %v6243_v3 = vor.u32 %v8415_v48, %v6240_v49  ;;  %v6294_v48 = vld [vmem:[#allocation3 + $0x468] sm:$0xf]  ;;  %v8430_v49 = vld [vmem:[#allocation3 + $0x474] sm:$0xf0]  ;;  %v6424_v56 = vld [vmem:[#allocation3 + $0x578] sm:$0xf0] }
  0xb3   : > { %1846 = vmatpush.bf16.msra.mxu2 %v6307_v4  ;;  %v8476_v4 = vld [vmem:[#allocation3 + $0x5ec] sm:$0xf]  ;;  %v6295_v57 = vor.u32 %v8430_v49, %v6294_v48 }
  0xb4   : > { %1859 = vmatpush.bf16.msra.mxu3 %v6435_v9  ;;  %v6371_v9 = vor.u32 %v8447_v52, %v6368_v53  ;;  %v8462_v52 = vld [vmem:[#allocation3 + $0x574] sm:$0xf0]  ;;  %v8428_v53 = vld [vmem:[#allocation3 + $0x46c] sm:$0xf] }
  0xb5   : > { %1821 = vmatpush.bf16.msra.mxu0 %v6287_v38  ;;  %v6491_v38 = vor.u32 %v8476_v4, %v6488_v5  ;;  %v6299_v59 = vor.u32 %v8428_v53, %v6296_v54  ;;  %v8424_v4 = vld [vmem:[#allocation3 + $0x44c] sm:$0xf]  ;;  %v6280_v5 = vld [vmem:[#allocation3 + $0x458] sm:$0xf0] }
  0xb6   : > { %1834 = vmatpush.bf16.msra.mxu1 %v6415_v2  ;;  %v6344_v2 = vld [vmem:[#allocation3 + $0x4d8] sm:$0xf0] }
  0xb7   : > { %1847 = vmatpush.bf16.msra.mxu2 %v6291_v16  ;;  %v9392_v16 = vor.u32 %v1493_v8, %v1489_v6  ;;  %v6347_v21 = vor.u32 %v8440_v7, %v6344_v2  ;;  %v8456_v6 = vld [vmem:[#allocation3 + $0x54c] sm:$0xf]  ;;  %v6408_v8 = vld [vmem:[#allocation3 + $0x558] sm:$0xf0] }
  0xb8   : > { %1860 = vmatpush.bf16.msra.mxu3 %v6419_v19  ;;  %v6343_v19 = vor.u32 %v8442_v13, %v6342_v12  ;;  %v8422_v12 = vld [vmem:[#allocation3 + $0x434] sm:$0xf0]  ;;  %v6390_v13 = vld [vmem:[#allocation3 + $0x528] sm:$0xf]  ;;  %v6411_v14 = vor.u32 %v8456_v6, %v6408_v8  ;;  %v6264_v7 = vld [vmem:[#allocation3 + $0x438] sm:$0xf0] }
  0xb9   : > { %1822 = vmatpush.bf16.msra.mxu0 %v6271_v0  ;;  %v6454_v0 = vld [vmem:[#allocation3 + $0x5a8] sm:$0xf]  ;;  %v8452_v2 = vld [vmem:[#allocation3 + $0x52c] sm:$0xf]  ;;  %v6590_v8 = vld [vmem:[#allocation7 + $0x4c0] sm:$0xf] }
  0xba   : > { %1835 = vmatpush.bf16.msra.mxu1 %v6399_v26  ;;  %v8436_v26 = vld [vmem:[#allocation3 + $0x4ac] sm:$0xf]  ;;  %v6455_v32 = vor.u32 %v8470_v25, %v6454_v0  ;;  %v6395_v0 = vor.u32 %v8452_v2, %v6392_v17 }
  0xbb   : > { %1848 = vmatpush.bf16.msra.mxu2 %v6275_v27  ;;  %v6328_v27 = vld [vmem:[#allocation3 + $0x4b8] sm:$0xf0]  ;;  %v8416_v25 = vld [vmem:[#allocation3 + $0x40c] sm:$0xf] }
  0xbc   : > { %1861 = vmatpush.bf16.msra.mxu3 %v6403_v33  ;;  %v6331_v33 = vor.u32 %v8436_v26, %v6328_v27  ;;  %v6248_v26 = vld [vmem:[#allocation3 + $0x418] sm:$0xf0]  ;;  %v8448_v27 = vld [vmem:[#allocation3 + $0x50c] sm:$0xf] }
  0xbd   : > { %1823 = vmatpush.bf16.msra.mxu0 %v6255_v42  ;;  %v6312_v42 = vld [vmem:[#allocation3 + $0x498] sm:$0xf0] }
  0xbe   : > { %1836 = vmatpush.bf16.msra.mxu1 %v6383_v46  ;;  %v6439_v46 = vor.u32 %v8466_v40, %v6438_v36 }
  0xbf   : > { %1849 = vmatpush.bf16.msra.mxu2 %v6259_v47  ;;  %v6315_v47 = vor.u32 %v8432_v41, %v6312_v42 }
  0xc0   : > { %1862 = vmatpush.bf16.msra.mxu3 %v6387_v51  ;;  %v6443_v51 = vor.u32 %v8464_v43, %v6440_v44 }
  0xc1   : > { %1824 = vmatpush.bf16.msra.mxu0 %v6239_v58  ;;  %v6423_v58 = vor.u32 %v8462_v52, %v6422_v50 }
  0xc2   : > { %1837 = vmatpush.bf16.msra.mxu1 %v6367_v63  ;;  %v6427_v63 = vor.u32 %v8460_v55, %v6424_v56 }
  0xc3   : > { %1850 = vmatpush.bf16.msra.mxu2 %v6243_v3  ;;  %v8458_v3 = vld [vmem:[#allocation3 + $0x554] sm:$0xf0] }
  0xc4   : > { %1863 = vmatpush.bf16.msra.mxu3 %v6371_v9  ;;  %1825 = vmatmul.bf16.vlgmr.msra.gmra.mxu0 %v9390_v15  ;;  %v6279_v9 = vor.u32 %v8426_v61, %v6278_v60  ;;  %v6606_v61 = vld [vmem:[#allocation7 + $0x4e0] sm:$0xf] }
  0xc5   : > { %1869 = vmatpush.bf16.msrb.mxu0 %v6359_v37  ;;  %1838 = vmatmul.bf16.vlgmr.msra.gmra.mxu1 %v9392_v16  ;;  %v6407_v37 = vor.u32 %v8458_v3, %v6406_v62  ;;  %v8637_v62 = vld [vmem:[#allocation7 + $0x4ec] sm:$0xf0] }
  0xc6   : > { %1882 = vmatpush.bf16.msrb.mxu1 %v6487_v10  ;;  %1851 = vmatmul.bf16.vlgmr.msra.gmra.mxu2 %v9390_v15  ;;  %v6283_v10 = vor.u32 %v8424_v4, %v6280_v5  ;;  %v6607_v4 = vor.u32 %v8637_v62, %v6606_v61  ;;  %v8669_v5 = vld [vmem:[#allocation7 + $0x5ec] sm:$0xf0]  ;;  %v6622_v61 = vld [vmem:[#allocation7 + $0x500] sm:$0xf] }
  0xc7   : > { %1895 = vmatpush.bf16.msrb.mxu2 %v6363_v11  ;;  %1864 = vmatmul.bf16.vlgmr.msra.gmra.mxu3 %v9392_v16  ;;  %v6262_v11 = vld [vmem:[#allocation3 + $0x428] sm:$0xf] }
  0xc8   : > { %1908 = vmatpush.bf16.msrb.mxu3 %v6491_v38  ;;  %v8454_v38 = vld [vmem:[#allocation3 + $0x534] sm:$0xf0]  ;;  %v6263_v18 = vor.u32 %v8422_v12, %v6262_v11  ;;  %v8665_v12 = vld [vmem:[#allocation7 + $0x5cc] sm:$0xf0] }
  0xc9   : > { %1870 = vmatpush.bf16.msrb.mxu0 %v6343_v19  ;;  %v6391_v19 = vor.u32 %v8454_v38, %v6390_v13  ;;  %v6574_v38 = vld [vmem:[#allocation7 + $0x4a0] sm:$0xf] }
  0xca   : > { %1883 = vmatpush.bf16.msrb.mxu1 %v6471_v20  ;;  %v6267_v20 = vor.u32 %v8420_v1, %v6264_v7  ;;  %v8629_v1 = vld [vmem:[#allocation7 + $0x4ac] sm:$0xf0]  ;;  %v6702_v7 = vld [vmem:[#allocation7 + $0x5a0] sm:$0xf] }
  0xcb   : > { %1896 = vmatpush.bf16.msrb.mxu2 %v6347_v21  ;;  %v6246_v21 = vld [vmem:[#allocation3 + $0x408] sm:$0xf]  ;;  %v6575_v17 = vor.u32 %v8629_v1, %v6574_v38  ;;  %v6846_v1 = vld [vmem:[#allocation7 + $0x6c0] sm:$0xf] }
  0xcc   : > { %1909 = vmatpush.bf16.msrb.mxu3 %v6475_v24  ;;  %v8450_v24 = vld [vmem:[#allocation3 + $0x514] sm:$0xf0]  ;;  %v6247_v29 = vor.u32 %v8418_v22, %v6246_v21 }
  0xcd   : > { %1871 = vmatpush.bf16.msrb.mxu0 %v6327_v31  ;;  %v6375_v31 = vor.u32 %v8450_v24, %v6374_v23  ;;  %v6558_v23 = vld [vmem:[#allocation7 + $0x480] sm:$0xf] }
  0xce   : > { %1884 = vmatpush.bf16.msrb.mxu1 %v6455_v32  ;;  %v6251_v32 = vor.u32 %v8416_v25, %v6248_v26  ;;  %v6686_v25 = vld [vmem:[#allocation7 + $0x580] sm:$0xf]  ;;  %v8657_v26 = vld [vmem:[#allocation7 + $0x58c] sm:$0xf0] }
  0xcf   : > { %1897 = vmatpush.bf16.msrb.mxu2 %v6331_v33  ;;  %v6379_v33 = vor.u32 %v8448_v27, %v6376_v28  ;;  %v6687_v27 = vor.u32 %v8657_v26, %v6686_v25  ;;  %v6830_v26 = vld [vmem:[#allocation7 + $0x6a0] sm:$0xf] }
  0xd0   : > { %1910 = vmatpush.bf16.msrb.mxu3 %v6459_v39 }
  0xd1   : > { %1872 = vmatpush.bf16.msrb.mxu0 %v6311_v45 }
  0xd2   : > { %1885 = vmatpush.bf16.msrb.mxu1 %v6439_v46  ;;  %v903_v34 = vpop.f32.mrf.mxu1 }
  0xd3   : > { %1898 = vmatpush.bf16.msrb.mxu2 %v6315_v47  ;;  %v890_v35 = vpop.f32.mrf.mxu0 }
  0xd4   : > { %1911 = vmatpush.bf16.msrb.mxu3 %v6443_v51  ;;  %v904_v36 = vadd.f32 %v903_v34, %v890_v35 }
  0xd5   : > { %1873 = vmatpush.bf16.msrb.mxu0 %v6295_v57 }
  0xd6   : > { %1886 = vmatpush.bf16.msrb.mxu1 %v6423_v58  ;;  %v929_v40 = vpop.f32.mrf.mxu3 }
  0xd7   : > { %1899 = vmatpush.bf16.msrb.mxu2 %v6299_v59  ;;  %v916_v39 = vpop.f32.mrf.mxu2 }
  0xd8   : > { %1912 = vmatpush.bf16.msrb.mxu3 %v6427_v63  ;;  %v9402_v41 = vadd.f32 %v929_v40, %v916_v39  ;;  %v6734_v63 = vld [vmem:[#allocation7 + $0x5e0] sm:$0xf] }
  0xd9   : > { %1874 = vmatpush.bf16.msrb.mxu0 %v6279_v9  ;;  %v6735_v6 = vor.u32 %v8669_v5, %v6734_v63  ;;  %v8633_v9 = vld [vmem:[#allocation7 + $0x4cc] sm:$0xf0] }
  0xda   : > { %1887 = vmatpush.bf16.msrb.mxu1 %v6407_v37  ;;  %v905_v42 = vpop.f32.mrf.mxu1  ;;  %v6718_v37 = vld [vmem:[#allocation7 + $0x5c0] sm:$0xf]  ;;  %v6591_v11 = vor.u32 %v8633_v9, %v6590_v8  ;;  %v8641_v63 = vld [vmem:[#allocation7 + $0x50c] sm:$0xf0] }
  0xdb   : > { %1900 = vmatpush.bf16.msrb.mxu2 %v6283_v10  ;;  %v892_v43 = vpop.f32.mrf.mxu0  ;;  %v6526_v42 = vld [vmem:[#allocation7 + $0x440] sm:$0xf]  ;;  %v6623_v5 = vor.u32 %v8641_v63, %v6622_v61  ;;  %v8733_v9 = vld [vmem:[#allocation7 + $0x7ec] sm:$0xf0]  ;;  %v9420_v61 = vld [vmem:[#allocation5] sm:$0xf] }
  0xdc   : > { %1913 = vmatpush.bf16.msrb.mxu3 %v6411_v14  ;;  %v6719_v14 = vor.u32 %v8665_v12, %v6718_v37  ;;  %v8617_v43 = vld [vmem:[#allocation7 + $0x44c] sm:$0xf0]  ;;  %v6990_v8 = vld [vmem:[#allocation7 + $0x7e0] sm:$0xf]  ;;  %v8635_v37 = vld [vmem:[#allocation7 + $0x4e4] sm:$0xf] }
  0xdd   : > { %1875 = vmatpush.bf16.msrb.mxu0 %v6263_v18  ;;  %v8661_v18 = vld [vmem:[#allocation7 + $0x5ac] sm:$0xf0]  ;;  %v8667_v12 = vld [vmem:[#allocation7 + $0x5e4] sm:$0xf]  ;;  %v6798_v63 = vld [vmem:[#allocation7 + $0x660] sm:$0xf] }
  0xde   : > { %1888 = vmatpush.bf16.msrb.mxu1 %v6391_v19  ;;  %v931_v45 = vpop.f32.mrf.mxu3  ;;  %v6703_v21 = vor.u32 %v8661_v18, %v6702_v7  ;;  %v8697_v7 = vld [vmem:[#allocation7 + $0x6cc] sm:$0xf0] }
  0xdf   : > { %1901 = vmatpush.bf16.msrb.mxu2 %v6267_v20  ;;  %v918_v44 = vpop.f32.mrf.mxu2  ;;  %v6527_v45 = vor.u32 %v8617_v43, %v6526_v42  ;;  %v8729_v18 = vld [vmem:[#allocation7 + $0x7cc] sm:$0xf0]  ;;  %v8659_v42 = vld [vmem:[#allocation7 + $0x5a4] sm:$0xf]  ;;  %v6704_v43 = vld [vmem:[#allocation7 + $0x5b0] sm:$0xf0] }
  0xe0   : > { %1914 = vmatpush.bf16.msrb.mxu3 %v6395_v0  ;;  %v8625_v0 = vld [vmem:[#allocation7 + $0x48c] sm:$0xf0]  ;;  %v6654_v44 = vld [vmem:[#allocation7 + $0x540] sm:$0xf] }
  0xe1   : > { %1876 = vmatpush.bf16.msrb.mxu0 %v6247_v29  ;;  %v6559_v24 = vor.u32 %v8625_v0, %v6558_v23  ;;  %v6542_v29 = vld [vmem:[#allocation7 + $0x460] sm:$0xf]  ;;  %v8663_v0 = vld [vmem:[#allocation7 + $0x5c4] sm:$0xf] }
  0xe2   : > { %1889 = vmatpush.bf16.msrb.mxu1 %v6375_v31  ;;  %v955_v46 = vpop.f32.mrf.mxu1  ;;  %v8621_v31 = vld [vmem:[#allocation7 + $0x46c] sm:$0xf0] }
  0xe3   : > { %1902 = vmatpush.bf16.msrb.mxu2 %v6251_v32  ;;  %v6670_v32 = vld [vmem:[#allocation7 + $0x560] sm:$0xf]  ;;  %v6543_v35 = vor.u32 %v8621_v31, %v6542_v29 }
  0xe4   : > { %1915 = vmatpush.bf16.msrb.mxu3 %v6379_v33  ;;  %1877 = vmatmul.bf16.vlgmr.msrb.gmra.mxu0 %v9390_v15  ;;  %v6958_v29 = vld [vmem:[#allocation7 + $0x7a0] sm:$0xf] }
  0xe5   : > { %1890 = vmatmul.bf16.vlgmr.msrb.gmra.mxu1 %v9392_v16  ;;  %v942_v47 = vpop.f32.mrf.mxu0  ;;  %2927 = vmatpush.bf16.msra.mxu0 %v6607_v4  ;;  %v8701_v4 = vld [vmem:[#allocation7 + $0x6ec] sm:$0xf0] }
  0xe6   : > { %1903 = vmatmul.bf16.vlgmr.msrb.gmra.mxu2 %v9390_v15  ;;  %v956_v48 = vadd.f32 %v955_v46, %v942_v47  ;;  %2940 = vmatpush.bf16.msra.mxu1 %v6735_v6  ;;  %v8649_v46 = vld [vmem:[#allocation7 + $0x54c] sm:$0xf0] }
  0xe7   : > { %1916 = vmatmul.bf16.vlgmr.msrb.gmra.mxu3 %v9392_v16  ;;  %v6655_v47 = vor.u32 %v8649_v46, %v6654_v44  ;;  %v6814_v46 = vld [vmem:[#allocation7 + $0x680] sm:$0xf] }
  0xe9   : > { %v968_v49 = vpop.f32.mrf.mxu2  ;;  %2928 = vmatpush.bf16.msra.mxu0 %v6591_v11  ;;  %v6608_v11 = vld [vmem:[#allocation7 + $0x4f0] sm:$0xf0] }
  0xea   : > { %v981_v50 = vpop.f32.mrf.mxu3  ;;  %v957_v52 = vpop.f32.mrf.mxu1  ;;  %2941 = vmatpush.bf16.msra.mxu1 %v6719_v14  ;;  %v6611_v14 = vor.u32 %v8635_v37, %v6608_v11  ;;  %v1927_v37 = vperm.slane %v9420_v61, 0 }
  0xeb   : > { %v9404_v51 = vadd.f32 %v981_v50, %v968_v49  ;;  %v6510_v50 = vld [vmem:[#allocation7 + $0x420] sm:$0xf]  ;;  %v8613_v52 = vld [vmem:[#allocation7 + $0x42c] sm:$0xf0] }
  0xed   : > { %v944_v15 = vpop.f32.mrf.mxu0  ;;  %2929 = vmatpush.bf16.msra.mxu0 %v6575_v17  ;;  %v6847_v17 = vor.u32 %v8697_v7, %v6846_v1 }
  0xee   : > { %2942 = vmatpush.bf16.msra.mxu1 %v6703_v21 }
  0xf1   : > { %v970_v53 = vpop.f32.mrf.mxu2  ;;  %2930 = vmatpush.bf16.msra.mxu0 %v6559_v24  ;;  %v6720_v24 = vld [vmem:[#allocation7 + $0x5d0] sm:$0xf0] }
  0xf2   : > { %v983_v54 = vpop.f32.mrf.mxu3  ;;  %2943 = vmatpush.bf16.msra.mxu1 %v6687_v27  ;;  %v6511_v53 = vor.u32 %v8613_v52, %v6510_v50  ;;  %v6723_v25 = vor.u32 %v8663_v0, %v6720_v24  ;;  %v8693_v27 = vld [vmem:[#allocation7 + $0x6ac] sm:$0xf0]  ;;  %v8623_v52 = vld [vmem:[#allocation7 + $0x484] sm:$0xf] }
  0xf3   : > { %v6638_v54 = vld [vmem:[#allocation7 + $0x520] sm:$0xf]  ;;  %v6831_v31 = vor.u32 %v8693_v27, %v6830_v26  ;;  %v8721_v50 = vld [vmem:[#allocation7 + $0x78c] sm:$0xf0]  ;;  %v8615_v24 = vld [vmem:[#allocation7 + $0x444] sm:$0xf] }
  0xf4   : > { %v8713_v0 = vld [vmem:[#allocation7 + $0x74c] sm:$0xf0] }
  0xf5   : > { %2931 = vmatpush.bf16.msra.mxu0 %v6543_v35  ;;  %v6576_v35 = vld [vmem:[#allocation7 + $0x4b0] sm:$0xf0] }
  0xf9   : > { %2932 = vmatpush.bf16.msra.mxu0 %v6527_v45  ;;  %v6707_v45 = vor.u32 %v8659_v42, %v6704_v43 }
  0xfd   : > { %2933 = vmatpush.bf16.msra.mxu0 %v6511_v53 }
 0x101   : > { %v1314_v16 = vpop.f32.mrf.mxu0 }
 0x102   : > { %v1315_v55 = vadd.f32 %v1314_v16, %v904_v36  ;;  %v1327_v56 = vpop.f32.mrf.mxu1  ;;  %v8653_v36 = vld [vmem:[#allocation7 + $0x56c] sm:$0xf0] }
 0x103   : > { %v6671_v40 = vor.u32 %v8653_v36, %v6670_v32  ;;  %v8645_v16 = vld [vmem:[#allocation7 + $0x52c] sm:$0xf0] }
 0x104   : > { %v9406_v57 = vadd.f32 %v1327_v56, %v1315_v55  ;;  %v6639_v55 = vor.u32 %v8645_v16, %v6638_v54  ;;  %v6494_v56 = vld [vmem:[#allocation7 + $0x400] sm:$0xf]  ;;  %v8725_v32 = vld [vmem:[#allocation7 + $0x7ac] sm:$0xf0] }
 0x105   : > { %2944 = vmatpush.bf16.msra.mxu1 %v6671_v40 }
 0x109   : > { %v9408_v58 = vpop.f32.mrf.mxu2  ;;  %v1316_v60 = vpop.f32.mrf.mxu0  ;;  %2945 = vmatpush.bf16.msra.mxu1 %v6655_v47  ;;  %v8689_v47 = vld [vmem:[#allocation7 + $0x68c] sm:$0xf0] }
 0x10a   : > { %v9410_v59 = vpop.f32.mrf.mxu3  ;;  %v1329_v3 = vpop.f32.mrf.mxu1  ;;  %v8609_v60 = vld [vmem:[#allocation7 + $0x40c] sm:$0xf0]  ;;  %v1341_v53 = vadd.f32 %v9408_v58, %v9402_v41  ;;  %v6544_v41 = vld [vmem:[#allocation7 + $0x470] sm:$0xf0] }
 0x10b   : > { %v6495_v62 = vor.u32 %v8609_v60, %v6494_v56  ;;  %v6862_v3 = vld [vmem:[#allocation7 + $0x6e0] sm:$0xf]  ;;  %v6688_v56 = vld [vmem:[#allocation7 + $0x590] sm:$0xf0] }
 0x10c   : > { %v6863_v6 = vor.u32 %v8701_v4, %v6862_v3  ;;  %v8685_v3 = vld [vmem:[#allocation7 + $0x66c] sm:$0xf0]  ;;  %v6926_v4 = vld [vmem:[#allocation7 + $0x760] sm:$0xf]  ;;  %v1354_v58 = vadd.f32 %v9410_v59, %v1341_v53 }
 0x10d   : > { %2946 = vmatpush.bf16.msra.mxu1 %v6639_v55  ;;  %2934 = vmatpush.bf16.msra.mxu0 %v6495_v62  ;;  %v8655_v55 = vld [vmem:[#allocation7 + $0x584] sm:$0xf]  ;;  %v6910_v59 = vld [vmem:[#allocation7 + $0x740] sm:$0xf] }
 0x10e   : > { %2953 = vmatpush.bf16.msra.mxu2 %v6863_v6  ;;  %v6691_v62 = vor.u32 %v8655_v55, %v6688_v56  ;;  %v6799_v6 = vor.u32 %v8685_v3, %v6798_v63  ;;  %v6911_v26 = vor.u32 %v8713_v0, %v6910_v59  ;;  %v8673_v55 = vld [vmem:[#allocation7 + $0x60c] sm:$0xf0]  ;;  %v6878_v56 = vld [vmem:[#allocation7 + $0x700] sm:$0xf]  ;;  %v8607_v3 = vld [vmem:[#allocation7 + $0x404] sm:$0xf] }
 0x10f   : > { %v8705_v63 = vld [vmem:[#allocation7 + $0x70c] sm:$0xf0] }
 0x111   : > { %v1342_v10 = vpop.f32.mrf.mxu2  ;;  %2947 = vmatpush.bf16.msra.mxu1 %v6623_v5  ;;  %2979 = vmatpush.bf16.msrb.mxu0 %v6611_v14  ;;  %v8651_v14 = vld [vmem:[#allocation7 + $0x564] sm:$0xf] }
 0x112   : > { %v1355_v13 = vpop.f32.mrf.mxu3  ;;  %v6991_v10 = vor.u32 %v8733_v9, %v6990_v8  ;;  %2954 = vmatpush.bf16.msra.mxu2 %v6847_v17  ;;  %v8717_v8 = vld [vmem:[#allocation7 + $0x76c] sm:$0xf0]  ;;  %v8619_v9 = vld [vmem:[#allocation7 + $0x464] sm:$0xf] }
 0x113   : > { %v6736_v13 = vld [vmem:[#allocation7 + $0x5f0] sm:$0xf0] }
 0x114   : > { %v6739_v38 = vor.u32 %v8667_v12, %v6736_v13  ;;  %2966 = vmatpush.bf16.msra.mxu3 %v6991_v10  ;;  %v6927_v12 = vor.u32 %v8717_v8, %v6926_v4  ;;  %v6547_v13 = vor.u32 %v8619_v9, %v6544_v41  ;;  %v6496_v4 = vld [vmem:[#allocation7 + $0x410] sm:$0xf0]  ;;  %v8639_v9 = vld [vmem:[#allocation7 + $0x504] sm:$0xf] }
 0x115   : > { %v6499_v8 = vor.u32 %v8607_v3, %v6496_v4  ;;  %v6624_v41 = vld [vmem:[#allocation7 + $0x510] sm:$0xf0] }
 0x116   : > { %2992 = vmatpush.bf16.msrb.mxu1 %v6739_v38  ;;  %2955 = vmatpush.bf16.msra.mxu2 %v6831_v31  ;;  %v6672_v38 = vld [vmem:[#allocation7 + $0x570] sm:$0xf0] }
 0x11a   : > { %2993 = vmatpush.bf16.msrb.mxu1 %v6723_v25  ;;  %v6528_v25 = vld [vmem:[#allocation7 + $0x450] sm:$0xf0] }
 0x11b   : > { %v6531_v27 = vor.u32 %v8615_v24, %v6528_v25  ;;  %v8723_v24 = vld [vmem:[#allocation7 + $0x7a4] sm:$0xf]  ;;  %v6960_v25 = vld [vmem:[#allocation7 + $0x7b0] sm:$0xf0] }
 0x11e   : > { %2994 = vmatpush.bf16.msrb.mxu1 %v6707_v45  ;;  %v8611_v45 = vld [vmem:[#allocation7 + $0x424] sm:$0xf] }
 0x121   : > { %v1366_v2 = vpop.f32.mrf.mxu0 }
 0x122   : > { %v1367_v19 = vadd.f32 %v1366_v2, %v956_v48  ;;  %v1379_v20 = vpop.f32.mrf.mxu1  ;;  %v9214_v48 = vmov 0.0   ;;  %v6974_v2 = vld [vmem:[#allocation7 + $0x7c0] sm:$0xf]  ;;  %2995 = vmatpush.bf16.msrb.mxu1 %v6691_v62 }
 0x123   : > { %1943 = vst [vmem:[#allocation2] sm:$0xff] %v9214_v48  ;;  %v6975_v21 = vor.u32 %v8729_v18, %v6974_v2  ;;  %v1928_v2 = vperm.slane %v9420_v61, 1  ;;  %v6675_v18 = vor.u32 %v8651_v14, %v6672_v38  ;;  %v8695_v38 = vld [vmem:[#allocation7 + $0x6c4] sm:$0xf] }
 0x124   : > { %v9412_v22 = vadd.f32 %v1379_v20, %v1367_v19  ;;  %1944 = vst [vmem:[#allocation2 + $0x8] sm:$0xff] %v9214_v48  ;;  %v8631_v19 = vld [vmem:[#allocation7 + $0x4c4] sm:$0xf]  ;;  %v6592_v20 = vld [vmem:[#allocation7 + $0x4d0] sm:$0xf0] }
 0x125   : > { %v6595_v23 = vor.u32 %v8631_v19, %v6592_v20  ;;  %2967 = vmatpush.bf16.msra.mxu3 %v6975_v21  ;;  %v6942_v48 = vld [vmem:[#allocation7 + $0x780] sm:$0xf]  ;;  %v8681_v20 = vld [vmem:[#allocation7 + $0x64c] sm:$0xf0] }
 0x126   : > { %v6943_v54 = vor.u32 %v8721_v50, %v6942_v48  ;;  %v6782_v19 = vld [vmem:[#allocation7 + $0x640] sm:$0xf]  ;;  %2996 = vmatpush.bf16.msrb.mxu1 %v6675_v18  ;;  %v6512_v48 = vld [vmem:[#allocation7 + $0x430] sm:$0xf0] }
 0x127   : > { %2980 = vmatpush.bf16.msrb.mxu0 %v6595_v23  ;;  %v6783_v23 = vor.u32 %v8681_v20, %v6782_v19  ;;  %v6640_v50 = vld [vmem:[#allocation7 + $0x530] sm:$0xf0]  ;;  %v6515_v53 = vor.u32 %v8611_v45, %v6512_v48 }
 0x129   : > { %v9414_v28 = vpop.f32.mrf.mxu2  ;;  %v1368_v34 = vpop.f32.mrf.mxu0 }
 0x12a   : > { %v9416_v33 = vpop.f32.mrf.mxu3  ;;  %v1381_v39 = vpop.f32.mrf.mxu1  ;;  %v8627_v34 = vld [vmem:[#allocation7 + $0x4a4] sm:$0xf] }
 0x12b   : > { %v6959_v39 = vor.u32 %v8725_v32, %v6958_v29  ;;  %v6579_v40 = vor.u32 %v8627_v34, %v6576_v35  ;;  %v6656_v29 = vld [vmem:[#allocation7 + $0x550] sm:$0xf0]  ;;  %v6766_v35 = vld [vmem:[#allocation7 + $0x620] sm:$0xf] }
 0x12d   : > { %2968 = vmatpush.bf16.msra.mxu3 %v6959_v39  ;;  %2981 = vmatpush.bf16.msrb.mxu0 %v6579_v40  ;;  %v6894_v39 = vld [vmem:[#allocation7 + $0x720] sm:$0xf] }
 0x131   : > { %v1394_v49 = vpop.f32.mrf.mxu2  ;;  %2969 = vmatpush.bf16.msra.mxu3 %v6943_v54 }
 0x132   : > { %v1407_v15 = vpop.f32.mrf.mxu3  ;;  %v6815_v49 = vor.u32 %v8689_v47, %v6814_v46 }
 0x133   : > { %v6560_v15 = vld [vmem:[#allocation7 + $0x490] sm:$0xf0] }
 0x134   : > { %v6563_v16 = vor.u32 %v8623_v52, %v6560_v15  ;;  %2956 = vmatpush.bf16.msra.mxu2 %v6815_v49  ;;  %v8643_v49 = vld [vmem:[#allocation7 + $0x524] sm:$0xf] }
 0x135   : > { %2970 = vmatpush.bf16.msra.mxu3 %v6927_v12  ;;  %v6643_v54 = vor.u32 %v8643_v49, %v6640_v50  ;;  %v8683_v50 = vld [vmem:[#allocation7 + $0x664] sm:$0xf] }
 0x136   : > { %2982 = vmatpush.bf16.msrb.mxu0 %v6563_v16  ;;  %v6750_v16 = vld [vmem:[#allocation7 + $0x600] sm:$0xf] }
 0x137   : > { %v6751_v62 = vor.u32 %v8673_v55, %v6750_v16  ;;  %v6928_v16 = vld [vmem:[#allocation7 + $0x770] sm:$0xf0] }
 0x138   : > { %2957 = vmatpush.bf16.msra.mxu2 %v6799_v6  ;;  %v6879_v6 = vor.u32 %v8705_v63, %v6878_v56  ;;  %v8679_v56 = vld [vmem:[#allocation7 + $0x644] sm:$0xf]  ;;  %v6912_v63 = vld [vmem:[#allocation7 + $0x750] sm:$0xf0] }
 0x139   : > { %2971 = vmatpush.bf16.msra.mxu3 %v6911_v26 }
 0x13a   : > { %2983 = vmatpush.bf16.msrb.mxu0 %v6547_v13  ;;  %v6992_v13 = vld [vmem:[#allocation7 + $0x7f0] sm:$0xf0] }
 0x13c   : > { %2958 = vmatpush.bf16.msra.mxu2 %v6783_v23  ;;  %v6832_v23 = vld [vmem:[#allocation7 + $0x6b0] sm:$0xf0] }
 0x13e   : > { %2984 = vmatpush.bf16.msrb.mxu0 %v6531_v27  ;;  %v6963_v27 = vor.u32 %v8723_v24, %v6960_v25  ;;  %v6752_v24 = vld [vmem:[#allocation7 + $0x610] sm:$0xf0] }
 0x141   : > { %v1826_v36 = vpop.f32.mrf.mxu0 }
 0x142   : > { %v1839_v44 = vpop.f32.mrf.mxu1  ;;  %2985 = vmatpush.bf16.msrb.mxu0 %v6515_v53 }
 0x143   : > { %v1840_v60 = vadd.f32 %v1839_v44, %v1826_v36  ;;  %v8677_v36 = vld [vmem:[#allocation7 + $0x62c] sm:$0xf0] }
 0x144   : > { %v6767_v43 = vor.u32 %v8677_v36, %v6766_v35  ;;  %v8709_v44 = vld [vmem:[#allocation7 + $0x72c] sm:$0xf0]  ;;  %v6944_v35 = vld [vmem:[#allocation7 + $0x790] sm:$0xf0] }
 0x145   : > { %v1921_v1 = vadd.f32 %v1840_v60, %v9406_v57  ;;  %v8647_v57 = vld [vmem:[#allocation7 + $0x544] sm:$0xf]  ;;  %v6895_v47 = vor.u32 %v8709_v44, %v6894_v39 }
 0x146   : > { %v6659_v34 = vor.u32 %v8647_v57, %v6656_v29  ;;  %2959 = vmatpush.bf16.msra.mxu2 %v6767_v43  ;;  %2986 = vmatpush.bf16.msrb.mxu0 %v6499_v8  ;;  %v8687_v57 = vld [vmem:[#allocation7 + $0x684] sm:$0xf]  ;;  %v6816_v29 = vld [vmem:[#allocation7 + $0x690] sm:$0xf0] }
 0x147   : > { %v1935_v31 = vadd.f32 %v1927_v37, %v1921_v1  ;;  %2972 = vmatpush.bf16.msra.mxu3 %v6895_v47  ;;  %v8699_v37 = vld [vmem:[#allocation7 + $0x6e4] sm:$0xf]  ;;  %v6848_v1 = vld [vmem:[#allocation7 + $0x6d0] sm:$0xf0] }
 0x148   : > { %2997 = vmatpush.bf16.msrb.mxu1 %v6659_v34  ;;  %v6819_v34 = vor.u32 %v8687_v57, %v6816_v29  ;;  %v8703_v57 = vld [vmem:[#allocation7 + $0x704] sm:$0xf] }
 0x149   : > { %v1852_v5 = vpop.f32.mrf.mxu2  ;;  %v1828_v11 = vpop.f32.mrf.mxu0  ;;  %v1939_v52 = vmax.f32 %v1935_v31, 0.0  ;;  %v8719_v31 = vld [vmem:[#allocation7 + $0x784] sm:$0xf] }
 0x14a   : > { %v1865_v10 = vpop.f32.mrf.mxu3  ;;  %v1841_v17 = vpop.f32.mrf.mxu1  ;;  %2960 = vmatpush.bf16.msra.mxu2 %v6751_v62  ;;  %v8731_v11 = vld [vmem:[#allocation7 + $0x7e4] sm:$0xf]  ;;  %v6947_v36 = vor.u32 %v8719_v31, %v6944_v35 }
 0x14b   : > { %v1866_v7 = vadd.f32 %v1865_v10, %v1852_v5  ;;  %v6864_v10 = vld [vmem:[#allocation7 + $0x6f0] sm:$0xf0]  ;;  %2973 = vmatpush.bf16.msra.mxu3 %v6879_v6  ;;  %v6995_v14 = vor.u32 %v8731_v11, %v6992_v13  ;;  %v8711_v62 = vld [vmem:[#allocation7 + $0x744] sm:$0xf] }
 0x14c   : > { %2998 = vmatpush.bf16.msrb.mxu1 %v6643_v54  ;;  %v6867_v12 = vor.u32 %v8699_v37, %v6864_v10  ;;  %v6976_v17 = vld [vmem:[#allocation7 + $0x7d0] sm:$0xf0]  ;;  %v6915_v3 = vor.u32 %v8711_v62, %v6912_v63  ;;  %v8622_v62 = vld [vmem:[#allocation7 + $0x474] sm:$0xf0] }
 0x14d   : > { %v1922_v21 = vadd.f32 %v1866_v7, %v1354_v58  ;;  %v6627_v58 = vor.u32 %v8639_v9, %v6624_v41  ;;  %v8727_v7 = vld [vmem:[#allocation7 + $0x7c4] sm:$0xf]  ;;  %v6768_v41 = vld [vmem:[#allocation7 + $0x630] sm:$0xf0] }
 0x14e   : > { %3005 = vmatpush.bf16.msrb.mxu2 %v6867_v12  ;;  %v6979_v18 = vor.u32 %v8727_v7, %v6976_v17  ;;  %v8675_v9 = vld [vmem:[#allocation7 + $0x624] sm:$0xf]  ;;  %v6896_v12 = vld [vmem:[#allocation7 + $0x730] sm:$0xf0]  ;;  %v6614_v17 = vld [vmem:[#allocation7 + $0x4e8] sm:$0xf] }
 0x14f   : > { %v1936_v32 = vadd.f32 %v1928_v2, %v1922_v21  ;;  %3018 = vmatpush.bf16.msrb.mxu3 %v6995_v14  ;;  %v6851_v2 = vor.u32 %v8695_v38, %v6848_v1  ;;  %v8691_v21 = vld [vmem:[#allocation7 + $0x6a4] sm:$0xf]  ;;  %v6771_v11 = vor.u32 %v8675_v9, %v6768_v41  ;;  %v6534_v41 = vld [vmem:[#allocation7 + $0x448] sm:$0xf] }
 0x150   : > { %2999 = vmatpush.bf16.msrb.mxu1 %v6627_v58  ;;  %v6835_v0 = vor.u32 %v8691_v21, %v6832_v23  ;;  %v8707_v58 = vld [vmem:[#allocation7 + $0x724] sm:$0xf]  ;;  %v8670_v21 = vld [vmem:[#allocation7 + $0x5f4] sm:$0xf0] }
 0x151   : > { %v1940_v40 = vmax.f32 %v1936_v32, 0.0  ;;  %v1854_v42 = vpop.f32.mrf.mxu2  ;;  %v1393_v32 = vadd.f32 %v9414_v28, %v9404_v51  ;;  %v1930_v51 = vperm.slane %v9420_v61, 3  ;;  %v6899_v1 = vor.u32 %v8707_v58, %v6896_v12  ;;  %v8618_v58 = vld [vmem:[#allocation7 + $0x454] sm:$0xf0]  ;;  %v6518_v12 = vld [vmem:[#allocation7 + $0x428] sm:$0xf] }
 0x152   : > { %v1867_v46 = vpop.f32.mrf.mxu3  ;;  %3006 = vmatpush.bf16.msrb.mxu2 %v6851_v2 }
 0x153   : > { %v1949_v15 = vrot.slane %v1940_v40, 4  ;;  %3019 = vmatpush.bf16.msrb.mxu3 %v6979_v18  ;;  %v1929_v40 = vperm.slane %v9420_v61, 2  ;;  %v1406_v47 = vadd.f32 %v9416_v33, %v1393_v32  ;;  %v6784_v33 = vld [vmem:[#allocation7 + $0x650] sm:$0xf0]  ;;  %v8638_v18 = vld [vmem:[#allocation7 + $0x4f4] sm:$0xf0] }
 0x154   : > { %v6787_v61 = vor.u32 %v8679_v56, %v6784_v33  ;;  %v6615_v32 = vor.u32 %v8638_v18, %v6614_v17  ;;  %v8658_v56 = vld [vmem:[#allocation7 + $0x594] sm:$0xf0]  ;;  %v6550_v33 = vld [vmem:[#allocation7 + $0x468] sm:$0xf] }
 0x155   : > { %v1952_v60 = vsel %vm1951_vm0, %v1939_v52, %v1949_v15  ;;  %v8715_v52 = vld [vmem:[#allocation7 + $0x764] sm:$0xf]  ;;  %v6502_v18 = vld [vmem:[#allocation7 + $0x408] sm:$0xf] }
 0x156   : > { %v1954_v5 = vrot.slane %v1952_v60, 7  ;;  %3007 = vmatpush.bf16.msrb.mxu2 %v6835_v0  ;;  %v6931_v55 = vor.u32 %v8715_v52, %v6928_v16  ;;  %v8671_v0 = vld [vmem:[#allocation7 + $0x604] sm:$0xf]  ;;  %v8662_v52 = vld [vmem:[#allocation7 + $0x5b4] sm:$0xf0] }
 0x157   : > { %3020 = vmatpush.bf16.msrb.mxu3 %v6963_v27  ;;  %v6755_v27 = vor.u32 %v8671_v0, %v6752_v24  ;;  %v8626_v16 = vld [vmem:[#allocation7 + $0x494] sm:$0xf0]  ;;  %v6870_v24 = vld [vmem:[#allocation7 + $0x6e8] sm:$0xf] }
 0x158   : > { %1958 = vst [vmem:[#allocation2] sm:$0x66] %v1954_v5  ;;  %v8642_v0 = vld [vmem:[#allocation7 + $0x514] sm:$0xf0] }
 0x15a   : > { %3008 = vmatpush.bf16.msrb.mxu2 %v6819_v34  ;;  %v6880_v34 = vld [vmem:[#allocation7 + $0x710] sm:$0xf0] }
 0x15b   : > { %3021 = vmatpush.bf16.msrb.mxu3 %v6947_v36 }
 0x15f   : > { %v1960_v19 = vld [vmem:[#allocation2] sm:$0x33]  ;;  %3022 = vmatpush.bf16.msrb.mxu3 %v6931_v55  ;;  %v3983_v13 = vld [vmem:[#allocation2] sm:$0xcc]  ;;  %v6694_v55 = vld [vmem:[#allocation7 + $0x588] sm:$0xf] }
 0x160   : > { %1964 = vst [vmem:[#allocation1] ss:$2 sm:$0xff] %v1960_v19  ;;  %v2107_v43 = vld [vmem:[#allocation2] sm:$0x66] }
 0x161   : > { %v1878_v20 = vpop.f32.mrf.mxu0 }
 0x162   : > { %v1891_v59 = vpop.f32.mrf.mxu1 }
 0x163   : > { %v1892_v26 = vadd.f32 %v1891_v59, %v1878_v20  ;;  %3023 = vmatpush.bf16.msrb.mxu3 %v6915_v3  ;;  %v6742_v59 = vld [vmem:[#allocation7 + $0x5e8] sm:$0xf] }
 0x164   : > { %v6743_v36 = vor.u32 %v8670_v21, %v6742_v59  ;;  %v6678_v3 = vld [vmem:[#allocation7 + $0x568] sm:$0xf] }
 0x165   : > { %v1923_v39 = vadd.f32 %v1892_v26, %v9412_v22  ;;  %v6800_v22 = vld [vmem:[#allocation7 + $0x670] sm:$0xf0] }
 0x166   : > { %v6803_v54 = vor.u32 %v8683_v50, %v6800_v22  ;;  %v6710_v22 = vld [vmem:[#allocation7 + $0x5a8] sm:$0xf] }
 0x167   : > { %v9431_v46 = vld.sshfl [vmem:[#allocation1] sm:$0xff pattern:$0x75316420]  ;;  %v9435_v49 = vld.sshfl [vmem:[#allocation1 + $0x8] sm:$0xff pattern:$0x75316420]  ;;  %v1937_v15 = vadd.f32 %v1929_v40, %v1923_v39  ;;  %3024 = vmatpush.bf16.msrb.mxu3 %v6899_v1 }
 0x168   : > { %2111 = vst [vmem:[#allocation1] ss:$2 sm:$0xff] %v2107_v43  ;;  %3009 = vmatpush.bf16.msrb.mxu2 %v6803_v54  ;;  %v6598_v39 = vld [vmem:[#allocation7 + $0x4c8] sm:$0xf]  ;;  %v8634_v40 = vld [vmem:[#allocation7 + $0x4d4] sm:$0xf0] }
 0x169   : > { %v1904_v42 = vpop.f32.mrf.mxu2  ;;  %v1880_v45 = vpop.f32.mrf.mxu0  ;;  %v1941_v4 = vmax.f32 %v1937_v15, 0.0  ;;  %v6566_v54 = vld [vmem:[#allocation7 + $0x488] sm:$0xf]  ;;  %v8646_v1 = vld [vmem:[#allocation7 + $0x534] sm:$0xf0] }
 0x16a   : > { %v1917_v44 = vpop.f32.mrf.mxu3  ;;  %v1893_v28 = vpop.f32.mrf.mxu1  ;;  %v8666_v45 = vld [vmem:[#allocation7 + $0x5d4] sm:$0xf0] }
 0x16b   : > { %v1918_v48 = vadd.f32 %v1917_v44, %v1904_v42  ;;  %v6883_v42 = vor.u32 %v8703_v57, %v6880_v34  ;;  %v6726_v44 = vld [vmem:[#allocation7 + $0x5c8] sm:$0xf]  ;;  %v8630_v28 = vld [vmem:[#allocation7 + $0x4b4] sm:$0xf0]  ;;  %v6616_v34 = vld [vmem:[#allocation7 + $0x4f8] sm:$0xf0] }
 0x16c   : > { %3010 = vmatpush.bf16.msrb.mxu2 %v6787_v61  ;;  %v6695_v61 = vor.u32 %v8658_v56, %v6694_v55  ;;  %v8730_v55 = vld [vmem:[#allocation7 + $0x7d4] sm:$0xf0]  ;;  %v8632_v56 = vld [vmem:[#allocation7 + $0x4cc] sm:$0xf] }
 0x16d   : > { %v1924_v53 = vadd.f32 %v1918_v48, %v1406_v47  ;;  %3025 = vmatpush.bf16.msrb.mxu3 %v6883_v42  ;;  %v6599_v47 = vor.u32 %v8634_v40, %v6598_v39  ;;  %v6727_v48 = vor.u32 %v8666_v45, %v6726_v44  ;;  %v6744_v45 = vld [vmem:[#allocation7 + $0x5f8] sm:$0xf0] }
 0x16f   : > { %v1938_v60 = vadd.f32 %v1930_v51, %v1924_v53  ;;  %v2114_v10 = vld.sshfl [vmem:[#allocation1] sm:$0xff pattern:$0x75316420]  ;;  %v2115_v38 = vld.sshfl [vmem:[#allocation1 + $0x8] sm:$0xff pattern:$0x75316420]  ;;  %v6711_v53 = vor.u32 %v8662_v52, %v6710_v22 }
 0x170   : > { %v2122_v14 = vpack.c.bf16 %v2114_v10, %v2114_v10  ;;  %v2123_v2 = vpack.c.bf16 %v2115_v38, %v2115_v38  ;;  %3987 = vst [vmem:[#allocation1] ss:$2 sm:$0xff] %v3983_v13  ;;  %3011 = vmatpush.bf16.msrb.mxu2 %v6771_v11  ;;  %v6582_v51 = vld [vmem:[#allocation7 + $0x4a8] sm:$0xf]  ;;  %v8650_v10 = vld [vmem:[#allocation7 + $0x554] sm:$0xf0]  ;;  %v6535_v11 = vor.u32 %v8618_v58, %v6534_v41 }
 0x171   : > { %v1942_v5 = vmax.f32 %v1938_v60, 0.0  ;;  %v1906_v6 = vpop.f32.mrf.mxu2  ;;  %v6583_v15 = vor.u32 %v8630_v28, %v6582_v51  ;;  %v6567_v60 = vor.u32 %v8626_v16, %v6566_v54  ;;  %v8614_v13 = vld [vmem:[#allocation7 + $0x434] sm:$0xf0]  ;;  %v6646_v38 = vld [vmem:[#allocation7 + $0x528] sm:$0xf] }
 0x172   : > { %v1919_v8 = vpop.f32.mrf.mxu3  ;;  %v2258_v20 = vshll.u32 %v2122_v14, 16  ;;  %v2265_v23 = vshll.u32 %v2123_v2, 16  ;;  %v2256_v25 = vshrl.u32 %v2122_v14, 16  ;;  %v2263_v29 = vshrl.u32 %v2123_v2, 16  ;;  %v6854_v52 = vld [vmem:[#allocation7 + $0x6c8] sm:$0xf] }
 0x173   : > { %v1950_v37 = vrot.slane %v1942_v5, 4  ;;  %v6551_v8 = vor.u32 %v8622_v62, %v6550_v33  ;;  %v6519_v21 = vor.u32 %v8614_v13, %v6518_v12  ;;  %v6982_v16 = vld [vmem:[#allocation7 + $0x7c8] sm:$0xf]  ;;  %v8664_v33 = vld [vmem:[#allocation7 + $0x5cc] sm:$0xf] }
 0x174   : > { %v2260_v26 = vrot.slane %v2258_v20, 1  ;;  %v2267_v31 = vrot.slane %v2265_v23, 1  ;;  %3012 = vmatpush.bf16.msrb.mxu2 %v6755_v27  ;;  %v6630_v23 = vld [vmem:[#allocation7 + $0x508] sm:$0xf]  ;;  %v6728_v62 = vld [vmem:[#allocation7 + $0x5d8] sm:$0xf0] }
 0x175   : > { %v1953_v7 = vsel %vm1951_vm0, %v1941_v4, %v1950_v37  ;;  %v8654_v4 = vld [vmem:[#allocation7 + $0x574] sm:$0xf0]  ;;  %v6662_v37 = vld [vmem:[#allocation7 + $0x548] sm:$0xf]  ;;  %v6631_v51 = vor.u32 %v8642_v0, %v6630_v23  ;;  %v6731_v41 = vor.u32 %v8664_v33, %v6728_v62  ;;  %v6712_v12 = vld [vmem:[#allocation7 + $0x5b8] sm:$0xf0] }
 0x176   : > { %v1955_v19 = vrot.slane %v1953_v7, 7  ;;  %v9438_v35 = vor.u32 %v2260_v26, %v2256_v25  ;;  %v9440_v43 = vor.u32 %v2267_v31, %v2263_v29  ;;  %v6679_v9 = vor.u32 %v8654_v4, %v6678_v3  ;;  %v8702_v25 = vld [vmem:[#allocation7 + $0x6f4] sm:$0xf0]  ;;  %v6998_v29 = vld [vmem:[#allocation7 + $0x7e8] sm:$0xf] }
 0x177   : > { %v6663_v14 = vor.u32 %v8650_v10, %v6662_v37  ;;  %v6647_v26 = vor.u32 %v8646_v1, %v6646_v38  ;;  %v8734_v31 = vld [vmem:[#allocation7 + $0x7f4] sm:$0xf0]  ;;  %v6838_v3 = vld [vmem:[#allocation7 + $0x6a8] sm:$0xf]  ;;  %v8628_v37 = vld [vmem:[#allocation7 + $0x4ac] sm:$0xf] }
 0x178   : > { %1959 = vst [vmem:[#allocation2 + $0x8] sm:$0x66] %v1955_v19  ;;  %2935 = vmatmul.bf16.vlgmr.msra.gmra.mxu0 %v9438_v35  ;;  %2948 = vmatmul.bf16.vlgmr.msra.gmra.mxu1 %v9440_v43  ;;  %v8610_v19 = vld [vmem:[#allocation7 + $0x414] sm:$0xf0]  ;;  %v6999_v22 = vor.u32 %v8734_v31, %v6998_v29  ;;  %v6584_v10 = vld [vmem:[#allocation7 + $0x4b8] sm:$0xf0] }
 0x179   : > { %3031 = vmatpush.bf16.msra.mxu0 %v6615_v32  ;;  %3044 = vmatpush.bf16.msra.mxu1 %v6743_v36  ;;  %v8636_v32 = vld [vmem:[#allocation7 + $0x4ec] sm:$0xf]  ;;  %v8694_v4 = vld [vmem:[#allocation7 + $0x6b4] sm:$0xf0]  ;;  %v6822_v13 = vld [vmem:[#allocation7 + $0x688] sm:$0xf] }
 0x17a   : > { %v8668_v36 = vld [vmem:[#allocation7 + $0x5ec] sm:$0xf]  ;;  %v8726_v58 = vld [vmem:[#allocation7 + $0x7b4] sm:$0xf0]  ;;  %v6950_v1 = vld [vmem:[#allocation7 + $0x788] sm:$0xf] }
 0x17b   : > { %v6747_v54 = vor.u32 %v8668_v36, %v6744_v45  ;;  %v8690_v38 = vld [vmem:[#allocation7 + $0x694] sm:$0xf0]  ;;  %v9458_v23 = vld.sshfl [vmem:[#allocation1] sm:$0xff pattern:$0x75316420] }
 0x17c   : > { %v9460_v0 = vld.sshfl [vmem:[#allocation1 + $0x8] sm:$0xff pattern:$0x75316420]  ;;  %v8686_v29 = vld [vmem:[#allocation7 + $0x674] sm:$0xf0] }
 0x17d   : > { %3032 = vmatpush.bf16.msra.mxu0 %v6599_v47  ;;  %3045 = vmatpush.bf16.msra.mxu1 %v6727_v48  ;;  %v6503_v47 = vor.u32 %v8610_v19, %v6502_v18  ;;  %v6871_v48 = vor.u32 %v8702_v25, %v6870_v24  ;;  %v6568_v18 = vld [vmem:[#allocation7 + $0x498] sm:$0xf0]  ;;  %v8656_v19 = vld [vmem:[#allocation7 + $0x58c] sm:$0xf]  ;;  %v8718_v36 = vld [vmem:[#allocation7 + $0x774] sm:$0xf0] }
 0x17e   : > { %v6774_v33 = vld [vmem:[#allocation7 + $0x628] sm:$0xf]  ;;  %v8678_v62 = vld [vmem:[#allocation7 + $0x634] sm:$0xf0] }
 0x17f   : > { %v1961_v50 = vld [vmem:[#allocation2 + $0x8] sm:$0x33]  ;;  %v3984_v7 = vld [vmem:[#allocation2 + $0x8] sm:$0xcc] }
 0x180   : > { %1966 = vst [vmem:[#allocation1 + $0x10] ss:$2 sm:$0xff] %v1961_v50  ;;  %v2108_v63 = vld [vmem:[#allocation2 + $0x8] sm:$0x66] }
 0x181   : > { %3033 = vmatpush.bf16.msra.mxu0 %v6583_v15  ;;  %3046 = vmatpush.bf16.msra.mxu1 %v6711_v53  ;;  %v8698_v15 = vld [vmem:[#allocation7 + $0x6d4] sm:$0xf0]  ;;  %v6619_v53 = vor.u32 %v8636_v32, %v6616_v34  ;;  %v6934_v34 = vld [vmem:[#allocation7 + $0x768] sm:$0xf] }
 0x185   : > { %3034 = vmatpush.bf16.msra.mxu0 %v6567_v60  ;;  %3047 = vmatpush.bf16.msra.mxu1 %v6695_v61  ;;  %v6600_v60 = vld [vmem:[#allocation7 + $0x4d8] sm:$0xf0]  ;;  %v6983_v61 = vor.u32 %v8730_v55, %v6982_v16  ;;  %v8648_v16 = vld [vmem:[#allocation7 + $0x54c] sm:$0xf] }
 0x186   : > { %v6664_v55 = vld [vmem:[#allocation7 + $0x558] sm:$0xf0] }
 0x187   : > { %v9444_v5 = vld.sshfl [vmem:[#allocation1 + $0x10] sm:$0xff pattern:$0x75316420]  ;;  %v9446_v6 = vld.sshfl [vmem:[#allocation1 + $0x18] sm:$0xff pattern:$0x75316420] }
 0x188   : > { %2113 = vst [vmem:[#allocation1 + $0x10] ss:$2 sm:$0xff] %v2108_v63  ;;  %2987 = vmatmul.bf16.vlgmr.msrb.gmra.mxu0 %v9438_v35  ;;  %3000 = vmatmul.bf16.vlgmr.msrb.gmra.mxu1 %v9440_v43  ;;  %v6855_v63 = vor.u32 %v8698_v15, %v6854_v52  ;;  %v6918_v52 = vld [vmem:[#allocation7 + $0x748] sm:$0xf]  ;;  %v8714_v15 = vld [vmem:[#allocation7 + $0x754] sm:$0xf0] }
 0x189   : > { %3035 = vmatpush.bf16.msra.mxu0 %v6551_v8  ;;  %3048 = vmatpush.bf16.msra.mxu1 %v6679_v9  ;;  %v6966_v8 = vld [vmem:[#allocation7 + $0x7a8] sm:$0xf]  ;;  %v6603_v9 = vor.u32 %v8632_v56, %v6600_v60  ;;  %v6919_v60 = vor.u32 %v8714_v15, %v6918_v52  ;;  %v7230_v52 = vld [vmem:[#allocation7 + $0x1c0] sm:$0xf]  ;;  %v8537_v15 = vld [vmem:[#allocation7 + $0x1cc] sm:$0xf0] }
 0x18d   : > { %3036 = vmatpush.bf16.msra.mxu0 %v6535_v11  ;;  %3049 = vmatpush.bf16.msra.mxu1 %v6663_v14  ;;  %v8660_v11 = vld [vmem:[#allocation7 + $0x5ac] sm:$0xf]  ;;  %v6839_v14 = vor.u32 %v8694_v4, %v6838_v3  ;;  %v6902_v3 = vld [vmem:[#allocation7 + $0x728] sm:$0xf]  ;;  %v8710_v4 = vld [vmem:[#allocation7 + $0x734] sm:$0xf0] }
 0x18f   : > { %v2116_v2 = vld.sshfl [vmem:[#allocation1 + $0x10] sm:$0xff pattern:$0x75316420]  ;;  %v2117_v17 = vld.sshfl [vmem:[#allocation1 + $0x18] sm:$0xff pattern:$0x75316420] }
 0x190   : > { %v2124_v20 = vpack.c.bf16 %v2116_v2, %v2116_v2  ;;  %v2125_v59 = vpack.c.bf16 %v2117_v17, %v2117_v17  ;;  %3989 = vst [vmem:[#allocation1 + $0x10] ss:$2 sm:$0xff] %v3984_v7  ;;  %v8722_v7 = vld [vmem:[#allocation7 + $0x794] sm:$0xf0]  ;;  %v6967_v2 = vor.u32 %v8726_v58, %v6966_v8  ;;  %v8624_v17 = vld [vmem:[#allocation7 + $0x48c] sm:$0xf] }
 0x191   : > { %3037 = vmatpush.bf16.msra.mxu0 %v6519_v21  ;;  %3050 = vmatpush.bf16.msra.mxu1 %v6647_v26  ;;  %v6715_v21 = vor.u32 %v8660_v11, %v6712_v12  ;;  %v6823_v26 = vor.u32 %v8690_v38, %v6822_v13  ;;  %v6571_v31 = vor.u32 %v8624_v17, %v6568_v18  ;;  %v8612_v8 = vld [vmem:[#allocation7 + $0x42c] sm:$0xf]  ;;  %v6648_v58 = vld [vmem:[#allocation7 + $0x538] sm:$0xf0]  ;;  %v8674_v11 = vld [vmem:[#allocation7 + $0x614] sm:$0xf0] }
 0x192   : > { %v2272_v27 = vshll.u32 %v2124_v20, 16  ;;  %v2279_v57 = vshll.u32 %v2125_v59, 16  ;;  %v2270_v39 = vshrl.u32 %v2124_v20, 16  ;;  %v2277_v42 = vshrl.u32 %v2125_v59, 16  ;;  %v6696_v20 = vld [vmem:[#allocation7 + $0x598] sm:$0xf0] }
 0x193   : > { %v6587_v59 = vor.u32 %v8628_v37, %v6584_v10  ;;  %v6699_v32 = vor.u32 %v8656_v19, %v6696_v20  ;;  %v6775_v37 = vor.u32 %v8678_v62, %v6774_v33  ;;  %v6758_v10 = vld [vmem:[#allocation7 + $0x608] sm:$0xf]  ;;  %v6903_v12 = vor.u32 %v8710_v4, %v6902_v3  ;;  %v8608_v38 = vld [vmem:[#allocation7 + $0x40c] sm:$0xf]  ;;  %v6872_v18 = vld [vmem:[#allocation7 + $0x6f8] sm:$0xf0] }
 0x194   : > { %v2274_v40 = vrot.slane %v2272_v27, 1  ;;  %v2281_v44 = vrot.slane %v2279_v57, 1  ;;  %v6951_v27 = vor.u32 %v8722_v7, %v6950_v1  ;;  %v6806_v57 = vld [vmem:[#allocation7 + $0x668] sm:$0xf]  ;;  %v8700_v17 = vld [vmem:[#allocation7 + $0x6ec] sm:$0xf]  ;;  %v7231_v33 = vor.u32 %v8537_v15, %v7230_v52 }
 0x195   : > { %3038 = vmatpush.bf16.msra.mxu0 %v6503_v47  ;;  %3051 = vmatpush.bf16.msra.mxu1 %v6631_v51  ;;  %v6807_v45 = vor.u32 %v8686_v29, %v6806_v57  ;;  %v6935_v47 = vor.u32 %v8718_v36, %v6934_v34  ;;  %v6886_v13 = vld [vmem:[#allocation7 + $0x708] sm:$0xf]  ;;  %v8640_v19 = vld [vmem:[#allocation7 + $0x50c] sm:$0xf]  ;;  %v6632_v20 = vld [vmem:[#allocation7 + $0x518] sm:$0xf0] }
 0x196   : > { %v9450_v28 = vor.u32 %v2274_v40, %v2270_v39  ;;  %v9452_v50 = vor.u32 %v2281_v44, %v2277_v42  ;;  %v8620_v39 = vld [vmem:[#allocation7 + $0x46c] sm:$0xf]  ;;  %v6552_v40 = vld [vmem:[#allocation7 + $0x478] sm:$0xf0]  ;;  %v8509_v57 = vld [vmem:[#allocation7 + $0xec] sm:$0xf0] }
 0x197   : > { %v9462_v24 = vld.sshfl [vmem:[#allocation1 + $0x10] sm:$0xff pattern:$0x75316420]  ;;  %v9464_v25 = vld.sshfl [vmem:[#allocation1 + $0x18] sm:$0xff pattern:$0x75316420]  ;;  %v6555_v51 = vor.u32 %v8620_v39, %v6552_v40  ;;  %v6635_v39 = vor.u32 %v8640_v19, %v6632_v20 }
 0x198   : > { %2961 = vmatmul.bf16.vlgmr.msra.gmra.mxu2 %v9450_v28  ;;  %2974 = vmatmul.bf16.vlgmr.msra.gmra.mxu3 %v9452_v50  ;;  %5069 = vst [vmem:[#allocation1] ss:$9 sm:$0xff] %v9353_v30  ;;  %v8652_v42 = vld [vmem:[#allocation7 + $0x56c] sm:$0xf]  ;;  %v6680_v44 = vld [vmem:[#allocation7 + $0x578] sm:$0xf0] }
 0x199   : > { %3057 = vmatpush.bf16.msra.mxu2 %v6871_v48  ;;  %3070 = vmatpush.bf16.msra.mxu3 %v6999_v22  ;;  %v6790_v48 = vld [vmem:[#allocation7 + $0x648] sm:$0xf]  ;;  %v8682_v30 = vld [vmem:[#allocation7 + $0x654] sm:$0xf0]  ;;  %v6683_v22 = vor.u32 %v8652_v42, %v6680_v44  ;;  %v8541_v34 = vld [vmem:[#allocation7 + $0x1ec] sm:$0xf0] }
 0x19a   : > { %3083 = vmatpush.bf16.msrb.mxu0 %v6619_v53  ;;  %3096 = vmatpush.bf16.msrb.mxu1 %v6747_v54  ;;  %v8616_v53 = vld [vmem:[#allocation7 + $0x44c] sm:$0xf]  ;;  %v6536_v54 = vld [vmem:[#allocation7 + $0x458] sm:$0xf0]  ;;  %v6791_v56 = vor.u32 %v8682_v30, %v6790_v48  ;;  %v7214_v3 = vld [vmem:[#allocation7 + $0x1a0] sm:$0xf] }
 0x19b   : > { %3039 = vmatmul.bf16.vlgmr.msra.gmra.mxu0 %v9438_v35  ;;  %3052 = vmatmul.bf16.vlgmr.msra.gmra.mxu1 %v9440_v43  ;;  %v8696_v44 = vld [vmem:[#allocation7 + $0x6cc] sm:$0xf]  ;;  %v6984_v30 = vld [vmem:[#allocation7 + $0x7d8] sm:$0xf0]  ;;  %v8533_v4 = vld [vmem:[#allocation7 + $0x1ac] sm:$0xf0] }
 0x19c   : > { %v6968_v62 = vld [vmem:[#allocation7 + $0x7b8] sm:$0xf0]  ;;  %v8708_v15 = vld [vmem:[#allocation7 + $0x72c] sm:$0xf] }
 0x19d   : > { %3058 = vmatpush.bf16.msra.mxu2 %v6855_v63  ;;  %3071 = vmatpush.bf16.msra.mxu3 %v6983_v61  ;;  %v6539_v63 = vor.u32 %v8616_v53, %v6536_v54  ;;  %v6667_v61 = vor.u32 %v8648_v16, %v6664_v55  ;;  %v8692_v55 = vld [vmem:[#allocation7 + $0x6ac] sm:$0xf]  ;;  %v6936_v20 = vld [vmem:[#allocation7 + $0x778] sm:$0xf0] }
 0x19e   : > { %3084 = vmatpush.bf16.msrb.mxu0 %v6603_v9  ;;  %3097 = vmatpush.bf16.msrb.mxu1 %v6731_v41  ;;  %v6520_v9 = vld [vmem:[#allocation7 + $0x438] sm:$0xf0]  ;;  %v8644_v41 = vld [vmem:[#allocation7 + $0x52c] sm:$0xf] }
 0x19f   : > { %v6523_v1 = vor.u32 %v8612_v8, %v6520_v9  ;;  %v6651_v7 = vor.u32 %v8644_v41, %v6648_v58  ;;  %v8688_v58 = vld [vmem:[#allocation7 + $0x68c] sm:$0xf]  ;;  %v6776_v52 = vld [vmem:[#allocation7 + $0x638] sm:$0xf0] }
 0x1a1   : > { %3059 = vmatpush.bf16.msra.mxu2 %v6839_v14  ;;  %3072 = vmatpush.bf16.msra.mxu3 %v6967_v2  ;;  %v8706_v14 = vld [vmem:[#allocation7 + $0x714] sm:$0xf0]  ;;  %v6504_v2 = vld [vmem:[#allocation7 + $0x418] sm:$0xf0] }
 0x1a2   : > { %3085 = vmatpush.bf16.msrb.mxu0 %v6587_v59  ;;  %3098 = vmatpush.bf16.msrb.mxu1 %v6715_v21  ;;  %v8732_v59 = vld [vmem:[#allocation7 + $0x7ec] sm:$0xf]  ;;  %v6759_v21 = vor.u32 %v8674_v11, %v6758_v10  ;;  %v6887_v29 = vor.u32 %v8706_v14, %v6886_v13  ;;  %v6507_v36 = vor.u32 %v8608_v38, %v6504_v2  ;;  %v7070_v13 = vld [vmem:[#allocation7 + $0x80] sm:$0xf] }
 0x1a3   : > { %v8720_v10 = vld [vmem:[#allocation7 + $0x78c] sm:$0xf]  ;;  %v7215_v11 = vor.u32 %v8533_v4, %v7214_v3  ;;  %v7198_v14 = vld [vmem:[#allocation7 + $0x180] sm:$0xf] }
 0x1a4   : > { %v8684_v2 = vld [vmem:[#allocation7 + $0x66c] sm:$0xf] }
 0x1a5   : > { %3060 = vmatpush.bf16.msra.mxu2 %v6823_v26  ;;  %3073 = vmatpush.bf16.msra.mxu3 %v6951_v27  ;;  %v7000_v26 = vld [vmem:[#allocation7 + $0x7f8] sm:$0xf0]  ;;  %v7118_v27 = vld [vmem:[#allocation7 + $0xe0] sm:$0xf]  ;;  %v8704_v4 = vld [vmem:[#allocation7 + $0x70c] sm:$0xf] }
 0x1a6   : > { %3086 = vmatpush.bf16.msrb.mxu0 %v6571_v31  ;;  %3099 = vmatpush.bf16.msrb.mxu1 %v6699_v32  ;;  %v6875_v31 = vor.u32 %v8700_v17, %v6872_v18  ;;  %v7246_v32 = vld [vmem:[#allocation7 + $0x1e0] sm:$0xf]  ;;  %v7003_v40 = vor.u32 %v8732_v59, %v7000_v26  ;;  %v7119_v42 = vor.u32 %v8509_v57, %v7118_v27  ;;  %v6808_v17 = vld [vmem:[#allocation7 + $0x678] sm:$0xf0]  ;;  %v8716_v18 = vld [vmem:[#allocation7 + $0x76c] sm:$0xf] }
 0x1a7   : > { %v7247_v48 = vor.u32 %v8541_v34, %v7246_v32  ;;  %v7054_v59 = vld [vmem:[#allocation7 + $0x60] sm:$0xf]  ;;  %v8525_v27 = vld [vmem:[#allocation7 + $0x16c] sm:$0xf0]  ;;  %v6811_v57 = vor.u32 %v8684_v2, %v6808_v17  ;;  %v8680_v32 = vld [vmem:[#allocation7 + $0x64c] sm:$0xf] }
 0x1a8   : > { %3013 = vmatmul.bf16.vlgmr.msrb.gmra.mxu2 %v9450_v28  ;;  %3026 = vmatmul.bf16.vlgmr.msrb.gmra.mxu3 %v9452_v50  ;;  %v7182_v26 = vld [vmem:[#allocation7 + $0x160] sm:$0xf]  ;;  %v6792_v34 = vld [vmem:[#allocation7 + $0x658] sm:$0xf0]  ;;  %v8539_v2 = vld [vmem:[#allocation7 + $0x1e4] sm:$0xf] }
 0x1a9   : > { %3061 = vmatpush.bf16.msra.mxu2 %v6807_v45  ;;  %3074 = vmatpush.bf16.msra.mxu3 %v6935_v47  ;;  %v6856_v45 = vld [vmem:[#allocation7 + $0x6d8] sm:$0xf0]  ;;  %v8728_v47 = vld [vmem:[#allocation7 + $0x7cc] sm:$0xf]  ;;  %v7248_v17 = vld [vmem:[#allocation7 + $0x1f0] sm:$0xf0] }
 0x1aa   : > { %3087 = vmatpush.bf16.msrb.mxu0 %v6555_v51  ;;  %3100 = vmatpush.bf16.msrb.mxu1 %v6683_v22  ;;  %v7102_v51 = vld [vmem:[#allocation7 + $0xc0] sm:$0xf]  ;;  %v8505_v22 = vld [vmem:[#allocation7 + $0xcc] sm:$0xf0]  ;;  %v6859_v53 = vor.u32 %v8696_v44, %v6856_v45  ;;  %v6987_v54 = vor.u32 %v8728_v47, %v6984_v30 }
 0x1ab   : > { %v7103_v16 = vor.u32 %v8505_v22, %v7102_v51  ;;  %v8489_v44 = vld [vmem:[#allocation7 + $0x4c] sm:$0xf0]  ;;  %v7166_v45 = vld [vmem:[#allocation7 + $0x140] sm:$0xf]  ;;  %v8676_v22 = vld [vmem:[#allocation7 + $0x62c] sm:$0xf] }
 0x1ac   : > { %v8521_v47 = vld [vmem:[#allocation7 + $0x14c] sm:$0xf0] }
 0x1ad   : > { %3062 = vmatpush.bf16.msra.mxu2 %v6791_v56  ;;  %3075 = vmatpush.bf16.msra.mxu3 %v6919_v60  ;;  %v6840_v56 = vld [vmem:[#allocation7 + $0x6b8] sm:$0xf0]  ;;  %v8724_v60 = vld [vmem:[#allocation7 + $0x7ac] sm:$0xf] }
 0x1ae   : > { %3088 = vmatpush.bf16.msrb.mxu0 %v6539_v63  ;;  %3101 = vmatpush.bf16.msrb.mxu1 %v6667_v61  ;;  %v7086_v63 = vld [vmem:[#allocation7 + $0xa0] sm:$0xf]  ;;  %v8501_v61 = vld [vmem:[#allocation7 + $0xac] sm:$0xf0]  ;;  %v6843_v8 = vor.u32 %v8692_v55, %v6840_v56  ;;  %v6971_v9 = vor.u32 %v8724_v60, %v6968_v62  ;;  %v8672_v62 = vld [vmem:[#allocation7 + $0x60c] sm:$0xf] }
 0x1af   : > { %v7087_v41 = vor.u32 %v8501_v61, %v7086_v63  ;;  %v8485_v55 = vld [vmem:[#allocation7 + $0x2c] sm:$0xf0]  ;;  %v7150_v56 = vld [vmem:[#allocation7 + $0x120] sm:$0xf]  ;;  %v6760_v63 = vld [vmem:[#allocation7 + $0x618] sm:$0xf0] }
 0x1b0   : > { %v8517_v60 = vld [vmem:[#allocation7 + $0x12c] sm:$0xf0] }
 0x1b1   : > { %3063 = vmatpush.bf16.msra.mxu2 %v6775_v37  ;;  %3076 = vmatpush.bf16.msra.mxu3 %v6903_v12  ;;  %v6824_v37 = vld [vmem:[#allocation7 + $0x698] sm:$0xf0] }
 0x1b2   : > { %3089 = vmatpush.bf16.msrb.mxu0 %v6523_v1  ;;  %3102 = vmatpush.bf16.msrb.mxu1 %v6651_v7  ;;  %v6952_v12 = vld [vmem:[#allocation7 + $0x798] sm:$0xf0]  ;;  %v6827_v38 = vor.u32 %v8688_v58, %v6824_v37  ;;  %v8481_v58 = vld [vmem:[#allocation7 + $0xc] sm:$0xf0]  ;;  %v7134_v37 = vld [vmem:[#allocation7 + $0x100] sm:$0xf] }
 0x1b3   : > { %v6955_v1 = vor.u32 %v8720_v10, %v6952_v12  ;;  %v8513_v10 = vld [vmem:[#allocation7 + $0x10c] sm:$0xf0] }
 0x1b4   : > { %v8573_v12 = vld [vmem:[#allocation7 + $0x2ec] sm:$0xf0] }
 0x1b5   : > { %3064 = vmatpush.bf16.msra.mxu2 %v6759_v21  ;;  %3077 = vmatpush.bf16.msra.mxu3 %v6887_v29  ;;  %v8493_v21 = vld [vmem:[#allocation7 + $0x6c] sm:$0xf0]  ;;  %v6939_v29 = vor.u32 %v8716_v18, %v6936_v20  ;;  %v7135_v18 = vor.u32 %v8513_v10, %v7134_v37 }
 0x1b6   : > { %3090 = vmatpush.bf16.msrb.mxu0 %v6507_v36  ;;  %3103 = vmatpush.bf16.msrb.mxu1 %v6635_v39  ;;  %v8712_v36 = vld [vmem:[#allocation7 + $0x74c] sm:$0xf]  ;;  %v7183_v39 = vor.u32 %v8525_v27, %v7182_v26  ;;  %v8569_v26 = vld [vmem:[#allocation7 + $0x2cc] sm:$0xf0]  ;;  %v7486_v27 = vld [vmem:[#allocation7 + $0x3c0] sm:$0xf] }
 0x1b7   : > { %v8589_v10 = vld [vmem:[#allocation7 + $0x36c] sm:$0xf0] }
 0x1b8   : > { %3065 = vmatmul.bf16.vlgmr.msra.gmra.mxu2 %v9450_v28  ;;  %3078 = vmatmul.bf16.vlgmr.msra.gmra.mxu3 %v9452_v50 }
 0x1b9   : > { %3109 = vmatpush.bf16.msrb.mxu2 %v6875_v31  ;;  %3122 = vmatpush.bf16.msrb.mxu3 %v7003_v40  ;;  %v7055_v31 = vor.u32 %v8493_v21, %v7054_v59  ;;  %v6920_v40 = vld [vmem:[#allocation7 + $0x758] sm:$0xf0]  ;;  %v7358_v21 = vld [vmem:[#allocation7 + $0x2c0] sm:$0xf] }
 0x1ba   : > { %3775 = vmatpush.bf16.msra.mxu0 %v7119_v42  ;;  %3788 = vmatpush.bf16.msra.mxu1 %v7247_v48  ;;  %v7038_v42 = vld [vmem:[#allocation7 + $0x40] sm:$0xf]  ;;  %v6795_v48 = vor.u32 %v8680_v32, %v6792_v34  ;;  %v6923_v30 = vor.u32 %v8712_v36, %v6920_v40  ;;  %v7104_v32 = vld [vmem:[#allocation7 + $0xd0] sm:$0xf0]  ;;  %v8535_v34 = vld [vmem:[#allocation7 + $0x1c4] sm:$0xf]  ;;  %v9475_v40 = vpack.c.bf16 %v9431_v46, %v9431_v46 }
 0x1bb   : > { %3091 = vmatmul.bf16.vlgmr.msrb.gmra.mxu0 %v9438_v35  ;;  %3104 = vmatmul.bf16.vlgmr.msrb.gmra.mxu1 %v9440_v43  ;;  %v8497_v35 = vld [vmem:[#allocation7 + $0x8c] sm:$0xf0]  ;;  %v7039_v51 = vor.u32 %v8489_v44, %v7038_v42  ;;  %v7232_v36 = vld [vmem:[#allocation7 + $0x1d0] sm:$0xf0]  ;;  %v8531_v46 = vld [vmem:[#allocation7 + $0x1a4] sm:$0xf] }
 0x1bc   : > { %v8529_v43 = vld [vmem:[#allocation7 + $0x18c] sm:$0xf0]  ;;  %v7071_v7 = vor.u32 %v8497_v35, %v7070_v13  ;;  %v7502_v13 = vld [vmem:[#allocation7 + $0x3e0] sm:$0xf]  ;;  %v6763_v35 = vor.u32 %v8672_v62, %v6760_v63  ;;  %v8495_v62 = vld [vmem:[#allocation7 + $0x84] sm:$0xf] }
 0x1bd   : > { %3110 = vmatpush.bf16.msrb.mxu2 %v6859_v53  ;;  %3123 = vmatpush.bf16.msrb.mxu3 %v6987_v54  ;;  %v7199_v19 = vor.u32 %v8529_v43, %v7198_v14  ;;  %v7167_v53 = vor.u32 %v8521_v47, %v7166_v45  ;;  %v6904_v54 = vld [vmem:[#allocation7 + $0x738] sm:$0xf0]  ;;  %v8605_v14 = vld [vmem:[#allocation7 + $0x3ec] sm:$0xf0]  ;;  %v8507_v43 = vld [vmem:[#allocation7 + $0xe4] sm:$0xf] }
 0x1be   : > { %3776 = vmatpush.bf16.msra.mxu0 %v7103_v16  ;;  %3789 = vmatpush.bf16.msra.mxu1 %v7231_v33  ;;  %v7022_v16 = vld [vmem:[#allocation7 + $0x20] sm:$0xf]  ;;  %v6779_v33 = vor.u32 %v8676_v22, %v6776_v52  ;;  %v6907_v61 = vor.u32 %v8708_v15, %v6904_v54  ;;  %v7503_v20 = vor.u32 %v8605_v14, %v7502_v13  ;;  %v8565_v47 = vld [vmem:[#allocation7 + $0x2ac] sm:$0xf0]  ;;  %v8499_v52 = vld [vmem:[#allocation7 + $0xa4] sm:$0xf] }
 0x1bf   : > { %v7023_v3 = vor.u32 %v8485_v55, %v7022_v16  ;;  %v7342_v45 = vld [vmem:[#allocation7 + $0x2a0] sm:$0xf]  ;;  %v8597_v22 = vld [vmem:[#allocation7 + $0x3ac] sm:$0xf0]  ;;  %v7088_v15 = vld [vmem:[#allocation7 + $0xb0] sm:$0xf0] }
 0x1c0   : > { %v7343_v54 = vor.u32 %v8565_v47, %v7342_v45  ;;  %v7091_v16 = vor.u32 %v8499_v52, %v7088_v15  ;;  %v8561_v55 = vld [vmem:[#allocation7 + $0x28c] sm:$0xf0]  ;;  %v8527_v63 = vld [vmem:[#allocation7 + $0x184] sm:$0xf]  ;;  %v7152_v45 = vld [vmem:[#allocation7 + $0x130] sm:$0xf0] }
 0x1c1   : > { %3111 = vmatpush.bf16.msrb.mxu2 %v6843_v8  ;;  %3124 = vmatpush.bf16.msrb.mxu3 %v6971_v9  ;;  %v6888_v8 = vld [vmem:[#allocation7 + $0x718] sm:$0xf0]  ;;  %v7006_v9 = vld [vmem:[#allocation7] sm:$0xf]  ;;  %v8523_v13 = vld [vmem:[#allocation7 + $0x164] sm:$0xf] }
 0x1c2   : > { %3777 = vmatpush.bf16.msra.mxu0 %v7087_v41  ;;  %3790 = vmatpush.bf16.msra.mxu1 %v7215_v11  ;;  %v7151_v41 = vor.u32 %v8517_v60, %v7150_v56  ;;  %v7374_v11 = vld [vmem:[#allocation7 + $0x2e0] sm:$0xf] }
 0x1c3   : > { %v7454_v56 = vld [vmem:[#allocation7 + $0x380] sm:$0xf] }
 0x1c4   : > { %v7390_v15 = vld [vmem:[#allocation7 + $0x300] sm:$0xf] }
 0x1c5   : > { %3112 = vmatpush.bf16.msrb.mxu2 %v6827_v38  ;;  %3125 = vmatpush.bf16.msrb.mxu3 %v6955_v1  ;;  %v7120_v38 = vld [vmem:[#allocation7 + $0xf0] sm:$0xf0]  ;;  %v6891_v1 = vor.u32 %v8704_v4, %v6888_v8 }
 0x1c6   : > { %3778 = vmatpush.bf16.msra.mxu0 %v7071_v7  ;;  %3791 = vmatpush.bf16.msra.mxu1 %v7199_v19  ;;  %v7007_v7 = vor.u32 %v8481_v58, %v7006_v9  ;;  %v7375_v19 = vor.u32 %v8573_v12, %v7374_v11  ;;  %v7123_v59 = vor.u32 %v8507_v43, %v7120_v38  ;;  %v7310_v9 = vld [vmem:[#allocation7 + $0x260] sm:$0xf]  ;;  %v8491_v11 = vld [vmem:[#allocation7 + $0x64] sm:$0xf]  ;;  %v7056_v12 = vld [vmem:[#allocation7 + $0x70] sm:$0xf0] }
 0x1c7   : > { %v7438_v58 = vld [vmem:[#allocation7 + $0x360] sm:$0xf]  ;;  %v7059_v38 = vor.u32 %v8491_v11, %v7056_v12  ;;  %v7360_v11 = vld [vmem:[#allocation7 + $0x2d0] sm:$0xf0]  ;;  %v8599_v12 = vld [vmem:[#allocation7 + $0x3c4] sm:$0xf] }
 0x1c8   : > { %v7439_v43 = vor.u32 %v8589_v10, %v7438_v58  ;;  %v8567_v10 = vld [vmem:[#allocation7 + $0x2c4] sm:$0xf] }
 0x1c9   : > { %3113 = vmatpush.bf16.msrb.mxu2 %v6811_v57  ;;  %3126 = vmatpush.bf16.msrb.mxu3 %v6939_v29  ;;  %v7251_v57 = vor.u32 %v8539_v2, %v7248_v17  ;;  %v8601_v29 = vld [vmem:[#allocation7 + $0x3cc] sm:$0xf0]  ;;  %v7422_v2 = vld [vmem:[#allocation7 + $0x340] sm:$0xf] }
 0x1ca   : > { %3779 = vmatpush.bf16.msra.mxu0 %v7055_v31  ;;  %3792 = vmatpush.bf16.msra.mxu1 %v7183_v39  ;;  %v8503_v31 = vld [vmem:[#allocation7 + $0xc4] sm:$0xf]  ;;  %v7359_v39 = vor.u32 %v8569_v26, %v7358_v21  ;;  %v7487_v42 = vor.u32 %v8601_v29, %v7486_v27  ;;  %v7168_v21 = vld [vmem:[#allocation7 + $0x150] sm:$0xf0]  ;;  %v7278_v29 = vld [vmem:[#allocation7 + $0x220] sm:$0xf] }
 0x1cb   : > { %v7107_v44 = vor.u32 %v8503_v31, %v7104_v32  ;;  %v8549_v31 = vld [vmem:[#allocation7 + $0x22c] sm:$0xf0]  ;;  %v7406_v32 = vld [vmem:[#allocation7 + $0x320] sm:$0xf] }
 0x1cc   : > { %v7279_v47 = vor.u32 %v8549_v31, %v7278_v29  ;;  %v7222_v29 = vld [vmem:[#allocation7 + $0x1a8] sm:$0xf]  ;;  %v8534_v31 = vld [vmem:[#allocation7 + $0x1b4] sm:$0xf0] }
 0x1cd   : > { %3114 = vmatpush.bf16.msrb.mxu2 %v6795_v48  ;;  %3127 = vmatpush.bf16.msrb.mxu3 %v6923_v30  ;;  %v7470_v48 = vld [vmem:[#allocation7 + $0x3a0] sm:$0xf]  ;;  %v9480_v30 = vpack.c.bf16 %v9435_v49, %v9435_v49 }
 0x1ce   : > { %3780 = vmatpush.bf16.msra.mxu0 %v7039_v51  ;;  %3793 = vmatpush.bf16.msra.mxu1 %v7167_v53  ;;  %v7235_v51 = vor.u32 %v8535_v34, %v7232_v36  ;;  %v7216_v53 = vld [vmem:[#allocation7 + $0x1b0] sm:$0xf0]  ;;  %v7326_v49 = vld [vmem:[#allocation7 + $0x280] sm:$0xf]  ;;  %v8581_v36 = vld [vmem:[#allocation7 + $0x32c] sm:$0xf0] }
 0x1cf   : > { %v7219_v60 = vor.u32 %v8531_v46, %v7216_v53  ;;  %v8577_v46 = vld [vmem:[#allocation7 + $0x30c] sm:$0xf0]  ;;  %v8479_v53 = vld [vmem:[#allocation7 + $0x4] sm:$0xf] }
 0x1d1   : > { %3115 = vmatpush.bf16.msrb.mxu2 %v6779_v33  ;;  %3128 = vmatpush.bf16.msrb.mxu3 %v6907_v61  ;;  %v8593_v33 = vld [vmem:[#allocation7 + $0x38c] sm:$0xf0]  ;;  %v7200_v61 = vld [vmem:[#allocation7 + $0x190] sm:$0xf0] }
 0x1d2   : > { %3781 = vmatpush.bf16.msra.mxu0 %v7023_v3  ;;  %3794 = vmatpush.bf16.msra.mxu1 %v7151_v41  ;;  %v7327_v3 = vor.u32 %v8561_v55, %v7326_v49  ;;  %v7455_v4 = vor.u32 %v8593_v33, %v7454_v56  ;;  %v8557_v41 = vld [vmem:[#allocation7 + $0x26c] sm:$0xf0]  ;;  %v7203_v37 = vor.u32 %v8527_v63, %v7200_v61  ;;  %v7136_v49 = vld [vmem:[#allocation7 + $0x110] sm:$0xf0]  ;;  %v8571_v55 = vld [vmem:[#allocation7 + $0x2e4] sm:$0xf] }
 0x1d3   : > { %v7311_v14 = vor.u32 %v8557_v41, %v7310_v9  ;;  %v7376_v56 = vld [vmem:[#allocation7 + $0x2f0] sm:$0xf0]  ;;  %v8510_v63 = vld [vmem:[#allocation7 + $0xf4] sm:$0xf0]  ;;  %v7391_v61 = vor.u32 %v8577_v46, %v7390_v15 }
 0x1d4   : > { %v7379_v41 = vor.u32 %v8571_v55, %v7376_v56  ;;  %v8530_v15 = vld [vmem:[#allocation7 + $0x194] sm:$0xf0]  ;;  %v8587_v55 = vld [vmem:[#allocation7 + $0x364] sm:$0xf] }
 0x1d5   : > { %3116 = vmatpush.bf16.msrb.mxu2 %v6763_v35  ;;  %3129 = vmatpush.bf16.msrb.mxu3 %v6891_v1  ;;  %v7184_v35 = vld [vmem:[#allocation7 + $0x170] sm:$0xf0]  ;;  %v7294_v1 = vld [vmem:[#allocation7 + $0x240] sm:$0xf] }
 0x1d6   : > { %3782 = vmatpush.bf16.msra.mxu0 %v7007_v7  ;;  %3795 = vmatpush.bf16.msra.mxu1 %v7135_v18  ;;  %v8553_v7 = vld [vmem:[#allocation7 + $0x24c] sm:$0xf0]  ;;  %v7187_v17 = vor.u32 %v8523_v13, %v7184_v35  ;;  %v7488_v35 = vld [vmem:[#allocation7 + $0x3d0] sm:$0xf0] }
 0x1d7   : > { %v8585_v18 = vld [vmem:[#allocation7 + $0x34c] sm:$0xf0]  ;;  %v7295_v26 = vor.u32 %v8553_v7, %v7294_v1  ;;  %v8538_v1 = vld [vmem:[#allocation7 + $0x1d4] sm:$0xf0]  ;;  %v9487_v7 = vpack.c.bf16 %v9444_v5, %v9444_v5 }
 0x1d8   : > { %3117 = vmatmul.bf16.vlgmr.msrb.gmra.mxu2 %v9450_v28  ;;  %3130 = vmatmul.bf16.vlgmr.msrb.gmra.mxu3 %v9452_v50  ;;  %v7471_v28 = vor.u32 %v8597_v22, %v7470_v48  ;;  %v7072_v50 = vld [vmem:[#allocation7 + $0x90] sm:$0xf0]  ;;  %v7423_v27 = vor.u32 %v8585_v18, %v7422_v2  ;;  %v7262_v48 = vld [vmem:[#allocation7 + $0x200] sm:$0xf]  ;;  %v7407_v22 = vor.u32 %v8581_v36, %v7406_v32  ;;  %v8502_v5 = vld [vmem:[#allocation7 + $0xb4] sm:$0xf0] }
 0x1d9   : > { %3801 = vmatpush.bf16.msra.mxu2 %v7375_v19  ;;  %3814 = vmatpush.bf16.msra.mxu3 %v7503_v20  ;;  %v7075_v8 = vor.u32 %v8495_v62, %v7072_v50  ;;  %v8487_v19 = vld [vmem:[#allocation7 + $0x44] sm:$0xf]  ;;  %v7040_v20 = vld [vmem:[#allocation7 + $0x50] sm:$0xf0]  ;;  %v7126_v50 = vld [vmem:[#allocation7 + $0xe8] sm:$0xf]  ;;  %v7363_v2 = vor.u32 %v8567_v10, %v7360_v11  ;;  %v7491_v18 = vor.u32 %v8599_v12, %v7488_v35 }
 0x1da   : > { %3827 = vmatpush.bf16.msrb.mxu0 %v7123_v59  ;;  %3840 = vmatpush.bf16.msrb.mxu1 %v7251_v57  ;;  %v8519_v59 = vld [vmem:[#allocation7 + $0x144] sm:$0xf]  ;;  %v7043_v57 = vor.u32 %v8487_v19, %v7040_v20  ;;  %v7504_v62 = vld [vmem:[#allocation7 + $0x3f0] sm:$0xf0]  ;;  %v7046_v11 = vld [vmem:[#allocation7 + $0x48] sm:$0xf] }
 0x1db   : > { %3783 = vmatmul.bf16.vlgmr.msra.gmra.mxu0 %v9475_v40  ;;  %3796 = vmatmul.bf16.vlgmr.msra.gmra.mxu1 %v9480_v30  ;;  %v7171_v34 = vor.u32 %v8519_v59, %v7168_v21  ;;  %v8563_v20 = vld [vmem:[#allocation7 + $0x2a4] sm:$0xf]  ;;  %v7344_v59 = vld [vmem:[#allocation7 + $0x2b0] sm:$0xf0]  ;;  %v8490_v12 = vld [vmem:[#allocation7 + $0x54] sm:$0xf0] }
 0x1dc   : > { %v8595_v21 = vld [vmem:[#allocation7 + $0x3a4] sm:$0xf]  ;;  %v7424_v10 = vld [vmem:[#allocation7 + $0x350] sm:$0xf0]  ;;  %v7174_v35 = vld [vmem:[#allocation7 + $0x148] sm:$0xf] }
 0x1dd   : > { %3802 = vmatpush.bf16.msra.mxu2 %v7359_v39  ;;  %3815 = vmatpush.bf16.msra.mxu3 %v7487_v42  ;;  %v8483_v39 = vld [vmem:[#allocation7 + $0x24] sm:$0xf]  ;;  %v7024_v42 = vld [vmem:[#allocation7 + $0x30] sm:$0xf0] }
 0x1de   : > { %3828 = vmatpush.bf16.msrb.mxu0 %v7107_v44  ;;  %3841 = vmatpush.bf16.msrb.mxu1 %v7235_v51  ;;  %v8515_v44 = vld [vmem:[#allocation7 + $0x124] sm:$0xf]  ;;  %v8545_v51 = vld [vmem:[#allocation7 + $0x20c] sm:$0xf0]  ;;  %v7027_v52 = vor.u32 %v8483_v39, %v7024_v42  ;;  %v7328_v39 = vld [vmem:[#allocation7 + $0x290] sm:$0xf0] }
 0x1df   : > { %v7263_v33 = vor.u32 %v8545_v51, %v7262_v48  ;;  %v8559_v36 = vld [vmem:[#allocation7 + $0x284] sm:$0xf]  ;;  %v7078_v48 = vld [vmem:[#allocation7 + $0x88] sm:$0xf]  ;;  %v8498_v51 = vld [vmem:[#allocation7 + $0x94] sm:$0xf0] }
 0x1e0   : > { %v8591_v42 = vld [vmem:[#allocation7 + $0x384] sm:$0xf] }
 0x1e1   : > { %3803 = vmatpush.bf16.msra.mxu2 %v7343_v54  ;;  %3816 = vmatpush.bf16.msra.mxu3 %v7471_v28  ;;  %v7155_v54 = vor.u32 %v8515_v44, %v7152_v45  ;;  %v7008_v28 = vld [vmem:[#allocation7 + $0x10] sm:$0xf0]  ;;  %v7223_v44 = vor.u32 %v8534_v31, %v7222_v29  ;;  %v8543_v29 = vld [vmem:[#allocation7 + $0x204] sm:$0xf] }
 0x1e2   : > { %3829 = vmatpush.bf16.msrb.mxu0 %v7091_v16  ;;  %3842 = vmatpush.bf16.msrb.mxu1 %v7219_v60  ;;  %v8511_v16 = vld [vmem:[#allocation7 + $0x104] sm:$0xf]  ;;  %v7264_v31 = vld [vmem:[#allocation7 + $0x210] sm:$0xf0] }
 0x1e3   : > { %v8603_v60 = vld [vmem:[#allocation7 + $0x3e4] sm:$0xf]  ;;  %v7139_v9 = vor.u32 %v8511_v16, %v7136_v49  ;;  %v7312_v49 = vld [vmem:[#allocation7 + $0x270] sm:$0xf0] }
 0x1e4   : > { %v7507_v58 = vor.u32 %v8603_v60, %v7504_v62  ;;  %v8555_v16 = vld [vmem:[#allocation7 + $0x264] sm:$0xf]  ;;  %v7440_v60 = vld [vmem:[#allocation7 + $0x370] sm:$0xf0]  ;;  %v8494_v62 = vld [vmem:[#allocation7 + $0x74] sm:$0xf0] }
 0x1e5   : > { %3804 = vmatpush.bf16.msra.mxu2 %v7327_v3  ;;  %3817 = vmatpush.bf16.msra.mxu3 %v7455_v4  ;;  %v7011_v3 = vor.u32 %v8479_v53, %v7008_v28  ;;  %v7254_v4 = vld [vmem:[#allocation7 + $0x1e8] sm:$0xf]  ;;  %v7331_v53 = vor.u32 %v8559_v36, %v7328_v39  ;;  %v7079_v28 = vor.u32 %v8498_v51, %v7078_v48  ;;  %v7392_v36 = vld [vmem:[#allocation7 + $0x310] sm:$0xf0]  ;;  %v8514_v48 = vld [vmem:[#allocation7 + $0x114] sm:$0xf0] }
 0x1e6   : > { %3830 = vmatpush.bf16.msrb.mxu0 %v7075_v8  ;;  %3843 = vmatpush.bf16.msrb.mxu1 %v7203_v37  ;;  %v8542_v8 = vld [vmem:[#allocation7 + $0x1f4] sm:$0xf0]  ;;  %v7127_v37 = vor.u32 %v8510_v63, %v7126_v50  ;;  %v7190_v50 = vld [vmem:[#allocation7 + $0x168] sm:$0xf] }
 0x1e7   : > { %v7255_v13 = vor.u32 %v8542_v8, %v7254_v4  ;;  %v8526_v63 = vld [vmem:[#allocation7 + $0x174] sm:$0xf0]  ;;  %v8551_v8 = vld [vmem:[#allocation7 + $0x244] sm:$0xf]  ;;  %v7014_v39 = vld [vmem:[#allocation7 + $0x8] sm:$0xf] }
 0x1e9   : > { %3805 = vmatpush.bf16.msra.mxu2 %v7311_v14  ;;  %3818 = vmatpush.bf16.msra.mxu3 %v7439_v43  ;;  %v7110_v14 = vld [vmem:[#allocation7 + $0xc8] sm:$0xf]  ;;  %v8506_v43 = vld [vmem:[#allocation7 + $0xd4] sm:$0xf0] }
 0x1ea   : > { %3831 = vmatpush.bf16.msrb.mxu0 %v7059_v38  ;;  %3844 = vmatpush.bf16.msrb.mxu1 %v7187_v17  ;;  %v7238_v38 = vld [vmem:[#allocation7 + $0x1c8] sm:$0xf]  ;;  %v9491_v17 = vpack.c.bf16 %v9446_v6, %v9446_v6  ;;  %v7111_v19 = vor.u32 %v8506_v43, %v7110_v14  ;;  %v7347_v6 = vor.u32 %v8563_v20, %v7344_v59  ;;  %v8522_v14 = vld [vmem:[#allocation7 + $0x154] sm:$0xf0]  ;;  %v7408_v59 = vld [vmem:[#allocation7 + $0x330] sm:$0xf0] }
 0x1eb   : > { %v7175_v20 = vor.u32 %v8522_v14, %v7174_v35 }
 0x1ed   : > { %3806 = vmatpush.bf16.msra.mxu2 %v7295_v26  ;;  %3819 = vmatpush.bf16.msra.mxu3 %v7423_v27  ;;  %v7239_v26 = vor.u32 %v8538_v1, %v7238_v38  ;;  %v7472_v27 = vld [vmem:[#allocation7 + $0x3b0] sm:$0xf0]  ;;  %v7047_v1 = vor.u32 %v8490_v12, %v7046_v11  ;;  %v7240_v11 = vld [vmem:[#allocation7 + $0x1d8] sm:$0xf0] }
 0x1ee   : > { %3832 = vmatpush.bf16.msrb.mxu0 %v7043_v57  ;;  %3845 = vmatpush.bf16.msrb.mxu1 %v7171_v34  ;;  %v7094_v57 = vld [vmem:[#allocation7 + $0xa8] sm:$0xf]  ;;  %v7475_v32 = vor.u32 %v8595_v21, %v7472_v27 }
 0x1ef   : > { %v7095_v34 = vor.u32 %v8502_v5, %v7094_v57  ;;  %v7030_v21 = vld [vmem:[#allocation7 + $0x28] sm:$0xf]  ;;  %v8518_v57 = vld [vmem:[#allocation7 + $0x134] sm:$0xf0] }
 0x1f0   : > { %v7158_v27 = vld [vmem:[#allocation7 + $0x128] sm:$0xf] }
 0x1f1   : > { %3807 = vmatpush.bf16.msra.mxu2 %v7279_v47  ;;  %3820 = vmatpush.bf16.msra.mxu3 %v7407_v22  ;;  %v7456_v47 = vld [vmem:[#allocation7 + $0x390] sm:$0xf0] }
 0x1f2   : > { %3833 = vmatpush.bf16.msrb.mxu0 %v7027_v52  ;;  %3846 = vmatpush.bf16.msrb.mxu1 %v7155_v54  ;;  %v7206_v52 = vld [vmem:[#allocation7 + $0x188] sm:$0xf]  ;;  %v7459_v54 = vor.u32 %v8591_v42, %v7456_v47  ;;  %v7159_v42 = vor.u32 %v8518_v57, %v7158_v27 }
 0x1f3   : > { %v7207_v56 = vor.u32 %v8530_v15, %v7206_v52  ;;  %v7142_v47 = vld [vmem:[#allocation7 + $0x108] sm:$0xf]  ;;  %v8574_v52 = vld [vmem:[#allocation7 + $0x2f4] sm:$0xf0] }
 0x1f4   : > { %v7510_v15 = vld [vmem:[#allocation7 + $0x3e8] sm:$0xf] }
 0x1f5   : > { %3808 = vmatpush.bf16.msra.mxu2 %v7263_v33  ;;  %3821 = vmatpush.bf16.msra.mxu3 %v7391_v61  ;;  %v2936_v45 = vpop.f32.mrf.mxu0  ;;  %v2949_v22 = vpop.f32.mrf.mxu1  ;;  %v7062_v33 = vld [vmem:[#allocation7 + $0x68] sm:$0xf]  ;;  %v7315_v61 = vor.u32 %v8555_v16, %v7312_v49  ;;  %v8508_v16 = vld [vmem:[#allocation7 + $0xec] sm:$0xf]  ;;  %v7128_v49 = vld [vmem:[#allocation7 + $0xf8] sm:$0xf0] }
 0x1f6   : > { %3834 = vmatpush.bf16.msrb.mxu0 %v7011_v3  ;;  %3847 = vmatpush.bf16.msrb.mxu1 %v7139_v9  ;;  %v9497_v46 = vadd.f32 %v2949_v22, %v2936_v45  ;;  %v7443_v3 = vor.u32 %v8587_v55, %v7440_v60  ;;  %v7063_v4 = vor.u32 %v8494_v62, %v7062_v33  ;;  %v7296_v9 = vld [vmem:[#allocation7 + $0x250] sm:$0xf0]  ;;  %v8482_v45 = vld [vmem:[#allocation7 + $0x14] sm:$0xf0]  ;;  %v7382_v22 = vld [vmem:[#allocation7 + $0x2e8] sm:$0xf] }
 0x1f7   : > { %v7299_v43 = vor.u32 %v8551_v8, %v7296_v9  ;;  %v8540_v60 = vld [vmem:[#allocation7 + $0x1ec] sm:$0xf]  ;;  %v7256_v33 = vld [vmem:[#allocation7 + $0x1f8] sm:$0xf0]  ;;  %v7143_v62 = vor.u32 %v8514_v48, %v7142_v47  ;;  %v7494_v8 = vld [vmem:[#allocation7 + $0x3c8] sm:$0xf] }
 0x1f8   : > { %3809 = vmatmul.bf16.vlgmr.msra.gmra.mxu2 %v9487_v7  ;;  %3822 = vmatmul.bf16.vlgmr.msra.gmra.mxu3 %v9491_v17  ;;  %v7259_v9 = vor.u32 %v8540_v60, %v7256_v33  ;;  %v8492_v60 = vld [vmem:[#allocation7 + $0x6c] sm:$0xf]  ;;  %v7064_v33 = vld [vmem:[#allocation7 + $0x78] sm:$0xf0] }
 0x1f9   : > { %3853 = vmatpush.bf16.msrb.mxu2 %v7379_v41  ;;  %3866 = vmatpush.bf16.msrb.mxu3 %v7507_v58  ;;  %v8583_v41 = vld [vmem:[#allocation7 + $0x344] sm:$0xf]  ;;  %v7191_v58 = vor.u32 %v8526_v63, %v7190_v50  ;;  %v7383_v50 = vor.u32 %v8574_v52, %v7382_v22  ;;  %v7318_v52 = vld [vmem:[#allocation7 + $0x268] sm:$0xf] }
 0x1fa   : > { %3879 = vmatpush.bf16.msra.mxu0 %v7127_v37  ;;  %3892 = vmatpush.bf16.msra.mxu1 %v7255_v13  ;;  %v7427_v38 = vor.u32 %v8583_v41, %v7424_v10  ;;  %v8602_v41 = vld [vmem:[#allocation7 + $0x3d4] sm:$0xf0]  ;;  %v8536_v10 = vld [vmem:[#allocation7 + $0x1cc] sm:$0xf] }
 0x1fb   : > { %3835 = vmatmul.bf16.vlgmr.msrb.gmra.mxu0 %v9475_v40  ;;  %3848 = vmatmul.bf16.vlgmr.msrb.gmra.mxu1 %v9480_v30  ;;  %v7495_v14 = vor.u32 %v8602_v41, %v7494_v8  ;;  %v7067_v8 = vor.u32 %v8492_v60, %v7064_v33  ;;  %v8554_v41 = vld [vmem:[#allocation7 + $0x254] sm:$0xf0]  ;;  %v7758_v33 = vld [vmem:[#allocation7 + $0x9e0] sm:$0xf] }
 0x1fd   : > { %3854 = vmatpush.bf16.msrb.mxu2 %v7363_v2  ;;  %3867 = vmatpush.bf16.msrb.mxu3 %v7491_v18  ;;  %v2938_v37 = vpop.f32.mrf.mxu0  ;;  %v2951_v13 = vpop.f32.mrf.mxu1  ;;  %v8547_v2 = vld [vmem:[#allocation7 + $0x224] sm:$0xf]  ;;  %v7280_v18 = vld [vmem:[#allocation7 + $0x230] sm:$0xf0] }
 0x1fe   : > { %3880 = vmatpush.bf16.msra.mxu0 %v7111_v19  ;;  %3893 = vmatpush.bf16.msra.mxu1 %v7239_v26  ;;  %v8579_v19 = vld [vmem:[#allocation7 + $0x324] sm:$0xf]  ;;  %v8486_v26 = vld [vmem:[#allocation7 + $0x34] sm:$0xf0]  ;;  %v7283_v5 = vor.u32 %v8547_v2, %v7280_v18  ;;  %v7112_v37 = vld [vmem:[#allocation7 + $0xd8] sm:$0xf0]  ;;  %v7243_v18 = vor.u32 %v8536_v10, %v7240_v11 }
 0x1ff   : > { %v7478_v2 = vld [vmem:[#allocation7 + $0x3a8] sm:$0xf]  ;;  %v8586_v10 = vld [vmem:[#allocation7 + $0x354] sm:$0xf0]  ;;  %v8488_v11 = vld [vmem:[#allocation7 + $0x4c] sm:$0xf] }
 0x201   : > { %3855 = vmatpush.bf16.msrb.mxu2 %v7347_v6  ;;  %3868 = vmatpush.bf16.msrb.mxu3 %v7475_v32  ;;  %v7411_v6 = vor.u32 %v8579_v19, %v7408_v59  ;;  %v7031_v32 = vor.u32 %v8486_v26, %v7030_v21  ;;  %v8598_v19 = vld [vmem:[#allocation7 + $0x3b4] sm:$0xf0]  ;;  %v7096_v59 = vld [vmem:[#allocation7 + $0xb8] sm:$0xf0]  ;;  %v8532_v21 = vld [vmem:[#allocation7 + $0x1ac] sm:$0xf] }
 0x202   : > { %3881 = vmatpush.bf16.msra.mxu0 %v7095_v34  ;;  %3894 = vmatpush.bf16.msra.mxu1 %v7223_v44  ;;  %v8575_v34 = vld [vmem:[#allocation7 + $0x304] sm:$0xf]  ;;  %v7224_v26 = vld [vmem:[#allocation7 + $0x1b8] sm:$0xf0]  ;;  %v7479_v57 = vor.u32 %v8598_v19, %v7478_v2  ;;  %v7286_v2 = vld [vmem:[#allocation7 + $0x228] sm:$0xf] }
 0x203   : > { %v7395_v55 = vor.u32 %v8575_v34, %v7392_v36  ;;  %v8594_v34 = vld [vmem:[#allocation7 + $0x394] sm:$0xf0]  ;;  %v8496_v36 = vld [vmem:[#allocation7 + $0x8c] sm:$0xf]  ;;  %v7414_v19 = vld [vmem:[#allocation7 + $0x328] sm:$0xf] }
 0x205   : > { %3856 = vmatpush.bf16.msrb.mxu2 %v7331_v53  ;;  %3869 = vmatpush.bf16.msrb.mxu3 %v7459_v54  ;;  %v2988_v44 = vpop.f32.mrf.mxu0  ;;  %v3001_v51 = vpop.f32.mrf.mxu1  ;;  %v7267_v54 = vor.u32 %v8543_v29, %v7264_v31  ;;  %v7334_v29 = vld [vmem:[#allocation7 + $0x288] sm:$0xf]  ;;  %v8562_v31 = vld [vmem:[#allocation7 + $0x294] sm:$0xf0] }
 0x206   : > { %3882 = vmatpush.bf16.msra.mxu0 %v7079_v28  ;;  %3895 = vmatpush.bf16.msra.mxu1 %v7207_v56  ;;  %v9499_v53 = vadd.f32 %v3001_v51, %v2988_v44  ;;  %v8606_v28 = vld [vmem:[#allocation7 + $0x3f4] sm:$0xf0]  ;;  %v7015_v56 = vor.u32 %v8482_v45, %v7014_v39  ;;  %v7080_v39 = vld [vmem:[#allocation7 + $0x98] sm:$0xf0]  ;;  %v7335_v47 = vor.u32 %v8562_v31, %v7334_v29 }
 0x207   : > { %v7511_v63 = vor.u32 %v8606_v28, %v7510_v15  ;;  %v7208_v44 = vld [vmem:[#allocation7 + $0x198] sm:$0xf0]  ;;  %v7083_v22 = vor.u32 %v8496_v36, %v7080_v39  ;;  %v8558_v15 = vld [vmem:[#allocation7 + $0x274] sm:$0xf0]  ;;  %v7398_v39 = vld [vmem:[#allocation7 + $0x308] sm:$0xf] }
 0x208   : > { %v7160_v29 = vld [vmem:[#allocation7 + $0x138] sm:$0xf0] }
 0x209   : > { %3857 = vmatpush.bf16.msrb.mxu2 %v7315_v61  ;;  %3870 = vmatpush.bf16.msrb.mxu3 %v7443_v3  ;;  %v7131_v61 = vor.u32 %v8508_v16, %v7128_v49  ;;  %v7366_v3 = vld [vmem:[#allocation7 + $0x2c8] sm:$0xf] }
 0x20a   : > { %3883 = vmatpush.bf16.msra.mxu0 %v7063_v4  ;;  %3896 = vmatpush.bf16.msra.mxu1 %v7191_v58  ;;  %v8570_v4 = vld [vmem:[#allocation7 + $0x2d4] sm:$0xf0]  ;;  %v8504_v58 = vld [vmem:[#allocation7 + $0xcc] sm:$0xf] }
 0x20b   : > { %v7367_v13 = vor.u32 %v8570_v4, %v7366_v3 }
 0x20d   : > { %3858 = vmatpush.bf16.msrb.mxu2 %v7299_v43  ;;  %3871 = vmatpush.bf16.msrb.mxu3 %v7427_v38  ;;  %v2990_v12 = vpop.f32.mrf.mxu0  ;;  %v3003_v35 = vpop.f32.mrf.mxu1  ;;  %v7115_v43 = vor.u32 %v8504_v58, %v7112_v37  ;;  %v7350_v38 = vld [vmem:[#allocation7 + $0x2a8] sm:$0xf] }
 0x20e   : > { %3884 = vmatpush.bf16.msra.mxu0 %v7047_v1  ;;  %3897 = vmatpush.bf16.msra.mxu1 %v7175_v20  ;;  %v8566_v1 = vld [vmem:[#allocation7 + $0x2b4] sm:$0xf0]  ;;  %v8500_v20 = vld [vmem:[#allocation7 + $0xac] sm:$0xf]  ;;  %v7430_v58 = vld [vmem:[#allocation7 + $0x348] sm:$0xf] }
 0x20f   : > { %v7351_v27 = vor.u32 %v8566_v1, %v7350_v38  ;;  %v7048_v12 = vld [vmem:[#allocation7 + $0x58] sm:$0xf0]  ;;  %v7431_v38 = vor.u32 %v8586_v10, %v7430_v58  ;;  %v8568_v58 = vld [vmem:[#allocation7 + $0x2cc] sm:$0xf] }
 0x210   : > { %v7051_v1 = vor.u32 %v8488_v11, %v7048_v12  ;;  %v8600_v10 = vld [vmem:[#allocation7 + $0x3cc] sm:$0xf]  ;;  %v7496_v12 = vld [vmem:[#allocation7 + $0x3d8] sm:$0xf0] }
 0x211   : > { %3859 = vmatpush.bf16.msrb.mxu2 %v7283_v5  ;;  %3872 = vmatpush.bf16.msrb.mxu3 %v7411_v6  ;;  %v7099_v5 = vor.u32 %v8500_v20, %v7096_v59  ;;  %v7462_v6 = vld [vmem:[#allocation7 + $0x388] sm:$0xf] }
 0x212   : > { %3885 = vmatpush.bf16.msra.mxu0 %v7031_v32  ;;  %3898 = vmatpush.bf16.msra.mxu1 %v7159_v42  ;;  %v7227_v32 = vor.u32 %v8532_v21, %v7224_v26  ;;  %v8528_v42 = vld [vmem:[#allocation7 + $0x18c] sm:$0xf]  ;;  %v7463_v51 = vor.u32 %v8594_v34, %v7462_v6  ;;  %v8582_v26 = vld [vmem:[#allocation7 + $0x334] sm:$0xf0]  ;;  %v7270_v6 = vld [vmem:[#allocation7 + $0x208] sm:$0xf] }
 0x213   : > { %v7211_v16 = vor.u32 %v8528_v42, %v7208_v44  ;;  %v7415_v34 = vor.u32 %v8582_v26, %v7414_v19  ;;  %v8578_v42 = vld [vmem:[#allocation7 + $0x314] sm:$0xf0]  ;;  %v8480_v44 = vld [vmem:[#allocation7 + $0xc] sm:$0xf]  ;;  %v8757_v26 = vld [vmem:[#allocation7 + $0x8ac] sm:$0xf0] }
 0x214   : > { %v8596_v19 = vld [vmem:[#allocation7 + $0x3ac] sm:$0xf] }
 0x215   : > { %3860 = vmatpush.bf16.msrb.mxu2 %v7267_v54  ;;  %3873 = vmatpush.bf16.msrb.mxu3 %v7395_v55  ;;  %v7446_v54 = vld [vmem:[#allocation7 + $0x368] sm:$0xf] }
 0x216   : > { %3886 = vmatpush.bf16.msra.mxu0 %v7015_v56  ;;  %3899 = vmatpush.bf16.msra.mxu1 %v7143_v62  ;;  %v8590_v56 = vld [vmem:[#allocation7 + $0x374] sm:$0xf0] }
 0x217   : > { %v7447_v4 = vor.u32 %v8590_v56, %v7446_v54  ;;  %v7399_v56 = vor.u32 %v8578_v42, %v7398_v39  ;;  %v8592_v39 = vld [vmem:[#allocation7 + $0x38c] sm:$0xf] }
 0x218   : > { %3861 = vmatmul.bf16.vlgmr.msrb.gmra.mxu2 %v9487_v7  ;;  %3874 = vmatmul.bf16.vlgmr.msrb.gmra.mxu3 %v9491_v17  ;;  %v3040_v45 = vpop.f32.mrf.mxu0  ;;  %v3053_v48 = vpop.f32.mrf.mxu1 }
 0x219   : > { %3905 = vmatpush.bf16.msra.mxu2 %v7383_v50  ;;  %3918 = vmatpush.bf16.msra.mxu3 %v7511_v63  ;;  %v9505_v28 = vadd.f32 %v3053_v48, %v3040_v45  ;;  %v8524_v50 = vld [vmem:[#allocation7 + $0x16c] sm:$0xf]  ;;  %v7192_v63 = vld [vmem:[#allocation7 + $0x178] sm:$0xf0] }
 0x21a   : > { %3931 = vmatpush.bf16.msrb.mxu0 %v7131_v61  ;;  %3944 = vmatpush.bf16.msrb.mxu1 %v7259_v9  ;;  %v7319_v61 = vor.u32 %v8558_v15, %v7318_v52  ;;  %v7302_v9 = vld [vmem:[#allocation7 + $0x248] sm:$0xf]  ;;  %v7195_v37 = vor.u32 %v8524_v50, %v7192_v63  ;;  %v8512_v48 = vld [vmem:[#allocation7 + $0x10c] sm:$0xf]  ;;  %v7384_v52 = vld [vmem:[#allocation7 + $0x2f8] sm:$0xf0] }
 0x21b   : > { %3887 = vmatmul.bf16.vlgmr.msra.gmra.mxu0 %v9475_v40  ;;  %3900 = vmatmul.bf16.vlgmr.msra.gmra.mxu1 %v9480_v30  ;;  %v2962_v49 = vpop.f32.mrf.mxu2  ;;  %v2975_v55 = vpop.f32.mrf.mxu3  ;;  %v8604_v15 = vld [vmem:[#allocation7 + $0x3ec] sm:$0xf] }
 0x21c   : > { %v2963_v62 = vadd.f32 %v2962_v49, %v9497_v46  ;;  %v7176_v46 = vld [vmem:[#allocation7 + $0x158] sm:$0xf0]  ;;  %v7630_v49 = vld [vmem:[#allocation7 + $0x8e0] sm:$0xf] }
 0x21d   : > { %3906 = vmatpush.bf16.msra.mxu2 %v7367_v13  ;;  %3919 = vmatpush.bf16.msra.mxu3 %v7495_v14  ;;  %v8520_v13 = vld [vmem:[#allocation7 + $0x14c] sm:$0xf]  ;;  %v7303_v14 = vor.u32 %v8554_v41, %v7302_v9 }
 0x21e   : > { %3932 = vmatpush.bf16.msrb.mxu0 %v7115_v43  ;;  %3945 = vmatpush.bf16.msrb.mxu1 %v7243_v18  ;;  %v9508_v3 = vadd.f32 %v2975_v55, %v2963_v62  ;;  %v8550_v18 = vld [vmem:[#allocation7 + $0x234] sm:$0xf0]  ;;  %v7179_v20 = vor.u32 %v8520_v13, %v7176_v46  ;;  %v8765_v55 = vld [vmem:[#allocation7 + $0x8ec] sm:$0xf0]  ;;  %v7614_v13 = vld [vmem:[#allocation7 + $0x8c0] sm:$0xf] }
 0x21f   : > { %v7287_v31 = vor.u32 %v8550_v18, %v7286_v2  ;;  %v8797_v62 = vld [vmem:[#allocation7 + $0x9ec] sm:$0xf0]  ;;  %v7631_v9 = vor.u32 %v8765_v55, %v7630_v49  ;;  %v8564_v2 = vld [vmem:[#allocation7 + $0x2ac] sm:$0xf]  ;;  %v7352_v18 = vld [vmem:[#allocation7 + $0x2b8] sm:$0xf0] }
 0x220   : > { %v3042_v35 = vpop.f32.mrf.mxu0  ;;  %v3055_v43 = vpop.f32.mrf.mxu1  ;;  %v7759_v11 = vor.u32 %v8797_v62, %v7758_v33  ;;  %v8761_v46 = vld [vmem:[#allocation7 + $0x8cc] sm:$0xf0]  ;;  %v7320_v49 = vld [vmem:[#allocation7 + $0x278] sm:$0xf0]  ;;  %v8588_v55 = vld [vmem:[#allocation7 + $0x36c] sm:$0xf] }
 0x221   : > { %3907 = vmatpush.bf16.msra.mxu2 %v7351_v27  ;;  %3920 = vmatpush.bf16.msra.mxu3 %v7479_v57  ;;  %v8484_v27 = vld [vmem:[#allocation7 + $0x2c] sm:$0xf]  ;;  %v7032_v57 = vld [vmem:[#allocation7 + $0x38] sm:$0xf0]  ;;  %v8793_v43 = vld [vmem:[#allocation7 + $0x9cc] sm:$0xf0] }
 0x222   : > { %3933 = vmatpush.bf16.msrb.mxu0 %v7099_v5  ;;  %3946 = vmatpush.bf16.msrb.mxu1 %v7227_v32  ;;  %v8516_v5 = vld [vmem:[#allocation7 + $0x12c] sm:$0xf]  ;;  %v8546_v32 = vld [vmem:[#allocation7 + $0x214] sm:$0xf0]  ;;  %v7035_v36 = vor.u32 %v8484_v27, %v7032_v57  ;;  %v7726_v27 = vld [vmem:[#allocation7 + $0x9a0] sm:$0xf] }
 0x223   : > { %v2964_v59 = vpop.f32.mrf.mxu2  ;;  %v2977_v21 = vpop.f32.mrf.mxu3  ;;  %v7163_v45 = vor.u32 %v8516_v5, %v7160_v29  ;;  %v7271_v54 = vor.u32 %v8546_v32, %v7270_v6  ;;  %v8789_v57 = vld [vmem:[#allocation7 + $0x9ac] sm:$0xf0]  ;;  %v7355_v5 = vor.u32 %v8564_v2, %v7352_v18  ;;  %v7566_v33 = vld [vmem:[#allocation7 + $0x860] sm:$0xf] }
 0x224   : > { %v7480_v59 = vld [vmem:[#allocation7 + $0x3b8] sm:$0xf0]  ;;  %v7598_v21 = vld [vmem:[#allocation7 + $0x8a0] sm:$0xf]  ;;  %v7727_v42 = vor.u32 %v8789_v57, %v7726_v27  ;;  %v8749_v62 = vld [vmem:[#allocation7 + $0x86c] sm:$0xf0] }
 0x225   : > { %3908 = vmatpush.bf16.msra.mxu2 %v7335_v47  ;;  %3921 = vmatpush.bf16.msra.mxu3 %v7463_v51  ;;  %v7016_v47 = vld [vmem:[#allocation7 + $0x18] sm:$0xf0]  ;;  %v7483_v6 = vor.u32 %v8596_v19, %v7480_v59  ;;  %v7599_v32 = vor.u32 %v8757_v26, %v7598_v21  ;;  %v8548_v59 = vld [vmem:[#allocation7 + $0x22c] sm:$0xf]  ;;  %v7534_v57 = vld [vmem:[#allocation7 + $0x820] sm:$0xf] }
 0x226   : > { %3934 = vmatpush.bf16.msrb.mxu0 %v7083_v22  ;;  %3947 = vmatpush.bf16.msrb.mxu1 %v7211_v16  ;;  %v7144_v51 = vld [vmem:[#allocation7 + $0x118] sm:$0xf0]  ;;  %v8572_v22 = vld [vmem:[#allocation7 + $0x2ec] sm:$0xf]  ;;  %v7019_v60 = vor.u32 %v8480_v44, %v7016_v47  ;;  %v7710_v47 = vld [vmem:[#allocation7 + $0x980] sm:$0xf] }
 0x227   : > { %v7512_v16 = vld [vmem:[#allocation7 + $0x3f8] sm:$0xf0]  ;;  %v7147_v50 = vor.u32 %v8512_v48, %v7144_v51  ;;  %v7387_v63 = vor.u32 %v8572_v22, %v7384_v52  ;;  %v8785_v48 = vld [vmem:[#allocation7 + $0x98c] sm:$0xf0]  ;;  %v8580_v26 = vld [vmem:[#allocation7 + $0x32c] sm:$0xf] }
 0x228   : > { %v7464_v44 = vld [vmem:[#allocation7 + $0x398] sm:$0xf0] }
 0x229   : > { %3909 = vmatpush.bf16.msra.mxu2 %v7319_v61  ;;  %3922 = vmatpush.bf16.msra.mxu3 %v7447_v4  ;;  %v7288_v21 = vld [vmem:[#allocation7 + $0x238] sm:$0xf0] }
 0x22a   : > { %3935 = vmatpush.bf16.msrb.mxu0 %v7067_v8  ;;  %3948 = vmatpush.bf16.msrb.mxu1 %v7195_v37  ;;  %v7515_v8 = vor.u32 %v8604_v15, %v7512_v16  ;;  %v7368_v37 = vld [vmem:[#allocation7 + $0x2d8] sm:$0xf0]  ;;  %v7467_v15 = vor.u32 %v8592_v39, %v7464_v44  ;;  %v8556_v16 = vld [vmem:[#allocation7 + $0x26c] sm:$0xf] }
 0x22b   : > { %v3014_v61 = vpop.f32.mrf.mxu2  ;;  %v3027_v4 = vpop.f32.mrf.mxu3  ;;  %v7416_v27 = vld [vmem:[#allocation7 + $0x338] sm:$0xf0]  ;;  %v8576_v44 = vld [vmem:[#allocation7 + $0x30c] sm:$0xf] }
 0x22c   : > { %v3015_v41 = vadd.f32 %v3014_v61, %v9499_v53  ;;  %v7499_v53 = vor.u32 %v8600_v10, %v7496_v12  ;;  %v7323_v61 = vor.u32 %v8556_v16, %v7320_v49  ;;  %v7432_v12 = vld [vmem:[#allocation7 + $0x358] sm:$0xf0]  ;;  %v8014_v16 = vld [vmem:[#allocation7 + $0xbe0] sm:$0xf] }
 0x22d   : > { %3910 = vmatpush.bf16.msra.mxu2 %v7303_v14  ;;  %3923 = vmatpush.bf16.msra.mxu3 %v7431_v38  ;;  %v7742_v14 = vld [vmem:[#allocation7 + $0x9c0] sm:$0xf]  ;;  %v7371_v38 = vor.u32 %v8568_v58, %v7368_v37  ;;  %v7304_v58 = vld [vmem:[#allocation7 + $0x258] sm:$0xf0]  ;;  %v8584_v37 = vld [vmem:[#allocation7 + $0x34c] sm:$0xf] }
 0x22e   : > { %3936 = vmatpush.bf16.msrb.mxu0 %v7051_v1  ;;  %3949 = vmatpush.bf16.msrb.mxu1 %v7179_v20  ;;  %v9511_v35 = vadd.f32 %v3027_v4, %v3015_v41  ;;  %v7615_v1 = vor.u32 %v8761_v46, %v7614_v13  ;;  %v7743_v20 = vor.u32 %v8793_v43, %v7742_v14  ;;  %v8552_v41 = vld [vmem:[#allocation7 + $0x24c] sm:$0xf]  ;;  %v7550_v13 = vld [vmem:[#allocation7 + $0x840] sm:$0xf]  ;;  %v8745_v46 = vld [vmem:[#allocation7 + $0x84c] sm:$0xf0] }
 0x22f   : > { %v7678_v43 = vld [vmem:[#allocation7 + $0x940] sm:$0xf]  ;;  %v7307_v18 = vor.u32 %v8552_v41, %v7304_v58  ;;  %v7435_v19 = vor.u32 %v8584_v37, %v7432_v12 }
 0x230   : > { %v7870_v37 = vld [vmem:[#allocation7 + $0xac0] sm:$0xf] }
 0x231   : > { %3911 = vmatpush.bf16.msra.mxu2 %v7287_v31  ;;  %3924 = vmatpush.bf16.msra.mxu3 %v7415_v34  ;;  %v8560_v34 = vld [vmem:[#allocation7 + $0x28c] sm:$0xf] }
 0x232   : > { %3937 = vmatpush.bf16.msrb.mxu0 %v7035_v36  ;;  %3950 = vmatpush.bf16.msrb.mxu1 %v7163_v45  ;;  %v7336_v36 = vld [vmem:[#allocation7 + $0x298] sm:$0xf0]  ;;  %v7582_v45 = vld [vmem:[#allocation7 + $0x880] sm:$0xf] }
 0x233   : > { %v3016_v29 = vpop.f32.mrf.mxu2  ;;  %v3029_v31 = vpop.f32.mrf.mxu3  ;;  %v7339_v22 = vor.u32 %v8560_v34, %v7336_v36  ;;  %v7272_v34 = vld [vmem:[#allocation7 + $0x218] sm:$0xf0]  ;;  %v7419_v36 = vor.u32 %v8580_v26, %v7416_v27  ;;  %v8853_v26 = vld [vmem:[#allocation7 + $0xbac] sm:$0xf0]  ;;  %v7600_v27 = vld [vmem:[#allocation7 + $0x8b0] sm:$0xf0] }
 0x234   : > { %v7662_v29 = vld [vmem:[#allocation7 + $0x920] sm:$0xf]  ;;  %v8773_v31 = vld [vmem:[#allocation7 + $0x92c] sm:$0xf0] }
 0x235   : > { %3912 = vmatpush.bf16.msra.mxu2 %v7271_v54  ;;  %3925 = vmatpush.bf16.msra.mxu3 %v7399_v56  ;;  %v7711_v56 = vor.u32 %v8785_v48, %v7710_v47  ;;  %v7663_v47 = vor.u32 %v8773_v31, %v7662_v29  ;;  %v8737_v48 = vld [vmem:[#allocation7 + $0x80c] sm:$0xf0] }
 0x236   : > { %3938 = vmatpush.bf16.msrb.mxu0 %v7019_v60  ;;  %3951 = vmatpush.bf16.msrb.mxu1 %v7147_v50  ;;  %v7448_v60 = vld [vmem:[#allocation7 + $0x378] sm:$0xf0]  ;;  %v7694_v50 = vld [vmem:[#allocation7 + $0x960] sm:$0xf] }
 0x237   : > { %v7451_v4 = vor.u32 %v8588_v55, %v7448_v60  ;;  %v8861_v55 = vld [vmem:[#allocation7 + $0xbec] sm:$0xf0]  ;;  %v7632_v60 = vld [vmem:[#allocation7 + $0x8f0] sm:$0xf0] }
 0x238   : > { %3913 = vmatmul.bf16.vlgmr.msra.gmra.mxu2 %v9487_v7  ;;  %3926 = vmatmul.bf16.vlgmr.msra.gmra.mxu3 %v9491_v17  ;;  %v3105_v51 = vpop.f32.mrf.mxu1  ;;  %v8015_v41 = vor.u32 %v8861_v55, %v8014_v16  ;;  %v7950_v16 = vld [vmem:[#allocation7 + $0xb60] sm:$0xf]  ;;  %v8845_v55 = vld [vmem:[#allocation7 + $0xb6c] sm:$0xf0] }
 0x239   : > { %3957 = vmatpush.bf16.msrb.mxu2 %v7387_v63  ;;  %3970 = vmatpush.bf16.msrb.mxu3 %v7515_v8  ;;  %v8781_v63 = vld [vmem:[#allocation7 + $0x96c] sm:$0xf0]  ;;  %v7567_v8 = vor.u32 %v8749_v62, %v7566_v33 }
 0x23a   : > { %4783 = vmatpush.bf16.msra.mxu0 %v7631_v9  ;;  %4796 = vmatpush.bf16.msra.mxu1 %v7759_v11  ;;  %v7695_v10 = vor.u32 %v8781_v63, %v7694_v50  ;;  %v8795_v50 = vld [vmem:[#allocation7 + $0x9e4] sm:$0xf]  ;;  %v7760_v63 = vld [vmem:[#allocation7 + $0x9f0] sm:$0xf0] }
 0x23b   : > { %3939 = vmatmul.bf16.vlgmr.msrb.gmra.mxu0 %v9475_v40  ;;  %3952 = vmatmul.bf16.vlgmr.msrb.gmra.mxu1 %v9480_v30  ;;  %v8753_v40 = vld [vmem:[#allocation7 + $0x88c] sm:$0xf0]  ;;  %v3092_v30 = vpop.f32.mrf.mxu0  ;;  %v3066_v9 = vpop.f32.mrf.mxu2  ;;  %v7763_v12 = vor.u32 %v8795_v50, %v7760_v63  ;;  %v7696_v50 = vld [vmem:[#allocation7 + $0x970] sm:$0xf0] }
 0x23c   : > { %v9517_v52 = vadd.f32 %v3105_v51, %v3092_v30  ;;  %v7583_v54 = vor.u32 %v8753_v40, %v7582_v45  ;;  %v3067_v11 = vadd.f32 %v3066_v9, %v9505_v28  ;;  %v3079_v14 = vpop.f32.mrf.mxu3  ;;  %v7400_v45 = vld [vmem:[#allocation7 + $0x318] sm:$0xf0]  ;;  %v7518_v40 = vld [vmem:[#allocation7 + $0x800] sm:$0xf]  ;;  %v8769_v51 = vld [vmem:[#allocation7 + $0x90c] sm:$0xf0]  ;;  %v3999_v9 = vpack.c.bf16 %v9460_v0, %v9460_v0 }
 0x23d   : > { %3958 = vmatpush.bf16.msrb.mxu2 %v7371_v38  ;;  %3971 = vmatpush.bf16.msrb.mxu3 %v7499_v53  ;;  %v8777_v38 = vld [vmem:[#allocation7 + $0x94c] sm:$0xf0]  ;;  %v7646_v30 = vld [vmem:[#allocation7 + $0x900] sm:$0xf]  ;;  %v7403_v33 = vor.u32 %v8576_v44, %v7400_v45  ;;  %v7519_v62 = vor.u32 %v8737_v48, %v7518_v40  ;;  %v8783_v44 = vld [vmem:[#allocation7 + $0x984] sm:$0xf] }
 0x23e   : > { %4784 = vmatpush.bf16.msra.mxu0 %v7615_v1  ;;  %4797 = vmatpush.bf16.msra.mxu1 %v7743_v20  ;;  %v9520_v53 = vadd.f32 %v3079_v14, %v3067_v11  ;;  %v7551_v20 = vor.u32 %v8745_v46, %v7550_v13  ;;  %v7679_v28 = vor.u32 %v8777_v38, %v7678_v43  ;;  %v7998_v11 = vld [vmem:[#allocation7 + $0xbc0] sm:$0xf]  ;;  %v8857_v13 = vld [vmem:[#allocation7 + $0xbcc] sm:$0xf0]  ;;  %v8759_v46 = vld [vmem:[#allocation7 + $0x8c4] sm:$0xf] }
 0x23f   : > { %v7616_v14 = vld [vmem:[#allocation7 + $0x8d0] sm:$0xf0]  ;;  %v8791_v43 = vld [vmem:[#allocation7 + $0x9c4] sm:$0xf] }
 0x240   : > { %v3107_v2 = vpop.f32.mrf.mxu1  ;;  %v7744_v38 = vld [vmem:[#allocation7 + $0x9d0] sm:$0xf0] }
 0x241   : > { %3959 = vmatpush.bf16.msrb.mxu2 %v7355_v5  ;;  %3972 = vmatpush.bf16.msrb.mxu3 %v7483_v6  ;;  %v8741_v5 = vld [vmem:[#allocation7 + $0x82c] sm:$0xf0]  ;;  %v7291_v6 = vor.u32 %v8548_v59, %v7288_v21  ;;  %v7999_v2 = vor.u32 %v8857_v13, %v7998_v11  ;;  %v7982_v59 = vld [vmem:[#allocation7 + $0xba0] sm:$0xf]  ;;  %v7747_v21 = vor.u32 %v8791_v43, %v7744_v38  ;;  %v7712_v45 = vld [vmem:[#allocation7 + $0x990] sm:$0xf0] }
 0x242   : > { %4785 = vmatpush.bf16.msra.mxu0 %v7599_v32  ;;  %4798 = vmatpush.bf16.msra.mxu1 %v7727_v42  ;;  %v8544_v32 = vld [vmem:[#allocation7 + $0x20c] sm:$0xf]  ;;  %v7535_v39 = vor.u32 %v8741_v5, %v7534_v57  ;;  %v8787_v57 = vld [vmem:[#allocation7 + $0x9a4] sm:$0xf]  ;;  %v7728_v5 = vld [vmem:[#allocation7 + $0x9b0] sm:$0xf0]  ;;  %v7983_v31 = vor.u32 %v8853_v26, %v7982_v59 }
 0x243   : > { %v3094_v1 = vpop.f32.mrf.mxu0  ;;  %v3068_v42 = vpop.f32.mrf.mxu2  ;;  %v7275_v49 = vor.u32 %v8544_v32, %v7272_v34  ;;  %v7838_v32 = vld [vmem:[#allocation7 + $0xa80] sm:$0xf]  ;;  %v8841_v11 = vld [vmem:[#allocation7 + $0xb4c] sm:$0xf0]  ;;  %v7552_v13 = vld [vmem:[#allocation7 + $0x850] sm:$0xf0] }
 0x244   : > { %v9528_v1 = vrot.slane %v3999_v9, 1  ;;  %v7966_v34 = vld [vmem:[#allocation7 + $0xb80] sm:$0xf]  ;;  %v8751_v42 = vld [vmem:[#allocation7 + $0x884] sm:$0xf] }
 0x245   : > { %3960 = vmatpush.bf16.msrb.mxu2 %v7339_v22  ;;  %3973 = vmatpush.bf16.msrb.mxu3 %v7467_v15  ;;  %v3081_v22 = vpop.f32.mrf.mxu3  ;;  %v7886_v15 = vld [vmem:[#allocation7 + $0xae0] sm:$0xf]  ;;  %v8809_v9 = vld [vmem:[#allocation7 + $0xa4c] sm:$0xf0] }
 0x246   : > { %4786 = vmatpush.bf16.msra.mxu0 %v7583_v54  ;;  %4799 = vmatpush.bf16.msra.mxu1 %v7711_v56  ;;  %v8829_v54 = vld [vmem:[#allocation7 + $0xaec] sm:$0xf0]  ;;  %v8763_v56 = vld [vmem:[#allocation7 + $0x8e4] sm:$0xf] }
 0x247   : > { %v7635_v58 = vor.u32 %v8763_v56, %v7632_v60  ;;  %v8747_v56 = vld [vmem:[#allocation7 + $0x864] sm:$0xf]  ;;  %v7568_v60 = vld [vmem:[#allocation7 + $0x870] sm:$0xf0]  ;;  %v8805_v59 = vld [vmem:[#allocation7 + $0xa2c] sm:$0xf0] }
 0x248   : > { %v8837_v26 = vld [vmem:[#allocation7 + $0xb2c] sm:$0xf0] }
 0x249   : > { %3961 = vmatpush.bf16.msrb.mxu2 %v7323_v61  ;;  %3974 = vmatpush.bf16.msrb.mxu3 %v7451_v4  ;;  %v7647_v61 = vor.u32 %v8769_v51, %v7646_v30  ;;  %v7887_v4 = vor.u32 %v8829_v54, %v7886_v15  ;;  %v7822_v15 = vld [vmem:[#allocation7 + $0xa60] sm:$0xf]  ;;  %v8813_v54 = vld [vmem:[#allocation7 + $0xa6c] sm:$0xf0] }
 0x24a   : > { %4787 = vmatpush.bf16.msra.mxu0 %v7567_v8  ;;  %4800 = vmatpush.bf16.msra.mxu1 %v7695_v10  ;;  %v3998_v8 = vpack.c.bf16 %v9458_v23, %v9458_v23  ;;  %v8825_v10 = vld [vmem:[#allocation7 + $0xacc] sm:$0xf0]  ;;  %v7823_v63 = vor.u32 %v8813_v54, %v7822_v15  ;;  %v8016_v15 = vld [vmem:[#allocation7 + $0xbf0] sm:$0xf0]  ;;  %v7638_v54 = vld [vmem:[#allocation7 + $0x8e8] sm:$0xf] }
 0x24b   : > { %v7871_v0 = vor.u32 %v8825_v10, %v7870_v37 }
 0x24c   : > { %v9526_v23 = vrot.slane %v3998_v8, 1  ;;  %v7806_v8 = vld [vmem:[#allocation7 + $0xa40] sm:$0xf] }
 0x24d   : > { %3962 = vmatpush.bf16.msrb.mxu2 %v7307_v18  ;;  %3975 = vmatpush.bf16.msrb.mxu3 %v7435_v19  ;;  %v7619_v18 = vor.u32 %v8759_v46, %v7616_v14  ;;  %v7854_v19 = vld [vmem:[#allocation7 + $0xaa0] sm:$0xf]  ;;  %v8775_v46 = vld [vmem:[#allocation7 + $0x944] sm:$0xf]  ;;  %v7680_v14 = vld [vmem:[#allocation7 + $0x950] sm:$0xf0] }
 0x24e   : > { %4788 = vmatpush.bf16.msra.mxu0 %v7551_v20  ;;  %4801 = vmatpush.bf16.msra.mxu1 %v7679_v28  ;;  %v8821_v20 = vld [vmem:[#allocation7 + $0xaac] sm:$0xf0]  ;;  %v8755_v28 = vld [vmem:[#allocation7 + $0x8a4] sm:$0xf] }
 0x24f   : > { %v7855_v29 = vor.u32 %v8821_v20, %v7854_v19  ;;  %v7790_v20 = vld [vmem:[#allocation7 + $0xa20] sm:$0xf] }
 0x251   : > { %3963 = vmatpush.bf16.msrb.mxu2 %v7291_v6  ;;  %3976 = vmatpush.bf16.msrb.mxu3 %v7419_v36  ;;  %v7603_v6 = vor.u32 %v8755_v28, %v7600_v27  ;;  %v7731_v36 = vor.u32 %v8787_v57, %v7728_v5  ;;  %v8739_v28 = vld [vmem:[#allocation7 + $0x824] sm:$0xf]  ;;  %v7536_v27 = vld [vmem:[#allocation7 + $0x830] sm:$0xf0] }
 0x252   : > { %4789 = vmatpush.bf16.msra.mxu0 %v7535_v39  ;;  %4802 = vmatpush.bf16.msra.mxu1 %v7663_v47  ;;  %v8849_v39 = vld [vmem:[#allocation7 + $0xb8c] sm:$0xf0]  ;;  %v8771_v57 = vld [vmem:[#allocation7 + $0x924] sm:$0xf]  ;;  %v7664_v5 = vld [vmem:[#allocation7 + $0x930] sm:$0xf0] }
 0x253   : > { %v7967_v51 = vor.u32 %v8849_v39, %v7966_v34  ;;  %v8833_v39 = vld [vmem:[#allocation7 + $0xb0c] sm:$0xf0] }
 0x255   : > { %3964 = vmatpush.bf16.msrb.mxu2 %v7275_v49  ;;  %3977 = vmatpush.bf16.msrb.mxu3 %v7403_v33  ;;  %v7715_v49 = vor.u32 %v8783_v44, %v7712_v45  ;;  %v7520_v45 = vld [vmem:[#allocation7 + $0x810] sm:$0xf0] }
 0x256   : > { %4790 = vmatpush.bf16.msra.mxu0 %v7519_v62  ;;  %4803 = vmatpush.bf16.msra.mxu1 %v7647_v61  ;;  %v8779_v62 = vld [vmem:[#allocation7 + $0x964] sm:$0xf]  ;;  %v7571_v61 = vor.u32 %v8747_v56, %v7568_v60  ;;  %v7766_v56 = vld [vmem:[#allocation7 + $0x9e8] sm:$0xf]  ;;  %v8798_v60 = vld [vmem:[#allocation7 + $0x9f4] sm:$0xf0] }
 0x258   : > { %3965 = vmatmul.bf16.vlgmr.msrb.gmra.mxu2 %v9487_v7  ;;  %3978 = vmatmul.bf16.vlgmr.msrb.gmra.mxu3 %v9491_v17  ;;  %v8817_v7 = vld [vmem:[#allocation7 + $0xa8c] sm:$0xf0]  ;;  %v7584_v17 = vld [vmem:[#allocation7 + $0x890] sm:$0xf0]  ;;  %v3784_v40 = vpop.f32.mrf.mxu0  ;;  %v3797_v30 = vpop.f32.mrf.mxu1 }
 0x259   : > { %4809 = vmatpush.bf16.msra.mxu2 %v7887_v4  ;;  %4822 = vmatpush.bf16.msra.mxu3 %v8015_v41  ;;  %v7839_v47 = vor.u32 %v8817_v7, %v7838_v32  ;;  %v3785_v48 = vadd.f32 %v3784_v40, %v9508_v3  ;;  %v7587_v22 = vor.u32 %v8751_v42, %v7584_v17  ;;  %v7934_v41 = vld [vmem:[#allocation7 + $0xb40] sm:$0xf]  ;;  %v8735_v42 = vld [vmem:[#allocation7 + $0x804] sm:$0xf] }
 0x25a   : > { %4835 = vmatpush.bf16.msrb.mxu0 %v7635_v58  ;;  %4848 = vmatpush.bf16.msrb.mxu1 %v7763_v12  ;;  %v7951_v3 = vor.u32 %v8845_v55, %v7950_v16  ;;  %v7699_v58 = vor.u32 %v8779_v62, %v7696_v50  ;;  %v8743_v12 = vld [vmem:[#allocation7 + $0x844] sm:$0xf]  ;;  %v7539_v7 = vor.u32 %v8739_v28, %v7536_v27  ;;  %v8766_v16 = vld [vmem:[#allocation7 + $0x8f4] sm:$0xf0] }
 0x25b   : > { %4791 = vmatmul.bf16.vlgmr.msra.gmra.mxu0 %v9526_v23  ;;  %4804 = vmatmul.bf16.vlgmr.msra.gmra.mxu1 %v9528_v1  ;;  %v9535_v33 = vadd.f32 %v3797_v30, %v3785_v48  ;;  %v3118_v4 = vpop.f32.mrf.mxu2  ;;  %v3131_v10 = vpop.f32.mrf.mxu3  ;;  %v7555_v19 = vor.u32 %v8743_v12, %v7552_v13  ;;  %v7667_v17 = vor.u32 %v8771_v57, %v7664_v5  ;;  %v8767_v40 = vld [vmem:[#allocation7 + $0x904] sm:$0xf]  ;;  %v7888_v30 = vld [vmem:[#allocation7 + $0xaf0] sm:$0xf0]  ;;  %v7750_v12 = vld [vmem:[#allocation7 + $0x9c8] sm:$0xf] }
 0x25c   : > { %v3119_v37 = vadd.f32 %v3118_v4, %v9517_v52  ;;  %v7683_v52 = vor.u32 %v8775_v46, %v7680_v14  ;;  %v8827_v48 = vld [vmem:[#allocation7 + $0xae4] sm:$0xf]  ;;  %v7523_v55 = vor.u32 %v8735_v42, %v7520_v45  ;;  %v7639_v4 = vor.u32 %v8766_v16, %v7638_v54  ;;  %v8794_v13 = vld [vmem:[#allocation7 + $0x9d4] sm:$0xf0]  ;;  %v7574_v54 = vld [vmem:[#allocation7 + $0x868] sm:$0xf] }
 0x25d   : > { %4810 = vmatpush.bf16.msra.mxu2 %v7871_v0  ;;  %4823 = vmatpush.bf16.msra.mxu3 %v7999_v2  ;;  %v7807_v0 = vor.u32 %v8809_v9, %v7806_v8  ;;  %v7891_v50 = vor.u32 %v8827_v48, %v7888_v30  ;;  %v8823_v8 = vld [vmem:[#allocation7 + $0xac4] sm:$0xf]  ;;  %v7872_v9 = vld [vmem:[#allocation7 + $0xad0] sm:$0xf0]  ;;  %v8750_v16 = vld [vmem:[#allocation7 + $0x874] sm:$0xf0] }
 0x25e   : > { %4836 = vmatpush.bf16.msrb.mxu0 %v7619_v18  ;;  %4849 = vmatpush.bf16.msrb.mxu1 %v7747_v21  ;;  %v9538_v43 = vadd.f32 %v3131_v10, %v3119_v37  ;;  %v7935_v18 = vor.u32 %v8841_v11, %v7934_v41  ;;  %v7918_v21 = vld [vmem:[#allocation7 + $0xb20] sm:$0xf]  ;;  %v8855_v41 = vld [vmem:[#allocation7 + $0xbc4] sm:$0xf]  ;;  %v8000_v37 = vld [vmem:[#allocation7 + $0xbd0] sm:$0xf0] }
 0x25f   : > { %v7919_v32 = vor.u32 %v8837_v26, %v7918_v21  ;;  %v7622_v10 = vld [vmem:[#allocation7 + $0x8c8] sm:$0xf]  ;;  %v8762_v11 = vld [vmem:[#allocation7 + $0x8d4] sm:$0xf0]  ;;  %v8003_v14 = vor.u32 %v8855_v41, %v8000_v37  ;;  %v8815_v5 = vld [vmem:[#allocation7 + $0xa84] sm:$0xf] }
 0x260   : > { %v3786_v38 = vpop.f32.mrf.mxu0  ;;  %v3799_v2 = vpop.f32.mrf.mxu1  ;;  %v8758_v21 = vld [vmem:[#allocation7 + $0x8b4] sm:$0xf0]  ;;  %v8811_v48 = vld [vmem:[#allocation7 + $0xa64] sm:$0xf]  ;;  %v7824_v30 = vld [vmem:[#allocation7 + $0xa70] sm:$0xf0] }
 0x261   : > { %4811 = vmatpush.bf16.msra.mxu2 %v7855_v29  ;;  %4824 = vmatpush.bf16.msra.mxu3 %v7983_v31  ;;  %v7791_v29 = vor.u32 %v8805_v59, %v7790_v20  ;;  %v7774_v31 = vld [vmem:[#allocation7 + $0xa00] sm:$0xf]  ;;  %v7623_v38 = vor.u32 %v8762_v11, %v7622_v10  ;;  %v7856_v2 = vld [vmem:[#allocation7 + $0xab0] sm:$0xf0]  ;;  %v7606_v59 = vld [vmem:[#allocation7 + $0x8a8] sm:$0xf] }
 0x262   : > { %4837 = vmatpush.bf16.msrb.mxu0 %v7603_v6  ;;  %4850 = vmatpush.bf16.msrb.mxu1 %v7731_v36  ;;  %v8801_v6 = vld [vmem:[#allocation7 + $0xa0c] sm:$0xf0]  ;;  %v7902_v36 = vld [vmem:[#allocation7 + $0xb00] sm:$0xf]  ;;  %v7984_v20 = vld [vmem:[#allocation7 + $0xbb0] sm:$0xf0]  ;;  %v7607_v57 = vor.u32 %v8758_v21, %v7606_v59 }
 0x263   : > { %v3120_v34 = vpop.f32.mrf.mxu2  ;;  %v3133_v44 = vpop.f32.mrf.mxu3  ;;  %v8790_v26 = vld [vmem:[#allocation7 + $0x9b4] sm:$0xf0]  ;;  %v7936_v41 = vld [vmem:[#allocation7 + $0xb50] sm:$0xf0]  ;;  %v7686_v10 = vld [vmem:[#allocation7 + $0x948] sm:$0xf] }
 0x264   : > { %v8754_v34 = vld [vmem:[#allocation7 + $0x894] sm:$0xf0]  ;;  %v7542_v59 = vld [vmem:[#allocation7 + $0x828] sm:$0xf] }
 0x265   : > { %4812 = vmatpush.bf16.msra.mxu2 %v7839_v47  ;;  %4825 = vmatpush.bf16.msra.mxu3 %v7967_v51  ;;  %v7648_v47 = vld [vmem:[#allocation7 + $0x910] sm:$0xf0]  ;;  %v8859_v51 = vld [vmem:[#allocation7 + $0xbe4] sm:$0xf]  ;;  %v8746_v37 = vld [vmem:[#allocation7 + $0x854] sm:$0xf0] }
 0x266   : > { %4838 = vmatpush.bf16.msrb.mxu0 %v7587_v22  ;;  %4851 = vmatpush.bf16.msrb.mxu1 %v7715_v49  ;;  %v7775_v22 = vor.u32 %v8801_v6, %v7774_v31  ;;  %v7903_v49 = vor.u32 %v8833_v39, %v7902_v36  ;;  %v7651_v62 = vor.u32 %v8767_v40, %v7648_v47  ;;  %v8847_v31 = vld [vmem:[#allocation7 + $0xb84] sm:$0xf]  ;;  %v7718_v36 = vld [vmem:[#allocation7 + $0x988] sm:$0xf]  ;;  %v8786_v39 = vld [vmem:[#allocation7 + $0x994] sm:$0xf0] }
 0x267   : > { %v8778_v11 = vld [vmem:[#allocation7 + $0x954] sm:$0xf0] }
 0x268   : > { %v8742_v21 = vld [vmem:[#allocation7 + $0x834] sm:$0xf0] }
 0x269   : > { %4813 = vmatpush.bf16.msra.mxu2 %v7823_v63  ;;  %4826 = vmatpush.bf16.msra.mxu3 %v7951_v3  ;;  %v4000_v63 = vpack.c.bf16 %v9462_v24, %v9462_v24  ;;  %v4001_v3 = vpack.c.bf16 %v9464_v25, %v9464_v25  ;;  %v7875_v25 = vor.u32 %v8823_v8, %v7872_v9 }
 0x26a   : > { %4839 = vmatpush.bf16.msrb.mxu0 %v7571_v61  ;;  %4852 = vmatpush.bf16.msrb.mxu1 %v7699_v58  ;;  %v8019_v61 = vor.u32 %v8859_v51, %v8016_v15  ;;  %v7767_v58 = vor.u32 %v8798_v60, %v7766_v56  ;;  %v8843_v51 = vld [vmem:[#allocation7 + $0xb64] sm:$0xf]  ;;  %v7952_v15 = vld [vmem:[#allocation7 + $0xb70] sm:$0xf0]  ;;  %v8782_v56 = vld [vmem:[#allocation7 + $0x974] sm:$0xf0]  ;;  %v7827_v60 = vor.u32 %v8811_v48, %v7824_v30 }
 0x26b   : > { %v9544_v24 = vrot.slane %v4000_v63, 1  ;;  %v9546_v46 = vrot.slane %v4001_v3, 1  ;;  %v8807_v63 = vld [vmem:[#allocation7 + $0xa44] sm:$0xf]  ;;  %v7808_v3 = vld [vmem:[#allocation7 + $0xa50] sm:$0xf0] }
 0x26c   : > { %v8862_v48 = vld [vmem:[#allocation7 + $0xbf4] sm:$0xf0]  ;;  %v8764_v30 = vld [vmem:[#allocation7 + $0x8ec] sm:$0xf] }
 0x26d   : > { %4814 = vmatpush.bf16.msra.mxu2 %v7807_v0  ;;  %4827 = vmatpush.bf16.msra.mxu3 %v7935_v18  ;;  %v8819_v0 = vld [vmem:[#allocation7 + $0xaa4] sm:$0xf] }
 0x26e   : > { %4840 = vmatpush.bf16.msrb.mxu0 %v7555_v19  ;;  %4853 = vmatpush.bf16.msrb.mxu1 %v7683_v52  ;;  %v8851_v18 = vld [vmem:[#allocation7 + $0xba4] sm:$0xf]  ;;  %v7751_v19 = vor.u32 %v8794_v13, %v7750_v12  ;;  %v7734_v52 = vld [vmem:[#allocation7 + $0x9a8] sm:$0xf]  ;;  %v7859_v28 = vor.u32 %v8819_v0, %v7856_v2 }
 0x26f   : > { %v7987_v27 = vor.u32 %v8851_v18, %v7984_v20  ;;  %v7735_v6 = vor.u32 %v8790_v26, %v7734_v52  ;;  %v8803_v2 = vld [vmem:[#allocation7 + $0xa24] sm:$0xf]  ;;  %v7792_v18 = vld [vmem:[#allocation7 + $0xa30] sm:$0xf0]  ;;  %v7670_v52 = vld [vmem:[#allocation7 + $0x928] sm:$0xf] }
 0x270   : > { %v7920_v20 = vld [vmem:[#allocation7 + $0xb30] sm:$0xf0]  ;;  %v8774_v26 = vld [vmem:[#allocation7 + $0x934] sm:$0xf0] }
 0x271   : > { %4815 = vmatpush.bf16.msra.mxu2 %v7791_v29  ;;  %4828 = vmatpush.bf16.msra.mxu3 %v7919_v32  ;;  %v7840_v29 = vld [vmem:[#allocation7 + $0xa90] sm:$0xf0] }
 0x272   : > { %4841 = vmatpush.bf16.msrb.mxu0 %v7539_v7  ;;  %4854 = vmatpush.bf16.msrb.mxu1 %v7667_v17  ;;  %v7968_v32 = vld [vmem:[#allocation7 + $0xb90] sm:$0xf0]  ;;  %v7590_v7 = vld [vmem:[#allocation7 + $0x888] sm:$0xf]  ;;  %v7843_v17 = vor.u32 %v8815_v5, %v7840_v29  ;;  %v7543_v29 = vor.u32 %v8742_v21, %v7542_v59 }
 0x273   : > { %v7971_v40 = vor.u32 %v8847_v31, %v7968_v32  ;;  %v7591_v47 = vor.u32 %v8754_v34, %v7590_v7  ;;  %v7904_v32 = vld [vmem:[#allocation7 + $0xb10] sm:$0xf0]  ;;  %v7526_v7 = vld [vmem:[#allocation7 + $0x808] sm:$0xf]  ;;  %v7671_v34 = vor.u32 %v8774_v26, %v7670_v52  ;;  %v8818_v52 = vld [vmem:[#allocation7 + $0xa94] sm:$0xf0] }
 0x274   : > { %v7846_v21 = vld [vmem:[#allocation7 + $0xa88] sm:$0xf] }
 0x275   : > { %4816 = vmatpush.bf16.msra.mxu2 %v7775_v22  ;;  %4829 = vmatpush.bf16.msra.mxu3 %v7903_v49  ;;  %v7719_v22 = vor.u32 %v8786_v39, %v7718_v36  ;;  %v8738_v39 = vld [vmem:[#allocation7 + $0x814] sm:$0xf0]  ;;  %v7974_v26 = vld [vmem:[#allocation7 + $0xb88] sm:$0xf] }
 0x276   : > { %4842 = vmatpush.bf16.msrb.mxu0 %v7523_v55  ;;  %4855 = vmatpush.bf16.msrb.mxu1 %v7651_v62  ;;  %v7702_v55 = vld [vmem:[#allocation7 + $0x968] sm:$0xf]  ;;  %v7575_v62 = vor.u32 %v8750_v16, %v7574_v54  ;;  %v8796_v54 = vld [vmem:[#allocation7 + $0x9ec] sm:$0xf]  ;;  %v7768_v16 = vld [vmem:[#allocation7 + $0x9f8] sm:$0xf0] }
 0x278   : > { %4817 = vmatmul.bf16.vlgmr.msra.gmra.mxu2 %v9544_v24  ;;  %4830 = vmatmul.bf16.vlgmr.msra.gmra.mxu3 %v9546_v46  ;;  %v3836_v42 = vpop.f32.mrf.mxu0  ;;  %v3849_v45 = vpop.f32.mrf.mxu1 }
 0x279   : > { %4861 = vmatpush.bf16.msrb.mxu2 %v7891_v50  ;;  %4874 = vmatpush.bf16.msrb.mxu3 %v8019_v61  ;;  %v3837_v44 = vadd.f32 %v3836_v42, %v9511_v35  ;;  %v7955_v35 = vor.u32 %v8843_v51, %v7952_v15  ;;  %v8839_v61 = vld [vmem:[#allocation7 + $0xb44] sm:$0xf]  ;;  %v7654_v42 = vld [vmem:[#allocation7 + $0x908] sm:$0xf]  ;;  %v7640_v51 = vld [vmem:[#allocation7 + $0x8f8] sm:$0xf0]  ;;  %v7527_v15 = vor.u32 %v8738_v39, %v7526_v7 }
 0x27a   : > { %4887 = vmatpush.bf16.msra.mxu0 %v7639_v4  ;;  %4900 = vmatpush.bf16.msra.mxu1 %v7767_v58  ;;  %v7703_v4 = vor.u32 %v8782_v56, %v7702_v55  ;;  %v7558_v58 = vld [vmem:[#allocation7 + $0x848] sm:$0xf] }
 0x27b   : > { %4843 = vmatmul.bf16.vlgmr.msrb.gmra.mxu0 %v9526_v23  ;;  %4856 = vmatmul.bf16.vlgmr.msrb.gmra.mxu1 %v9528_v1  ;;  %v9553_v49 = vadd.f32 %v3849_v45, %v3837_v44  ;;  %v3810_v50 = vpop.f32.mrf.mxu2  ;;  %v3823_v9 = vpop.f32.mrf.mxu3  ;;  %v7559_v0 = vor.u32 %v8746_v37, %v7558_v58  ;;  %v7894_v44 = vld [vmem:[#allocation7 + $0xae8] sm:$0xf]  ;;  %v8830_v45 = vld [vmem:[#allocation7 + $0xaf4] sm:$0xf0] }
 0x27c   : > { %v3811_v8 = vadd.f32 %v3810_v50, %v9535_v33  ;;  %v7687_v33 = vor.u32 %v8778_v11, %v7686_v10  ;;  %v7895_v56 = vor.u32 %v8830_v45, %v7894_v44  ;;  %v8826_v50 = vld [vmem:[#allocation7 + $0xad4] sm:$0xf0]  ;;  %v7862_v11 = vld [vmem:[#allocation7 + $0xaa8] sm:$0xf] }
 0x27d   : > { %4862 = vmatpush.bf16.msrb.mxu2 %v7875_v25  ;;  %4875 = vmatpush.bf16.msrb.mxu3 %v8003_v14  ;;  %v7811_v25 = vor.u32 %v8807_v63, %v7808_v3  ;;  %v8006_v63 = vld [vmem:[#allocation7 + $0xbc8] sm:$0xf]  ;;  %v7771_v3 = vor.u32 %v8796_v54, %v7768_v16 }
 0x27e   : > { %4888 = vmatpush.bf16.msra.mxu0 %v7623_v38  ;;  %4901 = vmatpush.bf16.msra.mxu1 %v7751_v19  ;;  %v9556_v12 = vadd.f32 %v3823_v9, %v3811_v8  ;;  %v7939_v38 = vor.u32 %v8839_v61, %v7936_v41  ;;  %v8835_v19 = vld [vmem:[#allocation7 + $0xb24] sm:$0xf]  ;;  %v8858_v61 = vld [vmem:[#allocation7 + $0xbd4] sm:$0xf0]  ;;  %v7624_v8 = vld [vmem:[#allocation7 + $0x8d8] sm:$0xf0] }
 0x27f   : > { %v7923_v5 = vor.u32 %v8835_v19, %v7920_v20  ;;  %v8792_v9 = vld [vmem:[#allocation7 + $0x9cc] sm:$0xf]  ;;  %v7752_v41 = vld [vmem:[#allocation7 + $0x9d8] sm:$0xf0]  ;;  %v8007_v37 = vor.u32 %v8858_v61, %v8006_v63  ;;  %v7958_v44 = vld [vmem:[#allocation7 + $0xb68] sm:$0xf] }
 0x280   : > { %v3838_v13 = vpop.f32.mrf.mxu0  ;;  %v3851_v14 = vpop.f32.mrf.mxu1  ;;  %v7736_v19 = vld [vmem:[#allocation7 + $0x9b8] sm:$0xf0]  ;;  %v8842_v63 = vld [vmem:[#allocation7 + $0xb54] sm:$0xf0] }
 0x281   : > { %4863 = vmatpush.bf16.msrb.mxu2 %v7859_v28  ;;  %4876 = vmatpush.bf16.msrb.mxu3 %v7987_v27  ;;  %v7795_v28 = vor.u32 %v8803_v2, %v7792_v18  ;;  %v8799_v27 = vld [vmem:[#allocation7 + $0xa04] sm:$0xf]  ;;  %v8822_v13 = vld [vmem:[#allocation7 + $0xab4] sm:$0xf0]  ;;  %v7755_v14 = vor.u32 %v8792_v9, %v7752_v41  ;;  %v7608_v2 = vld [vmem:[#allocation7 + $0x8b8] sm:$0xf0] }
 0x282   : > { %4889 = vmatpush.bf16.msra.mxu0 %v7607_v57  ;;  %4902 = vmatpush.bf16.msra.mxu1 %v7735_v6  ;;  %v7776_v57 = vld [vmem:[#allocation7 + $0xa10] sm:$0xf0]  ;;  %v8831_v6 = vld [vmem:[#allocation7 + $0xb04] sm:$0xf]  ;;  %v8788_v18 = vld [vmem:[#allocation7 + $0x9ac] sm:$0xf] }
 0x283   : > { %v3812_v31 = vpop.f32.mrf.mxu2  ;;  %v3825_v36 = vpop.f32.mrf.mxu3  ;;  %v7560_v61 = vld [vmem:[#allocation7 + $0x858] sm:$0xf0] }
 0x284   : > { %v7720_v31 = vld [vmem:[#allocation7 + $0x998] sm:$0xf0] }
 0x285   : > { %4864 = vmatpush.bf16.msrb.mxu2 %v7843_v17  ;;  %4877 = vmatpush.bf16.msrb.mxu3 %v7971_v40  ;;  %v8770_v17 = vld [vmem:[#allocation7 + $0x914] sm:$0xf0]  ;;  %v8022_v40 = vld [vmem:[#allocation7 + $0xbe8] sm:$0xf] }
 0x286   : > { %4890 = vmatpush.bf16.msra.mxu0 %v7591_v47  ;;  %4903 = vmatpush.bf16.msra.mxu1 %v7719_v22  ;;  %v7779_v47 = vor.u32 %v8799_v27, %v7776_v57  ;;  %v7907_v22 = vor.u32 %v8831_v6, %v7904_v32  ;;  %v7655_v55 = vor.u32 %v8770_v17, %v7654_v42  ;;  %v8850_v27 = vld [vmem:[#allocation7 + $0xb94] sm:$0xf0]  ;;  %v8752_v57 = vld [vmem:[#allocation7 + $0x88c] sm:$0xf]  ;;  %v7830_v42 = vld [vmem:[#allocation7 + $0xa68] sm:$0xf] }
 0x287   : > { %v7847_v32 = vor.u32 %v8818_v52, %v7846_v21  ;;  %v7975_v36 = vor.u32 %v8850_v27, %v7974_v26  ;;  %v8814_v17 = vld [vmem:[#allocation7 + $0xa74] sm:$0xf0] }
 0x288   : > { %v8834_v27 = vld [vmem:[#allocation7 + $0xb14] sm:$0xf0] }
 0x289   : > { %4865 = vmatpush.bf16.msrb.mxu2 %v7827_v60  ;;  %4878 = vmatpush.bf16.msrb.mxu3 %v7955_v35  ;;  %v8023_v60 = vor.u32 %v8862_v48, %v8022_v40  ;;  %v7643_v35 = vor.u32 %v8764_v30, %v7640_v51  ;;  %v8846_v40 = vld [vmem:[#allocation7 + $0xb74] sm:$0xf0]  ;;  %v7576_v48 = vld [vmem:[#allocation7 + $0x878] sm:$0xf0]  ;;  %v8780_v51 = vld [vmem:[#allocation7 + $0x96c] sm:$0xf] }
 0x28a   : > { %4891 = vmatpush.bf16.msra.mxu0 %v7575_v62  ;;  %4904 = vmatpush.bf16.msra.mxu1 %v7703_v4  ;;  %v7878_v62 = vld [vmem:[#allocation7 + $0xac8] sm:$0xf]  ;;  %v8760_v4 = vld [vmem:[#allocation7 + $0x8cc] sm:$0xf] }
 0x28b   : > { %v7879_v58 = vor.u32 %v8826_v50, %v7878_v62  ;;  %v7627_v10 = vor.u32 %v8760_v4, %v7624_v8  ;;  %v8776_v4 = vld [vmem:[#allocation7 + $0x94c] sm:$0xf]  ;;  %v7688_v8 = vld [vmem:[#allocation7 + $0x958] sm:$0xf0] }
 0x28d   : > { %4866 = vmatpush.bf16.msrb.mxu2 %v7811_v25  ;;  %4879 = vmatpush.bf16.msrb.mxu3 %v7939_v38  ;;  %v7990_v25 = vld [vmem:[#allocation7 + $0xba8] sm:$0xf]  ;;  %v8854_v38 = vld [vmem:[#allocation7 + $0xbb4] sm:$0xf0] }
 0x28e   : > { %4892 = vmatpush.bf16.msra.mxu0 %v7559_v0  ;;  %4905 = vmatpush.bf16.msra.mxu1 %v7687_v33  ;;  %v8756_v0 = vld [vmem:[#allocation7 + $0x8ac] sm:$0xf]  ;;  %v7863_v33 = vor.u32 %v8822_v13, %v7862_v11  ;;  %v7991_v20 = vor.u32 %v8854_v38, %v7990_v25  ;;  %v7798_v13 = vld [vmem:[#allocation7 + $0xa28] sm:$0xf]  ;;  %v8806_v25 = vld [vmem:[#allocation7 + $0xa34] sm:$0xf0] }
 0x28f   : > { %v7611_v59 = vor.u32 %v8756_v0, %v7608_v2  ;;  %v8838_v38 = vld [vmem:[#allocation7 + $0xb34] sm:$0xf0]  ;;  %v8740_v0 = vld [vmem:[#allocation7 + $0x82c] sm:$0xf]  ;;  %v7544_v2 = vld [vmem:[#allocation7 + $0x838] sm:$0xf0] }
 0x290   : > { %v7547_v52 = vor.u32 %v8740_v0, %v7544_v2  ;;  %v8816_v2 = vld [vmem:[#allocation7 + $0xa8c] sm:$0xf] }
 0x291   : > { %4867 = vmatpush.bf16.msrb.mxu2 %v7795_v28  ;;  %4880 = vmatpush.bf16.msrb.mxu3 %v7923_v5  ;;  %v7739_v28 = vor.u32 %v8788_v18, %v7736_v19  ;;  %v7592_v5 = vld [vmem:[#allocation7 + $0x898] sm:$0xf0]  ;;  %v8772_v18 = vld [vmem:[#allocation7 + $0x92c] sm:$0xf] }
 0x292   : > { %4893 = vmatpush.bf16.msra.mxu0 %v7543_v29  ;;  %4906 = vmatpush.bf16.msra.mxu1 %v7671_v34  ;;  %v8784_v29 = vld [vmem:[#allocation7 + $0x98c] sm:$0xf]  ;;  %v7595_v39 = vor.u32 %v8752_v57, %v7592_v5  ;;  %v7672_v19 = vld [vmem:[#allocation7 + $0x938] sm:$0xf0] }
 0x293   : > { %v7723_v45 = vor.u32 %v8784_v29, %v7720_v31  ;;  %v8736_v57 = vld [vmem:[#allocation7 + $0x80c] sm:$0xf]  ;;  %v7675_v5 = vor.u32 %v8772_v18, %v7672_v19  ;;  %v7528_v31 = vld [vmem:[#allocation7 + $0x818] sm:$0xf0] }
 0x294   : > { %v7848_v18 = vld [vmem:[#allocation7 + $0xa98] sm:$0xf0]  ;;  %v8848_v19 = vld [vmem:[#allocation7 + $0xb8c] sm:$0xf] }
 0x295   : > { %4868 = vmatpush.bf16.msrb.mxu2 %v7779_v47  ;;  %4881 = vmatpush.bf16.msrb.mxu3 %v7907_v22  ;;  %v8748_v47 = vld [vmem:[#allocation7 + $0x86c] sm:$0xf]  ;;  %v7704_v22 = vld [vmem:[#allocation7 + $0x978] sm:$0xf0] }
 0x296   : > { %4894 = vmatpush.bf16.msra.mxu0 %v7527_v15  ;;  %4907 = vmatpush.bf16.msra.mxu1 %v7655_v55  ;;  %v7831_v15 = vor.u32 %v8814_v17, %v7830_v42  ;;  %v7579_v54 = vor.u32 %v8748_v47, %v7576_v48  ;;  %v7814_v55 = vld [vmem:[#allocation7 + $0xa48] sm:$0xf]  ;;  %v8024_v42 = vld [vmem:[#allocation7 + $0xbf8] sm:$0xf0]  ;;  %v8142_v17 = vld [vmem:[#allocation10 + $0xe0] sm:$0xf] }
 0x297   : > { %v8270_v47 = vld [vmem:[#allocation10 + $0x1e0] sm:$0xf]  ;;  %v8925_v48 = vld [vmem:[#allocation10 + $0x1ec] sm:$0xf0] }
 0x298   : > { %4869 = vmatmul.bf16.vlgmr.msrb.gmra.mxu2 %v9544_v24  ;;  %4882 = vmatmul.bf16.vlgmr.msrb.gmra.mxu3 %v9546_v46  ;;  %v3888_v6 = vpop.f32.mrf.mxu0  ;;  %v3901_v34 = vpop.f32.mrf.mxu1 }
 0x299   : > { %4913 = vmatpush.bf16.msra.mxu2 %v7895_v56  ;;  %4926 = vmatpush.bf16.msra.mxu3 %v8023_v60  ;;  %v3889_v7 = vadd.f32 %v3888_v6, %v9520_v53  ;;  %v7959_v53 = vor.u32 %v8846_v40, %v7958_v44  ;;  %v8810_v56 = vld [vmem:[#allocation7 + $0xa54] sm:$0xf0]  ;;  %v7942_v60 = vld [vmem:[#allocation7 + $0xb48] sm:$0xf]  ;;  %v8768_v6 = vld [vmem:[#allocation7 + $0x90c] sm:$0xf]  ;;  %v7531_v40 = vor.u32 %v8736_v57, %v7528_v31 }
 0x29a   : > { %4939 = vmatpush.bf16.msrb.mxu0 %v7643_v35  ;;  %4952 = vmatpush.bf16.msrb.mxu1 %v7771_v3  ;;  %v7707_v35 = vor.u32 %v8780_v51, %v7704_v22  ;;  %v8744_v3 = vld [vmem:[#allocation7 + $0x84c] sm:$0xf]  ;;  %v8893_v44 = vld [vmem:[#allocation10 + $0xec] sm:$0xf0]  ;;  %v7832_v31 = vld [vmem:[#allocation7 + $0xa78] sm:$0xf0] }
 0x29b   : > { %4895 = vmatmul.bf16.vlgmr.msra.gmra.mxu0 %v9526_v23  ;;  %4908 = vmatmul.bf16.vlgmr.msra.gmra.mxu1 %v9528_v1  ;;  %v9563_v30 = vadd.f32 %v3901_v34, %v3889_v7  ;;  %v3862_v16 = vpop.f32.mrf.mxu2  ;;  %v3875_v50 = vpop.f32.mrf.mxu3  ;;  %v7563_v11 = vor.u32 %v8744_v3, %v7560_v61  ;;  %v8828_v7 = vld [vmem:[#allocation7 + $0xaec] sm:$0xf]  ;;  %v7896_v34 = vld [vmem:[#allocation7 + $0xaf8] sm:$0xf0] }
 0x29c   : > { %v3863_v62 = vadd.f32 %v3862_v16, %v9553_v49  ;;  %v7691_v49 = vor.u32 %v8776_v4, %v7688_v8  ;;  %v7899_v22 = vor.u32 %v8828_v7, %v7896_v34  ;;  %v7880_v16 = vld [vmem:[#allocation7 + $0xad8] sm:$0xf0]  ;;  %v8820_v8 = vld [vmem:[#allocation7 + $0xaac] sm:$0xf]  ;;  %v8078_v34 = vld [vmem:[#allocation10 + $0x60] sm:$0xf] }
 0x29d   : > { %4914 = vmatpush.bf16.msra.mxu2 %v7879_v58  ;;  %4927 = vmatpush.bf16.msra.mxu3 %v8007_v37  ;;  %v7815_v58 = vor.u32 %v8810_v56, %v7814_v55  ;;  %v8856_v55 = vld [vmem:[#allocation7 + $0xbcc] sm:$0xf]  ;;  %v8271_v56 = vor.u32 %v8925_v48, %v8270_v47  ;;  %v7960_v7 = vld [vmem:[#allocation7 + $0xb78] sm:$0xf0] }
 0x29e   : > { %4940 = vmatpush.bf16.msrb.mxu0 %v7627_v10  ;;  %4953 = vmatpush.bf16.msrb.mxu1 %v7755_v14  ;;  %v9566_v9 = vadd.f32 %v3875_v50, %v3863_v62  ;;  %v7943_v10 = vor.u32 %v8842_v63, %v7942_v60  ;;  %v7926_v14 = vld [vmem:[#allocation7 + $0xb28] sm:$0xf]  ;;  %v8008_v60 = vld [vmem:[#allocation7 + $0xbd8] sm:$0xf0]  ;;  %v8889_v62 = vld [vmem:[#allocation10 + $0xcc] sm:$0xf0] }
 0x29f   : > { %v7927_v21 = vor.u32 %v8838_v38, %v7926_v14  ;;  %v8254_v50 = vld [vmem:[#allocation10 + $0x1c0] sm:$0xf]  ;;  %v8921_v63 = vld [vmem:[#allocation10 + $0x1cc] sm:$0xf0]  ;;  %v8011_v61 = vor.u32 %v8856_v55, %v8008_v60  ;;  %v8808_v47 = vld [vmem:[#allocation7 + $0xa4c] sm:$0xf] }
 0x2a0   : > { %v3890_v41 = vpop.f32.mrf.mxu0  ;;  %v3903_v37 = vpop.f32.mrf.mxu1  ;;  %v8917_v14 = vld [vmem:[#allocation10 + $0x1ac] sm:$0xf0]  ;;  %v7816_v48 = vld [vmem:[#allocation7 + $0xa58] sm:$0xf0] }
 0x2a1   : > { %4915 = vmatpush.bf16.msra.mxu2 %v7863_v33  ;;  %4928 = vmatpush.bf16.msra.mxu3 %v7991_v20  ;;  %v7799_v33 = vor.u32 %v8806_v25, %v7798_v13  ;;  %v7782_v20 = vld [vmem:[#allocation7 + $0xa08] sm:$0xf]  ;;  %v7864_v41 = vld [vmem:[#allocation7 + $0xab8] sm:$0xf0]  ;;  %v8255_v37 = vor.u32 %v8921_v63, %v8254_v50  ;;  %v8885_v13 = vld [vmem:[#allocation10 + $0xac] sm:$0xf0]  ;;  %v7819_v50 = vor.u32 %v8808_v47, %v7816_v48 }
 0x2a2   : > { %4941 = vmatpush.bf16.msrb.mxu0 %v7611_v59  ;;  %4954 = vmatpush.bf16.msrb.mxu1 %v7739_v28  ;;  %v8802_v59 = vld [vmem:[#allocation7 + $0xa14] sm:$0xf0]  ;;  %v7910_v28 = vld [vmem:[#allocation7 + $0xb08] sm:$0xf]  ;;  %v8238_v25 = vld [vmem:[#allocation10 + $0x1a0] sm:$0xf] }
 0x2a3   : > { %v3864_v26 = vpop.f32.mrf.mxu2  ;;  %v3877_v29 = vpop.f32.mrf.mxu3  ;;  %v8873_v55 = vld [vmem:[#allocation10 + $0x4c] sm:$0xf0]  ;;  %v8256_v47 = vld [vmem:[#allocation10 + $0x1d0] sm:$0xf0]  ;;  %v8134_v48 = vld [vmem:[#allocation10 + $0xc8] sm:$0xf] }
 0x2a4   : > { %v8812_v29 = vld [vmem:[#allocation7 + $0xa6c] sm:$0xf]  ;;  %v8905_v60 = vld [vmem:[#allocation10 + $0x14c] sm:$0xf0] }
 0x2a5   : > { %4916 = vmatpush.bf16.msra.mxu2 %v7847_v32  ;;  %4929 = vmatpush.bf16.msra.mxu3 %v7975_v36  ;;  %v7656_v32 = vld [vmem:[#allocation7 + $0x918] sm:$0xf0]  ;;  %v8860_v36 = vld [vmem:[#allocation7 + $0xbec] sm:$0xf] }
 0x2a6   : > { %4942 = vmatpush.bf16.msrb.mxu0 %v7595_v39  ;;  %4955 = vmatpush.bf16.msrb.mxu1 %v7723_v45  ;;  %v7783_v39 = vor.u32 %v8802_v59, %v7782_v20  ;;  %v7911_v45 = vor.u32 %v8834_v27, %v7910_v28  ;;  %v7659_v51 = vor.u32 %v8768_v6, %v7656_v32  ;;  %v7976_v20 = vld [vmem:[#allocation7 + $0xb98] sm:$0xf0]  ;;  %v8094_v59 = vld [vmem:[#allocation10 + $0x80] sm:$0xf]  ;;  %v8844_v6 = vld [vmem:[#allocation7 + $0xb6c] sm:$0xf] }
 0x2a7   : > { %v7851_v28 = vor.u32 %v8816_v2, %v7848_v18  ;;  %v7979_v57 = vor.u32 %v8848_v19, %v7976_v20  ;;  %v8832_v18 = vld [vmem:[#allocation7 + $0xb0c] sm:$0xf]  ;;  %v7912_v19 = vld [vmem:[#allocation7 + $0xb18] sm:$0xf0] }
 0x2a9   : > { %4917 = vmatpush.bf16.msra.mxu2 %v7831_v15  ;;  %4930 = vmatpush.bf16.msra.mxu3 %v7959_v53  ;;  %v8027_v15 = vor.u32 %v8860_v36, %v8024_v42  ;;  %v8143_v53 = vor.u32 %v8893_v44, %v8142_v17  ;;  %v8877_v36 = vld [vmem:[#allocation10 + $0x6c] sm:$0xf0]  ;;  %v8206_v42 = vld [vmem:[#allocation10 + $0x160] sm:$0xf]  ;;  %v7835_v44 = vor.u32 %v8812_v29, %v7832_v31  ;;  %v8894_v29 = vld [vmem:[#allocation10 + $0xf4] sm:$0xf0] }
 0x2aa   : > { %4943 = vmatpush.bf16.msrb.mxu0 %v7579_v54  ;;  %4956 = vmatpush.bf16.msrb.mxu1 %v7707_v35  ;;  %v8824_v54 = vld [vmem:[#allocation7 + $0xacc] sm:$0xf]  ;;  %v8126_v35 = vld [vmem:[#allocation10 + $0xc0] sm:$0xf]  ;;  %v8909_v17 = vld [vmem:[#allocation10 + $0x16c] sm:$0xf0]  ;;  %v7915_v31 = vor.u32 %v8832_v18, %v7912_v19 }
 0x2ab   : > { %v7883_v3 = vor.u32 %v8824_v54, %v7880_v16  ;;  %v8127_v4 = vor.u32 %v8889_v62, %v8126_v35  ;;  %v7944_v54 = vld [vmem:[#allocation7 + $0xb58] sm:$0xf0]  ;;  %v8062_v16 = vld [vmem:[#allocation10 + $0x40] sm:$0xf] }
 0x2ad   : > { %4918 = vmatpush.bf16.msra.mxu2 %v7815_v58  ;;  %4931 = vmatpush.bf16.msra.mxu3 %v7943_v10  ;;  %v8852_v58 = vld [vmem:[#allocation7 + $0xbac] sm:$0xf]  ;;  %v7992_v10 = vld [vmem:[#allocation7 + $0xbb8] sm:$0xf0] }
 0x2ae   : > { %4944 = vmatpush.bf16.msrb.mxu0 %v7563_v11  ;;  %4957 = vmatpush.bf16.msrb.mxu1 %v7691_v49  ;;  %v8110_v11 = vld [vmem:[#allocation10 + $0xa0] sm:$0xf]  ;;  %v7867_v49 = vor.u32 %v8820_v8, %v7864_v41  ;;  %v7995_v38 = vor.u32 %v8852_v58, %v7992_v10  ;;  %v7800_v8 = vld [vmem:[#allocation7 + $0xa38] sm:$0xf0]  ;;  %v8836_v41 = vld [vmem:[#allocation7 + $0xb2c] sm:$0xf] }
 0x2af   : > { %v8111_v0 = vor.u32 %v8885_v13, %v8110_v11  ;;  %v7928_v58 = vld [vmem:[#allocation7 + $0xb38] sm:$0xf0]  ;;  %v8869_v10 = vld [vmem:[#allocation10 + $0x2c] sm:$0xf0]  ;;  %v8174_v11 = vld [vmem:[#allocation10 + $0x120] sm:$0xf] }
 0x2b0   : > { %v8901_v13 = vld [vmem:[#allocation10 + $0x12c] sm:$0xf0] }
 0x2b1   : > { %4919 = vmatpush.bf16.msra.mxu2 %v7799_v33  ;;  %4932 = vmatpush.bf16.msra.mxu3 %v7927_v21  ;;  %v8239_v33 = vor.u32 %v8917_v14, %v8238_v25  ;;  %v8881_v21 = vld [vmem:[#allocation10 + $0x8c] sm:$0xf0]  ;;  %v8800_v14 = vld [vmem:[#allocation7 + $0xa0c] sm:$0xf]  ;;  %v8175_v20 = vor.u32 %v8901_v13, %v8174_v11  ;;  %v8911_v11 = vld [vmem:[#allocation10 + $0x184] sm:$0xf] }
 0x2b2   : > { %4945 = vmatpush.bf16.msrb.mxu0 %v7547_v52  ;;  %4958 = vmatpush.bf16.msrb.mxu1 %v7675_v5  ;;  %v8222_v52 = vld [vmem:[#allocation10 + $0x180] sm:$0xf]  ;;  %v8095_v5 = vor.u32 %v8881_v21, %v8094_v59  ;;  %v8865_v21 = vld [vmem:[#allocation10 + $0xc] sm:$0xf0] }
 0x2b5   : > { %4920 = vmatpush.bf16.msra.mxu2 %v7783_v39  ;;  %4933 = vmatpush.bf16.msra.mxu3 %v7911_v45  ;;  %v8079_v45 = vor.u32 %v8877_v36, %v8078_v34 }
 0x2b6   : > { %4946 = vmatpush.bf16.msrb.mxu0 %v7531_v40  ;;  %4959 = vmatpush.bf16.msrb.mxu1 %v7659_v51  ;;  %v8840_v51 = vld [vmem:[#allocation7 + $0xb4c] sm:$0xf] }
 0x2b8   : > { %4921 = vmatmul.bf16.vlgmr.msra.gmra.mxu2 %v9544_v24  ;;  %4934 = vmatmul.bf16.vlgmr.msra.gmra.mxu3 %v9546_v46  ;;  %v3940_v26 = vpop.f32.mrf.mxu0  ;;  %v3953_v27 = vpop.f32.mrf.mxu1 }
 0x2b9   : > { %4965 = vmatpush.bf16.msrb.mxu2 %v7899_v22  ;;  %4978 = vmatpush.bf16.msrb.mxu3 %v8027_v15  ;;  %v8207_v22 = vor.u32 %v8909_v17, %v8206_v42 }
 0x2ba   : > { %5394 = vmatpush.bf16.msra.mxu0 %v8143_v53  ;;  %5407 = vmatpush.bf16.msra.mxu1 %v8271_v56  ;;  %v8190_v56 = vld [vmem:[#allocation10 + $0x140] sm:$0xf] }
 0x2bb   : > { %4947 = vmatmul.bf16.vlgmr.msrb.gmra.mxu0 %v9526_v23  ;;  %4960 = vmatmul.bf16.vlgmr.msrb.gmra.mxu1 %v9528_v1  ;;  %v8913_v23 = vld [vmem:[#allocation10 + $0x18c] sm:$0xf0]  ;;  %v3941_v1 = vadd.f32 %v3940_v26, %v9538_v43  ;;  %v7963_v43 = vor.u32 %v8844_v6, %v7960_v7  ;;  %v3914_v40 = vpop.f32.mrf.mxu2  ;;  %v3927_v53 = vpop.f32.mrf.mxu3  ;;  %v8891_v26 = vld [vmem:[#allocation10 + $0xe4] sm:$0xf]  ;;  %v8926_v7 = vld [vmem:[#allocation10 + $0x1f4] sm:$0xf0] }
 0x2bc   : > { %v8223_v32 = vor.u32 %v8913_v23, %v8222_v52  ;;  %v3915_v15 = vadd.f32 %v3914_v40, %v9563_v30  ;;  %v8191_v30 = vor.u32 %v8905_v60, %v8190_v56  ;;  %v8158_v52 = vld [vmem:[#allocation10 + $0x100] sm:$0xf]  ;;  %v8897_v23 = vld [vmem:[#allocation10 + $0x10c] sm:$0xf0]  ;;  %v8883_v56 = vld [vmem:[#allocation10 + $0xa4] sm:$0xf] }
 0x2bd   : > { %4966 = vmatpush.bf16.msrb.mxu2 %v7883_v3  ;;  %4979 = vmatpush.bf16.msrb.mxu3 %v8011_v61  ;;  %v9573_v39 = vadd.f32 %v3953_v27, %v3941_v1  ;;  %v7947_v3 = vor.u32 %v8840_v51, %v7944_v54  ;;  %v8063_v61 = vor.u32 %v8873_v55, %v8062_v16  ;;  %v8923_v1 = vld [vmem:[#allocation10 + $0x1e4] sm:$0xf]  ;;  %v8890_v51 = vld [vmem:[#allocation10 + $0xd4] sm:$0xf0]  ;;  %v8112_v60 = vld [vmem:[#allocation10 + $0xb0] sm:$0xf0] }
 0x2be   : > { %5395 = vmatpush.bf16.msra.mxu0 %v8127_v4  ;;  %5408 = vmatpush.bf16.msra.mxu1 %v8255_v37  ;;  %v9576_v35 = vadd.f32 %v3927_v53, %v3915_v15  ;;  %v8804_v4 = vld [vmem:[#allocation7 + $0xa2c] sm:$0xf]  ;;  %v8046_v37 = vld [vmem:[#allocation10 + $0x20] sm:$0xf]  ;;  %v8159_v34 = vor.u32 %v8897_v23, %v8158_v52  ;;  %v8922_v15 = vld [vmem:[#allocation10 + $0x1d4] sm:$0xf0]  ;;  %v8135_v55 = vor.u32 %v8890_v51, %v8134_v48 }
 0x2bf   : > { %v7803_v25 = vor.u32 %v8804_v4, %v7800_v8  ;;  %v9578_v53 = vld [vmem:[#allocation1] sm:$0xff]  ;;  %v9583_v4 = vld [vmem:[#allocation1 + $0x9] sm:$0xff] }
 0x2c0   : > { %v3942_v62 = vpop.f32.mrf.mxu0  ;;  %v3955_v63 = vpop.f32.mrf.mxu1  ;;  %v8246_v8 = vld [vmem:[#allocation10 + $0x1a8] sm:$0xf] }
 0x2c1   : > { %4967 = vmatpush.bf16.msrb.mxu2 %v7867_v49  ;;  %4980 = vmatpush.bf16.msrb.mxu3 %v7995_v38  ;;  %v7784_v49 = vld [vmem:[#allocation7 + $0xa18] sm:$0xf0]  ;;  %v7931_v38 = vor.u32 %v8836_v41, %v7928_v58  ;;  %v8915_v62 = vld [vmem:[#allocation10 + $0x1a4] sm:$0xf]  ;;  %v8240_v63 = vld [vmem:[#allocation10 + $0x1b0] sm:$0xf0] }
 0x2c2   : > { %5396 = vmatpush.bf16.msra.mxu0 %v8111_v0  ;;  %5409 = vmatpush.bf16.msra.mxu1 %v8239_v33  ;;  %v8047_v0 = vor.u32 %v8869_v10, %v8046_v37  ;;  %v8030_v33 = vld [vmem:[#allocation10] sm:$0xf]  ;;  %v7787_v27 = vor.u32 %v8800_v14, %v7784_v49  ;;  %v8918_v41 = vld [vmem:[#allocation10 + $0x1b4] sm:$0xf0]  ;;  %v8243_v58 = vor.u32 %v8915_v62, %v8240_v63  ;;  %v8879_v37 = vld [vmem:[#allocation10 + $0x84] sm:$0xf] }
 0x2c3   : > { %v3916_v2 = vpop.f32.mrf.mxu2  ;;  %v3929_v59 = vpop.f32.mrf.mxu3  ;;  %v8031_v6 = vor.u32 %v8865_v21, %v8030_v33  ;;  %v8096_v10 = vld [vmem:[#allocation10 + $0x90] sm:$0xf0]  ;;  %v8247_v13 = vor.u32 %v8918_v41, %v8246_v8  ;;  %v8882_v14 = vld [vmem:[#allocation10 + $0x94] sm:$0xf0]  ;;  %v8230_v49 = vld [vmem:[#allocation10 + $0x188] sm:$0xf] }
 0x2c4   : > { %v8099_v2 = vor.u32 %v8879_v37, %v8096_v10  ;;  %v8080_v59 = vld [vmem:[#allocation10 + $0x70] sm:$0xf0]  ;;  %v8907_v21 = vld [vmem:[#allocation10 + $0x164] sm:$0xf]  ;;  %v8870_v63 = vld [vmem:[#allocation10 + $0x34] sm:$0xf0] }
 0x2c5   : > { %4968 = vmatpush.bf16.msrb.mxu2 %v7851_v28  ;;  %4981 = vmatpush.bf16.msrb.mxu3 %v7979_v57  ;;  %v8144_v28 = vld [vmem:[#allocation10 + $0xf0] sm:$0xf0]  ;;  %v8863_v41 = vld [vmem:[#allocation10 + $0x4] sm:$0xf] }
 0x2c6   : > { %5397 = vmatpush.bf16.msra.mxu0 %v8095_v5  ;;  %5410 = vmatpush.bf16.msra.mxu1 %v8223_v32  ;;  %v8272_v57 = vld [vmem:[#allocation10 + $0x1f0] sm:$0xf0]  ;;  %v8150_v5 = vld [vmem:[#allocation10 + $0xe8] sm:$0xf]  ;;  %v8147_v36 = vor.u32 %v8891_v26, %v8144_v28  ;;  %v8895_v10 = vld [vmem:[#allocation10 + $0x104] sm:$0xf] }
 0x2c7   : > { %v8278_v32 = vld [vmem:[#allocation10 + $0x1e8] sm:$0xf]  ;;  %v8275_v42 = vor.u32 %v8923_v1, %v8272_v57  ;;  %v8151_v17 = vor.u32 %v8894_v29, %v8150_v5  ;;  %v8208_v26 = vld [vmem:[#allocation10 + $0x170] sm:$0xf0]  ;;  %v8878_v1 = vld [vmem:[#allocation10 + $0x74] sm:$0xf0] }
 0x2c8   : > { %v8279_v40 = vor.u32 %v8926_v7, %v8278_v32  ;;  %v8086_v28 = vld [vmem:[#allocation10 + $0x68] sm:$0xf]  ;;  %v8910_v57 = vld [vmem:[#allocation10 + $0x174] sm:$0xf0]  ;;  %v8211_v29 = vor.u32 %v8907_v21, %v8208_v26  ;;  %v8871_v32 = vld [vmem:[#allocation10 + $0x44] sm:$0xf] }
 0x2c9   : > { %4969 = vmatpush.bf16.msrb.mxu2 %v7835_v44  ;;  %4982 = vmatpush.bf16.msrb.mxu3 %v7963_v43  ;;  %v8887_v44 = vld [vmem:[#allocation10 + $0xc4] sm:$0xf]  ;;  %v8128_v43 = vld [vmem:[#allocation10 + $0xd0] sm:$0xf0] }
 0x2ca   : > { %5398 = vmatpush.bf16.msra.mxu0 %v8079_v45  ;;  %5411 = vmatpush.bf16.msra.mxu1 %v8207_v22  ;;  %v8919_v45 = vld [vmem:[#allocation10 + $0x1c4] sm:$0xf]  ;;  %v8262_v22 = vld [vmem:[#allocation10 + $0x1c8] sm:$0xf]  ;;  %v8131_v54 = vor.u32 %v8887_v44, %v8128_v43  ;;  %v8064_v7 = vld [vmem:[#allocation10 + $0x50] sm:$0xf0] }
 0x2cb   : > { %v8259_v16 = vor.u32 %v8919_v45, %v8256_v47  ;;  %v8192_v44 = vld [vmem:[#allocation10 + $0x150] sm:$0xf0]  ;;  %v8070_v43 = vld [vmem:[#allocation10 + $0x48] sm:$0xf]  ;;  %v8874_v45 = vld [vmem:[#allocation10 + $0x54] sm:$0xf0] }
 0x2cc   : > { %v8906_v47 = vld [vmem:[#allocation10 + $0x154] sm:$0xf0]  ;;  %v8176_v62 = vld [vmem:[#allocation10 + $0x130] sm:$0xf0] }
 0x2cd   : > { %4970 = vmatpush.bf16.msrb.mxu2 %v7819_v50  ;;  %4983 = vmatpush.bf16.msrb.mxu3 %v7947_v3  ;;  %v8263_v50 = vor.u32 %v8922_v15, %v8262_v22  ;;  %v8118_v3 = vld [vmem:[#allocation10 + $0xa8] sm:$0xf]  ;;  %v8067_v22 = vor.u32 %v8871_v32, %v8064_v7  ;;  %v8032_v37 = vld [vmem:[#allocation10 + $0x10] sm:$0xf0]  ;;  %v8916_v32 = vld [vmem:[#allocation10 + $0x1ac] sm:$0xf] }
 0x2ce   : > { %5399 = vmatpush.bf16.msra.mxu0 %v8063_v61  ;;  %5412 = vmatpush.bf16.msra.mxu1 %v8191_v30  ;;  %v8886_v61 = vld [vmem:[#allocation10 + $0xb4] sm:$0xf0]  ;;  %v8115_v30 = vor.u32 %v8883_v56, %v8112_v60  ;;  %v8048_v56 = vld [vmem:[#allocation10 + $0x30] sm:$0xf0]  ;;  %v8899_v60 = vld [vmem:[#allocation10 + $0x124] sm:$0xf] }
 0x2cf   : > { %v8248_v7 = vld [vmem:[#allocation10 + $0x1b8] sm:$0xf0] }
 0x2d1   : > { %4971 = vmatpush.bf16.msrb.mxu2 %v7803_v25  ;;  %4984 = vmatpush.bf16.msrb.mxu3 %v7931_v38  ;;  %v8102_v25 = vld [vmem:[#allocation10 + $0x88] sm:$0xf]  ;;  %v8914_v38 = vld [vmem:[#allocation10 + $0x194] sm:$0xf0] }
 0x2d2   : > { %5400 = vmatpush.bf16.msra.mxu0 %v8047_v0  ;;  %5413 = vmatpush.bf16.msra.mxu1 %v8175_v20  ;;  %v8103_v33 = vor.u32 %v8882_v14, %v8102_v25  ;;  %v8875_v20 = vld [vmem:[#allocation10 + $0x64] sm:$0xf]  ;;  %v8231_v23 = vor.u32 %v8914_v38, %v8230_v49  ;;  %v8038_v25 = vld [vmem:[#allocation10 + $0x8] sm:$0xf]  ;;  %v8866_v14 = vld [vmem:[#allocation10 + $0x14] sm:$0xf0] }
 0x2d3   : > { %v8083_v5 = vor.u32 %v8875_v20, %v8080_v59  ;;  %v8166_v49 = vld [vmem:[#allocation10 + $0x108] sm:$0xf]  ;;  %v8898_v38 = vld [vmem:[#allocation10 + $0x114] sm:$0xf0]  ;;  %v8039_v59 = vor.u32 %v8866_v14, %v8038_v25  ;;  %v8184_v25 = vld [vmem:[#allocation10 + $0x138] sm:$0xf0] }
 0x2d4   : > { %v8167_v21 = vor.u32 %v8898_v38, %v8166_v49  ;;  %v8864_v38 = vld [vmem:[#allocation10 + $0xc] sm:$0xf] }
 0x2d5   : > { %4972 = vmatpush.bf16.msrb.mxu2 %v7787_v27  ;;  %4985 = vmatpush.bf16.msrb.mxu3 %v7915_v31  ;;  %v8214_v27 = vld [vmem:[#allocation10 + $0x168] sm:$0xf]  ;;  %v8087_v31 = vor.u32 %v8878_v1, %v8086_v28  ;;  %v8888_v28 = vld [vmem:[#allocation10 + $0xcc] sm:$0xf]  ;;  %v8136_v1 = vld [vmem:[#allocation10 + $0xd8] sm:$0xf0] }
 0x2d6   : > { %5401 = vmatpush.bf16.msra.mxu0 %v8031_v6  ;;  %5414 = vmatpush.bf16.msra.mxu1 %v8159_v34  ;;  %v8903_v34 = vld [vmem:[#allocation10 + $0x144] sm:$0xf] }
 0x2d8   : > { %4973 = vmatmul.bf16.vlgmr.msrb.gmra.mxu2 %v9544_v24  ;;  %4986 = vmatmul.bf16.vlgmr.msrb.gmra.mxu3 %v9546_v46  ;;  %v8119_v24 = vor.u32 %v8886_v61, %v8118_v3  ;;  %v8224_v46 = vld [vmem:[#allocation10 + $0x190] sm:$0xf0]  ;;  %v4792_v0 = vpop.f32.mrf.mxu0  ;;  %v4805_v18 = vpop.f32.mrf.mxu1  ;;  %v8182_v3 = vld [vmem:[#allocation10 + $0x128] sm:$0xf]  ;;  %v8902_v61 = vld [vmem:[#allocation10 + $0x134] sm:$0xf0] }
 0x2d9   : > { %5420 = vmatpush.bf16.msra.mxu2 %v8147_v36  ;;  %5433 = vmatpush.bf16.msra.mxu3 %v8275_v42  ;;  %v8227_v19 = vor.u32 %v8911_v11, %v8224_v46  ;;  %v9586_v52 = vadd.f32 %v4805_v18, %v4792_v0  ;;  %v8215_v36 = vor.u32 %v8910_v57, %v8214_v27  ;;  %v8160_v11 = vld [vmem:[#allocation10 + $0x110] sm:$0xf0]  ;;  %v8892_v0 = vld [vmem:[#allocation10 + $0xec] sm:$0xf]  ;;  %v8264_v57 = vld [vmem:[#allocation10 + $0x1d8] sm:$0xf0] }
 0x2da   : > { %5446 = vmatpush.bf16.msrb.mxu0 %v8151_v17  ;;  %5459 = vmatpush.bf16.msrb.mxu1 %v8279_v40  ;;  %v8198_v40 = vld [vmem:[#allocation10 + $0x148] sm:$0xf]  ;;  %v8035_v18 = vor.u32 %v8863_v41, %v8032_v37  ;;  %v8163_v20 = vor.u32 %v8895_v10, %v8160_v11  ;;  %v8920_v27 = vld [vmem:[#allocation10 + $0x1cc] sm:$0xf]  ;;  %v8056_v11 = vld [vmem:[#allocation10 + $0x38] sm:$0xf0] }
 0x2db   : > { %5402 = vmatmul.bf16.vlgmr.msra.gmra.mxu0 %v9578_v53  ;;  %5415 = vmatmul.bf16.vlgmr.msra.gmra.mxu1 %v9583_v4  ;;  %v3966_v6 = vpop.f32.mrf.mxu2  ;;  %v3979_v17 = vpop.f32.mrf.mxu3  ;;  %v8868_v10 = vld [vmem:[#allocation10 + $0x2c] sm:$0xf] }
 0x2dc   : > { %v3967_v42 = vadd.f32 %v3966_v6, %v9573_v39  ;;  %v8199_v39 = vor.u32 %v8906_v47, %v8198_v40  ;;  %v8120_v6 = vld [vmem:[#allocation10 + $0xb8] sm:$0xf0]  ;;  %v8059_v14 = vor.u32 %v8868_v10, %v8056_v11 }
 0x2dd   : > { %5421 = vmatpush.bf16.msra.mxu2 %v8131_v54  ;;  %5434 = vmatpush.bf16.msra.mxu3 %v8259_v16  ;;  %v8195_v54 = vor.u32 %v8903_v34, %v8192_v44  ;;  %v8071_v16 = vor.u32 %v8874_v45, %v8070_v43  ;;  %v8912_v44 = vld [vmem:[#allocation10 + $0x18c] sm:$0xf]  ;;  %v8232_v43 = vld [vmem:[#allocation10 + $0x198] sm:$0xf0] }
 0x2de   : > { %5447 = vmatpush.bf16.msrb.mxu0 %v8135_v55  ;;  %5460 = vmatpush.bf16.msrb.mxu1 %v8263_v50  ;;  %v9589_v48 = vadd.f32 %v3979_v17, %v3967_v42  ;;  %v8867_v55 = vld [vmem:[#allocation10 + $0x24] sm:$0xf]  ;;  %v8054_v50 = vld [vmem:[#allocation10 + $0x28] sm:$0xf]  ;;  %v8880_v42 = vld [vmem:[#allocation10 + $0x8c] sm:$0xf] }
 0x2df   : > { %v8051_v8 = vor.u32 %v8867_v55, %v8048_v56  ;;  %v8104_v17 = vld [vmem:[#allocation10 + $0x98] sm:$0xf0] }
 0x2e0   : > { %v4794_v51 = vpop.f32.mrf.mxu0  ;;  %v4807_v15 = vpop.f32.mrf.mxu1  ;;  %v8107_v40 = vor.u32 %v8880_v42, %v8104_v17  ;;  %v8216_v55 = vld [vmem:[#allocation10 + $0x178] sm:$0xf0] }
 0x2e1   : > { %5422 = vmatpush.bf16.msra.mxu2 %v8115_v30  ;;  %5435 = vmatpush.bf16.msra.mxu3 %v8243_v58  ;;  %v8179_v30 = vor.u32 %v8899_v60, %v8176_v62  ;;  %v8055_v58 = vor.u32 %v8870_v63, %v8054_v50  ;;  %v8235_v51 = vor.u32 %v8912_v44, %v8232_v43  ;;  %v8088_v15 = vld [vmem:[#allocation10 + $0x78] sm:$0xf0]  ;;  %v8872_v62 = vld [vmem:[#allocation10 + $0x4c] sm:$0xf] }
 0x2e2   : > { %5448 = vmatpush.bf16.msrb.mxu0 %v8119_v24  ;;  %5461 = vmatpush.bf16.msrb.mxu1 %v8247_v13  ;;  %v8183_v13 = vor.u32 %v8902_v61, %v8182_v3  ;;  %v8072_v50 = vld [vmem:[#allocation10 + $0x58] sm:$0xf0]  ;;  %v8904_v61 = vld [vmem:[#allocation10 + $0x14c] sm:$0xf] }
 0x2e3   : > { %v3968_v24 = vpop.f32.mrf.mxu2  ;;  %v3981_v46 = vpop.f32.mrf.mxu3 }
 0x2e4   : > { %v8900_v46 = vld [vmem:[#allocation10 + $0x12c] sm:$0xf] }
 0x2e5   : > { %5423 = vmatpush.bf16.msra.mxu2 %v8099_v2  ;;  %5436 = vmatpush.bf16.msra.mxu3 %v8227_v19  ;;  %v8152_v2 = vld [vmem:[#allocation10 + $0xf8] sm:$0xf0]  ;;  %v8924_v19 = vld [vmem:[#allocation10 + $0x1ec] sm:$0xf] }
 0x2e6   : > { %5449 = vmatpush.bf16.msrb.mxu0 %v8103_v33  ;;  %5462 = vmatpush.bf16.msrb.mxu1 %v8231_v23  ;;  %v8280_v33 = vld [vmem:[#allocation10 + $0x1f8] sm:$0xf0]  ;;  %v8155_v23 = vor.u32 %v8892_v0, %v8152_v2 }
 0x2e7   : > { %v8283_v26 = vor.u32 %v8924_v19, %v8280_v33  ;;  %v8040_v0 = vld [vmem:[#allocation10 + $0x18] sm:$0xf0] }
 0x2e8   : > { %v8168_v19 = vld [vmem:[#allocation10 + $0x118] sm:$0xf0]  ;;  %v8043_v33 = vor.u32 %v8864_v38, %v8040_v0 }
 0x2e9   : > { %5424 = vmatpush.bf16.msra.mxu2 %v8083_v5  ;;  %5437 = vmatpush.bf16.msra.mxu3 %v8211_v29  ;;  %v8139_v5 = vor.u32 %v8888_v28, %v8136_v1  ;;  %v8267_v29 = vor.u32 %v8920_v27, %v8264_v57 }
 0x2ea   : > { %5450 = vmatpush.bf16.msrb.mxu0 %v8087_v31  ;;  %5463 = vmatpush.bf16.msrb.mxu1 %v8215_v36  ;;  %v8884_v31 = vld [vmem:[#allocation10 + $0xac] sm:$0xf]  ;;  %v8251_v36 = vor.u32 %v8916_v32, %v8248_v7 }
 0x2eb   : > { %v8123_v34 = vor.u32 %v8884_v31, %v8120_v6 }
 0x2ed   : > { %5425 = vmatpush.bf16.msra.mxu2 %v8067_v22  ;;  %5438 = vmatpush.bf16.msra.mxu3 %v8195_v54  ;;  %v8876_v22 = vld [vmem:[#allocation10 + $0x6c] sm:$0xf] }
 0x2ee   : > { %5451 = vmatpush.bf16.msrb.mxu0 %v8071_v16  ;;  %5464 = vmatpush.bf16.msrb.mxu1 %v8199_v39  ;;  %v8908_v16 = vld [vmem:[#allocation10 + $0x16c] sm:$0xf]  ;;  %v8091_v56 = vor.u32 %v8876_v22, %v8088_v15 }
 0x2ef   : > { %v8219_v60 = vor.u32 %v8908_v16, %v8216_v55 }
 0x2f1   : > { %5426 = vmatpush.bf16.msra.mxu2 %v8051_v8  ;;  %5439 = vmatpush.bf16.msra.mxu3 %v8179_v30  ;;  %v8200_v8 = vld [vmem:[#allocation10 + $0x158] sm:$0xf0] }
 0x2f2   : > { %5452 = vmatpush.bf16.msrb.mxu0 %v8055_v58  ;;  %5465 = vmatpush.bf16.msrb.mxu1 %v8183_v13  ;;  %v8075_v58 = vor.u32 %v8872_v62, %v8072_v50  ;;  %v8203_v37 = vor.u32 %v8904_v61, %v8200_v8 }
 0x2f5   : > { %5427 = vmatpush.bf16.msra.mxu2 %v8035_v18  ;;  %5440 = vmatpush.bf16.msra.mxu3 %v8163_v20  ;;  %v8896_v18 = vld [vmem:[#allocation10 + $0x10c] sm:$0xf] }
 0x2f6   : > { %5453 = vmatpush.bf16.msrb.mxu0 %v8039_v59  ;;  %5466 = vmatpush.bf16.msrb.mxu1 %v8167_v21  ;;  %v8171_v20 = vor.u32 %v8896_v18, %v8168_v19 }
 0x2f8   : > { %5428 = vmatmul.bf16.vlgmr.msra.gmra.mxu2 %v9578_v53  ;;  %5441 = vmatmul.bf16.vlgmr.msra.gmra.mxu3 %v9583_v4  ;;  %v4844_v45 = vpop.f32.mrf.mxu0  ;;  %v4857_v47 = vpop.f32.mrf.mxu1 }
 0x2f9   : > { %5472 = vmatpush.bf16.msrb.mxu2 %v8155_v23  ;;  %5485 = vmatpush.bf16.msrb.mxu3 %v8283_v26  ;;  %v4858_v54 = vadd.f32 %v4857_v47, %v4844_v45  ;;  %v9603_v47 = vld [vmem:[#allocation8] sm:$0xf] }
 0x2fa   : > { %5454 = vmatmul.bf16.vlgmr.msrb.gmra.mxu0 %v9578_v53  ;;  %5467 = vmatmul.bf16.vlgmr.msrb.gmra.mxu1 %v9583_v4  ;;  %v5501_v11 = vperm.slane %v9603_v47, 1 }
 0x2fb   : > { %v4818_v39 = vpop.f32.mrf.mxu2  ;;  %v4831_v3 = vpop.f32.mrf.mxu3 }
 0x2fc   : > { %v4819_v63 = vadd.f32 %v4818_v39, %v9586_v52  ;;  %v8187_v52 = vor.u32 %v8900_v46, %v8184_v25 }
 0x2fd   : > { %5473 = vmatpush.bf16.msrb.mxu2 %v8139_v5  ;;  %5486 = vmatpush.bf16.msrb.mxu3 %v8267_v29 }
 0x2fe   : > { %v4832_v41 = vadd.f32 %v4831_v3, %v4819_v63 }
 0x300   : > { %v4846_v30 = vpop.f32.mrf.mxu0  ;;  %v4859_v24 = vpop.f32.mrf.mxu1  ;;  %v4991_v13 = vadd.f32 %v4832_v41, %v9556_v12 }
 0x301   : > { %5474 = vmatpush.bf16.msrb.mxu2 %v8123_v34  ;;  %5487 = vmatpush.bf16.msrb.mxu3 %v8251_v36 }
 0x303   : > { %v4820_v49 = vpop.f32.mrf.mxu2  ;;  %v4833_v2 = vpop.f32.mrf.mxu3 }
 0x305   : > { %5475 = vmatpush.bf16.msrb.mxu2 %v8107_v40  ;;  %5488 = vmatpush.bf16.msrb.mxu3 %v8235_v51  ;;  %v9601_v40 = vld [vmem:[#allocation11] sm:$0xf]  ;;  %v5500_v51 = vperm.slane %v9603_v47, 0 }
 0x306   : > { %v5062_v10 = vperm.slane %v9601_v40, 1 }
 0x307   : > { %v5508_v55 = vadd.f32 %v5500_v51, %v4991_v13 }
 0x309   : > { %5476 = vmatpush.bf16.msrb.mxu2 %v8091_v56  ;;  %5489 = vmatpush.bf16.msrb.mxu3 %v8219_v60 }
 0x30d   : > { %5477 = vmatpush.bf16.msrb.mxu2 %v8075_v58  ;;  %5490 = vmatpush.bf16.msrb.mxu3 %v8203_v37  ;;  %v9215_v58 = vmov 2.0  }
 0x30e   : > { %9000 = vrcp.f32 %v9215_v58 }
 0x311   : > { %5478 = vmatpush.bf16.msrb.mxu2 %v8059_v14  ;;  %5491 = vmatpush.bf16.msrb.mxu3 %v8187_v52  ;;  %v5063_v52 = vperm.slane %v9601_v40, 2 }
 0x315   : > { %5479 = vmatpush.bf16.msrb.mxu2 %v8043_v33  ;;  %5492 = vmatpush.bf16.msrb.mxu3 %v8171_v20 }
 0x318   : > { %5480 = vmatmul.bf16.vlgmr.msrb.gmra.mxu2 %v9578_v53  ;;  %5493 = vmatmul.bf16.vlgmr.msrb.gmra.mxu3 %v9583_v4  ;;  %v4896_v12 = vpop.f32.mrf.mxu0  ;;  %v4909_v59 = vpop.f32.mrf.mxu1 }
 0x319   : > { %v4910_v21 = vadd.f32 %v4909_v59, %v4896_v12 }
 0x31b   : > { %v4870_v23 = vpop.f32.mrf.mxu2  ;;  %v4883_v28 = vpop.f32.mrf.mxu3 }
 0x31c   : > { %v4871_v26 = vadd.f32 %v4870_v23, %v4858_v54 }
 0x31e   : > { %v4884_v1 = vadd.f32 %v4883_v28, %v4871_v26  ;;  %v5502_v26 = vperm.slane %v9603_v47, 2 }
 0x320   : > { %v4898_v27 = vpop.f32.mrf.mxu0  ;;  %v4911_v57 = vpop.f32.mrf.mxu1  ;;  %v4992_v5 = vadd.f32 %v4884_v1, %v9566_v9  ;;  %v5061_v9 = vperm.slane %v9601_v40, 0 }
 0x322   : > { %v5509_v38 = vadd.f32 %v5501_v11, %v4992_v5 }
 0x323   : > { %v4872_v29 = vpop.f32.mrf.mxu2  ;;  %v4885_v31 = vpop.f32.mrf.mxu3 }
 0x338   : > { %v4948_v6 = vpop.f32.mrf.mxu0  ;;  %v4961_v32 = vpop.f32.mrf.mxu1 }
 0x339   : > { %v4962_v7 = vadd.f32 %v4961_v32, %v4948_v6 }
 0x33b   : > { %v4922_v34 = vpop.f32.mrf.mxu2  ;;  %v4935_v36 = vpop.f32.mrf.mxu3 }
 0x33c   : > { %v4923_v53 = vadd.f32 %v4922_v34, %v4910_v21 }
 0x33e   : > { %v4936_v4 = vadd.f32 %v4935_v36, %v4923_v53 }
 0x340   : > { %v4950_v42 = vpop.f32.mrf.mxu0  ;;  %v4963_v17 = vpop.f32.mrf.mxu1  ;;  %v4993_v44 = vadd.f32 %v4936_v4, %v9576_v35 }
 0x342   : > { %v5510_v6 = vadd.f32 %v5502_v26, %v4993_v44  ;;  %v5064_v44 = vperm.slane %v9601_v40, 3 }
 0x343   : > { %v4924_v43 = vpop.f32.mrf.mxu2  ;;  %v4937_v45 = vpop.f32.mrf.mxu3 }
 0x358   : > { %v5403_v22 = vpop.f32.mrf.mxu0  ;;  %v5416_v54 = vpop.f32.mrf.mxu1 }
 0x359   : > { %v5404_v15 = vadd.f32 %v5403_v22, %v5061_v9 }
 0x35b   : > { %v5417_v16 = vadd.f32 %v5416_v54, %v5404_v15  ;;  %v4974_v60 = vpop.f32.mrf.mxu2  ;;  %v4987_v62 = vpop.f32.mrf.mxu3 }
 0x35c   : > { %v4975_v39 = vadd.f32 %v4974_v60, %v4962_v7 }
 0x35d   : > { %v5512_v56 = vadd.f32 %v5508_v55, %v5417_v16  ;;  %v5503_v55 = vperm.slane %v9603_v47, 3 }
 0x35e   : > { %v4988_v35 = vadd.f32 %v4987_v62, %v4975_v39 }
 0x35f   : > { %v5516_v41 = vmax.f32 %v5512_v56, 0.0 }
 0x360   : > { %v5405_v50 = vpop.f32.mrf.mxu0  ;;  %v5418_v63 = vpop.f32.mrf.mxu1  ;;  %v9608_v3 = vadd.f32 %v4988_v35, %v9589_v48 }
 0x361   : > { %v5521_v37 = vsel %vm5520_vm1, %v5516_v41, 0.0  ;;  %v9001_v48 = vpop.eup %9000 }
 0x362   : > { %v5522_v13 = vrot.slane %v5521_v37, 4  ;;  %v5550_v19 = vmul.f32 2.0, %v9001_v48  ;;  %vm5554_vm2 = vweird.f32 %v9001_v48  ;;  %v5511_v50 = vadd.f32 %v5503_v55, %v9608_v3 }
 0x363   : > { %v4976_v61 = vpop.f32.mrf.mxu2  ;;  %v4989_v8 = vpop.f32.mrf.mxu3 }
 0x364   : > { %v5523_v2 = vadd.f32 %v5522_v13, %v5521_v37  ;;  %v5551_v23 = vsub.f32 1.0, %v5550_v19 }
 0x366   : > { %v5524_v59 = vrot.slane %v5523_v2, 2  ;;  %v5552_v5 = vmul.f32 %v9001_v48, %v5551_v23 }
 0x368   : > { %v5525_v29 = vadd.f32 %v5524_v59, %v5523_v2  ;;  %v5553_v36 = vadd.f32 %v9001_v48, %v5552_v5 }
 0x36a   : > { %v5526_v34 = vrot.slane %v5525_v29, 1  ;;  %v5555_v45 = vsel %vm5554_vm2, %v9001_v48, %v5553_v36  ;;  %v5573_v48 = vlaneseq }
 0x36c   : > { %v5527_v17 = vadd.f32 %v5526_v34, %v5525_v29  ;;  %vm5575_vm5 = vcmp.lt.s32.totalorder %v5573_v48, 512 }
 0x36e   : > { %v5556_v22 = vmul.f32 %v5555_v45, %v5527_v17 }
 0x377   : > { %v5455_v30 = vpop.f32.mrf.mxu0  ;;  %v5468_v24 = vpop.f32.mrf.mxu1 }
 0x378   : > { %v5456_v20 = vadd.f32 %v5455_v30, %v5063_v52 }
 0x37a   : > { %v5469_v57 = vadd.f32 %v5468_v24, %v5456_v20 }
 0x37b   : > { %v5429_v46 = vpop.f32.mrf.mxu2  ;;  %v5442_v14 = vpop.f32.mrf.mxu3 }
 0x37c   : > { %v5430_v25 = vadd.f32 %v5429_v46, %v5062_v10  ;;  %v5514_v7 = vadd.f32 %v5510_v6, %v5469_v57 }
 0x37e   : > { %v5443_v49 = vadd.f32 %v5442_v14, %v5430_v25  ;;  %v5518_v42 = vmax.f32 %v5514_v7, 0.0 }
 0x37f   : > { %v5457_v0 = vpop.f32.mrf.mxu0  ;;  %v5470_v18 = vpop.f32.mrf.mxu1 }
 0x380   : > { %v5513_v33 = vadd.f32 %v5509_v38, %v5443_v49  ;;  %v5535_v51 = vsel %vm5520_vm1, %v5518_v42, 0.0 }
 0x381   : > { %v5536_v54 = vrot.slane %v5535_v51, 4 }
 0x382   : > { %v5517_v12 = vmax.f32 %v5513_v33, 0.0 }
 0x383   : > { %v5431_v21 = vpop.f32.mrf.mxu2  ;;  %v5444_v1 = vpop.f32.mrf.mxu3  ;;  %v5537_v56 = vadd.f32 %v5536_v54, %v5535_v51 }
 0x384   : > { %v5528_v28 = vsel %vm5520_vm1, %v5517_v12, 0.0 }
 0x385   : > { %v5529_v27 = vrot.slane %v5528_v28, 4  ;;  %v5538_v63 = vrot.slane %v5537_v56, 2 }
 0x387   : > { %v5530_v31 = vadd.f32 %v5529_v27, %v5528_v28  ;;  %v5539_v41 = vadd.f32 %v5538_v63, %v5537_v56 }
 0x389   : > { %v5531_v32 = vrot.slane %v5530_v31, 2  ;;  %v5540_v40 = vrot.slane %v5539_v41, 1 }
 0x38b   : > { %v5532_v53 = vadd.f32 %v5531_v32, %v5530_v31  ;;  %v5541_v11 = vadd.f32 %v5540_v40, %v5539_v41 }
 0x38d   : > { %v5533_v4 = vrot.slane %v5532_v53, 1  ;;  %v5558_v25 = vmul.f32 %v5555_v45, %v5541_v11 }
 0x38f   : > { %v5534_v43 = vadd.f32 %v5533_v4, %v5532_v53  ;;  %v5565_v52 = vrot.slane %v5558_v25, 6 }
 0x391   : > { %v5557_v9 = vmul.f32 %v5555_v45, %v5534_v43 }
 0x393   : > { %v5564_v15 = vrot.slane %v5557_v9, 7 }
 0x395   : > { %v5568_v16 = vsel %vm5567_vm3, %v5556_v22, %v5564_v15 }
 0x39b   : > { %v5481_v60 = vpop.f32.mrf.mxu2  ;;  %v5494_v62 = vpop.f32.mrf.mxu3 }
 0x39c   : > { %v5482_v39 = vadd.f32 %v5481_v60, %v5064_v44 }
 0x39e   : > { %v5495_v35 = vadd.f32 %v5494_v62, %v5482_v39 }
 0x3a0   : > { %v5515_v61 = vadd.f32 %v5511_v50, %v5495_v35 }
 0x3a2   : > { %v5519_v8 = vmax.f32 %v5515_v61, 0.0 }
 0x3a3   : > { %v5483_v30 = vpop.f32.mrf.mxu2  ;;  %v5496_v24 = vpop.f32.mrf.mxu3 }
 0x3a4   : > { %v5542_v58 = vsel %vm5520_vm1, %v5519_v8, 0.0 }
 0x3a5   : > { %v5543_v37 = vrot.slane %v5542_v58, 4 }
 0x3a7   : > { %v5544_v10 = vadd.f32 %v5543_v37, %v5542_v58 }
 0x3a9   : > { %v5545_v47 = vrot.slane %v5544_v10, 2 }
 0x3ab   : > { %v5546_v13 = vadd.f32 %v5545_v47, %v5544_v10 }
 0x3ad   : > { %v5547_v46 = vrot.slane %v5546_v13, 1 }
 0x3af   : > { %v5548_v14 = vadd.f32 %v5547_v46, %v5546_v13 }
 0x3b1   : > { %v5559_v3 = vmul.f32 %v5555_v45, %v5548_v14 }
 0x3b3   : > { %v5566_v49 = vrot.slane %v5559_v3, 5 }
 0x3b5   : > { %v5570_v38 = vsel %vm5569_vm4, %v5565_v52, %v5566_v49 }
 0x3b6   : > { %v5571_v0 = vsel %vm5520_vm1, %v5568_v16, %v5570_v38 }
 0x3b7   : > { %5577 = vst.msk [vmem:[%s414_s30] sm:$0xf] %vm5575_vm5, %v5571_v0 }
 0x3b8 PF: > { %s22_s27 = sadd.s32 1, %s9204_s27  }
 0x3b9   : > { %p19_p7 = scmp.ge.s32.totalorder %s22_s27, 4  }
 0x3bb   :  { %21 = sbr.rel (!%p19_p7) target bundleno = 4 (0x4), region = 117 }
 0x3c0   :  { %5597 = vsyncpa [#allocation4], 1 }
 0x3c1   :  { %5599 = vsyncpa [#allocation4 + $0x1], 1 }
 0x3c2   :  { %5600 = vsyncpa [#allocation6], 1 }
 0x3c3   :  { %5601 = vsyncpa [#allocation9], 1 }
 0x3c4   :  { %5602 = vsyncpa [#allocation12], 1 }

</bundles_post_ra>
